<compile_context>
chip_gen: v5e
topology: v5e:2x2
jax: 0.10.0
libtpu: 0.0.40
codegen_flags: <defaults>
</compile_context>

<pallas_src>
import functools

import jax
import jax.numpy as jnp
import numpy as np
from jax.experimental import pallas as pl
from jax.experimental.pallas import tpu as pltpu


# ----------------------------------------------------------------------------
# helpers
# ----------------------------------------------------------------------------
def _pick_tile_h(h):
    cands = [th for th in (40, 32, 24, 16, 8) if h % th == 0 and h // th >= 2]
    for th in cands:                       # prefer an even tile count (v7x: 2 TCs)
        if (h // th) % 2 == 0:
            return th
    return cands[0] if cands else h


def _vmem_cap_bytes():
    try:
        return int(pltpu.get_tpu_info().vmem_capacity_bytes) * 3 // 4
    except Exception:                      # fallback safe on every generation
        return 48 * 1024 * 1024


def _phase1_vmem_bytes(TH, W, C):
    bf, f32 = 2, 4
    wp = W + 4
    est = 0
    est += 2 * TH * wp * C * bf                   # x core blocks (double-buffered)
    est += 2 * 4 * wp * C * bf                    # halo blocks
    est += 2 * TH * W * C * bf                    # res out blocks (bf16)
    est += 2 * C * f32                            # psum out
    est += 2 * 2 * 9 * C * C * bf                 # conv weights
    est += (TH + 4) * wp * C * bf                 # xt assembly
    est += 2 * (TH + 2) * (W + 2) * 3 * C * bf    # live im2col chunks
    est += 3 * (TH + 2) * (W + 2) * C * f32       # acc1 / c1 / r1
    est += 2 * TH * W * C * f32                   # acc2 / c2
    return est


# ----------------------------------------------------------------------------
# Phase 1: res = conv2(relu(conv1(x)) + x)  per (batch, row-tile),
#          plus per-tile channel partial sums for the exact CA mean.
# ----------------------------------------------------------------------------
def _phase1_kernel(xc_ref,              # (1, TH, W+4, C) bf16   core rows (col-padded)
                   xh_ref,              # (1, 1, 4, W+4, C) bf16 2-row top/bottom halos
                   w1_ref, b1_ref,      # (3, 3C, C) bf16, (1, C) f32
                   w2_ref, b2_ref,      # (3, 3C, C) bf16, (1, C) f32
                   res_ref,             # out block (1, TH, W, C) bf16
                   psum_ref,            # out block (1, 1, 1, C) f32
                   *, H, W, C, TH):
    t = pl.program_id(1)

    xc = xc_ref[0]                                           # (TH,   W+4, C)
    xh = xh_ref[0, 0]                                        # (4,    W+4, C)
    xt = jnp.concatenate([xh[0:2], xc, xh[2:4]], axis=0)     # (TH+4, W+4, C) bf16

    # --- conv1 + ReLU + skip on a (TH+2, W+2) window (1-pixel halo for conv2).
    # Each conv = 3 accumulating K=3C matmuls (one per tap row) on the MXU.
    P1 = (TH + 2) * (W + 2)
    acc1 = jnp.zeros((P1, C), jnp.float32)
    for dy in range(3):
        chunk = jnp.concatenate(
            [xt[dy:dy + TH + 2, dx:dx + W + 2, :].reshape(P1, C)
             for dx in range(3)], axis=-1)                   # (P1, 3C) bf16
        acc1 = acc1 + jnp.dot(chunk, w1_ref[dy],
                              preferred_element_type=jnp.float32)
    c1 = jnp.maximum(acc1 + b1_ref[...], 0.0).reshape(TH + 2, W + 2, C)
    r1 = c1 + xt[1:TH + 3, 1:W + 3, :].astype(jnp.float32)   # skip add in f32

    # Zero everything outside the real image: this IS conv2's SAME padding
    # (replaces the old sublane-axis column concat / padded scratch).
    grow = t * TH - 1 + jax.lax.broadcasted_iota(jnp.int32, (TH + 2, 1, 1), 0)
    gcol = jax.lax.broadcasted_iota(jnp.int32, (1, W + 2, 1), 1) - 1
    inside = (grow >= 0) & (grow < H) & (gcol >= 0) & (gcol < W)
    r1 = jnp.where(inside, r1, 0.0).astype(jnp.bfloat16)     # (TH+2, W+2, C)

    # --- conv2 on the TH x W output rows of this tile -------------------------
    P2 = TH * W
    acc2 = jnp.zeros((P2, C), jnp.float32)
    for dy in range(3):
        chunk = jnp.concatenate(
            [r1[dy:dy + TH, dx:dx + W, :].reshape(P2, C) for dx in range(3)],
            axis=-1)                                         # (P2, 3C) bf16
        acc2 = acc2 + jnp.dot(chunk, w2_ref[dy],
                              preferred_element_type=jnp.float32)
    c2 = acc2 + b2_ref[...]                                  # (P2, C) f32

    res_ref[0] = c2.reshape(TH, W, C).astype(jnp.bfloat16)
    psum_ref[...] = jnp.sum(c2, axis=0).reshape(1, 1, 1, C)  # exact f32 partial sum


# ----------------------------------------------------------------------------
# Phase 2: apply the (precomputed) CALayer scale -> PALayer -> + x.
# Pointwise / tiny matmuls only, so it tiles with no halo.
# ----------------------------------------------------------------------------
def _phase2_kernel(res_ref,             # (1, TH, W, C) bf16
                   x_ref,               # (1, TH, W, C) f32
                   ca_ref,              # (1, 1, C) f32
                   pa_w1_ref, pa_b1_ref, pa_w2_ref, pa_b2_ref,
                   o_ref):              # (1, TH, W, C) f32
    _, TH, W, C = res_ref.shape
    res = res_ref[0].astype(jnp.float32).reshape(TH * W, C) * ca_ref[0]  # CA scale

    # PALayer: pixel attention
    hp = jnp.maximum(
        jnp.dot(res, pa_w1_ref[...], preferred_element_type=jnp.float32)
        + pa_b1_ref[...], 0.0)                                           # (P, C//8)
    pa = jax.nn.sigmoid(
        jnp.dot(hp, pa_w2_ref[...], preferred_element_type=jnp.float32)
        + pa_b2_ref[...])                                                # (P, 1)
    out = res * pa + x_ref[0].reshape(TH * W, C)                         # final skip
    o_ref[0] = out.reshape(TH, W, C)


# ----------------------------------------------------------------------------
# Wrapper: NCHW in / NCHW out.
# ----------------------------------------------------------------------------
def block_forward(x_nchw, params):
    N, C, H, W = x_nchw.shape
    C8 = max(C // 8, 1)
    TH = _pick_tile_h(H)
    T = H // TH

    x_nhwc = jnp.transpose(x_nchw, (0, 2, 3, 1)).astype(jnp.float32)     # (N,H,W,C)

    # bf16 conv input with a 2-column zero halo (halves the dominant DMA bytes).
    x_cols = jnp.pad(x_nhwc.astype(jnp.bfloat16),
                     ((0, 0), (0, 0), (2, 2), (0, 0)))                   # (N,H,W+4,C)

    # Per-tile 2-row top/bottom halos (zero outside the image), gathered once in
    # the wrapper so every phase-1 input is a plain non-overlapping block and the
    # whole tile fetch is auto-double-buffered by the BlockSpec pipeline.
    starts = np.arange(T) * TH
    row_ids = np.stack([starts - 2, starts - 1, starts + TH, starts + TH + 1],
                       axis=1)                                           # (T, 4)
    valid = jnp.asarray((row_ids >= 0) & (row_ids < H))
    x_halo = jnp.where(valid[None, :, :, None, None],
                       x_cols[:, np.clip(row_ids, 0, H - 1)],
                       jnp.zeros((), jnp.bfloat16)).astype(jnp.bfloat16)  # (N,T,4,W+4,C)

    # conv weights in im2col layout: one (3C, C) chunk per tap row, bf16 for MXU.
    w1 = params["w1"].astype(jnp.bfloat16).reshape(3, 3 * C, C)
    w2 = params["w2"].astype(jnp.bfloat16).reshape(3, 3 * C, C)
    b1 = params["b1"].astype(jnp.float32)
    b2 = params["b2"].astype(jnp.float32)

    def full_spec(a):
        nd = a.ndim
        return pl.BlockSpec(a.shape, lambda n, t, nd=nd: (0,) * nd)

    cap = _vmem_cap_bytes()
    vmem_limit = int(min(cap, max(32 * 1024 * 1024,
                                  2 * _phase1_vmem_bytes(TH, W, C))))

    res_tile = pl.BlockSpec((1, TH, W, C), lambda n, t: (n, t, 0, 0))

    # ------------------------------ phase 1 ---------------------------------
    k1 = functools.partial(_phase1_kernel, H=H, W=W, C=C, TH=TH)
    res, psums = pl.pallas_call(
        k1,
        out_shape=(jax.ShapeDtypeStruct((N, H, W, C), jnp.bfloat16),
                   jax.ShapeDtypeStruct((N, T, 1, C), jnp.float32)),
        grid_spec=pltpu.PrefetchScalarGridSpec(
            num_scalar_prefetch=0,
            grid=(N, T),
            in_specs=[pl.BlockSpec((1, TH, W + 4, C), lambda n, t: (n, t, 0, 0)),
                      pl.BlockSpec((1, 1, 4, W + 4, C),
                                   lambda n, t: (n, t, 0, 0, 0)),
                      full_spec(w1), full_spec(b1),
                      full_spec(w2), full_spec(b2)],
            out_specs=[res_tile,
                       pl.BlockSpec((1, 1, 1, C), lambda n, t: (n, t, 0, 0))]),
        compiler_params=pltpu.CompilerParams(
            dimension_semantics=("parallel", "parallel"),
            vmem_limit_bytes=vmem_limit),
        cost_estimate=pl.CostEstimate(
            flops=int(2 * 2 * 9 * C * C * N * H * W),
            transcendentals=0,
            bytes_accessed=int(2 * (x_cols.size + x_halo.size + N * H * W * C
                                    + w1.size + w2.size)
                               + 4 * (N * T * C + b1.size + b2.size))),
    )(x_cols, x_halo, w1, b1, w2, b2)

    # --------------- CALayer gating, hoisted out of the tile grid ------------
    y = jnp.sum(psums, axis=(1, 2)) * (1.0 / (H * W))                     # (N, C)
    h = jax.nn.relu(y @ params["ca_w1"].astype(jnp.float32)
                    + params["ca_b1"].astype(jnp.float32))                # (N, C8)
    ca = jax.nn.sigmoid(h @ params["ca_w2"].astype(jnp.float32)
                        + params["ca_b2"].astype(jnp.float32))            # (N, C)
    ca = ca.reshape(N, 1, C)

    pa_w1 = params["pa_w1"].astype(jnp.float32)
    pa_b1 = params["pa_b1"].astype(jnp.float32)
    pa_w2 = params["pa_w2"].astype(jnp.float32)
    pa_b2 = params["pa_b2"].astype(jnp.float32)

    # ------------------------------ phase 2 ---------------------------------
    out_nhwc = pl.pallas_call(
        _phase2_kernel,
        out_shape=jax.ShapeDtypeStruct((N, H, W, C), jnp.float32),
        grid_spec=pltpu.PrefetchScalarGridSpec(
            num_scalar_prefetch=0,
            grid=(N, T),
            in_specs=[res_tile,                                # res (bf16)
                      res_tile,                                # x (f32 final skip)
                      pl.BlockSpec((1, 1, C), lambda n, t: (n, 0, 0)),
                      full_spec(pa_w1), full_spec(pa_b1),
                      full_spec(pa_w2), full_spec(pa_b2)],
            out_specs=res_tile),
        compiler_params=pltpu.CompilerParams(
            dimension_semantics=("parallel", "parallel"),
            vmem_limit_bytes=vmem_limit),
        cost_estimate=pl.CostEstimate(
            flops=int(2 * N * H * W * (C * C8 + C8)),
            transcendentals=int(N * H * W),
            bytes_accessed=int(N * H * W * C * (2 + 4 + 4))),
    )(res, x_nhwc, ca, pa_w1, pa_b1, pa_w2, pa_b2)

    return jnp.transpose(out_nhwc, (0, 3, 1, 2))               # back to NCHW


# ----------------------------------------------------------------------------
# Pure-JAX reference (matches the PyTorch Block) for correctness check.
# ----------------------------------------------------------------------------
def block_reference(x_nchw, p):
    x = jnp.transpose(x_nchw, (0, 2, 3, 1)).astype(jnp.float32)

    def conv(inp, w, b):
        out = jax.lax.conv_general_dilated(
            inp, w, window_strides=(1, 1), padding="SAME",
            dimension_numbers=("NHWC", "HWIO", "NHWC"))
        return out + b.reshape(1, 1, 1, -1)

    res = jax.nn.relu(conv(x, p["w1"], p["b1"])) + x
    res = conv(res, p["w2"], p["b2"])
    # CALayer
    y = jnp.mean(res, axis=(1, 2), keepdims=True)
    h = jax.nn.relu(jnp.einsum("nijc,cd->nijd", y, p["ca_w1"])
                    + p["ca_b1"].reshape(1, 1, 1, -1))
    ca = jax.nn.sigmoid(jnp.einsum("nijd,dc->nijc", h, p["ca_w2"])
                        + p["ca_b2"].reshape(1, 1, 1, -1))
    res = res * ca
    # PALayer
    h = jax.nn.relu(jnp.einsum("nhwc,cd->nhwd", res, p["pa_w1"])
                    + p["pa_b1"].reshape(1, 1, 1, -1))
    pa = jax.nn.sigmoid(jnp.einsum("nhwd,do->nhwo", h, p["pa_w2"])
                        + p["pa_b2"].reshape(1, 1, 1, -1))
    res = res * pa + x
    return jnp.transpose(res, (0, 3, 1, 2))


# ----------------------------------------------------------------------------
def make_params(key, dim):
    c8 = max(dim // 8, 1)
    ks = jax.random.split(key, 12)
    s = 0.1
    return {
        # conv weights stored HWIO (kh, kw, Cin, Cout); PyTorch (Cout,Cin,kh,kw)
        # would be transposed (2, 3, 1, 0) to get this layout.
        "w1": s * jax.random.normal(ks[0], (3, 3, dim, dim), jnp.float32),
        "b1": s * jax.random.normal(ks[1], (1, dim), jnp.float32),
        "w2": s * jax.random.normal(ks[2], (3, 3, dim, dim), jnp.float32),
        "b2": s * jax.random.normal(ks[3], (1, dim), jnp.float32),
        "ca_w1": s * jax.random.normal(ks[4], (dim, c8), jnp.float32),
        "ca_b1": s * jax.random.normal(ks[5], (1, c8), jnp.float32),
        "ca_w2": s * jax.random.normal(ks[6], (c8, dim), jnp.float32),
        "ca_b2": s * jax.random.normal(ks[7], (1, dim), jnp.float32),
        "pa_w1": s * jax.random.normal(ks[8], (dim, c8), jnp.float32),
        "pa_b1": s * jax.random.normal(ks[9], (1, c8), jnp.float32),
        "pa_w2": s * jax.random.normal(ks[10], (c8, 1), jnp.float32),
        "pa_b2": s * jax.random.normal(ks[11], (1, 1), jnp.float32),
    }


if __name__ == "__main__":
    key = jax.random.PRNGKey(0)
    k_x, k_p = jax.random.split(key)

    N, dim, H, W = 2, 8, 16, 16          # dim // 8 == 1 (matches CALayer/PALayer)
    x = jax.random.normal(k_x, (N, dim, H, W), jnp.float32)   # NCHW, like PyTorch
    params = make_params(k_p, dim)

    out = jax.block_until_ready(block_forward(x, params))
    ref = jax.block_until_ready(block_reference(x, params))

    # bf16 conv inputs / bf16 inter-phase res with f32 accumulation -> slightly
    # looser tolerance than a pure-f32 path.
    np.testing.assert_allclose(np.asarray(out), np.asarray(ref),
                               rtol=4e-2, atol=4e-2)

    print("KERNEL_OK")
</pallas_src>

<mosaic_0001>
module attributes {stable_mosaic.version = 11 : i64} {
  func.func @_phase1_kernel(%arg0: i32, %arg1: i32, %arg2: memref<1x8x20x8xbf16, #tpu.memory_space<vmem>>, %arg3: memref<1x1x4x20x8xbf16, #tpu.memory_space<vmem>>, %arg4: memref<3x24x8xbf16, #tpu.memory_space<vmem>>, %arg5: memref<1x8xf32, #tpu.memory_space<vmem>>, %arg6: memref<3x24x8xbf16, #tpu.memory_space<vmem>>, %arg7: memref<1x8xf32, #tpu.memory_space<vmem>>, %arg8: memref<1x8x16x8xbf16, #tpu.memory_space<vmem>>, %arg9: memref<1x1x1x8xf32, #tpu.memory_space<vmem>>) attributes {dimension_semantics = [#tpu.dimension_semantics<parallel>, #tpu.dimension_semantics<parallel>], iteration_bounds = array<i64: 2, 2>, scalar_prefetch = 0 : i64, scratch_operands = 0 : i64, tpu.core_type = #tpu.core_type<tc>, window_params = [{transform_indices = @transform_0, window_bounds = array<i64: 1, 8, 20, 8>}, {transform_indices = @transform_1, window_bounds = array<i64: 1, 1, 4, 20, 8>}, {pipeline_mode = #tpu.pipeline_mode<synchronous>, transform_indices = @transform_2, window_bounds = array<i64: 3, 24, 8>}, {pipeline_mode = #tpu.pipeline_mode<synchronous>, transform_indices = @transform_3, window_bounds = array<i64: 1, 8>}, {pipeline_mode = #tpu.pipeline_mode<synchronous>, transform_indices = @transform_4, window_bounds = array<i64: 3, 24, 8>}, {pipeline_mode = #tpu.pipeline_mode<synchronous>, transform_indices = @transform_5, window_bounds = array<i64: 1, 8>}, {transform_indices = @transform_6, window_bounds = array<i64: 1, 8, 16, 8>}, {transform_indices = @transform_7, window_bounds = array<i64: 1, 1, 1, 8>}]} {
    %c0 = arith.constant 0 : index
    %c0_0 = arith.constant 0 : index
    %c0_1 = arith.constant 0 : index
    %c0_2 = arith.constant 0 : index
    %0 = vector.load %arg2[%c0, %c0_0, %c0_1, %c0_2] : memref<1x8x20x8xbf16, #tpu.memory_space<vmem>>, vector<1x8x20x8xbf16>
    %1 = vector.shape_cast %0 : vector<1x8x20x8xbf16> to vector<8x20x8xbf16>
    %c0_3 = arith.constant 0 : index
    %c0_4 = arith.constant 0 : index
    %c0_5 = arith.constant 0 : index
    %c0_6 = arith.constant 0 : index
    %c0_7 = arith.constant 0 : index
    %2 = vector.load %arg3[%c0_3, %c0_4, %c0_5, %c0_6, %c0_7] : memref<1x1x4x20x8xbf16, #tpu.memory_space<vmem>>, vector<1x1x4x20x8xbf16>
    %3 = vector.shape_cast %2 : vector<1x1x4x20x8xbf16> to vector<4x20x8xbf16>
    %4 = vector.extract_strided_slice %3 {offsets = [0, 0, 0], sizes = [2, 20, 8], strides = [1, 1, 1]} : vector<4x20x8xbf16> to vector<2x20x8xbf16>
    %5 = vector.extract_strided_slice %3 {offsets = [2, 0, 0], sizes = [2, 20, 8], strides = [1, 1, 1]} : vector<4x20x8xbf16> to vector<2x20x8xbf16>
    %6 = tpu.concatenate %4, %1, %5 in 0 : vector<2x20x8xbf16>, vector<8x20x8xbf16>, vector<2x20x8xbf16> -> vector<12x20x8xbf16>
    %cst = arith.constant 0.000000e+00 : f32
    %7 = vector.broadcast %cst : f32 to vector<180x8xf32>
    %8 = vector.extract_strided_slice %6 {offsets = [0, 0, 0], sizes = [10, 18, 8], strides = [1, 1, 1]} : vector<12x20x8xbf16> to vector<10x18x8xbf16>
    %9 = vector.shape_cast %8 : vector<10x18x8xbf16> to vector<180x8xbf16>
    %10 = vector.extract_strided_slice %6 {offsets = [0, 1, 0], sizes = [10, 18, 8], strides = [1, 1, 1]} : vector<12x20x8xbf16> to vector<10x18x8xbf16>
    %11 = vector.shape_cast %10 : vector<10x18x8xbf16> to vector<180x8xbf16>
    %12 = vector.extract_strided_slice %6 {offsets = [0, 2, 0], sizes = [10, 18, 8], strides = [1, 1, 1]} : vector<12x20x8xbf16> to vector<10x18x8xbf16>
    %13 = vector.shape_cast %12 : vector<10x18x8xbf16> to vector<180x8xbf16>
    %14 = tpu.concatenate %9, %11, %13 in 1 : vector<180x8xbf16>, vector<180x8xbf16>, vector<180x8xbf16> -> vector<180x24xbf16>
    %c0_8 = arith.constant 0 : index
    %c0_9 = arith.constant 0 : index
    %c0_10 = arith.constant 0 : index
    %15 = vector.load %arg4[%c0_8, %c0_9, %c0_10] : memref<3x24x8xbf16, #tpu.memory_space<vmem>>, vector<1x24x8xbf16>
    %16 = vector.shape_cast %15 : vector<1x24x8xbf16> to vector<24x8xbf16>
    %cst_11 = arith.constant dense<0.000000e+00> : vector<180x8xf32>
    %17 = tpu.matmul %14, %16, %cst_11 {dimension_numbers = #tpu.dot_dimension_numbers<[1], [0], [0], [1], [0, 0, 1, 1], [], []>} : vector<180x24xbf16>, vector<24x8xbf16>, vector<180x8xf32> -> vector<180x8xf32>
    %18 = arith.addf %7, %17 : vector<180x8xf32>
    %19 = vector.extract_strided_slice %6 {offsets = [1, 0, 0], sizes = [10, 18, 8], strides = [1, 1, 1]} : vector<12x20x8xbf16> to vector<10x18x8xbf16>
    %20 = vector.shape_cast %19 : vector<10x18x8xbf16> to vector<180x8xbf16>
    %21 = vector.extract_strided_slice %6 {offsets = [1, 1, 0], sizes = [10, 18, 8], strides = [1, 1, 1]} : vector<12x20x8xbf16> to vector<10x18x8xbf16>
    %22 = vector.shape_cast %21 : vector<10x18x8xbf16> to vector<180x8xbf16>
    %23 = vector.extract_strided_slice %6 {offsets = [1, 2, 0], sizes = [10, 18, 8], strides = [1, 1, 1]} : vector<12x20x8xbf16> to vector<10x18x8xbf16>
    %24 = vector.shape_cast %23 : vector<10x18x8xbf16> to vector<180x8xbf16>
    %25 = tpu.concatenate %20, %22, %24 in 1 : vector<180x8xbf16>, vector<180x8xbf16>, vector<180x8xbf16> -> vector<180x24xbf16>
    %c1 = arith.constant 1 : index
    %c0_12 = arith.constant 0 : index
    %c0_13 = arith.constant 0 : index
    %26 = vector.load %arg4[%c1, %c0_12, %c0_13] : memref<3x24x8xbf16, #tpu.memory_space<vmem>>, vector<1x24x8xbf16>
    %27 = vector.shape_cast %26 : vector<1x24x8xbf16> to vector<24x8xbf16>
    %cst_14 = arith.constant dense<0.000000e+00> : vector<180x8xf32>
    %28 = tpu.matmul %25, %27, %cst_14 {dimension_numbers = #tpu.dot_dimension_numbers<[1], [0], [0], [1], [0, 0, 1, 1], [], []>} : vector<180x24xbf16>, vector<24x8xbf16>, vector<180x8xf32> -> vector<180x8xf32>
    %29 = arith.addf %18, %28 : vector<180x8xf32>
    %30 = vector.extract_strided_slice %6 {offsets = [2, 0, 0], sizes = [10, 18, 8], strides = [1, 1, 1]} : vector<12x20x8xbf16> to vector<10x18x8xbf16>
    %31 = vector.shape_cast %30 : vector<10x18x8xbf16> to vector<180x8xbf16>
    %32 = vector.extract_strided_slice %6 {offsets = [2, 1, 0], sizes = [10, 18, 8], strides = [1, 1, 1]} : vector<12x20x8xbf16> to vector<10x18x8xbf16>
    %33 = vector.shape_cast %32 : vector<10x18x8xbf16> to vector<180x8xbf16>
    %34 = vector.extract_strided_slice %6 {offsets = [2, 2, 0], sizes = [10, 18, 8], strides = [1, 1, 1]} : vector<12x20x8xbf16> to vector<10x18x8xbf16>
    %35 = vector.shape_cast %34 : vector<10x18x8xbf16> to vector<180x8xbf16>
    %36 = tpu.concatenate %31, %33, %35 in 1 : vector<180x8xbf16>, vector<180x8xbf16>, vector<180x8xbf16> -> vector<180x24xbf16>
    %c2 = arith.constant 2 : index
    %c0_15 = arith.constant 0 : index
    %c0_16 = arith.constant 0 : index
    %37 = vector.load %arg4[%c2, %c0_15, %c0_16] : memref<3x24x8xbf16, #tpu.memory_space<vmem>>, vector<1x24x8xbf16>
    %38 = vector.shape_cast %37 : vector<1x24x8xbf16> to vector<24x8xbf16>
    %cst_17 = arith.constant dense<0.000000e+00> : vector<180x8xf32>
    %39 = tpu.matmul %36, %38, %cst_17 {dimension_numbers = #tpu.dot_dimension_numbers<[1], [0], [0], [1], [0, 0, 1, 1], [], []>} : vector<180x24xbf16>, vector<24x8xbf16>, vector<180x8xf32> -> vector<180x8xf32>
    %40 = arith.addf %29, %39 : vector<180x8xf32>
    %c0_18 = arith.constant 0 : index
    %c0_19 = arith.constant 0 : index
    %41 = vector.load %arg5[%c0_18, %c0_19] : memref<1x8xf32, #tpu.memory_space<vmem>>, vector<1x8xf32>
    %42 = vector.broadcast %41 : vector<1x8xf32> to vector<180x8xf32>
    %43 = arith.addf %40, %42 : vector<180x8xf32>
    %cst_20 = arith.constant 0.000000e+00 : f32
    %44 = vector.broadcast %cst_20 : f32 to vector<180x8xf32>
    %45 = arith.maximumf %43, %44 : vector<180x8xf32>
    %46 = vector.shape_cast %45 : vector<180x8xf32> to vector<10x18x8xf32>
    %47 = vector.extract_strided_slice %6 {offsets = [1, 1, 0], sizes = [10, 18, 8], strides = [1, 1, 1]} : vector<12x20x8xbf16> to vector<10x18x8xbf16>
    %48 = arith.extf %47 : vector<10x18x8xbf16> to vector<10x18x8xf32>
    %49 = arith.addf %46, %48 : vector<10x18x8xf32>
    %c8_i32 = arith.constant 8 : i32
    %50 = arith.muli %arg1, %c8_i32 : i32
    %c1_i32 = arith.constant 1 : i32
    %51 = arith.subi %50, %c1_i32 : i32
    %52 = tpu.iota {dimensions = array<i32: 0>} : vector<10x1x1xi32>
    %53 = vector.broadcast %51 : i32 to vector<10x1x1xi32>
    %54 = arith.addi %53, %52 : vector<10x1x1xi32>
    %55 = tpu.iota {dimensions = array<i32: 1>} : vector<1x18x1xi32>
    %c1_i32_21 = arith.constant 1 : i32
    %56 = vector.broadcast %c1_i32_21 : i32 to vector<1x18x1xi32>
    %57 = arith.subi %55, %56 : vector<1x18x1xi32>
    %c0_i32 = arith.constant 0 : i32
    %58 = vector.broadcast %c0_i32 : i32 to vector<10x1x1xi32>
    %59 = arith.cmpi sge, %54, %58 : vector<10x1x1xi32>
    %c16_i32 = arith.constant 16 : i32
    %60 = vector.broadcast %c16_i32 : i32 to vector<10x1x1xi32>
    %61 = arith.cmpi slt, %54, %60 : vector<10x1x1xi32>
    %62 = arith.andi %59, %61 : vector<10x1x1xi1>
    %c0_i32_22 = arith.constant 0 : i32
    %63 = vector.broadcast %c0_i32_22 : i32 to vector<1x18x1xi32>
    %64 = arith.cmpi sge, %57, %63 : vector<1x18x1xi32>
    %65 = vector.broadcast %62 : vector<10x1x1xi1> to vector<10x18x1xi1>
    %66 = vector.broadcast %64 : vector<1x18x1xi1> to vector<10x18x1xi1>
    %67 = arith.andi %65, %66 : vector<10x18x1xi1>
    %c16_i32_23 = arith.constant 16 : i32
    %68 = vector.broadcast %c16_i32_23 : i32 to vector<1x18x1xi32>
    %69 = arith.cmpi slt, %57, %68 : vector<1x18x1xi32>
    %70 = vector.broadcast %69 : vector<1x18x1xi1> to vector<10x18x1xi1>
    %71 = arith.andi %67, %70 : vector<10x18x1xi1>
    %cst_24 = arith.constant 0.000000e+00 : f32
    %72 = vector.shape_cast %71 : vector<10x18x1xi1> to vector<10x18x1xi1>
    %73 = vector.broadcast %72 : vector<10x18x1xi1> to vector<10x18x8xi1>
    %74 = vector.broadcast %cst_24 : f32 to vector<10x18x8xf32>
    %75 = arith.select %73, %49, %74 : vector<10x18x8xi1>, vector<10x18x8xf32>
    %76 = arith.truncf %75 : vector<10x18x8xf32> to vector<10x18x8xbf16>
    %cst_25 = arith.constant 0.000000e+00 : f32
    %77 = vector.broadcast %cst_25 : f32 to vector<128x8xf32>
    %78 = vector.extract_strided_slice %76 {offsets = [0, 0, 0], sizes = [8, 16, 8], strides = [1, 1, 1]} : vector<10x18x8xbf16> to vector<8x16x8xbf16>
    %79 = vector.shape_cast %78 : vector<8x16x8xbf16> to vector<128x8xbf16>
    %80 = vector.extract_strided_slice %76 {offsets = [0, 1, 0], sizes = [8, 16, 8], strides = [1, 1, 1]} : vector<10x18x8xbf16> to vector<8x16x8xbf16>
    %81 = vector.shape_cast %80 : vector<8x16x8xbf16> to vector<128x8xbf16>
    %82 = vector.extract_strided_slice %76 {offsets = [0, 2, 0], sizes = [8, 16, 8], strides = [1, 1, 1]} : vector<10x18x8xbf16> to vector<8x16x8xbf16>
    %83 = vector.shape_cast %82 : vector<8x16x8xbf16> to vector<128x8xbf16>
    %84 = tpu.concatenate %79, %81, %83 in 1 : vector<128x8xbf16>, vector<128x8xbf16>, vector<128x8xbf16> -> vector<128x24xbf16>
    %c0_26 = arith.constant 0 : index
    %c0_27 = arith.constant 0 : index
    %c0_28 = arith.constant 0 : index
    %85 = vector.load %arg6[%c0_26, %c0_27, %c0_28] : memref<3x24x8xbf16, #tpu.memory_space<vmem>>, vector<1x24x8xbf16>
    %86 = vector.shape_cast %85 : vector<1x24x8xbf16> to vector<24x8xbf16>
    %cst_29 = arith.constant dense<0.000000e+00> : vector<128x8xf32>
    %87 = tpu.matmul %84, %86, %cst_29 {dimension_numbers = #tpu.dot_dimension_numbers<[1], [0], [0], [1], [0, 0, 1, 1], [], []>} : vector<128x24xbf16>, vector<24x8xbf16>, vector<128x8xf32> -> vector<128x8xf32>
    %88 = arith.addf %77, %87 : vector<128x8xf32>
    %89 = vector.extract_strided_slice %76 {offsets = [1, 0, 0], sizes = [8, 16, 8], strides = [1, 1, 1]} : vector<10x18x8xbf16> to vector<8x16x8xbf16>
    %90 = vector.shape_cast %89 : vector<8x16x8xbf16> to vector<128x8xbf16>
    %91 = vector.extract_strided_slice %76 {offsets = [1, 1, 0], sizes = [8, 16, 8], strides = [1, 1, 1]} : vector<10x18x8xbf16> to vector<8x16x8xbf16>
    %92 = vector.shape_cast %91 : vector<8x16x8xbf16> to vector<128x8xbf16>
    %93 = vector.extract_strided_slice %76 {offsets = [1, 2, 0], sizes = [8, 16, 8], strides = [1, 1, 1]} : vector<10x18x8xbf16> to vector<8x16x8xbf16>
    %94 = vector.shape_cast %93 : vector<8x16x8xbf16> to vector<128x8xbf16>
    %95 = tpu.concatenate %90, %92, %94 in 1 : vector<128x8xbf16>, vector<128x8xbf16>, vector<128x8xbf16> -> vector<128x24xbf16>
    %c1_30 = arith.constant 1 : index
    %c0_31 = arith.constant 0 : index
    %c0_32 = arith.constant 0 : index
    %96 = vector.load %arg6[%c1_30, %c0_31, %c0_32] : memref<3x24x8xbf16, #tpu.memory_space<vmem>>, vector<1x24x8xbf16>
    %97 = vector.shape_cast %96 : vector<1x24x8xbf16> to vector<24x8xbf16>
    %cst_33 = arith.constant dense<0.000000e+00> : vector<128x8xf32>
    %98 = tpu.matmul %95, %97, %cst_33 {dimension_numbers = #tpu.dot_dimension_numbers<[1], [0], [0], [1], [0, 0, 1, 1], [], []>} : vector<128x24xbf16>, vector<24x8xbf16>, vector<128x8xf32> -> vector<128x8xf32>
    %99 = arith.addf %88, %98 : vector<128x8xf32>
    %100 = vector.extract_strided_slice %76 {offsets = [2, 0, 0], sizes = [8, 16, 8], strides = [1, 1, 1]} : vector<10x18x8xbf16> to vector<8x16x8xbf16>
    %101 = vector.shape_cast %100 : vector<8x16x8xbf16> to vector<128x8xbf16>
    %102 = vector.extract_strided_slice %76 {offsets = [2, 1, 0], sizes = [8, 16, 8], strides = [1, 1, 1]} : vector<10x18x8xbf16> to vector<8x16x8xbf16>
    %103 = vector.shape_cast %102 : vector<8x16x8xbf16> to vector<128x8xbf16>
    %104 = vector.extract_strided_slice %76 {offsets = [2, 2, 0], sizes = [8, 16, 8], strides = [1, 1, 1]} : vector<10x18x8xbf16> to vector<8x16x8xbf16>
    %105 = vector.shape_cast %104 : vector<8x16x8xbf16> to vector<128x8xbf16>
    %106 = tpu.concatenate %101, %103, %105 in 1 : vector<128x8xbf16>, vector<128x8xbf16>, vector<128x8xbf16> -> vector<128x24xbf16>
    %c2_34 = arith.constant 2 : index
    %c0_35 = arith.constant 0 : index
    %c0_36 = arith.constant 0 : index
    %107 = vector.load %arg6[%c2_34, %c0_35, %c0_36] : memref<3x24x8xbf16, #tpu.memory_space<vmem>>, vector<1x24x8xbf16>
    %108 = vector.shape_cast %107 : vector<1x24x8xbf16> to vector<24x8xbf16>
    %cst_37 = arith.constant dense<0.000000e+00> : vector<128x8xf32>
    %109 = tpu.matmul %106, %108, %cst_37 {dimension_numbers = #tpu.dot_dimension_numbers<[1], [0], [0], [1], [0, 0, 1, 1], [], []>} : vector<128x24xbf16>, vector<24x8xbf16>, vector<128x8xf32> -> vector<128x8xf32>
    %110 = arith.addf %99, %109 : vector<128x8xf32>
    %c0_38 = arith.constant 0 : index
    %c0_39 = arith.constant 0 : index
    %111 = vector.load %arg7[%c0_38, %c0_39] : memref<1x8xf32, #tpu.memory_space<vmem>>, vector<1x8xf32>
    %112 = vector.broadcast %111 : vector<1x8xf32> to vector<128x8xf32>
    %113 = arith.addf %110, %112 : vector<128x8xf32>
    %114 = vector.shape_cast %113 : vector<128x8xf32> to vector<8x16x8xf32>
    %115 = arith.truncf %114 : vector<8x16x8xf32> to vector<8x16x8xbf16>
    %c0_40 = arith.constant 0 : index
    %c0_41 = arith.constant 0 : index
    %c0_42 = arith.constant 0 : index
    %c0_43 = arith.constant 0 : index
    %116 = vector.load %arg8[%c0_40, %c0_41, %c0_42, %c0_43] : memref<1x8x16x8xbf16, #tpu.memory_space<vmem>>, vector<1x8x16x8xbf16>
    %117 = vector.shape_cast %116 : vector<1x8x16x8xbf16> to vector<8x16x8xbf16>
    %118 = vector.shape_cast %115 : vector<8x16x8xbf16> to vector<1x8x16x8xbf16>
    tpu.vector_store %arg8[%c0_40, %c0_41, %c0_42, %c0_43], %118 {strides = array<i32>} : memref<1x8x16x8xbf16, #tpu.memory_space<vmem>>, vector<1x8x16x8xbf16>,
    %cst_44 = arith.constant dense<0.000000e+00> : vector<8xf32>
    %119 = vector.multi_reduction <add>, %113, %cst_44 [0] : vector<128x8xf32> to vector<8xf32>
    %120 = vector.shape_cast %119 : vector<8xf32> to vector<1x1x1x8xf32>
    %c0_45 = arith.constant 0 : index
    %c0_46 = arith.constant 0 : index
    %c0_47 = arith.constant 0 : index
    %c0_48 = arith.constant 0 : index
    %121 = vector.load %arg9[%c0_45, %c0_46, %c0_47, %c0_48] : memref<1x1x1x8xf32, #tpu.memory_space<vmem>>, vector<1x1x1x8xf32>
    tpu.vector_store %arg9[%c0_45, %c0_46, %c0_47, %c0_48], %120 {strides = array<i32>} : memref<1x1x1x8xf32, #tpu.memory_space<vmem>>, vector<1x1x1x8xf32>,
    return
  }
  func.func @transform_0(%arg0: i32, %arg1: i32) -> (i32, i32, i32, i32) {
    %c0_i32 = arith.constant 0 : i32
    %c0_i32_0 = arith.constant 0 : i32
    %c0_i32_1 = arith.constant 0 : i32
    return %arg0, %arg1, %c0_i32, %c0_i32_0 : i32, i32, i32, i32
  }
  func.func @transform_1(%arg0: i32, %arg1: i32) -> (i32, i32, i32, i32, i32) {
    %c0_i32 = arith.constant 0 : i32
    %c0_i32_0 = arith.constant 0 : i32
    %c0_i32_1 = arith.constant 0 : i32
    %c0_i32_2 = arith.constant 0 : i32
    return %arg0, %arg1, %c0_i32, %c0_i32_0, %c0_i32_1 : i32, i32, i32, i32, i32
  }
  func.func @transform_2(%arg0: i32, %arg1: i32) -> (i32, i32, i32) {
    %c0_i32 = arith.constant 0 : i32
    %c0_i32_0 = arith.constant 0 : i32
    %c0_i32_1 = arith.constant 0 : i32
    %c0_i32_2 = arith.constant 0 : i32
    return %c0_i32, %c0_i32_0, %c0_i32_1 : i32, i32, i32
  }
  func.func @transform_3(%arg0: i32, %arg1: i32) -> (i32, i32) {
    %c0_i32 = arith.constant 0 : i32
    %c0_i32_0 = arith.constant 0 : i32
    %c0_i32_1 = arith.constant 0 : i32
    return %c0_i32, %c0_i32_0 : i32, i32
  }
  func.func @transform_4(%arg0: i32, %arg1: i32) -> (i32, i32, i32) {
    %c0_i32 = arith.constant 0 : i32
    %c0_i32_0 = arith.constant 0 : i32
    %c0_i32_1 = arith.constant 0 : i32
    %c0_i32_2 = arith.constant 0 : i32
    return %c0_i32, %c0_i32_0, %c0_i32_1 : i32, i32, i32
  }
  func.func @transform_5(%arg0: i32, %arg1: i32) -> (i32, i32) {
    %c0_i32 = arith.constant 0 : i32
    %c0_i32_0 = arith.constant 0 : i32
    %c0_i32_1 = arith.constant 0 : i32
    return %c0_i32, %c0_i32_0 : i32, i32
  }
  func.func @transform_6(%arg0: i32, %arg1: i32) -> (i32, i32, i32, i32) {
    %c0_i32 = arith.constant 0 : i32
    %c0_i32_0 = arith.constant 0 : i32
    %c0_i32_1 = arith.constant 0 : i32
    return %arg0, %arg1, %c0_i32, %c0_i32_0 : i32, i32, i32, i32
  }
  func.func @transform_7(%arg0: i32, %arg1: i32) -> (i32, i32, i32, i32) {
    %c0_i32 = arith.constant 0 : i32
    %c0_i32_0 = arith.constant 0 : i32
    %c0_i32_1 = arith.constant 0 : i32
    return %arg0, %arg1, %c0_i32, %c0_i32_0 : i32, i32, i32, i32
  }
}

</mosaic_0001>

<bundles_post_ra>
// kernel: tpu_custom_call.1
= control target key start
LH: loop header
LB: loop body
LE: loop exit
PB: predicated region body
PF: predicated region fallthrough
CT: control target
= control target key end

     0   :  { %s11357_s0 = inlined_call_operand.vmem [shape: bf16[2,16,20,8], index: 0, kind: input, shape index: {}]   ;;  %s11358_s1 = inlined_call_operand.vmem [shape: bf16[2,2,4,20,8], index: 1, kind: input, shape index: {}]   ;;  %s11359_s2 = inlined_call_operand.vmem [shape: bf16[3,24,8], index: 2, kind: input, shape index: {}]   ;;  %s11360_s3 = inlined_call_operand.vmem [shape: f32[1,8], index: 3, kind: input, shape index: {}]   ;;  %s11361_s4 = inlined_call_operand.vmem [shape: bf16[3,24,8], index: 4, kind: input, shape index: {}]   ;;  %s11362_s5 = inlined_call_operand.vmem [shape: f32[1,8], index: 5, kind: input, shape index: {}]   ;;  %s11363_s6 = inlined_call_operand.vmem [shape: bf16[2,16,16,8], index: 6, kind: output, shape index: {0}]   ;;  %s11364_s7 = inlined_call_operand.hbm [shape: f32[2,2,1,8], index: 7, kind: output, shape index: {1}]  }
   0x1   :  { %11751 = sst [smem:[#allocation294_spill]] %s11357_s0 }
   0x2   :  { %13 = vsyncpa [#allocation3], 0 }
   0x3   :  { %15 = vsyncpa [#allocation3 + $0x1], 0  ;;  %s6695_s24 = smov 0   ;;  %s6697_s25 = smov 0  }
   0x4   :  { %s6699_s26 = smov 0   ;;  %s6701_s27 = smov 0  }
   0x5   :  { %s6703_s28 = smov 0   ;;  %s6705_s29 = smov 0  }
   0x6   :  { %s6707_s30 = smov 0   ;;  %s6709_s8 = smov 0  }
   0x7 LB: > { %s6210_s9 = sadd.s32 4294967295, %s6651_s8   ;;  %s6211_s10 = sadd.s32 4294967294, %s6651_s8   ;;  %s6651_s8 = sphi %s6709_s8, %s21_s8   ;;  %s6647_s30 = sphi %s6707_s30, %s12934_s30   ;;  %s6643_s29 = sphi %s6705_s29, %s12933_s29   ;;  %s6639_s28 = sphi %s6703_s28, %s12932_s28   ;;  %s6635_s27 = sphi %s6701_s27, %s12931_s27   ;;  %s6631_s26 = sphi %s6699_s26, %s12930_s26   ;;  %s6627_s25 = sphi %s6697_s25, %s12929_s25   ;;  %s6623_s24 = sphi %s6695_s24, %s12928_s24  }
   0x8   : > { %s30_s11 = sadd.s32 1, %s6643_s29  ;;  %s33_s12 = sadd.s32 1, %s6647_s30 }
   0x9   : > { %p31_p0 = scmp.ge.s32.totalorder %s30_s11, 2  ;;  %p220_p1 = scmp.ne.s32.totalorder %s6631_s26, %s6627_s25 }
   0xa   : > { %p221_p2 = scmp.eq.s32.totalorder %s6210_s9, 3  ;;  %p226_p5 = scmp.ne.s32.totalorder %s6627_s25, %s6623_s24 }
   0xb   : > { %s12936_s11 = smov (%p31_p0, %s30_s11), 0  ;;  %s12938_s12 = smov (!%p31_p0, %s33_s12), %s6647_s30 }
   0xc   : > { %s206_s13 = ssub.s32 %s6643_s29, %s12936_s11  ;;  %p6746_p3 = por %p221_p2, %p220_p1 }
   0xd   : > { %p35_p4 = scmp.ge.s32.totalorder %s12938_s12, 2  ;;  %p227_p6 = scmp.eq.s32.totalorder %s6211_s10, 3 }
   0xe   : > { %p6214_p7 = scmp.ge.s32.totalorder %s6651_s8, 1  ;;  %p283_p9 = scmp.lt.s32.totalorder %s6651_s8, 5 }
   0xf   : > { %s12940_s12 = smov (%p35_p4, %s12938_s12), 0  ;;  %p6755_p8 = por %p227_p6, %p226_p5 }
  0x10   : > { %s205_s16 = ssub.s32 %s6647_s30, %s12940_s12  ;;  %s210_s17 = sadd.s32 1, %s6631_s26 }
  0x11   : > { %s207_s18 = sor.u32 %s206_s13, %s205_s16  ;;  %p284_p10 = pnand %p6214_p7, %p283_p9 }
  0x12   : > { %p208_p11 = scmp.eq.s32.totalorder %s207_s18, 0 }
  0x13   : > { %287 = sbr.rel (%p284_p10) target bundleno = 2917 (0xb65), region = 44 }
  0x14   : > { %s6764_s19 = scalar_select %p208_p11, %s6631_s26, %s210_s17  }
  0x18   : > { %p339_p12 = scmp.lt.s32.totalorder %s6639_s28, 1  ;;  %p351_p13 = scmp.lt.s32.totalorder %s6635_s27, 1  ;;  %vm470_vm0 = vcmask 1041409   ;;  %vm474_vm1 = vcmask 1042434   ;;  %vm478_vm2 = vcmask 1043459   ;;  %vm466_vm3 = vcmask 1040384  }
  0x19   : > { %s6785_s18 = sshll.u32 %s6635_s27, 3  ;;  %s11769_s0 = sld [smem:[#allocation294_spill]]  ;;  %vm770_vm4 = vsmask.f32 256  ;;  %vm771_vm5 = vsmask.f32 1284 }
  0x1a   : > { %s6769_s20 = scalar_select %p339_p12, %s6639_s28, 1  ;;  %vm772_vm6 = vmor %vm770_vm4, %vm771_vm5  ;;  %vm773_vm7 = vsmask.f32 2312  ;;  %vm775_vm9 = vsmask.f32 3340 }
  0x1b   : > { %s352_s21 = scalar_select %p351_p13, %s6635_s27, 1  ;;  %vm774_vm8 = vmor %vm772_vm6, %vm773_vm7  ;;  %vm777_vm11 = vsmask.f32 4368  ;;  %vm779_vm13 = vsmask.f32 5396  ;;  %vm2101_vm7 = vcmask 64512  }
  0x1c   : > { %s6479_s22 = smul.u32 24, %s6769_s20  ;;  %p341_p0 = scmp.lt.s32.totalorder %s6785_s18, 15  ;;  %vm776_vm10 = vmor %vm774_vm8, %vm775_vm9  ;;  %vm781_vm15 = vsmask.f32 6424  ;;  %vm783_vm5 = vsmask.f32 7452 }
  0x1d   : > { %s6478_s23 = smul.u32 12, %s352_s21  ;;  %vm778_vm12 = vmor %vm776_vm10, %vm777_vm11  ;;  %vm2126_vm8 = vcmask 130048   ;;  %vm2856_vm9 = vcmask 195584   ;;  %vm4215_vm10 = vcmask 1044484  }
  0x1e   : > { %s6791_s21 = scalar_select %p341_p0, %s6785_s18, 15  ;;  %vm780_vm14 = vmor %vm778_vm12, %vm779_vm13  ;;  %vm4217_vm12 = vcmask 1046534  }
  0x1f   : > { %s355_s9 = sadd.s32 %s6479_s22, %s6478_s23  ;;  %s6477_s22 = smul.u32 48, %s6769_s20  ;;  %vm782_vm4 = vmor %vm780_vm14, %vm781_vm15 }
  0x20   : > { %s6217_s10 = sshll.u32 %s355_s9, 2  ;;  %s6476_s23 = smul.u32 3, %s6791_s21  ;;  %vm7622_vm6 = vmor %vm782_vm4, %vm783_vm5 }
  0x21   : > { %s6776_s17 = scalar_lea.vmem %s11358_s1, %s6217_s10 }
  0x22   : > { %v6779_v0 = vld [vmem:[%s6776_s17] sm:$0xf]  ;;  %v6782_v1 = vld [vmem:[%s6776_s17 + $0x4] sm:$0xf]  ;;  %v6794_v2 = vld [vmem:[%s6776_s17 + $0x8] sm:$0x3]  ;;  %s345_s9 = sadd.s32 %s6477_s22, %s6476_s23 }
  0x23   : > { %1485 = vst [vmem:[#allocation1] sm:$0xff] %v6779_v0  ;;  %v6801_v5 = vld [vmem:[%s6776_s17 + $0xc] sm:$0xf]  ;;  %v6818_v11 = vld [vmem:[%s6776_s17 + $0x10] sm:$0xf]  ;;  %s6216_s10 = sshll.u32 %s345_s9, 2 }
  0x24   : > { %1486 = vst [vmem:[#allocation1 + $0x20] sm:$0xff] %v6782_v1  ;;  %v6825_v14 = vld [vmem:[%s6776_s17 + $0x14] sm:$0x3]  ;;  %s6837_s22 = scalar_lea.vmem %s11769_s0, %s6216_s10  ;;  %v11365_v35 = vrot.slane %v6794_v2, 3  ;;  %s6653_s23 = smov 8  }
  0x25   : > { %11756 = vst [vmem:[#allocation7_spill] sm:$0xff] %v6801_v5  ;;  %v6841_v18 = vld [vmem:[%s6837_s22] sm:$0xf]  ;;  %v6852_v23 = vld [vmem:[%s6837_s22 + $0x4] sm:$0xf]  ;;  %s6654_s9 = smov 16  }
  0x26   : > { %11762 = vst [vmem:[#allocation13_spill] sm:$0xff] %v6818_v11  ;;  %v6861_v26 = vld [vmem:[%s6837_s22 + $0x8] sm:$0x3]  ;;  %v6870_v30 = vld [vmem:[%s6837_s22 + $0xc] sm:$0xf]  ;;  %v6890_v37 = vsel %vm470_vm0, %v6794_v2, %v11365_v35 }
  0x27   : > { %11765 = vst [vmem:[#allocation16_spill] sm:$0xff] %v6825_v14  ;;  %v6884_v36 = vld [vmem:[%s6837_s22 + $0x10] sm:$0xf]  ;;  %v6897_v40 = vld [vmem:[%s6837_s22 + $0x14] sm:$0x3] }
  0x28   : > { %11770 = vst [vmem:[#allocation20_spill] sm:$0xff] %v6841_v18  ;;  %v6908_v44 = vld [vmem:[%s6837_s22 + $0x18] sm:$0xf]  ;;  %v6915_v47 = vld [vmem:[%s6837_s22 + $0x1c] sm:$0xf] }
  0x29   : > { %11775 = vst [vmem:[#allocation25_spill] sm:$0xff] %v6852_v23  ;;  %v6928_v52 = vld [vmem:[%s6837_s22 + $0x20] sm:$0x3]  ;;  %v6937_v56 = vld [vmem:[%s6837_s22 + $0x24] sm:$0xf] }
  0x2a   : > { %v6796_v3 = vld [vmem:[#allocation1 + $0x1] ss:$4 sm:$0xff]  ;;  %v6798_v4 = vld [vmem:[#allocation1 + $0x2] ss:$4 sm:$0xff]  ;;  %v6803_v6 = vld [vmem:[#allocation1 + $0x3] ss:$4 sm:$0xff] }
  0x2b   : > { %11754 = vst [vmem:[#allocation5_spill] sm:$0xff] %v6796_v3  ;;  %v6805_v7 = vld [vmem:[#allocation1 + $0x20] ss:$4 sm:$0xff]  ;;  %v6808_v8 = vld [vmem:[#allocation1 + $0x21] ss:$4 sm:$0xff] }
  0x2c   : > { %11755 = vst [vmem:[#allocation6_spill] sm:$0xff] %v6798_v4  ;;  %v6812_v9 = vld [vmem:[#allocation1 + $0x22] ss:$4 sm:$0xff]  ;;  %v6814_v10 = vld [vmem:[#allocation1 + $0x23] ss:$4 sm:$0xff] }
  0x2d   : > { %11757 = vst [vmem:[#allocation8_spill] sm:$0xff] %v6803_v6  ;;  %v6950_v61 = vld [vmem:[%s6837_s22 + $0x28] sm:$0xf]  ;;  %v6957_v35 = vld [vmem:[%s6837_s22 + $0x2c] sm:$0x3] }
  0x2e   : > { %11758 = vst [vmem:[#allocation9_spill] sm:$0xff] %v6805_v7 }
  0x2f   : > { %11759 = vst [vmem:[#allocation10_spill] sm:$0xff] %v6808_v8 }
  0x30   : > { %1501 = vst [vmem:[#allocation1] sm:$0xff] %v6794_v2 }
  0x31   : > { %11760 = vst [vmem:[#allocation11_spill] sm:$0xff] %v6812_v9 }
  0x32   : > { %11761 = vst [vmem:[#allocation12_spill] sm:$0xff] %v6814_v10 }
  0x33   : > { %1504 = vst [vmem:[#allocation1 + $0x20] sm:$0xff] %v6801_v5 }
  0x34   : > { %11778 = vst [vmem:[#allocation28_spill] sm:$0xff] %v6861_v26 }
  0x35   : > { %11782 = vst [vmem:[#allocation32_spill] sm:$0xff] %v6870_v30 }
  0x36   : > { %11787 = vst [vmem:[#allocation37_spill] sm:$0xff] %v6884_v36 }
  0x37   : > { %v6820_v12 = vld [vmem:[#allocation1] ss:$4 sm:$0xff]  ;;  %v6822_v13 = vld [vmem:[#allocation1 + $0x1] ss:$4 sm:$0xff]  ;;  %11790 = vst [vmem:[#allocation40_spill] sm:$0xff] %v6897_v40 }
  0x38   : > { %11763 = vst [vmem:[#allocation14_spill] sm:$0xff] %v6820_v12 }
  0x39   : > { %11764 = vst [vmem:[#allocation15_spill] sm:$0xff] %v6822_v13 }
  0x3a   : > { %1508 = vst [vmem:[#allocation1] sm:$0xff] %v6818_v11  ;;  %v6828_v15 = vld [vmem:[#allocation1 + $0x21] ss:$4 sm:$0xff]  ;;  %v6830_v16 = vld [vmem:[#allocation1 + $0x22] ss:$4 sm:$0xff] }
  0x3b   : > { %11766 = vst [vmem:[#allocation17_spill] sm:$0xff] %v6828_v15  ;;  %v6832_v17 = vld [vmem:[#allocation1 + $0x23] ss:$4 sm:$0xff] }
  0x3c   : > { %11767 = vst [vmem:[#allocation18_spill] sm:$0xff] %v6830_v16 }
  0x3d   : > { %11768 = vst [vmem:[#allocation19_spill] sm:$0xff] %v6832_v17 }
  0x3e   : > { %1509 = vst [vmem:[#allocation1 + $0x20] sm:$0xff] %v6825_v14 }
  0x3f   : > { %11794 = vst [vmem:[#allocation44_spill] sm:$0xff] %v6908_v44 }
  0x40   : > { %11797 = vst [vmem:[#allocation47_spill] sm:$0xff] %v6915_v47 }
  0x41   : > { %v6843_v19 = vld [vmem:[#allocation1] ss:$4 sm:$0xff]  ;;  %v6845_v20 = vld [vmem:[#allocation1 + $0x1] ss:$4 sm:$0xff]  ;;  %v6847_v21 = vld [vmem:[#allocation1 + $0x2] ss:$4 sm:$0xff] }
  0x42   : > { %11771 = vst [vmem:[#allocation21_spill] sm:$0xff] %v6843_v19  ;;  %v6849_v22 = vld [vmem:[#allocation1 + $0x3] ss:$4 sm:$0xff] }
  0x43   : > { %11772 = vst [vmem:[#allocation22_spill] sm:$0xff] %v6845_v20 }
  0x44   : > { %11773 = vst [vmem:[#allocation23_spill] sm:$0xff] %v6847_v21 }
  0x45   : > { %11774 = vst [vmem:[#allocation24_spill] sm:$0xff] %v6849_v22  ;;  %v6855_v24 = vld [vmem:[#allocation1 + $0x20] ss:$4 sm:$0xff]  ;;  %v6857_v25 = vld [vmem:[#allocation1 + $0x21] ss:$4 sm:$0xff] }
  0x46   : > { %1516 = vst [vmem:[#allocation1] sm:$0xff] %v6841_v18 }
  0x47   : > { %11776 = vst [vmem:[#allocation26_spill] sm:$0xff] %v6855_v24 }
  0x48   : > { %11777 = vst [vmem:[#allocation27_spill] sm:$0xff] %v6857_v25 }
  0x49   : > { %1517 = vst [vmem:[#allocation1 + $0x20] sm:$0xff] %v6852_v23 }
  0x4a   : > { %11802 = vst [vmem:[#allocation52_spill] sm:$0xff] %v6928_v52 }
  0x4b   : > { %11806 = vst [vmem:[#allocation56_spill] sm:$0xff] %v6937_v56 }
  0x4c   : > { %11811 = vst [vmem:[#allocation61_spill] sm:$0xff] %v6950_v61 }
  0x4d   : > { %v6863_v27 = vld [vmem:[#allocation1 + $0x1] ss:$4 sm:$0xff]  ;;  %v6865_v28 = vld [vmem:[#allocation1 + $0x2] ss:$4 sm:$0xff]  ;;  %v6867_v29 = vld [vmem:[#allocation1 + $0x3] ss:$4 sm:$0xff] }
  0x4e   : > { %11779 = vst [vmem:[#allocation29_spill] sm:$0xff] %v6863_v27 }
  0x4f   : > { %11780 = vst [vmem:[#allocation30_spill] sm:$0xff] %v6865_v28 }
  0x50   : > { %11781 = vst [vmem:[#allocation31_spill] sm:$0xff] %v6867_v29  ;;  %v6873_v31 = vld [vmem:[#allocation1 + $0x20] ss:$4 sm:$0xff]  ;;  %v6875_v32 = vld [vmem:[#allocation1 + $0x21] ss:$4 sm:$0xff] }
  0x51   : > { %1525 = vst [vmem:[#allocation1] sm:$0xff] %v6861_v26  ;;  %v6877_v33 = vld [vmem:[#allocation1 + $0x22] ss:$4 sm:$0xff]  ;;  %v6879_v34 = vld [vmem:[#allocation1 + $0x23] ss:$4 sm:$0xff] }
  0x52   : > { %11783 = vst [vmem:[#allocation33_spill] sm:$0xff] %v6873_v31 }
  0x53   : > { %11784 = vst [vmem:[#allocation34_spill] sm:$0xff] %v6875_v32 }
  0x54   : > { %11785 = vst [vmem:[#allocation35_spill] sm:$0xff] %v6877_v33 }
  0x55   : > { %11786 = vst [vmem:[#allocation36_spill] sm:$0xff] %v6879_v34 }
  0x56   : > { %1528 = vst [vmem:[#allocation1 + $0x20] sm:$0xff] %v6870_v30 }
  0x57   : > { %11814 = vst [vmem:[#allocation64_spill] sm:$0xff] %v6957_v35 }
  0x58   : > { %v6892_v38 = vld [vmem:[#allocation1] ss:$4 sm:$0xff]  ;;  %v6894_v39 = vld [vmem:[#allocation1 + $0x1] ss:$4 sm:$0xff] }
  0x59   : > { %11788 = vst [vmem:[#allocation38_spill] sm:$0xff] %v6892_v38 }
  0x5a   : > { %11789 = vst [vmem:[#allocation39_spill] sm:$0xff] %v6894_v39  ;;  %v436_v39 = vrot.slane %v6779_v0, 3 }
  0x5b   : > { %1532 = vst [vmem:[#allocation1] sm:$0xff] %v6884_v36 }
  0x5d   : > { %v6900_v41 = vld [vmem:[#allocation1 + $0x21] ss:$4 sm:$0xff]  ;;  %v6902_v42 = vld [vmem:[#allocation1 + $0x22] ss:$4 sm:$0xff]  ;;  %v6904_v43 = vld [vmem:[#allocation1 + $0x23] ss:$4 sm:$0xff] }
  0x5e   : > { %11791 = vst [vmem:[#allocation41_spill] sm:$0xff] %v6900_v41  ;;  %v7070_v41 = vld [vmem:[%s6837_s22 + $0x58] sm:$0xf] }
  0x5f   : > { %11792 = vst [vmem:[#allocation42_spill] sm:$0xff] %v6902_v42 }
  0x60   : > { %11793 = vst [vmem:[#allocation43_spill] sm:$0xff] %v6904_v43  ;;  %v7057_v43 = vld [vmem:[%s6837_s22 + $0x54] sm:$0xf] }
  0x61   : > { %1533 = vst [vmem:[#allocation1 + $0x20] sm:$0xff] %v6897_v40 }
  0x62   : > { %v6910_v45 = vld [vmem:[#allocation1] ss:$4 sm:$0xff]  ;;  %v6912_v46 = vld [vmem:[#allocation1 + $0x1] ss:$4 sm:$0xff]  ;;  %v6917_v48 = vld [vmem:[#allocation1 + $0x2] ss:$4 sm:$0xff] }
  0x63   : > { %11795 = vst [vmem:[#allocation45_spill] sm:$0xff] %v6910_v45  ;;  %v6919_v49 = vld [vmem:[#allocation1 + $0x3] ss:$4 sm:$0xff] }
  0x64   : > { %11796 = vst [vmem:[#allocation46_spill] sm:$0xff] %v6912_v46  ;;  %v7037_v46 = vld [vmem:[%s6837_s22 + $0x4c] sm:$0xf] }
  0x65   : > { %11798 = vst [vmem:[#allocation48_spill] sm:$0xff] %v6917_v48 }
  0x66   : > { %11799 = vst [vmem:[#allocation49_spill] sm:$0xff] %v6919_v49 }
  0x67   : > { %1540 = vst [vmem:[#allocation1] sm:$0xff] %v6908_v44 }
  0x68   : > { %v6921_v50 = vld [vmem:[#allocation1 + $0x20] ss:$4 sm:$0xff]  ;;  %v6923_v51 = vld [vmem:[#allocation1 + $0x21] ss:$4 sm:$0xff]  ;;  %11846 = vst [vmem:[#allocation96_spill] sm:$0xff] %v7037_v46 }
  0x69   : > { %11800 = vst [vmem:[#allocation50_spill] sm:$0xff] %v6921_v50 }
  0x6a   : > { %11801 = vst [vmem:[#allocation51_spill] sm:$0xff] %v6923_v51  ;;  %v6997_v51 = vld [vmem:[%s6837_s22 + $0x3c] sm:$0xf] }
  0x6b   : > { %1541 = vst [vmem:[#allocation1 + $0x20] sm:$0xff] %v6915_v47 }
  0x6c   : > { %11830 = vst [vmem:[#allocation80_spill] sm:$0xff] %v6997_v51 }
  0x6d   : > { %11854 = vst [vmem:[#allocation104_spill] sm:$0xff] %v7057_v43 }
  0x6e   : > { %v6930_v53 = vld [vmem:[#allocation1 + $0x1] ss:$4 sm:$0xff]  ;;  %v6932_v54 = vld [vmem:[#allocation1 + $0x2] ss:$4 sm:$0xff]  ;;  %v6934_v55 = vld [vmem:[#allocation1 + $0x3] ss:$4 sm:$0xff] }
  0x6f   : > { %11803 = vst [vmem:[#allocation53_spill] sm:$0xff] %v6930_v53 }
  0x70   : > { %11804 = vst [vmem:[#allocation54_spill] sm:$0xff] %v6932_v54  ;;  %v6977_v54 = vld [vmem:[%s6837_s22 + $0x34] sm:$0xf] }
  0x71   : > { %11805 = vst [vmem:[#allocation55_spill] sm:$0xff] %v6934_v55 }
  0x72   : > { %v6939_v57 = vld [vmem:[#allocation1 + $0x20] ss:$4 sm:$0xff]  ;;  %1549 = vst [vmem:[#allocation1] sm:$0xff] %v6928_v52  ;;  %v6942_v58 = vld [vmem:[#allocation1 + $0x21] ss:$4 sm:$0xff] }
  0x73   : > { %11807 = vst [vmem:[#allocation57_spill] sm:$0xff] %v6939_v57  ;;  %v6944_v59 = vld [vmem:[#allocation1 + $0x22] ss:$4 sm:$0xff]  ;;  %v6946_v60 = vld [vmem:[#allocation1 + $0x23] ss:$4 sm:$0xff] }
  0x74   : > { %11808 = vst [vmem:[#allocation58_spill] sm:$0xff] %v6942_v58 }
  0x75   : > { %11809 = vst [vmem:[#allocation59_spill] sm:$0xff] %v6944_v59 }
  0x76   : > { %11810 = vst [vmem:[#allocation60_spill] sm:$0xff] %v6946_v60  ;;  %v6968_v60 = vld [vmem:[%s6837_s22 + $0x30] sm:$0xf] }
  0x77   : > { %1552 = vst [vmem:[#allocation1 + $0x20] sm:$0xff] %v6937_v56 }
  0x78   : > { %11818 = vst [vmem:[#allocation68_spill] sm:$0xff] %v6968_v60 }
  0x79   : > { %v6952_v62 = vld [vmem:[#allocation1] ss:$4 sm:$0xff]  ;;  %v6954_v63 = vld [vmem:[#allocation1 + $0x1] ss:$4 sm:$0xff]  ;;  %11822 = vst [vmem:[#allocation72_spill] sm:$0xff] %v6977_v54 }
  0x7a   : > { %11812 = vst [vmem:[#allocation62_spill] sm:$0xff] %v6952_v62 }
  0x7b   : > { %11813 = vst [vmem:[#allocation63_spill] sm:$0xff] %v6954_v63 }
  0x7c   : > { %1556 = vst [vmem:[#allocation1] sm:$0xff] %v6950_v61 }
  0x7d   : > { %11859 = vst [vmem:[#allocation109_spill] sm:$0xff] %v7070_v41 }
  0x7e   : > { %v6960_v57 = vld [vmem:[#allocation1 + $0x21] ss:$4 sm:$0xff]  ;;  %v6962_v58 = vld [vmem:[#allocation1 + $0x22] ss:$4 sm:$0xff]  ;;  %v6964_v59 = vld [vmem:[#allocation1 + $0x23] ss:$4 sm:$0xff] }
  0x7f   : > { %11815 = vst [vmem:[#allocation65_spill] sm:$0xff] %v6960_v57 }
  0x80   : > { %11816 = vst [vmem:[#allocation66_spill] sm:$0xff] %v6962_v58  ;;  %v6988_v58 = vld [vmem:[%s6837_s22 + $0x38] sm:$0x3] }
  0x81   : > { %11817 = vst [vmem:[#allocation67_spill] sm:$0xff] %v6964_v59 }
  0x82   : > { %1557 = vst [vmem:[#allocation1 + $0x20] sm:$0xff] %v6957_v35 }
  0x83   : > { %v6970_v55 = vld [vmem:[#allocation1] ss:$4 sm:$0xff]  ;;  %v6972_v62 = vld [vmem:[#allocation1 + $0x1] ss:$4 sm:$0xff]  ;;  %v6974_v63 = vld [vmem:[#allocation1 + $0x2] ss:$4 sm:$0xff] }
  0x84   : > { %11819 = vst [vmem:[#allocation69_spill] sm:$0xff] %v6970_v55  ;;  %v6979_v53 = vld [vmem:[#allocation1 + $0x3] ss:$4 sm:$0xff] }
  0x85   : > { %11820 = vst [vmem:[#allocation70_spill] sm:$0xff] %v6972_v62 }
  0x86   : > { %11821 = vst [vmem:[#allocation71_spill] sm:$0xff] %v6974_v63 }
  0x87   : > { %11823 = vst [vmem:[#allocation73_spill] sm:$0xff] %v6979_v53 }
  0x88   : > { %1564 = vst [vmem:[#allocation1] sm:$0xff] %v6968_v60 }
  0x89   : > { %v6981_v57 = vld [vmem:[#allocation1 + $0x20] ss:$4 sm:$0xff]  ;;  %v6984_v59 = vld [vmem:[#allocation1 + $0x21] ss:$4 sm:$0xff]  ;;  %11826 = vst [vmem:[#allocation76_spill] sm:$0xff] %v6988_v58 }
  0x8a   : > { %11824 = vst [vmem:[#allocation74_spill] sm:$0xff] %v6981_v57 }
  0x8b   : > { %11825 = vst [vmem:[#allocation75_spill] sm:$0xff] %v6984_v59 }
  0x8c   : > { %1565 = vst [vmem:[#allocation1 + $0x20] sm:$0xff] %v6977_v54 }
  0x8f   : > { %v6990_v55 = vld [vmem:[#allocation1 + $0x1] ss:$4 sm:$0xff]  ;;  %v6992_v62 = vld [vmem:[#allocation1 + $0x2] ss:$4 sm:$0xff]  ;;  %v6994_v63 = vld [vmem:[#allocation1 + $0x3] ss:$4 sm:$0xff] }
  0x90   : > { %11827 = vst [vmem:[#allocation77_spill] sm:$0xff] %v6990_v55  ;;  %v7010_v55 = vld [vmem:[%s6837_s22 + $0x40] sm:$0xf] }
  0x91   : > { %11828 = vst [vmem:[#allocation78_spill] sm:$0xff] %v6992_v62 }
  0x92   : > { %11829 = vst [vmem:[#allocation79_spill] sm:$0xff] %v6994_v63 }
  0x93   : > { %v6999_v53 = vld [vmem:[#allocation1 + $0x20] ss:$4 sm:$0xff]  ;;  %1573 = vst [vmem:[#allocation1] sm:$0xff] %v6988_v58  ;;  %v7002_v57 = vld [vmem:[#allocation1 + $0x21] ss:$4 sm:$0xff] }
  0x94   : > { %11831 = vst [vmem:[#allocation81_spill] sm:$0xff] %v6999_v53  ;;  %v7004_v59 = vld [vmem:[#allocation1 + $0x22] ss:$4 sm:$0xff]  ;;  %v7006_v50 = vld [vmem:[#allocation1 + $0x23] ss:$4 sm:$0xff] }
  0x95   : > { %11832 = vst [vmem:[#allocation82_spill] sm:$0xff] %v7002_v57  ;;  %v7018_v53 = vld [vmem:[%s6837_s22 + $0x44] sm:$0x3] }
  0x96   : > { %11833 = vst [vmem:[#allocation83_spill] sm:$0xff] %v7004_v59 }
  0x97   : > { %11834 = vst [vmem:[#allocation84_spill] sm:$0xff] %v7006_v50  ;;  %v7028_v50 = vld [vmem:[%s6837_s22 + $0x48] sm:$0xf] }
  0x98   : > { %1576 = vst [vmem:[#allocation1 + $0x20] sm:$0xff] %v6997_v51 }
  0x99   : > { %11835 = vst [vmem:[#allocation85_spill] sm:$0xff] %v7010_v55 }
  0x9a   : > { %v7012_v62 = vld [vmem:[#allocation1] ss:$4 sm:$0xff]  ;;  %v7014_v63 = vld [vmem:[#allocation1 + $0x1] ss:$4 sm:$0xff]  ;;  %11838 = vst [vmem:[#allocation88_spill] sm:$0xff] %v7018_v53 }
  0x9b   : > { %11836 = vst [vmem:[#allocation86_spill] sm:$0xff] %v7012_v62 }
  0x9c   : > { %11837 = vst [vmem:[#allocation87_spill] sm:$0xff] %v7014_v63 }
  0x9d   : > { %1580 = vst [vmem:[#allocation1] sm:$0xff] %v7010_v55 }
  0x9e   : > { %11842 = vst [vmem:[#allocation92_spill] sm:$0xff] %v7028_v50 }
  0x9f   : > { %v7020_v49 = vld [vmem:[#allocation1 + $0x21] ss:$4 sm:$0xff]  ;;  %v7022_v57 = vld [vmem:[#allocation1 + $0x22] ss:$4 sm:$0xff]  ;;  %v7024_v59 = vld [vmem:[#allocation1 + $0x23] ss:$4 sm:$0xff] }
  0xa0   : > { %11839 = vst [vmem:[#allocation89_spill] sm:$0xff] %v7020_v49  ;;  %v7048_v49 = vld [vmem:[%s6837_s22 + $0x50] sm:$0x3] }
  0xa1   : > { %11840 = vst [vmem:[#allocation90_spill] sm:$0xff] %v7022_v57 }
  0xa2   : > { %11841 = vst [vmem:[#allocation91_spill] sm:$0xff] %v7024_v59 }
  0xa3   : > { %1581 = vst [vmem:[#allocation1 + $0x20] sm:$0xff] %v7018_v53 }
  0xa4   : > { %v7030_v48 = vld [vmem:[#allocation1] ss:$4 sm:$0xff]  ;;  %v7032_v62 = vld [vmem:[#allocation1 + $0x1] ss:$4 sm:$0xff]  ;;  %v7034_v63 = vld [vmem:[#allocation1 + $0x2] ss:$4 sm:$0xff] }
  0xa5   : > { %11843 = vst [vmem:[#allocation93_spill] sm:$0xff] %v7030_v48  ;;  %v7039_v45 = vld [vmem:[#allocation1 + $0x3] ss:$4 sm:$0xff] }
  0xa6   : > { %11844 = vst [vmem:[#allocation94_spill] sm:$0xff] %v7032_v62 }
  0xa7   : > { %11845 = vst [vmem:[#allocation95_spill] sm:$0xff] %v7034_v63 }
  0xa8   : > { %11847 = vst [vmem:[#allocation97_spill] sm:$0xff] %v7039_v45 }
  0xa9   : > { %1588 = vst [vmem:[#allocation1] sm:$0xff] %v7028_v50 }
  0xaa   : > { %v7042_v57 = vld [vmem:[#allocation1 + $0x20] ss:$4 sm:$0xff]  ;;  %v7044_v59 = vld [vmem:[#allocation1 + $0x21] ss:$4 sm:$0xff]  ;;  %11850 = vst [vmem:[#allocation100_spill] sm:$0xff] %v7048_v49 }
  0xab   : > { %11848 = vst [vmem:[#allocation98_spill] sm:$0xff] %v7042_v57 }
  0xac   : > { %11849 = vst [vmem:[#allocation99_spill] sm:$0xff] %v7044_v59 }
  0xad   : > { %1589 = vst [vmem:[#allocation1 + $0x20] sm:$0xff] %v7037_v46 }
  0xb0   : > { %v7050_v48 = vld [vmem:[#allocation1 + $0x1] ss:$4 sm:$0xff]  ;;  %v7052_v62 = vld [vmem:[#allocation1 + $0x2] ss:$4 sm:$0xff]  ;;  %v7054_v63 = vld [vmem:[#allocation1 + $0x3] ss:$4 sm:$0xff] }
  0xb1   : > { %11851 = vst [vmem:[#allocation101_spill] sm:$0xff] %v7050_v48 }
  0xb2   : > { %11852 = vst [vmem:[#allocation102_spill] sm:$0xff] %v7052_v62 }
  0xb3   : > { %11853 = vst [vmem:[#allocation103_spill] sm:$0xff] %v7054_v63  ;;  %v7077_v63 = vld [vmem:[%s6837_s22 + $0x5c] sm:$0x3]  ;;  %s6405_s22 = sadd.s32 4294967295, %s6785_s18 }
  0xb4   : > { %1597 = vst [vmem:[#allocation1] sm:$0xff] %v7048_v49  ;;  %v7060_v45 = vld [vmem:[#allocation1 + $0x20] ss:$4 sm:$0xff]  ;;  %v7062_v57 = vld [vmem:[#allocation1 + $0x21] ss:$4 sm:$0xff] }
  0xb5   : > { %11855 = vst [vmem:[#allocation105_spill] sm:$0xff] %v7060_v45  ;;  %v7064_v59 = vld [vmem:[#allocation1 + $0x22] ss:$4 sm:$0xff]  ;;  %v7066_v42 = vld [vmem:[#allocation1 + $0x23] ss:$4 sm:$0xff] }
  0xb6   : > { %11856 = vst [vmem:[#allocation106_spill] sm:$0xff] %v7062_v57 }
  0xb7   : > { %11857 = vst [vmem:[#allocation107_spill] sm:$0xff] %v7064_v59 }
  0xb8   : > { %11858 = vst [vmem:[#allocation108_spill] sm:$0xff] %v7066_v42  ;;  %v475_v42 = vsel %vm474_vm1, %v6779_v0, %v436_v39 }
  0xb9   : > { %1600 = vst [vmem:[#allocation1 + $0x20] sm:$0xff] %v7057_v43  ;;  %v7109_v31 = vrot.slane %v475_v42, 2 }
  0xba   : > { %11862 = vst [vmem:[#allocation112_spill] sm:$0xff] %v7077_v63 }
  0xbb   : > { %v7072_v48 = vld [vmem:[#allocation1] ss:$4 sm:$0xff]  ;;  %v7074_v62 = vld [vmem:[#allocation1 + $0x1] ss:$4 sm:$0xff] }
  0xbc   : > { %11860 = vst [vmem:[#allocation110_spill] sm:$0xff] %v7072_v48  ;;  %v471_v48 = vsel %vm470_vm0, %v6779_v0, %v436_v39 }
  0xbd   : > { %11861 = vst [vmem:[#allocation111_spill] sm:$0xff] %v7074_v62  ;;  %v437_v62 = vrot.slane %v6782_v1, 3  ;;  %v7093_v38 = vrot.slane %v471_v48, 1 }
  0xbe   : > { %1604 = vst [vmem:[#allocation1] sm:$0xff] %v7070_v41 }
  0xbf   : > { %v485_v48 = vsel %vm470_vm0, %v6782_v1, %v437_v62  ;;  %v7126_v42 = vsel %vm466_vm3, %v6782_v1, %v437_v62 }
  0xc0   : > { %v7081_v45 = vld [vmem:[#allocation1 + $0x21] ss:$4 sm:$0xff]  ;;  %v7083_v57 = vld [vmem:[#allocation1 + $0x22] ss:$4 sm:$0xff]  ;;  %v7085_v59 = vld [vmem:[#allocation1 + $0x23] ss:$4 sm:$0xff] }
  0xc1   : > { %11863 = vst [vmem:[#allocation113_spill] sm:$0xff] %v7081_v45 }
  0xc2   : > { %11864 = vst [vmem:[#allocation114_spill] sm:$0xff] %v7083_v57  ;;  %v479_v57 = vsel %vm478_vm2, %v6779_v0, %v436_v39 }
  0xc3   : > { %11865 = vst [vmem:[#allocation115_spill] sm:$0xff] %v7085_v59  ;;  %v7101_v59 = vsel %vm466_vm3, %v6779_v0, %v436_v39  ;;  %v7113_v29 = vrot.slane %v479_v57, 3  ;;  %v491_v39 = vsel %vm478_vm2, %v6782_v1, %v437_v62 }
  0xc4   : > { %1605 = vst [vmem:[#allocation1 + $0x20] sm:$0xff] %v7077_v63 }
  0xc5   : > { %v7097_v45 = vld [vmem:[#allocation1] ss:$4 sm:$0xff]  ;;  %v7103_v34 = vld [vmem:[#allocation1 + $0x1] ss:$4 sm:$0xff]  ;;  %v7105_v33 = vld [vmem:[#allocation1 + $0x2] ss:$4 sm:$0xff] }
  0xc6   : > { %11866 = vst [vmem:[#allocation116_spill] sm:$0xff] %v7097_v45  ;;  %v7107_v32 = vld [vmem:[#allocation1 + $0x3] ss:$4 sm:$0xff]  ;;  %v488_v45 = vsel %vm474_vm1, %v6782_v1, %v437_v62  ;;  %v440_v1 = vrot.slane %v6818_v11, 3 }
  0xc7   : > { %11867 = vst [vmem:[#allocation117_spill] sm:$0xff] %v7103_v34  ;;  %v7131_v57 = vrot.slane %v488_v45, 2 }
  0xc8   : > { %11868 = vst [vmem:[#allocation118_spill] sm:$0xff] %v7105_v33  ;;  %v512_v24 = vsel %vm470_vm0, %v6818_v11, %v440_v1 }
  0xc9   : > { %11869 = vst [vmem:[#allocation119_spill] sm:$0xff] %v7107_v32  ;;  %v7128_v32 = vrot.slane %v485_v48, 1  ;;  %v11872_v48 = vrot.slane %v6794_v2, 3 }
  0xcb   : > { %v7117_v28 = vld [vmem:[#allocation1 + $0x20] ss:$4 sm:$0xff]  ;;  %v7119_v0 = vld [vmem:[#allocation1 + $0x21] ss:$4 sm:$0xff] }
  0xcc   : > { %11870 = vst [vmem:[#allocation120_spill] sm:$0xff] %v7117_v28  ;;  %v7134_v28 = vrot.slane %v491_v39, 3  ;;  %v7151_v39 = vsel %vm466_vm3, %v6794_v2, %v11872_v48  ;;  %v515_v2 = vsel %vm474_vm1, %v6818_v11, %v440_v1  ;;  %v11370_v48 = vrot.slane %v6825_v14, 3 }
  0xcd   : > { %11871 = vst [vmem:[#allocation121_spill] sm:$0xff] %v7119_v0  ;;  %v439_v0 = vrot.slane %v6801_v5, 3 }
  0xce   : > { %1612 = vst [vmem:[#allocation1] ss:$9 sm:$0xff] %v7101_v59  ;;  %v7202_v19 = vsel %vm466_vm3, %v6825_v14, %v11370_v48 }
  0xcf   : > { %1614 = vst [vmem:[#allocation1 + $0x1] ss:$9 sm:$0xff] %v7093_v38  ;;  %v500_v45 = vsel %vm470_vm0, %v6801_v5, %v439_v0  ;;  %v503_v62 = vsel %vm474_vm1, %v6801_v5, %v439_v0  ;;  %v506_v33 = vsel %vm478_vm2, %v6801_v5, %v439_v0  ;;  %v7157_v34 = vsel %vm466_vm3, %v6801_v5, %v439_v0 }
  0xd0   : > { %1616 = vst [vmem:[#allocation1 + $0x2] ss:$9 sm:$0xff] %v7109_v31  ;;  %v7159_v27 = vrot.slane %v500_v45, 1  ;;  %v7161_v25 = vrot.slane %v503_v62, 2  ;;  %v7167_v21 = vrot.slane %v506_v33, 3  ;;  %v7175_v0 = vsel %vm466_vm3, %v6818_v11, %v440_v1 }
  0xd1   : > { %1618 = vst [vmem:[#allocation1 + $0x3] ss:$9 sm:$0xff] %v7113_v29  ;;  %v7177_v45 = vrot.slane %v512_v24, 1  ;;  %v7180_v62 = vrot.slane %v515_v2, 2  ;;  %v442_v33 = vrot.slane %v6841_v18, 3  ;;  %v518_v24 = vsel %vm478_vm2, %v6818_v11, %v440_v1 }
  0xd2   : > { %1620 = vst [vmem:[#allocation1 + $0x4] ss:$9 sm:$0xff] %v7126_v42  ;;  %v443_v2 = vrot.slane %v6852_v23, 3 }
  0xd3   : > { %1622 = vst [vmem:[#allocation1 + $0x5] ss:$9 sm:$0xff] %v7128_v32  ;;  %v527_v5 = vsel %vm470_vm0, %v6841_v18, %v442_v33  ;;  %v530_v20 = vsel %vm474_vm1, %v6841_v18, %v442_v33  ;;  %v533_v1 = vsel %vm478_vm2, %v6841_v18, %v442_v33  ;;  %v7208_v11 = vsel %vm466_vm3, %v6841_v18, %v442_v33 }
  0xd4   : > { %1624 = vst [vmem:[#allocation1 + $0x6] ss:$9 sm:$0xff] %v7131_v57  ;;  %v7214_v16 = vrot.slane %v530_v20, 2  ;;  %v539_v15 = vsel %vm470_vm0, %v6852_v23, %v443_v2  ;;  %v7219_v48 = vrot.slane %v533_v1, 3  ;;  %v7225_v33 = vsel %vm466_vm3, %v6852_v23, %v443_v2 }
  0xd5   : > { %1626 = vst [vmem:[#allocation1 + $0x7] ss:$9 sm:$0xff] %v7134_v28  ;;  %v445_v20 = vrot.slane %v6870_v30, 3  ;;  %v542_v1 = vsel %vm474_vm1, %v6852_v23, %v443_v2 }
  0xd6   : > { %v7240_v18 = vrot.slane %v542_v1, 2 }
  0xd7   : > { %v554_v12 = vsel %vm470_vm0, %v6870_v30, %v445_v20  ;;  %v557_v10 = vsel %vm474_vm1, %v6870_v30, %v445_v20  ;;  %v7261_v1 = vsel %vm466_vm3, %v6870_v30, %v445_v20 }
  0xd8   : > { %v7263_v8 = vrot.slane %v554_v12, 1  ;;  %v7266_v7 = vrot.slane %v557_v10, 2  ;;  %v448_v12 = vrot.slane %v6908_v44, 3 }
  0xda   : > { %11876 = vst [vmem:[#allocation125_spill] sm:$0xff] %v7266_v7 }
  0xdc   : > { %v7165_v22 = vld [vmem:[#allocation1] sm:$0xff] }
  0xdd   : > { %11873 = vst [vmem:[#allocation122_spill] sm:$0xff] %v7165_v22  ;;  %v7192_v22 = vrot.slane %v518_v24, 3  ;;  %v7210_v24 = vrot.slane %v527_v5, 1  ;;  %v7227_v5 = vrot.slane %v539_v15, 1  ;;  %v11375_v15 = vrot.slane %v6861_v26, 3 }
  0xde   : > { %1628 = vst [vmem:[#allocation1] ss:$9 sm:$0xff] %v7151_v39 }
  0xdf   : > { %1629 = vst [vmem:[#allocation1 + $0x1] ss:$9 sm:$0xff] %v7157_v34  ;;  %v7252_v9 = vsel %vm466_vm3, %v6861_v26, %v11375_v15 }
  0xe0   : > { %1630 = vst [vmem:[#allocation1 + $0x2] ss:$9 sm:$0xff] %v7159_v27 }
  0xe1   : > { %1631 = vst [vmem:[#allocation1 + $0x3] ss:$9 sm:$0xff] %v7161_v25 }
  0xe2   : > { %1632 = vst [vmem:[#allocation1 + $0x4] ss:$9 sm:$0xff] %v7167_v21 }
  0xe3   : > { %1633 = vst [vmem:[#allocation1 + $0x5] ss:$9 sm:$0xff] %v7175_v0 }
  0xe4   : > { %1634 = vst [vmem:[#allocation1 + $0x6] ss:$9 sm:$0xff] %v7177_v45 }
  0xe5   : > { %1635 = vst [vmem:[#allocation1 + $0x7] ss:$9 sm:$0xff] %v7180_v62 }
  0xec   : > { %v7212_v17 = vld [vmem:[#allocation1] sm:$0xff] }
  0xed   : > { %11874 = vst [vmem:[#allocation123_spill] sm:$0xff] %v7212_v17  ;;  %v545_v17 = vsel %vm478_vm2, %v6852_v23, %v443_v2  ;;  %v560_v2 = vsel %vm478_vm2, %v6870_v30, %v445_v20  ;;  %v11386_v30 = vrot.slane %v6897_v40, 3 }
  0xee   : > { %1637 = vst [vmem:[#allocation1] ss:$9 sm:$0xff] %v7192_v22  ;;  %v7242_v13 = vrot.slane %v545_v17, 3  ;;  %v446_v17 = vrot.slane %v6884_v36, 3  ;;  %v7269_v15 = vrot.slane %v560_v2, 3 }
  0xef   : > { %1638 = vst [vmem:[#allocation1 + $0x1] ss:$9 sm:$0xff] %v7202_v19 }
  0xf0   : > { %1639 = vst [vmem:[#allocation1 + $0x2] ss:$9 sm:$0xff] %v7208_v11  ;;  %v566_v10 = vsel %vm470_vm0, %v6884_v36, %v446_v17  ;;  %v569_v20 = vsel %vm474_vm1, %v6884_v36, %v446_v17  ;;  %v572_v2 = vsel %vm478_vm2, %v6884_v36, %v446_v17 }
  0xf1   : > { %1640 = vst [vmem:[#allocation1 + $0x3] ss:$9 sm:$0xff] %v7210_v24  ;;  %v7289_v6 = vrot.slane %v566_v10, 1  ;;  %v7291_v4 = vrot.slane %v569_v20, 2  ;;  %v7293_v3 = vrot.slane %v572_v2, 3  ;;  %v587_v10 = vsel %vm478_vm2, %v6908_v44, %v448_v12 }
  0xf2   : > { %1641 = vst [vmem:[#allocation1 + $0x4] ss:$9 sm:$0xff] %v7214_v16  ;;  %v7312_v20 = vsel %vm466_vm3, %v6908_v44, %v448_v12 }
  0xf3   : > { %1642 = vst [vmem:[#allocation1 + $0x5] ss:$9 sm:$0xff] %v7219_v48 }
  0xf4   : > { %1643 = vst [vmem:[#allocation1 + $0x6] ss:$9 sm:$0xff] %v7225_v33 }
  0xf5   : > { %1644 = vst [vmem:[#allocation1 + $0x7] ss:$9 sm:$0xff] %v7227_v5 }
  0xf6   : > { %11877 = vst [vmem:[#allocation126_spill] sm:$0xff] %v7269_v15 }
  0xf7   : > { %11879 = vst [vmem:[#allocation128_spill] sm:$0xff] %v7291_v4 }
  0xf8   : > { %11880 = vst [vmem:[#allocation129_spill] sm:$0xff] %v7293_v3 }
  0xf9   : > { %11883 = vst [vmem:[#allocation132_spill] sm:$0xff] %v7312_v20 }
  0xfc   : > { %v7256_v23 = vld [vmem:[#allocation1] sm:$0xff] }
  0xfd   : > { %11875 = vst [vmem:[#allocation124_spill] sm:$0xff] %v7256_v23  ;;  %v7275_v23 = vsel %vm466_vm3, %v6884_v36, %v446_v17  ;;  %v7305_v17 = vsel %vm466_vm3, %v6897_v40, %v11386_v30  ;;  %v7320_v36 = vrot.slane %v587_v10, 3  ;;  %v449_v30 = vrot.slane %v6915_v47, 3 }
  0xfe   : > { %1646 = vst [vmem:[#allocation1] ss:$9 sm:$0xff] %v7240_v18 }
  0xff   : > { %1647 = vst [vmem:[#allocation1 + $0x1] ss:$9 sm:$0xff] %v7242_v13  ;;  %v599_v10 = vsel %vm478_vm2, %v6915_v47, %v449_v30 }
 0x100   : > { %1648 = vst [vmem:[#allocation1 + $0x2] ss:$9 sm:$0xff] %v7252_v9 }
 0x101   : > { %1649 = vst [vmem:[#allocation1 + $0x3] ss:$9 sm:$0xff] %v7261_v1 }
 0x102   : > { %11878 = vst [vmem:[#allocation127_spill] sm:$0xff] %v7275_v23 }
 0x103   : > { %1650 = vst [vmem:[#allocation1 + $0x4] ss:$9 sm:$0xff] %v7263_v8 }
 0x104   : > { %1651 = vst [vmem:[#allocation1 + $0x5] ss:$9 sm:$0xff] %v7266_v7 }
 0x105   : > { %1652 = vst [vmem:[#allocation1 + $0x6] ss:$9 sm:$0xff] %v7269_v15  ;;  %v584_v15 = vsel %vm474_vm1, %v6908_v44, %v448_v12 }
 0x106   : > { %1653 = vst [vmem:[#allocation1 + $0x7] ss:$9 sm:$0xff] %v7275_v23  ;;  %v581_v23 = vsel %vm470_vm0, %v6908_v44, %v448_v12  ;;  %v596_v12 = vsel %vm474_vm1, %v6915_v47, %v449_v30  ;;  %v11403_v44 = vrot.slane %v6928_v52, 3 }
 0x107   : > { %11882 = vst [vmem:[#allocation131_spill] sm:$0xff] %v7305_v17  ;;  %v7314_v2 = vrot.slane %v581_v23, 1  ;;  %v593_v23 = vsel %vm470_vm0, %v6915_v47, %v449_v30 }
 0x108   : > { %11886 = vst [vmem:[#allocation135_spill] sm:$0xff] %v7320_v36 }
 0x109   : > { %11884 = vst [vmem:[#allocation133_spill] sm:$0xff] %v7314_v2 }
 0x10d   : > { %v7299_v7 = vld [vmem:[#allocation1] sm:$0xff] }
 0x10e   : > { %11881 = vst [vmem:[#allocation130_spill] sm:$0xff] %v7299_v7  ;;  %v7317_v7 = vrot.slane %v584_v15, 2  ;;  %v451_v15 = vrot.slane %v6937_v56, 3 }
 0x10f   : > { %1655 = vst [vmem:[#allocation1] ss:$9 sm:$0xff] %v7289_v6 }
 0x110   : > { %1656 = vst [vmem:[#allocation1 + $0x1] ss:$9 sm:$0xff] %v7291_v4  ;;  %v611_v4 = vsel %vm474_vm1, %v6937_v56, %v451_v15 }
 0x111   : > { %11885 = vst [vmem:[#allocation134_spill] sm:$0xff] %v7317_v7 }
 0x112   : > { %1657 = vst [vmem:[#allocation1 + $0x2] ss:$9 sm:$0xff] %v7293_v3 }
 0x113   : > { %1658 = vst [vmem:[#allocation1 + $0x3] ss:$9 sm:$0xff] %v7305_v17  ;;  %v608_v17 = vsel %vm470_vm0, %v6937_v56, %v451_v15 }
 0x114   : > { %1659 = vst [vmem:[#allocation1 + $0x4] ss:$9 sm:$0xff] %v7312_v20  ;;  %v7344_v20 = vrot.slane %v599_v10, 3  ;;  %v7367_v10 = vrot.slane %v611_v4, 2  ;;  %v454_v4 = vrot.slane %v6968_v60, 3 }
 0x115   : > { %1660 = vst [vmem:[#allocation1 + $0x5] ss:$9 sm:$0xff] %v7314_v2  ;;  %v7338_v2 = vsel %vm466_vm3, %v6915_v47, %v449_v30  ;;  %v7357_v30 = vsel %vm466_vm3, %v6928_v52, %v11403_v44  ;;  %v452_v44 = vrot.slane %v6950_v61, 3 }
 0x116   : > { %1661 = vst [vmem:[#allocation1 + $0x6] ss:$9 sm:$0xff] %v7317_v7  ;;  %v7340_v7 = vrot.slane %v593_v23, 1  ;;  %v7362_v23 = vsel %vm466_vm3, %v6937_v56, %v451_v15 }
 0x117   : > { %1662 = vst [vmem:[#allocation1 + $0x7] ss:$9 sm:$0xff] %v7320_v36  ;;  %v7342_v36 = vrot.slane %v596_v12, 2  ;;  %v7364_v12 = vrot.slane %v608_v17, 1  ;;  %v614_v17 = vsel %vm478_vm2, %v6937_v56, %v451_v15 }
 0x118   : > { %11887 = vst [vmem:[#allocation136_spill] sm:$0xff] %v7338_v2  ;;  %v7380_v47 = vrot.slane %v614_v17, 3 }
 0x119   : > { %11888 = vst [vmem:[#allocation137_spill] sm:$0xff] %v7340_v7 }
 0x11a   : > { %11889 = vst [vmem:[#allocation138_spill] sm:$0xff] %v7342_v36 }
 0x11b   : > { %11890 = vst [vmem:[#allocation139_spill] sm:$0xff] %v7344_v20 }
 0x11c   : > { %11892 = vst [vmem:[#allocation141_spill] sm:$0xff] %v7357_v30 }
 0x11d   : > { %11893 = vst [vmem:[#allocation142_spill] sm:$0xff] %v7362_v23 }
 0x11e   : > { %v7348_v3 = vld [vmem:[#allocation1] sm:$0xff]  ;;  %11894 = vst [vmem:[#allocation143_spill] sm:$0xff] %v7364_v12 }
 0x11f   : > { %11891 = vst [vmem:[#allocation140_spill] sm:$0xff] %v7348_v3  ;;  %v620_v3 = vsel %vm470_vm0, %v6950_v61, %v452_v44 }
 0x120   : > { %1664 = vst [vmem:[#allocation1] ss:$9 sm:$0xff] %v7338_v2  ;;  %v7391_v15 = vrot.slane %v620_v3, 1  ;;  %v7412_v3 = vsel %vm466_vm3, %v6968_v60, %v454_v4 }
 0x121   : > { %1665 = vst [vmem:[#allocation1 + $0x1] ss:$9 sm:$0xff] %v7340_v7 }
 0x122   : > { %1666 = vst [vmem:[#allocation1 + $0x2] ss:$9 sm:$0xff] %v7342_v36  ;;  %v635_v36 = vsel %vm470_vm0, %v6968_v60, %v454_v4 }
 0x123   : > { %11895 = vst [vmem:[#allocation144_spill] sm:$0xff] %v7367_v10 }
 0x124   : > { %1667 = vst [vmem:[#allocation1 + $0x3] ss:$9 sm:$0xff] %v7344_v20 }
 0x125   : > { %1668 = vst [vmem:[#allocation1 + $0x4] ss:$9 sm:$0xff] %v7357_v30  ;;  %v623_v30 = vsel %vm474_vm1, %v6950_v61, %v452_v44 }
 0x126   : > { %1669 = vst [vmem:[#allocation1 + $0x5] ss:$9 sm:$0xff] %v7362_v23  ;;  %v626_v23 = vsel %vm478_vm2, %v6950_v61, %v452_v44  ;;  %v7393_v56 = vrot.slane %v623_v30, 2  ;;  %v7414_v30 = vrot.slane %v635_v36, 1 }
 0x127   : > { %1670 = vst [vmem:[#allocation1 + $0x6] ss:$9 sm:$0xff] %v7364_v12  ;;  %v11420_v12 = vrot.slane %v6957_v35, 3  ;;  %v7397_v17 = vrot.slane %v626_v23, 3  ;;  %v455_v23 = vrot.slane %v6977_v54, 3 }
 0x128   : > { %1671 = vst [vmem:[#allocation1 + $0x7] ss:$9 sm:$0xff] %v7367_v10  ;;  %v7389_v10 = vsel %vm466_vm3, %v6950_v61, %v452_v44 }
 0x129   : > { %11896 = vst [vmem:[#allocation145_spill] sm:$0xff] %v7380_v47  ;;  %v7407_v44 = vsel %vm466_vm3, %v6957_v35, %v11420_v12  ;;  %v638_v12 = vsel %vm474_vm1, %v6968_v60, %v454_v4  ;;  %v647_v61 = vsel %vm470_vm0, %v6977_v54, %v455_v23 }
 0x12a   : > { %11897 = vst [vmem:[#allocation146_spill] sm:$0xff] %v7389_v10  ;;  %v7426_v36 = vrot.slane %v638_v12, 2 }
 0x12b   : > { %11898 = vst [vmem:[#allocation147_spill] sm:$0xff] %v7391_v15 }
 0x12c   : > { %11899 = vst [vmem:[#allocation148_spill] sm:$0xff] %v7393_v56 }
 0x12d   : > { %11901 = vst [vmem:[#allocation150_spill] sm:$0xff] %v7397_v17 }
 0x12e   : > { %11902 = vst [vmem:[#allocation151_spill] sm:$0xff] %v7407_v44 }
 0x12f   : > { %v7395_v20 = vld [vmem:[#allocation1] sm:$0xff]  ;;  %11903 = vst [vmem:[#allocation152_spill] sm:$0xff] %v7412_v3 }
 0x130   : > { %11900 = vst [vmem:[#allocation149_spill] sm:$0xff] %v7395_v20  ;;  %v641_v20 = vsel %vm478_vm2, %v6968_v60, %v454_v4  ;;  %v7441_v4 = vrot.slane %v647_v61, 1  ;;  %v457_v60 = vrot.slane %v6997_v51, 3 }
 0x131   : > { %1673 = vst [vmem:[#allocation1] ss:$9 sm:$0xff] %v7380_v47 }
 0x132   : > { %1674 = vst [vmem:[#allocation1 + $0x1] ss:$9 sm:$0xff] %v7389_v10 }
 0x133   : > { %1675 = vst [vmem:[#allocation1 + $0x2] ss:$9 sm:$0xff] %v7391_v15 }
 0x134   : > { %11904 = vst [vmem:[#allocation153_spill] sm:$0xff] %v7414_v30 }
 0x135   : > { %1676 = vst [vmem:[#allocation1 + $0x3] ss:$9 sm:$0xff] %v7393_v56  ;;  %v7439_v56 = vsel %vm466_vm3, %v6977_v54, %v455_v23 }
 0x136   : > { %1677 = vst [vmem:[#allocation1 + $0x4] ss:$9 sm:$0xff] %v7397_v17  ;;  %v7430_v17 = vrot.slane %v641_v20, 3 }
 0x137   : > { %1678 = vst [vmem:[#allocation1 + $0x5] ss:$9 sm:$0xff] %v7407_v44  ;;  %v653_v44 = vsel %vm478_vm2, %v6977_v54, %v455_v23 }
 0x138   : > { %1679 = vst [vmem:[#allocation1 + $0x6] ss:$9 sm:$0xff] %v7412_v3  ;;  %v650_v3 = vsel %vm474_vm1, %v6977_v54, %v455_v23  ;;  %v7449_v15 = vrot.slane %v653_v44, 3  ;;  %v458_v44 = vrot.slane %v7010_v55, 3  ;;  %v662_v23 = vsel %vm470_vm0, %v6997_v51, %v457_v60 }
 0x139   : > { %1680 = vst [vmem:[#allocation1 + $0x7] ss:$9 sm:$0xff] %v7414_v30  ;;  %v11437_v30 = vrot.slane %v6988_v58, 3  ;;  %v7446_v20 = vrot.slane %v650_v3, 2  ;;  %v7462_v3 = vsel %vm466_vm3, %v6997_v51, %v457_v60  ;;  %v7475_v54 = vrot.slane %v662_v23, 1 }
 0x13a   : > { %11905 = vst [vmem:[#allocation154_spill] sm:$0xff] %v7426_v36 }
 0x13b   : > { %11906 = vst [vmem:[#allocation155_spill] sm:$0xff] %v7430_v17  ;;  %v7457_v61 = vsel %vm466_vm3, %v6988_v58, %v11437_v30  ;;  %v665_v30 = vsel %vm474_vm1, %v6997_v51, %v457_v60 }
 0x13c   : > { %11907 = vst [vmem:[#allocation156_spill] sm:$0xff] %v7439_v56 }
 0x13d   : > { %11908 = vst [vmem:[#allocation157_spill] sm:$0xff] %v7441_v4 }
 0x13e   : > { %11910 = vst [vmem:[#allocation159_spill] sm:$0xff] %v7446_v20 }
 0x13f   : > { %11911 = vst [vmem:[#allocation160_spill] sm:$0xff] %v7449_v15 }
 0x140   : > { %v7443_v12 = vld [vmem:[#allocation1] sm:$0xff]  ;;  %11912 = vst [vmem:[#allocation161_spill] sm:$0xff] %v7457_v61 }
 0x141   : > { %11909 = vst [vmem:[#allocation158_spill] sm:$0xff] %v7443_v12  ;;  %v668_v12 = vsel %vm478_vm2, %v6997_v51, %v457_v60  ;;  %v7492_v60 = vsel %vm466_vm3, %v7010_v55, %v458_v44 }
 0x142   : > { %1682 = vst [vmem:[#allocation1] ss:$9 sm:$0xff] %v7426_v36 }
 0x143   : > { %1683 = vst [vmem:[#allocation1 + $0x1] ss:$9 sm:$0xff] %v7430_v17  ;;  %v11454_v17 = vrot.slane %v7018_v53, 3 }
 0x144   : > { %1684 = vst [vmem:[#allocation1 + $0x2] ss:$9 sm:$0xff] %v7439_v56 }
 0x145   : > { %1685 = vst [vmem:[#allocation1 + $0x3] ss:$9 sm:$0xff] %v7441_v4  ;;  %v680_v4 = vsel %vm478_vm2, %v7010_v55, %v458_v44 }
 0x146   : > { %11913 = vst [vmem:[#allocation162_spill] sm:$0xff] %v7462_v3  ;;  %v7500_v23 = vrot.slane %v680_v4, 3  ;;  %v461_v4 = vrot.slane %v7037_v46, 3 }
 0x147   : > { %1686 = vst [vmem:[#allocation1 + $0x4] ss:$9 sm:$0xff] %v7446_v20  ;;  %v7477_v20 = vrot.slane %v665_v30, 2 }
 0x148   : > { %1687 = vst [vmem:[#allocation1 + $0x5] ss:$9 sm:$0xff] %v7449_v15  ;;  %v7481_v15 = vrot.slane %v668_v12, 3 }
 0x149   : > { %1688 = vst [vmem:[#allocation1 + $0x6] ss:$9 sm:$0xff] %v7457_v61  ;;  %v674_v61 = vsel %vm470_vm0, %v7010_v55, %v458_v44 }
 0x14a   : > { %1689 = vst [vmem:[#allocation1 + $0x7] ss:$9 sm:$0xff] %v7462_v3  ;;  %v677_v3 = vsel %vm474_vm1, %v7010_v55, %v458_v44  ;;  %v7494_v30 = vrot.slane %v674_v61, 1  ;;  %v7508_v44 = vsel %vm466_vm3, %v7018_v53, %v11454_v17  ;;  %v460_v61 = vrot.slane %v7028_v50, 3 }
 0x14b   : > { %11914 = vst [vmem:[#allocation163_spill] sm:$0xff] %v7475_v54  ;;  %v7497_v12 = vrot.slane %v677_v3, 2 }
 0x14c   : > { %11915 = vst [vmem:[#allocation164_spill] sm:$0xff] %v7477_v20  ;;  %v689_v3 = vsel %vm470_vm0, %v7028_v50, %v460_v61  ;;  %v695_v17 = vsel %vm478_vm2, %v7028_v50, %v460_v61  ;;  %v7524_v51 = vsel %vm466_vm3, %v7028_v50, %v460_v61 }
 0x14d   : > { %11916 = vst [vmem:[#allocation165_spill] sm:$0xff] %v7481_v15  ;;  %v7526_v55 = vrot.slane %v689_v3, 1 }
 0x14e   : > { %11918 = vst [vmem:[#allocation167_spill] sm:$0xff] %v7492_v60 }
 0x14f   : > { %11919 = vst [vmem:[#allocation168_spill] sm:$0xff] %v7494_v30 }
 0x150   : > { %11920 = vst [vmem:[#allocation169_spill] sm:$0xff] %v7497_v12 }
 0x151   : > { %v7487_v56 = vld [vmem:[#allocation1] sm:$0xff]  ;;  %11921 = vst [vmem:[#allocation170_spill] sm:$0xff] %v7500_v23 }
 0x152   : > { %11917 = vst [vmem:[#allocation166_spill] sm:$0xff] %v7487_v56  ;;  %v692_v56 = vsel %vm474_vm1, %v7028_v50, %v460_v61  ;;  %v7543_v61 = vsel %vm466_vm3, %v7037_v46, %v461_v4 }
 0x153   : > { %1691 = vst [vmem:[#allocation1] ss:$9 sm:$0xff] %v7475_v54 }
 0x154   : > { %1692 = vst [vmem:[#allocation1 + $0x1] ss:$9 sm:$0xff] %v7477_v20 }
 0x155   : > { %1693 = vst [vmem:[#allocation1 + $0x2] ss:$9 sm:$0xff] %v7481_v15  ;;  %v707_v15 = vsel %vm478_vm2, %v7037_v46, %v461_v4 }
 0x156   : > { %1694 = vst [vmem:[#allocation1 + $0x3] ss:$9 sm:$0xff] %v7492_v60  ;;  %v7551_v3 = vrot.slane %v707_v15, 3 }
 0x157   : > { %11922 = vst [vmem:[#allocation171_spill] sm:$0xff] %v7508_v44 }
 0x158   : > { %1695 = vst [vmem:[#allocation1 + $0x4] ss:$9 sm:$0xff] %v7494_v30  ;;  %v704_v30 = vsel %vm474_vm1, %v7037_v46, %v461_v4 }
 0x159   : > { %1696 = vst [vmem:[#allocation1 + $0x5] ss:$9 sm:$0xff] %v7497_v12  ;;  %v7532_v12 = vrot.slane %v695_v17, 3  ;;  %v7548_v17 = vrot.slane %v704_v30, 2  ;;  %v464_v30 = vrot.slane %v7070_v41, 3 }
 0x15a   : > { %1697 = vst [vmem:[#allocation1 + $0x6] ss:$9 sm:$0xff] %v7500_v23  ;;  %v7528_v23 = vrot.slane %v692_v56, 2 }
 0x15b   : > { %1698 = vst [vmem:[#allocation1 + $0x7] ss:$9 sm:$0xff] %v7508_v44  ;;  %v701_v44 = vsel %vm470_vm0, %v7037_v46, %v461_v4 }
 0x15c   : > { %11923 = vst [vmem:[#allocation172_spill] sm:$0xff] %v7524_v51  ;;  %v7545_v56 = vrot.slane %v701_v44, 1  ;;  %v11485_v44 = vrot.slane %v7048_v49, 3 }
 0x15d   : > { %11924 = vst [vmem:[#allocation173_spill] sm:$0xff] %v7526_v55 }
 0x15e   : > { %11925 = vst [vmem:[#allocation174_spill] sm:$0xff] %v7528_v23  ;;  %v7569_v46 = vsel %vm466_vm3, %v7048_v49, %v11485_v44  ;;  %v731_v49 = vsel %vm474_vm1, %v7070_v41, %v464_v30 }
 0x15f   : > { %11926 = vst [vmem:[#allocation175_spill] sm:$0xff] %v7532_v12 }
 0x160   : > { %11928 = vst [vmem:[#allocation177_spill] sm:$0xff] %v7543_v61 }
 0x161   : > { %11929 = vst [vmem:[#allocation178_spill] sm:$0xff] %v7545_v56 }
 0x162   : > { %v7536_v60 = vld [vmem:[#allocation1] sm:$0xff]  ;;  %11930 = vst [vmem:[#allocation179_spill] sm:$0xff] %v7548_v17 }
 0x163   : > { %11927 = vst [vmem:[#allocation176_spill] sm:$0xff] %v7536_v60  ;;  %v463_v60 = vrot.slane %v7057_v43, 3 }
 0x164   : > { %1700 = vst [vmem:[#allocation1] ss:$9 sm:$0xff] %v7524_v51 }
 0x165   : > { %1701 = vst [vmem:[#allocation1 + $0x1] ss:$9 sm:$0xff] %v7526_v55  ;;  %v716_v15 = vsel %vm470_vm0, %v7057_v43, %v463_v60  ;;  %v719_v4 = vsel %vm474_vm1, %v7057_v43, %v463_v60  ;;  %v722_v50 = vsel %vm478_vm2, %v7057_v43, %v463_v60 }
 0x166   : > { %1702 = vst [vmem:[#allocation1 + $0x2] ss:$9 sm:$0xff] %v7528_v23  ;;  %v7585_v44 = vrot.slane %v722_v50, 3  ;;  %v734_v50 = vsel %vm478_vm2, %v7070_v41, %v464_v30 }
 0x167   : > { %11931 = vst [vmem:[#allocation180_spill] sm:$0xff] %v7551_v3 }
 0x168   : > { %1703 = vst [vmem:[#allocation1 + $0x3] ss:$9 sm:$0xff] %v7532_v12 }
 0x169   : > { %1704 = vst [vmem:[#allocation1 + $0x4] ss:$9 sm:$0xff] %v7543_v61  ;;  %v728_v61 = vsel %vm470_vm0, %v7070_v41, %v464_v30 }
 0x16a   : > { %1705 = vst [vmem:[#allocation1 + $0x5] ss:$9 sm:$0xff] %v7545_v56  ;;  %v7579_v56 = vrot.slane %v719_v4, 2  ;;  %v7598_v4 = vrot.slane %v731_v49, 2  ;;  %v11494_v49 = vrot.slane %v7077_v63, 3 }
 0x16b   : > { %1706 = vst [vmem:[#allocation1 + $0x6] ss:$9 sm:$0xff] %v7548_v17  ;;  %v7577_v17 = vrot.slane %v716_v15, 1  ;;  %v7595_v15 = vrot.slane %v728_v61, 1  ;;  %v7608_v61 = vrot.slane %v734_v50, 3  ;;  %v790_v50 = vshll.u32 %v7093_v38, 16 }
 0x16c   : > { %1707 = vst [vmem:[#allocation1 + $0x7] ss:$9 sm:$0xff] %v7551_v3  ;;  %v7575_v3 = vsel %vm466_vm3, %v7057_v43, %v463_v60  ;;  %v7593_v60 = vsel %vm466_vm3, %v7070_v41, %v464_v30  ;;  %v785_v30 = vshrl.u32 %v7101_v59, 16  ;;  %v11944_v41 = vmov 0 }
 0x16d   : > { %11932 = vst [vmem:[#allocation181_spill] sm:$0xff] %v7569_v46  ;;  %v11945_v41 = vsel %vm7622_vm6, 4294967295, %v11944_v41 }
 0x16e   : > { %11933 = vst [vmem:[#allocation182_spill] sm:$0xff] %v7575_v3  ;;  %v792_v59 = vsel %vm7622_vm6, %v785_v30, %v790_v50  ;;  %v840_v30 = vshrl.u32 %v7134_v28, 16  ;;  %v879_v50 = vshrl.u32 %v7167_v21, 16 }
 0x16f   : > { %11934 = vst [vmem:[#allocation183_spill] sm:$0xff] %v7577_v17 }
 0x170   : > { %11935 = vst [vmem:[#allocation184_spill] sm:$0xff] %v7579_v56 }
 0x171   : > { %11937 = vst [vmem:[#allocation186_spill] sm:$0xff] %v7585_v44 }
 0x172   : > { %11938 = vst [vmem:[#allocation187_spill] sm:$0xff] %v7593_v60 }
 0x173   : > { %v7583_v12 = vld [vmem:[#allocation1] sm:$0xff]  ;;  %11939 = vst [vmem:[#allocation188_spill] sm:$0xff] %v7595_v15 }
 0x174   : > { %11936 = vst [vmem:[#allocation185_spill] sm:$0xff] %v7583_v12  ;;  %v7614_v12 = vsel %vm466_vm3, %v7077_v63, %v11494_v49  ;;  %v798_v49 = vshll.u32 %v7109_v31, 16  ;;  %v806_v63 = vshll.u32 %v7113_v29, 16 }
 0x175   : > { %1709 = vst [vmem:[#allocation1] ss:$9 sm:$0xff] %v7569_v46 }
 0x176   : > { %1710 = vst [vmem:[#allocation1 + $0x1] ss:$9 sm:$0xff] %v7575_v3 }
 0x177   : > { %1711 = vst [vmem:[#allocation1 + $0x2] ss:$9 sm:$0xff] %v7577_v17  ;;  %v837_v17 = vshll.u32 %v7134_v28, 16 }
 0x178   : > { %11940 = vst [vmem:[#allocation189_spill] sm:$0xff] %v7598_v4 }
 0x179   : > { %1712 = vst [vmem:[#allocation1 + $0x3] ss:$9 sm:$0xff] %v7579_v56 }
 0x17a   : > { %1713 = vst [vmem:[#allocation1 + $0x4] ss:$9 sm:$0xff] %v7585_v44  ;;  %v824_v44 = vshrl.u32 %v7128_v32, 16 }
 0x17b   : > { %1714 = vst [vmem:[#allocation1 + $0x5] ss:$9 sm:$0xff] %v7593_v60  ;;  %v821_v60 = vshll.u32 %v7128_v32, 16 }
 0x17c   : > { %1715 = vst [vmem:[#allocation1 + $0x6] ss:$9 sm:$0xff] %v7595_v15  ;;  %v816_v15 = vshrl.u32 %v7126_v42, 16 }
 0x17d   : > { %1716 = vst [vmem:[#allocation1 + $0x7] ss:$9 sm:$0xff] %v7598_v4  ;;  %v793_v4 = vshrl.u32 %v7093_v38, 16 }
 0x17e   : > { %11941 = vst [vmem:[#allocation190_spill] sm:$0xff] %v7608_v61  ;;  %v823_v32 = vsel %vm7622_vm6, %v816_v15, %v821_v60  ;;  %v855_v15 = vshrl.u32 %v7157_v34, 16 }
 0x17f   : > { %11942 = vst [vmem:[#allocation191_spill] sm:$0xff] %v7614_v12  ;;  %v800_v38 = vsel %vm7622_vm6, %v793_v4, %v798_v49  ;;  %v844_v4 = vshll.u32 %v7151_v39, 16  ;;  %v876_v49 = vshll.u32 %v7167_v21, 16 }
 0x180   : > { %11946 = vst [vmem:[#allocation193_spill] sm:$0xff] %v11945_v41 }
 0x181   : > { %v846_v28 = vsel %vm7622_vm6, %v840_v30, %v844_v4  ;;  %v899_v30 = vshll.u32 %v7180_v62, 16 }
 0x184   : > { %v7616_v43 = vld [vmem:[#allocation1] sm:$0xff] }
 0x185   : > { %11943 = vst [vmem:[#allocation192_spill] sm:$0xff] %v7616_v43  ;;  %v801_v43 = vshrl.u32 %v7109_v31, 16  ;;  %v829_v31 = vshll.u32 %v7131_v57, 16 }
 0x186   : > { %1718 = vst [vmem:[#allocation1] ss:$9 sm:$0xff] %v7608_v61  ;;  %v809_v61 = vshrl.u32 %v7113_v29, 16  ;;  %v832_v29 = vshrl.u32 %v7131_v57, 16  ;;  %v742_v57 = vrot.slane %v6890_v37, 1  ;;  %v871_v37 = vshrl.u32 %v7161_v25, 16 }
 0x187   : > { %1719 = vst [vmem:[#allocation1 + $0x1] ss:$9 sm:$0xff] %v7614_v12  ;;  %v813_v12 = vshll.u32 %v7126_v42, 16  ;;  %v808_v56 = vsel %vm7622_vm6, %v801_v43, %v806_v63  ;;  %v831_v43 = vsel %vm7622_vm6, %v824_v44, %v829_v31  ;;  %v863_v44 = vshrl.u32 %v7159_v27, 16 }
 0x188   : > { %v839_v63 = vsel %vm7622_vm6, %v832_v29, %v837_v17  ;;  %v852_v60 = vshll.u32 %v742_v57, 16  ;;  %v868_v17 = vshll.u32 %v7161_v25, 16  ;;  %v891_v31 = vshll.u32 %v7177_v45, 16 }
 0x189   : > { %v815_v42 = vsel %vm7622_vm6, %v809_v61, %v813_v12  ;;  %v847_v12 = vshrl.u32 %v7151_v39, 16  ;;  %v883_v39 = vshll.u32 %v7175_v0, 16 }
 0x18a   : > { %v7678_v29 = vsel %vm7622_vm6, %v863_v44, %v868_v17  ;;  %v910_v17 = vshrl.u32 %v7192_v22, 16 }
 0x18b   : > { %v854_v61 = vsel %vm7622_vm6, %v847_v12, %v852_v60  ;;  %11949 = vst [vmem:[#allocation196_spill] sm:$0xff] %v7678_v29  ;;  %v7692_v57 = vsel %vm7622_vm6, %v879_v50, %v883_v39  ;;  %v925_v50 = vshrl.u32 %v7208_v11, 16  ;;  %v930_v39 = vshll.u32 %v7210_v24, 16 }
 0x18c   : > { %11952 = vst [vmem:[#allocation199_spill] sm:$0xff] %v7692_v57 }
 0x18e   : > { %v7644_v3 = vld [vmem:[#allocation1] sm:$0xff] }
 0x18f   : > { %11947 = vst [vmem:[#allocation194_spill] sm:$0xff] %v7644_v3  ;;  %v956_v3 = vshrl.u32 %v7225_v33, 16 }
 0x190   : > { %1722 = vst [vmem:[#allocation1] ss:$9 sm:$0xff] %v792_v59 }
 0x191   : > { %1725 = vst [vmem:[#allocation1 + $0x1] ss:$9 sm:$0xff] %v800_v38  ;;  %v886_v38 = vshrl.u32 %v7175_v0, 16 }
 0x192   : > { %1728 = vst [vmem:[#allocation1 + $0x2] ss:$9 sm:$0xff] %v808_v56  ;;  %v860_v56 = vshll.u32 %v7159_v27, 16 }
 0x193   : > { %1731 = vst [vmem:[#allocation1 + $0x3] ss:$9 sm:$0xff] %v815_v42  ;;  %v894_v42 = vshrl.u32 %v7177_v45, 16  ;;  %v7701_v60 = vsel %vm7622_vm6, %v886_v38, %v891_v31  ;;  %v933_v38 = vshrl.u32 %v7210_v24, 16  ;;  %v938_v31 = vshll.u32 %v7214_v16, 16 }
 0x194   : > { %1734 = vst [vmem:[#allocation1 + $0x4] ss:$9 sm:$0xff] %v823_v32  ;;  %v7672_v59 = vsel %vm7622_vm6, %v855_v15, %v860_v56  ;;  %v7686_v32 = vsel %vm7622_vm6, %v871_v37, %v876_v49  ;;  %v914_v37 = vshll.u32 %v7202_v19, 16  ;;  %v917_v49 = vshrl.u32 %v7202_v19, 16 }
 0x195   : > { %1737 = vst [vmem:[#allocation1 + $0x5] ss:$9 sm:$0xff] %v831_v43  ;;  %v902_v43 = vshrl.u32 %v7180_v62, 16  ;;  %v7706_v15 = vsel %vm7622_vm6, %v894_v42, %v899_v30  ;;  %v941_v30 = vshrl.u32 %v7214_v16, 16 }
 0x196   : > { %1740 = vst [vmem:[#allocation1 + $0x6] ss:$9 sm:$0xff] %v839_v63  ;;  %v907_v63 = vshll.u32 %v7192_v22, 16  ;;  %v7726_v42 = vsel %vm7622_vm6, %v910_v17, %v914_v37  ;;  %v961_v17 = vshll.u32 %v7227_v5, 16 }
 0x197   : > { %1743 = vst [vmem:[#allocation1 + $0x7] ss:$9 sm:$0xff] %v846_v28  ;;  %v11953_v28 = vrot.slane %v6825_v14, 3 }
 0x198   : > { %11948 = vst [vmem:[#allocation195_spill] sm:$0xff] %v7672_v59  ;;  %v7711_v56 = vsel %vm7622_vm6, %v902_v43, %v907_v63  ;;  %v946_v43 = vshll.u32 %v7219_v48, 16 }
 0x199   : > { %11951 = vst [vmem:[#allocation198_spill] sm:$0xff] %v7686_v32  ;;  %v743_v12 = vsel %vm470_vm0, %v6825_v14, %v11953_v28  ;;  %v949_v28 = vshrl.u32 %v7219_v48, 16 }
 0x19a   : > { %11954 = vst [vmem:[#allocation200_spill] sm:$0xff] %v7701_v60  ;;  %v745_v44 = vrot.slane %v743_v12, 1  ;;  %v953_v12 = vshll.u32 %v7225_v33, 16 }
 0x19b   : > { %11955 = vst [vmem:[#allocation201_spill] sm:$0xff] %v7706_v15 }
 0x19c   : > { %11956 = vst [vmem:[#allocation202_spill] sm:$0xff] %v7711_v56 }
 0x19d   : > { %11957 = vst [vmem:[#allocation203_spill] sm:$0xff] %v7726_v42 }
 0x19e   : > { %v7682_v4 = vld [vmem:[#allocation1] sm:$0xff] }
 0x19f   : > { %11950 = vst [vmem:[#allocation197_spill] sm:$0xff] %v7682_v4  ;;  %v7746_v4 = vsel %vm7622_vm6, %v933_v38, %v938_v31  ;;  %v11964_v38 = vrot.slane %v6861_v26, 3 }
 0x1a0   : > { %1747 = vst [vmem:[#allocation1] ss:$9 sm:$0xff] %v854_v61  ;;  %v922_v61 = vshll.u32 %v745_v44, 16  ;;  %v7738_v44 = vsel %vm7622_vm6, %v925_v50, %v930_v39  ;;  %v7753_v50 = vsel %vm7622_vm6, %v941_v30, %v946_v43  ;;  %v7758_v39 = vsel %vm7622_vm6, %v949_v28, %v953_v12 }
 0x1a1   : > { %1749 = vst [vmem:[#allocation1 + $0x1] ss:$9 sm:$0xff] %v7672_v59  ;;  %v746_v31 = vsel %vm470_vm0, %v6861_v26, %v11964_v38  ;;  %v972_v28 = vshrl.u32 %v7240_v18, 16  ;;  %v980_v12 = vshrl.u32 %v7242_v13, 16  ;;  %v995_v38 = vshrl.u32 %v7261_v1, 16 }
 0x1a2   : > { %1751 = vst [vmem:[#allocation1 + $0x2] ss:$9 sm:$0xff] %v7678_v29  ;;  %v7732_v63 = vsel %vm7622_vm6, %v917_v49, %v922_v61  ;;  %v964_v49 = vshrl.u32 %v7227_v5, 16  ;;  %v969_v61 = vshll.u32 %v7240_v18, 16  ;;  %v748_v43 = vrot.slane %v746_v31, 1  ;;  %v11987_v29 = vld [vmem:[#allocation134_spill] sm:$0xff] }
 0x1a3   : > { %1753 = vst [vmem:[#allocation1 + $0x3] ss:$9 sm:$0xff] %v7686_v32  ;;  %v1078_v59 = vshll.u32 %v11987_v29, 16 }
 0x1a4   : > { %1755 = vst [vmem:[#allocation1 + $0x4] ss:$9 sm:$0xff] %v7692_v57  ;;  %v7772_v30 = vsel %vm7622_vm6, %v964_v49, %v969_v61  ;;  %v987_v49 = vshrl.u32 %v7252_v9, 16  ;;  %v992_v61 = vshll.u32 %v748_v43, 16 }
 0x1a5   : > { %1757 = vst [vmem:[#allocation1 + $0x5] ss:$9 sm:$0xff] %v7701_v60 }
 0x1a6   : > { %1759 = vst [vmem:[#allocation1 + $0x6] ss:$9 sm:$0xff] %v7706_v15 }
 0x1a7   : > { %1761 = vst [vmem:[#allocation1 + $0x7] ss:$9 sm:$0xff] %v7711_v56 }
 0x1a8   : > { %11958 = vst [vmem:[#allocation204_spill] sm:$0xff] %v7732_v63 }
 0x1a9   : > { %11959 = vst [vmem:[#allocation205_spill] sm:$0xff] %v7738_v44 }
 0x1aa   : > { %11961 = vst [vmem:[#allocation207_spill] sm:$0xff] %v7746_v4 }
 0x1ab   : > { %11962 = vst [vmem:[#allocation208_spill] sm:$0xff] %v7753_v50 }
 0x1ac   : > { %11963 = vst [vmem:[#allocation209_spill] sm:$0xff] %v7758_v39 }
 0x1ad   : > { %11966 = vst [vmem:[#allocation211_spill] sm:$0xff] %v7772_v30 }
 0x1ae   : > { %v7742_v37 = vld [vmem:[#allocation1] sm:$0xff] }
 0x1af   : > { %11960 = vst [vmem:[#allocation206_spill] sm:$0xff] %v7742_v37  ;;  %v7767_v37 = vsel %vm7622_vm6, %v956_v3, %v961_v17  ;;  %v977_v3 = vshll.u32 %v7242_v13, 16  ;;  %v984_v17 = vshll.u32 %v7252_v9, 16 }
 0x1b0   : > { %1765 = vst [vmem:[#allocation1] ss:$9 sm:$0xff] %v7726_v42  ;;  %v7799_v42 = vsel %vm7622_vm6, %v987_v49, %v992_v61 }
 0x1b1   : > { %1767 = vst [vmem:[#allocation1 + $0x1] ss:$9 sm:$0xff] %v7732_v63  ;;  %v7787_v31 = vsel %vm7622_vm6, %v972_v28, %v977_v3  ;;  %v11970_v63 = vld [vmem:[#allocation126_spill] sm:$0xff]  ;;  %v11972_v28 = vld [vmem:[#allocation127_spill] sm:$0xff] }
 0x1b2   : > { %1769 = vst [vmem:[#allocation1 + $0x2] ss:$9 sm:$0xff] %v7738_v44  ;;  %v1016_v43 = vshll.u32 %v11970_v63, 16  ;;  %v1019_v56 = vshrl.u32 %v11970_v63, 16  ;;  %v1023_v3 = vshll.u32 %v11972_v28, 16 }
 0x1b3   : > { %11965 = vst [vmem:[#allocation210_spill] sm:$0xff] %v7767_v37 }
 0x1b4   : > { %1771 = vst [vmem:[#allocation1 + $0x3] ss:$9 sm:$0xff] %v7746_v4  ;;  %v7793_v4 = vsel %vm7622_vm6, %v980_v12, %v984_v17  ;;  %v1026_v12 = vshrl.u32 %v11972_v28, 16  ;;  %v1031_v17 = vshll.u32 %v7289_v6, 16 }
 0x1b5   : > { %1773 = vst [vmem:[#allocation1 + $0x4] ss:$9 sm:$0xff] %v7753_v50 }
 0x1b6   : > { %1775 = vst [vmem:[#allocation1 + $0x5] ss:$9 sm:$0xff] %v7758_v39  ;;  %v1000_v39 = vshll.u32 %v7263_v8, 16 }
 0x1b7   : > { %1777 = vst [vmem:[#allocation1 + $0x6] ss:$9 sm:$0xff] %v7767_v37  ;;  %v11968_v37 = vld [vmem:[#allocation125_spill] sm:$0xff] }
 0x1b8   : > { %1779 = vst [vmem:[#allocation1 + $0x7] ss:$9 sm:$0xff] %v7772_v30  ;;  %v1003_v30 = vshrl.u32 %v7263_v8, 16  ;;  %v1008_v50 = vshll.u32 %v11968_v37, 16  ;;  %v1011_v44 = vshrl.u32 %v11968_v37, 16  ;;  %v7807_v60 = vsel %vm7622_vm6, %v995_v38, %v1000_v39 }
 0x1b9   : > { %11967 = vst [vmem:[#allocation212_spill] sm:$0xff] %v7787_v31  ;;  %v7824_v39 = vsel %vm7622_vm6, %v1019_v56, %v1023_v3  ;;  %v11978_v38 = vrot.slane %v6897_v40, 3  ;;  %v1034_v56 = vshrl.u32 %v7289_v6, 16 }
 0x1ba   : > { %11969 = vst [vmem:[#allocation125_spill] sm:$0xff] %v7793_v4  ;;  %v7814_v49 = vsel %vm7622_vm6, %v1003_v30, %v1008_v50  ;;  %v7819_v61 = vsel %vm7622_vm6, %v1011_v44, %v1016_v43  ;;  %v7833_v30 = vsel %vm7622_vm6, %v1026_v12, %v1031_v17  ;;  %v11980_v43 = vld [vmem:[#allocation128_spill] sm:$0xff]  ;;  %v11982_v17 = vld [vmem:[#allocation131_spill] sm:$0xff] }
 0x1bb   : > { %11971 = vst [vmem:[#allocation126_spill] sm:$0xff] %v7799_v42  ;;  %v749_v50 = vsel %vm470_vm0, %v6897_v40, %v11978_v38  ;;  %v1039_v3 = vshll.u32 %v11980_v43, 16  ;;  %v11981_v38 = vld [vmem:[#allocation129_spill] sm:$0xff] }
 0x1bc   : > { %11974 = vst [vmem:[#allocation213_spill] sm:$0xff] %v7807_v60  ;;  %v751_v44 = vrot.slane %v749_v50, 1  ;;  %v1050_v12 = vshrl.u32 %v11981_v38, 16 }
 0x1bd   : > { %11975 = vst [vmem:[#allocation214_spill] sm:$0xff] %v7814_v49  ;;  %v7848_v50 = vsel %vm7622_vm6, %v1034_v56, %v1039_v3  ;;  %v11989_v56 = vld [vmem:[#allocation135_spill] sm:$0xff] }
 0x1be   : > { %11976 = vst [vmem:[#allocation215_spill] sm:$0xff] %v7819_v61  ;;  %v1086_v3 = vshll.u32 %v11989_v56, 16 }
 0x1bf   : > { %v7803_v15 = vld [vmem:[#allocation1] sm:$0xff]  ;;  %11977 = vst [vmem:[#allocation216_spill] sm:$0xff] %v7824_v39 }
 0x1c0   : > { %11973 = vst [vmem:[#allocation127_spill] sm:$0xff] %v7803_v15  ;;  %v1042_v15 = vshrl.u32 %v11980_v43, 16 }
 0x1c1   : > { %1783 = vst [vmem:[#allocation1] ss:$9 sm:$0xff] %v7787_v31 }
 0x1c2   : > { %1785 = vst [vmem:[#allocation1 + $0x1] ss:$9 sm:$0xff] %v7793_v4  ;;  %v11985_v4 = vld [vmem:[#allocation133_spill] sm:$0xff] }
 0x1c3   : > { %1787 = vst [vmem:[#allocation1 + $0x2] ss:$9 sm:$0xff] %v7799_v42  ;;  %v1054_v42 = vshll.u32 %v11982_v17, 16  ;;  %v1070_v31 = vshll.u32 %v11985_v4, 16  ;;  %v1073_v32 = vshrl.u32 %v11985_v4, 16 }
 0x1c4   : > { %1789 = vst [vmem:[#allocation1 + $0x3] ss:$9 sm:$0xff] %v7807_v60  ;;  %v1047_v60 = vshll.u32 %v11981_v38, 16 }
 0x1c5   : > { %11979 = vst [vmem:[#allocation217_spill] sm:$0xff] %v7833_v30 }
 0x1c6   : > { %1791 = vst [vmem:[#allocation1 + $0x4] ss:$9 sm:$0xff] %v7814_v49  ;;  %v1057_v49 = vshrl.u32 %v11982_v17, 16  ;;  %v7854_v57 = vsel %vm7622_vm6, %v1042_v15, %v1047_v60  ;;  %v7860_v17 = vsel %vm7622_vm6, %v1050_v12, %v1054_v42  ;;  %v1089_v60 = vshrl.u32 %v11989_v56, 16 }
 0x1c7   : > { %1793 = vst [vmem:[#allocation1 + $0x5] ss:$9 sm:$0xff] %v7819_v61  ;;  %v1062_v61 = vshll.u32 %v751_v44, 16  ;;  %v1081_v44 = vshrl.u32 %v11987_v29, 16  ;;  %v1093_v15 = vshll.u32 %v7338_v2, 16  ;;  %v7880_v12 = vsel %vm7622_vm6, %v1073_v32, %v1078_v59  ;;  %v12005_v29 = vld [vmem:[#allocation144_spill] sm:$0xff] }
 0x1c8   : > { %1795 = vst [vmem:[#allocation1 + $0x6] ss:$9 sm:$0xff] %v7824_v39 }
 0x1c9   : > { %1797 = vst [vmem:[#allocation1 + $0x7] ss:$9 sm:$0xff] %v7833_v30  ;;  %v11984_v30 = vld [vmem:[#allocation132_spill] sm:$0xff] }
 0x1ca   : > { %11983 = vst [vmem:[#allocation128_spill] sm:$0xff] %v7848_v50  ;;  %v1065_v39 = vshrl.u32 %v11984_v30, 16  ;;  %v7868_v30 = vsel %vm7622_vm6, %v1057_v49, %v1062_v61  ;;  %v7885_v49 = vsel %vm7622_vm6, %v1081_v44, %v1086_v3  ;;  %v7890_v61 = vsel %vm7622_vm6, %v1089_v60, %v1093_v15  ;;  %v11997_v60 = vld [vmem:[#allocation138_spill] sm:$0xff] }
 0x1cb   : > { %11986 = vst [vmem:[#allocation218_spill] sm:$0xff] %v7854_v57  ;;  %v1101_v44 = vshll.u32 %v7340_v7, 16  ;;  %v1104_v3 = vshrl.u32 %v7340_v7, 16  ;;  %v1109_v15 = vshll.u32 %v11997_v60, 16 }
 0x1cc   : > { %11988 = vst [vmem:[#allocation219_spill] sm:$0xff] %v7860_v17  ;;  %v7875_v42 = vsel %vm7622_vm6, %v1065_v39, %v1070_v31  ;;  %v11996_v31 = vrot.slane %v6928_v52, 3  ;;  %v1096_v39 = vshrl.u32 %v7338_v2, 16 }
 0x1cd   : > { %11991 = vst [vmem:[#allocation221_spill] sm:$0xff] %v7868_v30 }
 0x1ce   : > { %11992 = vst [vmem:[#allocation222_spill] sm:$0xff] %v7875_v42  ;;  %v752_v59 = vsel %vm470_vm0, %v6928_v52, %v11996_v31 }
 0x1cf   : > { %11993 = vst [vmem:[#allocation223_spill] sm:$0xff] %v7880_v12  ;;  %v754_v32 = vrot.slane %v752_v59, 1 }
 0x1d0   : > { %v7864_v38 = vld [vmem:[#allocation1] sm:$0xff]  ;;  %11994 = vst [vmem:[#allocation224_spill] sm:$0xff] %v7885_v49 }
 0x1d1   : > { %11990 = vst [vmem:[#allocation220_spill] sm:$0xff] %v7864_v38  ;;  %v1112_v38 = vshrl.u32 %v11997_v60, 16  ;;  %v12003_v60 = vld [vmem:[#allocation143_spill] sm:$0xff] }
 0x1d2   : > { %1801 = vst [vmem:[#allocation1] ss:$9 sm:$0xff] %v7848_v50  ;;  %v12002_v50 = vld [vmem:[#allocation142_spill] sm:$0xff]  ;;  %v1140_v2 = vshll.u32 %v12003_v60, 16  ;;  %v1143_v56 = vshrl.u32 %v12003_v60, 16  ;;  %v12021_v60 = vld [vmem:[#allocation153_spill] sm:$0xff] }
 0x1d3   : > { %1803 = vst [vmem:[#allocation1 + $0x1] ss:$9 sm:$0xff] %v7854_v57  ;;  %v7915_v57 = vsel %vm7622_vm6, %v1104_v3, %v1109_v15  ;;  %v1135_v7 = vshrl.u32 %v12002_v50, 16  ;;  %v1151_v3 = vshrl.u32 %v12005_v29, 16  ;;  %v1156_v15 = vshll.u32 %v7380_v47, 16 }
 0x1d4   : > { %1805 = vst [vmem:[#allocation1 + $0x2] ss:$9 sm:$0xff] %v7860_v17 }
 0x1d5   : > { %1807 = vst [vmem:[#allocation1 + $0x3] ss:$9 sm:$0xff] %v7868_v30 }
 0x1d6   : > { %11995 = vst [vmem:[#allocation225_spill] sm:$0xff] %v7890_v61 }
 0x1d7   : > { %1809 = vst [vmem:[#allocation1 + $0x4] ss:$9 sm:$0xff] %v7875_v42  ;;  %v11998_v42 = vld [vmem:[#allocation139_spill] sm:$0xff] }
 0x1d8   : > { %1811 = vst [vmem:[#allocation1 + $0x5] ss:$9 sm:$0xff] %v7880_v12  ;;  %v1117_v30 = vshll.u32 %v11998_v42, 16  ;;  %v1120_v31 = vshrl.u32 %v11998_v42, 16  ;;  %v11999_v12 = vld [vmem:[#allocation141_spill] sm:$0xff] }
 0x1d9   : > { %1813 = vst [vmem:[#allocation1 + $0x6] ss:$9 sm:$0xff] %v7885_v49  ;;  %v1124_v17 = vshll.u32 %v11999_v12, 16  ;;  %v1127_v59 = vshrl.u32 %v11999_v12, 16  ;;  %v1132_v49 = vshll.u32 %v754_v32, 16 }
 0x1da   : > { %1815 = vst [vmem:[#allocation1 + $0x7] ss:$9 sm:$0xff] %v7890_v61  ;;  %v7910_v61 = vsel %vm7622_vm6, %v1096_v39, %v1101_v44  ;;  %v7921_v42 = vsel %vm7622_vm6, %v1112_v38, %v1117_v30  ;;  %v1148_v39 = vshll.u32 %v12005_v29, 16  ;;  %v7941_v38 = vsel %vm7622_vm6, %v1135_v7, %v1140_v2 }
 0x1db   : > { %12000 = vst [vmem:[#allocation226_spill] sm:$0xff] %v7910_v61  ;;  %v7929_v32 = vsel %vm7622_vm6, %v1120_v31, %v1124_v17  ;;  %v7936_v30 = vsel %vm7622_vm6, %v1127_v59, %v1132_v49  ;;  %v7951_v31 = vsel %vm7622_vm6, %v1151_v3, %v1156_v15  ;;  %v12012_v49 = vrot.slane %v6957_v35, 3  ;;  %v12013_v3 = vld [vmem:[#allocation147_spill] sm:$0xff] }
 0x1dc   : > { %12001 = vst [vmem:[#allocation227_spill] sm:$0xff] %v7915_v57  ;;  %v7946_v17 = vsel %vm7622_vm6, %v1143_v56, %v1148_v39  ;;  %v1159_v2 = vshrl.u32 %v7380_v47, 16  ;;  %v1163_v56 = vshll.u32 %v7389_v10, 16  ;;  %v1166_v39 = vshrl.u32 %v7389_v10, 16  ;;  %v12020_v47 = vld [vmem:[#allocation152_spill] sm:$0xff] }
 0x1dd   : > { %12004 = vst [vmem:[#allocation228_spill] sm:$0xff] %v7921_v42  ;;  %v755_v7 = vsel %vm470_vm0, %v6957_v35, %v12012_v49  ;;  %v1171_v15 = vshll.u32 %v12013_v3, 16  ;;  %v12015_v49 = vld [vmem:[#allocation150_spill] sm:$0xff]  ;;  %v1205_v29 = vshrl.u32 %v12020_v47, 16 }
 0x1de   : > { %12007 = vst [vmem:[#allocation230_spill] sm:$0xff] %v7929_v32  ;;  %v757_v59 = vrot.slane %v755_v7, 1  ;;  %v12040_v47 = vld [vmem:[#allocation162_spill] sm:$0xff] }
 0x1df   : > { %12008 = vst [vmem:[#allocation231_spill] sm:$0xff] %v7936_v30 }
 0x1e0   : > { %12009 = vst [vmem:[#allocation232_spill] sm:$0xff] %v7941_v38  ;;  %v1202_v10 = vshll.u32 %v757_v59, 16  ;;  %v12029_v59 = vld [vmem:[#allocation155_spill] sm:$0xff] }
 0x1e1   : > { %v7925_v44 = vld [vmem:[#allocation1] sm:$0xff]  ;;  %12010 = vst [vmem:[#allocation233_spill] sm:$0xff] %v7946_v17 }
 0x1e2   : > { %12006 = vst [vmem:[#allocation229_spill] sm:$0xff] %v7925_v44  ;;  %v1174_v44 = vshrl.u32 %v12013_v3, 16 }
 0x1e3   : > { %1819 = vst [vmem:[#allocation1] ss:$9 sm:$0xff] %v7910_v61  ;;  %v7977_v61 = vsel %vm7622_vm6, %v1166_v39, %v1171_v15  ;;  %v1213_v39 = vshrl.u32 %v12021_v60, 16  ;;  %v1218_v15 = vshll.u32 %v7426_v36, 16 }
 0x1e4   : > { %1821 = vst [vmem:[#allocation1 + $0x1] ss:$9 sm:$0xff] %v7915_v57  ;;  %v12017_v57 = vld [vmem:[#allocation151_spill] sm:$0xff] }
 0x1e5   : > { %1823 = vst [vmem:[#allocation1 + $0x2] ss:$9 sm:$0xff] %v7921_v42  ;;  %v1187_v42 = vshll.u32 %v12015_v49, 16  ;;  %v1194_v7 = vshll.u32 %v12017_v57, 16  ;;  %v1197_v3 = vshrl.u32 %v12017_v57, 16 }
 0x1e6   : > { %1825 = vst [vmem:[#allocation1 + $0x3] ss:$9 sm:$0xff] %v7929_v32 }
 0x1e7   : > { %12011 = vst [vmem:[#allocation234_spill] sm:$0xff] %v7951_v31 }
 0x1e8   : > { %1827 = vst [vmem:[#allocation1 + $0x4] ss:$9 sm:$0xff] %v7936_v30 }
 0x1e9   : > { %1829 = vst [vmem:[#allocation1 + $0x5] ss:$9 sm:$0xff] %v7941_v38  ;;  %v12014_v38 = vld [vmem:[#allocation148_spill] sm:$0xff] }
 0x1ea   : > { %1831 = vst [vmem:[#allocation1 + $0x6] ss:$9 sm:$0xff] %v7946_v17  ;;  %v1179_v30 = vshll.u32 %v12014_v38, 16  ;;  %v1182_v32 = vshrl.u32 %v12014_v38, 16  ;;  %v1190_v17 = vshrl.u32 %v12015_v49, 16 }
 0x1eb   : > { %1833 = vst [vmem:[#allocation1 + $0x7] ss:$9 sm:$0xff] %v7951_v31  ;;  %v7971_v31 = vsel %vm7622_vm6, %v1159_v2, %v1163_v56  ;;  %v1210_v2 = vshll.u32 %v12021_v60, 16 }
 0x1ec   : > { %12016 = vst [vmem:[#allocation235_spill] sm:$0xff] %v7971_v31  ;;  %v7982_v38 = vsel %vm7622_vm6, %v1174_v44, %v1179_v30  ;;  %v7990_v49 = vsel %vm7622_vm6, %v1182_v32, %v1187_v42  ;;  %v7997_v44 = vsel %vm7622_vm6, %v1190_v17, %v1194_v7  ;;  %v8002_v30 = vsel %vm7622_vm6, %v1197_v3, %v1202_v10 }
 0x1ed   : > { %12018 = vst [vmem:[#allocation236_spill] sm:$0xff] %v7977_v61  ;;  %v8007_v42 = vsel %vm7622_vm6, %v1205_v29, %v1210_v2  ;;  %v8012_v32 = vsel %vm7622_vm6, %v1213_v39, %v1218_v15  ;;  %v12028_v10 = vrot.slane %v6988_v58, 3  ;;  %v1221_v29 = vshrl.u32 %v7426_v36, 16  ;;  %v12030_v2 = vld [vmem:[#allocation156_spill] sm:$0xff] }
 0x1ee   : > { %12019 = vst [vmem:[#allocation237_spill] sm:$0xff] %v7982_v38  ;;  %v1226_v3 = vshll.u32 %v12029_v59, 16  ;;  %v1229_v7 = vshrl.u32 %v12029_v59, 16  ;;  %v1233_v39 = vshll.u32 %v12030_v2, 16 }
 0x1ef   : > { %12023 = vst [vmem:[#allocation239_spill] sm:$0xff] %v7990_v49  ;;  %v758_v17 = vsel %vm470_vm0, %v6988_v58, %v12028_v10 }
 0x1f0   : > { %12024 = vst [vmem:[#allocation240_spill] sm:$0xff] %v7997_v44  ;;  %v760_v15 = vrot.slane %v758_v17, 1  ;;  %v8032_v10 = vsel %vm7622_vm6, %v1221_v29, %v1226_v3  ;;  %v8038_v59 = vsel %vm7622_vm6, %v1229_v7, %v1233_v39  ;;  %v1275_v7 = vshrl.u32 %v12040_v47, 16 }
 0x1f1   : > { %12025 = vst [vmem:[#allocation241_spill] sm:$0xff] %v8002_v30  ;;  %v1280_v39 = vshll.u32 %v7475_v54, 16 }
 0x1f2   : > { %v7986_v56 = vld [vmem:[#allocation1] sm:$0xff]  ;;  %12026 = vst [vmem:[#allocation242_spill] sm:$0xff] %v8007_v42  ;;  %v1272_v29 = vshll.u32 %v760_v15, 16  ;;  %v12046_v15 = vld [vmem:[#allocation165_spill] sm:$0xff] }
 0x1f3   : > { %12022 = vst [vmem:[#allocation238_spill] sm:$0xff] %v7986_v56  ;;  %v1236_v56 = vshrl.u32 %v12030_v2, 16  ;;  %v12036_v2 = vld [vmem:[#allocation161_spill] sm:$0xff] }
 0x1f4   : > { %1837 = vst [vmem:[#allocation1] ss:$9 sm:$0xff] %v7971_v31  ;;  %v1264_v36 = vshll.u32 %v12036_v2, 16  ;;  %v1267_v60 = vshrl.u32 %v12036_v2, 16 }
 0x1f5   : > { %1839 = vst [vmem:[#allocation1 + $0x1] ss:$9 sm:$0xff] %v7977_v61  ;;  %v12034_v61 = vld [vmem:[#allocation160_spill] sm:$0xff] }
 0x1f6   : > { %1841 = vst [vmem:[#allocation1 + $0x2] ss:$9 sm:$0xff] %v7982_v38  ;;  %v1257_v31 = vshll.u32 %v12034_v61, 16  ;;  %v1260_v17 = vshrl.u32 %v12034_v61, 16 }
 0x1f7   : > { %1843 = vst [vmem:[#allocation1 + $0x3] ss:$9 sm:$0xff] %v7990_v49  ;;  %v12032_v49 = vld [vmem:[#allocation159_spill] sm:$0xff] }
 0x1f8   : > { %12027 = vst [vmem:[#allocation243_spill] sm:$0xff] %v8012_v32  ;;  %v1249_v38 = vshll.u32 %v12032_v49, 16 }
 0x1f9   : > { %1845 = vst [vmem:[#allocation1 + $0x4] ss:$9 sm:$0xff] %v7997_v44 }
 0x1fa   : > { %1847 = vst [vmem:[#allocation1 + $0x5] ss:$9 sm:$0xff] %v8002_v30  ;;  %v12031_v30 = vld [vmem:[#allocation157_spill] sm:$0xff] }
 0x1fb   : > { %1849 = vst [vmem:[#allocation1 + $0x6] ss:$9 sm:$0xff] %v8007_v42  ;;  %v1241_v42 = vshll.u32 %v12031_v30, 16  ;;  %v1244_v44 = vshrl.u32 %v12031_v30, 16 }
 0x1fc   : > { %1851 = vst [vmem:[#allocation1 + $0x7] ss:$9 sm:$0xff] %v8012_v32  ;;  %v1252_v32 = vshrl.u32 %v12032_v49, 16 }
 0x1fd   : > { %12033 = vst [vmem:[#allocation244_spill] sm:$0xff] %v8032_v10  ;;  %v8044_v30 = vsel %vm7622_vm6, %v1236_v56, %v1241_v42  ;;  %v8051_v49 = vsel %vm7622_vm6, %v1244_v44, %v1249_v38  ;;  %v8063_v56 = vsel %vm7622_vm6, %v1260_v17, %v1264_v36  ;;  %v8068_v38 = vsel %vm7622_vm6, %v1267_v60, %v1272_v29 }
 0x1fe   : > { %12035 = vst [vmem:[#allocation245_spill] sm:$0xff] %v8038_v59  ;;  %v8058_v61 = vsel %vm7622_vm6, %v1252_v32, %v1257_v31  ;;  %v8073_v44 = vsel %vm7622_vm6, %v1275_v7, %v1280_v39  ;;  %v12045_v36 = vrot.slane %v7018_v53, 3  ;;  %v1283_v31 = vshrl.u32 %v7475_v54, 16  ;;  %v12047_v7 = vld [vmem:[#allocation167_spill] sm:$0xff] }
 0x1ff   : > { %12037 = vst [vmem:[#allocation246_spill] sm:$0xff] %v8044_v30  ;;  %v1288_v42 = vshll.u32 %v7477_v20, 16  ;;  %v1291_v32 = vshrl.u32 %v7477_v20, 16  ;;  %v1296_v17 = vshll.u32 %v12046_v15, 16  ;;  %v1299_v29 = vshrl.u32 %v12046_v15, 16  ;;  %v12052_v15 = vld [vmem:[#allocation170_spill] sm:$0xff] }
 0x200   : > { %12039 = vst [vmem:[#allocation248_spill] sm:$0xff] %v8051_v49  ;;  %v761_v60 = vsel %vm470_vm0, %v7018_v53, %v12045_v36  ;;  %v1303_v39 = vshll.u32 %v12047_v7, 16  ;;  %v1330_v20 = vshrl.u32 %v12052_v15, 16 }
 0x201   : > { %12041 = vst [vmem:[#allocation249_spill] sm:$0xff] %v8058_v61  ;;  %v8093_v36 = vsel %vm7622_vm6, %v1283_v31, %v1288_v42  ;;  %v12054_v31 = vld [vmem:[#allocation171_spill] sm:$0xff] }
 0x202   : > { %12042 = vst [vmem:[#allocation250_spill] sm:$0xff] %v8063_v56  ;;  %v1334_v42 = vshll.u32 %v12054_v31, 16 }
 0x203   : > { %v8047_v3 = vld [vmem:[#allocation1] sm:$0xff]  ;;  %12043 = vst [vmem:[#allocation251_spill] sm:$0xff] %v8068_v38 }
 0x204   : > { %12038 = vst [vmem:[#allocation247_spill] sm:$0xff] %v8047_v3  ;;  %v763_v3 = vrot.slane %v761_v60, 1  ;;  %v1327_v60 = vshll.u32 %v12052_v15, 16 }
 0x205   : > { %1855 = vst [vmem:[#allocation1] ss:$9 sm:$0xff] %v8032_v10 }
 0x206   : > { %1857 = vst [vmem:[#allocation1 + $0x1] ss:$9 sm:$0xff] %v8038_v59  ;;  %v8099_v59 = vsel %vm7622_vm6, %v1291_v32, %v1296_v17  ;;  %v1337_v32 = vshrl.u32 %v12054_v31, 16  ;;  %v1342_v17 = vshll.u32 %v763_v3, 16 }
 0x207   : > { %1859 = vst [vmem:[#allocation1 + $0x2] ss:$9 sm:$0xff] %v8044_v30 }
 0x208   : > { %1861 = vst [vmem:[#allocation1 + $0x3] ss:$9 sm:$0xff] %v8051_v49  ;;  %v12050_v49 = vld [vmem:[#allocation169_spill] sm:$0xff]  ;;  %v8134_v3 = vsel %vm7622_vm6, %v1337_v32, %v1342_v17 }
 0x209   : > { %12044 = vst [vmem:[#allocation252_spill] sm:$0xff] %v8073_v44  ;;  %v1319_v30 = vshll.u32 %v12050_v49, 16  ;;  %v1322_v10 = vshrl.u32 %v12050_v49, 16  ;;  %v12062_v32 = vld [vmem:[#allocation177_spill] sm:$0xff] }
 0x20a   : > { %1863 = vst [vmem:[#allocation1 + $0x4] ss:$9 sm:$0xff] %v8058_v61  ;;  %v1373_v17 = vshll.u32 %v12062_v32, 16 }
 0x20b   : > { %1865 = vst [vmem:[#allocation1 + $0x5] ss:$9 sm:$0xff] %v8063_v56 }
 0x20c   : > { %1867 = vst [vmem:[#allocation1 + $0x6] ss:$9 sm:$0xff] %v8068_v38  ;;  %v12048_v38 = vld [vmem:[#allocation168_spill] sm:$0xff] }
 0x20d   : > { %1869 = vst [vmem:[#allocation1 + $0x7] ss:$9 sm:$0xff] %v8073_v44  ;;  %v1306_v44 = vshrl.u32 %v12047_v7, 16  ;;  %v1311_v56 = vshll.u32 %v12048_v38, 16  ;;  %v1314_v61 = vshrl.u32 %v12048_v38, 16  ;;  %v8105_v7 = vsel %vm7622_vm6, %v1299_v29, %v1303_v39  ;;  %v12061_v39 = vld [vmem:[#allocation175_spill] sm:$0xff] }
 0x20e   : > { %12049 = vst [vmem:[#allocation253_spill] sm:$0xff] %v8093_v36  ;;  %v8124_v29 = vsel %vm7622_vm6, %v1322_v10, %v1327_v60  ;;  %v1358_v10 = vshll.u32 %v7528_v23, 16  ;;  %v1366_v60 = vshll.u32 %v12061_v39, 16 }
 0x20f   : > { %12051 = vst [vmem:[#allocation254_spill] sm:$0xff] %v8099_v59  ;;  %v8113_v38 = vsel %vm7622_vm6, %v1306_v44, %v1311_v56  ;;  %v8119_v49 = vsel %vm7622_vm6, %v1314_v61, %v1319_v30  ;;  %v8129_v56 = vsel %vm7622_vm6, %v1330_v20, %v1334_v42  ;;  %v1345_v61 = vshrl.u32 %v7524_v51, 16 }
 0x210   : > { %12053 = vst [vmem:[#allocation255_spill] sm:$0xff] %v8105_v7  ;;  %v1350_v30 = vshll.u32 %v7526_v55, 16  ;;  %v1353_v20 = vshrl.u32 %v7526_v55, 16  ;;  %v1361_v44 = vshrl.u32 %v7528_v23, 16  ;;  %v1369_v42 = vshrl.u32 %v12061_v39, 16 }
 0x211   : > { %12056 = vst [vmem:[#allocation257_spill] sm:$0xff] %v8113_v38 }
 0x212   : > { %12057 = vst [vmem:[#allocation258_spill] sm:$0xff] %v8119_v49 }
 0x213   : > { %12058 = vst [vmem:[#allocation259_spill] sm:$0xff] %v8124_v29 }
 0x214   : > { %v8109_v54 = vld [vmem:[#allocation1] sm:$0xff]  ;;  %12059 = vst [vmem:[#allocation260_spill] sm:$0xff] %v8129_v56 }
 0x215   : > { %12055 = vst [vmem:[#allocation256_spill] sm:$0xff] %v8109_v54  ;;  %v8150_v54 = vsel %vm7622_vm6, %v1345_v61, %v1350_v30  ;;  %v12068_v61 = vld [vmem:[#allocation180_spill] sm:$0xff] }
 0x216   : > { %1873 = vst [vmem:[#allocation1] ss:$9 sm:$0xff] %v8093_v36  ;;  %v8162_v36 = vsel %vm7622_vm6, %v1361_v44, %v1366_v60  ;;  %v1397_v30 = vshll.u32 %v12068_v61, 16 }
 0x217   : > { %1875 = vst [vmem:[#allocation1 + $0x1] ss:$9 sm:$0xff] %v8099_v59 }
 0x218   : > { %1877 = vst [vmem:[#allocation1 + $0x2] ss:$9 sm:$0xff] %v8105_v7  ;;  %v12066_v7 = vld [vmem:[#allocation179_spill] sm:$0xff] }
 0x219   : > { %1879 = vst [vmem:[#allocation1 + $0x3] ss:$9 sm:$0xff] %v8113_v38  ;;  %v1389_v59 = vshll.u32 %v12066_v7, 16  ;;  %v1392_v39 = vshrl.u32 %v12066_v7, 16 }
 0x21a   : > { %12060 = vst [vmem:[#allocation261_spill] sm:$0xff] %v8134_v3 }
 0x21b   : > { %1881 = vst [vmem:[#allocation1 + $0x4] ss:$9 sm:$0xff] %v8119_v49  ;;  %v8156_v49 = vsel %vm7622_vm6, %v1353_v20, %v1358_v10  ;;  %v1400_v20 = vshrl.u32 %v12068_v61, 16  ;;  %v1404_v10 = vshll.u32 %v7569_v46, 16 }
 0x21c   : > { %1883 = vst [vmem:[#allocation1 + $0x5] ss:$9 sm:$0xff] %v8124_v29 }
 0x21d   : > { %1885 = vst [vmem:[#allocation1 + $0x6] ss:$9 sm:$0xff] %v8129_v56  ;;  %v12064_v56 = vld [vmem:[#allocation178_spill] sm:$0xff] }
 0x21e   : > { %1887 = vst [vmem:[#allocation1 + $0x7] ss:$9 sm:$0xff] %v8134_v3  ;;  %v1376_v3 = vshrl.u32 %v12062_v32, 16  ;;  %v1381_v29 = vshll.u32 %v12064_v56, 16  ;;  %v1384_v38 = vshrl.u32 %v12064_v56, 16  ;;  %v8170_v32 = vsel %vm7622_vm6, %v1369_v42, %v1373_v17  ;;  %v12071_v56 = vld [vmem:[#allocation100_spill] sm:$0xff] }
 0x21f   : > { %12063 = vst [vmem:[#allocation262_spill] sm:$0xff] %v8150_v54  ;;  %v12072_v55 = vrot.slane %v12071_v56, 3  ;;  %v8191_v17 = vsel %vm7622_vm6, %v1392_v39, %v1397_v30  ;;  %v12078_v39 = vld [vmem:[#allocation183_spill] sm:$0xff] }
 0x220   : > { %12065 = vst [vmem:[#allocation263_spill] sm:$0xff] %v8156_v49  ;;  %v8181_v60 = vsel %vm7622_vm6, %v1376_v3, %v1381_v29  ;;  %v8186_v42 = vsel %vm7622_vm6, %v1384_v38, %v1389_v59  ;;  %v1407_v59 = vshrl.u32 %v7569_v46, 16  ;;  %v12077_v29 = vld [vmem:[#allocation182_spill] sm:$0xff]  ;;  %v1420_v30 = vshll.u32 %v12078_v39, 16 }
 0x221   : > { %12067 = vst [vmem:[#allocation264_spill] sm:$0xff] %v8162_v36  ;;  %v764_v44 = vsel %vm470_vm0, %v12071_v56, %v12072_v55  ;;  %v8196_v55 = vsel %vm7622_vm6, %v1400_v20, %v1404_v10  ;;  %v1415_v3 = vshrl.u32 %v12077_v29, 16 }
 0x222   : > { %12070 = vst [vmem:[#allocation266_spill] sm:$0xff] %v8170_v32 }
 0x223   : > { %12073 = vst [vmem:[#allocation267_spill] sm:$0xff] %v8181_v60 }
 0x224   : > { %12074 = vst [vmem:[#allocation268_spill] sm:$0xff] %v8186_v42 }
 0x225   : > { %v8166_v23 = vld [vmem:[#allocation1] sm:$0xff]  ;;  %12075 = vst [vmem:[#allocation269_spill] sm:$0xff] %v8191_v17 }
 0x226   : > { %12069 = vst [vmem:[#allocation265_spill] sm:$0xff] %v8166_v23  ;;  %v766_v23 = vrot.slane %v764_v44, 1  ;;  %v1423_v44 = vshrl.u32 %v12078_v39, 16  ;;  %v12084_v39 = vld [vmem:[#allocation188_spill] sm:$0xff] }
 0x227   : > { %1891 = vst [vmem:[#allocation1] ss:$9 sm:$0xff] %v8150_v54  ;;  %v1451_v29 = vshll.u32 %v12084_v39, 16  ;;  %v1454_v46 = vshrl.u32 %v12084_v39, 16 }
 0x228   : > { %1893 = vst [vmem:[#allocation1 + $0x1] ss:$9 sm:$0xff] %v8156_v49  ;;  %v1412_v38 = vshll.u32 %v766_v23, 16  ;;  %v8217_v49 = vsel %vm7622_vm6, %v1415_v3, %v1420_v30  ;;  %v12089_v30 = vld [vmem:[#allocation190_spill] sm:$0xff] }
 0x229   : > { %1895 = vst [vmem:[#allocation1 + $0x2] ss:$9 sm:$0xff] %v8162_v36 }
 0x22a   : > { %1897 = vst [vmem:[#allocation1 + $0x3] ss:$9 sm:$0xff] %v8170_v32  ;;  %v12079_v32 = vld [vmem:[#allocation184_spill] sm:$0xff] }
 0x22b   : > { %12076 = vst [vmem:[#allocation270_spill] sm:$0xff] %v8196_v55  ;;  %v1428_v20 = vshll.u32 %v12079_v32, 16  ;;  %v1431_v10 = vshrl.u32 %v12079_v32, 16 }
 0x22c   : > { %1899 = vst [vmem:[#allocation1 + $0x4] ss:$9 sm:$0xff] %v8181_v60  ;;  %v12080_v60 = vld [vmem:[#allocation186_spill] sm:$0xff] }
 0x22d   : > { %1901 = vst [vmem:[#allocation1 + $0x5] ss:$9 sm:$0xff] %v8186_v42  ;;  %v1436_v36 = vshll.u32 %v12080_v60, 16  ;;  %v12082_v42 = vld [vmem:[#allocation187_spill] sm:$0xff]  ;;  %v8223_v32 = vsel %vm7622_vm6, %v1423_v44, %v1428_v20  ;;  %v12091_v20 = vld [vmem:[#allocation112_spill] sm:$0xff] }
 0x22e   : > { %1903 = vst [vmem:[#allocation1 + $0x6] ss:$9 sm:$0xff] %v8191_v17  ;;  %v8211_v17 = vsel %vm7622_vm6, %v1407_v59, %v1412_v38  ;;  %v1443_v23 = vshll.u32 %v12082_v42, 16  ;;  %v1446_v54 = vshrl.u32 %v12082_v42, 16  ;;  %v12086_v59 = vld [vmem:[#allocation189_spill] sm:$0xff]  ;;  %v1467_v42 = vshll.u32 %v12089_v30, 16 }
 0x22f   : > { %1905 = vst [vmem:[#allocation1 + $0x7] ss:$9 sm:$0xff] %v8196_v55  ;;  %v1439_v55 = vshrl.u32 %v12080_v60, 16  ;;  %v1459_v38 = vshll.u32 %v12086_v59, 16  ;;  %v8231_v60 = vsel %vm7622_vm6, %v1431_v10, %v1436_v36  ;;  %v1462_v3 = vshrl.u32 %v12086_v59, 16 }
 0x230   : > { %12081 = vst [vmem:[#allocation271_spill] sm:$0xff] %v8211_v17  ;;  %v12092_v39 = vrot.slane %v12091_v20, 3  ;;  %v8247_v36 = vsel %vm7622_vm6, %v1446_v54, %v1451_v29  ;;  %v1470_v54 = vshrl.u32 %v12089_v30, 16  ;;  %v12096_v29 = vld [vmem:[#allocation191_spill] sm:$0xff] }
 0x231   : > { %12083 = vst [vmem:[#allocation272_spill] sm:$0xff] %v8217_v49  ;;  %v8238_v44 = vsel %vm7622_vm6, %v1439_v55, %v1443_v23  ;;  %v8252_v10 = vsel %vm7622_vm6, %v1454_v46, %v1459_v38  ;;  %v8257_v55 = vsel %vm7622_vm6, %v1462_v3, %v1467_v42  ;;  %v1474_v46 = vshll.u32 %v12096_v29, 16 }
 0x232   : > { %12085 = vst [vmem:[#allocation273_spill] sm:$0xff] %v8223_v32 }
 0x233   : > { %12088 = vst [vmem:[#allocation275_spill] sm:$0xff] %v8231_v60  ;;  %v8268_v42 = vsel %vm7622_vm6, %v1470_v54, %v1474_v46  ;;  %v12104_v54 = vld [vmem:[#allocation9_spill] sm:$0xff]  ;;  %v12105_v46 = vld [vmem:[#allocation10_spill] sm:$0xff] }
 0x234   : > { %12090 = vst [vmem:[#allocation276_spill] sm:$0xff] %v8238_v44 }
 0x235   : > { %12093 = vst [vmem:[#allocation277_spill] sm:$0xff] %v8247_v36 }
 0x236   : > { %v8227_v61 = vld [vmem:[#allocation1] sm:$0xff]  ;;  %12094 = vst [vmem:[#allocation278_spill] sm:$0xff] %v8252_v10 }
 0x237   : > { %12087 = vst [vmem:[#allocation274_spill] sm:$0xff] %v8227_v61  ;;  %v767_v61 = vsel %vm470_vm0, %v12091_v20, %v12092_v39  ;;  %v1477_v39 = vshrl.u32 %v12096_v29, 16 }
 0x238   : > { %1909 = vst [vmem:[#allocation1] ss:$9 sm:$0xff] %v8211_v17  ;;  %v769_v23 = vrot.slane %v767_v61, 1 }
 0x239   : > { %1911 = vst [vmem:[#allocation1 + $0x1] ss:$9 sm:$0xff] %v8217_v49 }
 0x23a   : > { %1913 = vst [vmem:[#allocation1 + $0x2] ss:$9 sm:$0xff] %v8223_v32  ;;  %v1482_v38 = vshll.u32 %v769_v23, 16  ;;  %v12103_v23 = vld [vmem:[#allocation8_spill] sm:$0xff] }
 0x23b   : > { %1915 = vst [vmem:[#allocation1 + $0x3] ss:$9 sm:$0xff] %v8231_v60 }
 0x23c   : > { %12095 = vst [vmem:[#allocation279_spill] sm:$0xff] %v8257_v55  ;;  %v8272_v61 = vsel %vm7622_vm6, %v1477_v39, %v1482_v38  ;;  %v12106_v39 = vld [vmem:[#allocation11_spill] sm:$0xff]  ;;  %v12107_v38 = vld [vmem:[#allocation12_spill] sm:$0xff] }
 0x23d   : > { %1917 = vst [vmem:[#allocation1 + $0x4] ss:$9 sm:$0xff] %v8238_v44 }
 0x23e   : > { %1919 = vst [vmem:[#allocation1 + $0x5] ss:$9 sm:$0xff] %v8247_v36  ;;  %v12102_v36 = vld [vmem:[#allocation6_spill] sm:$0xff] }
 0x23f   : > { %1921 = vst [vmem:[#allocation1 + $0x6] ss:$9 sm:$0xff] %v8252_v10  ;;  %v12101_v10 = vld [vmem:[#allocation5_spill] sm:$0xff] }
 0x240   : > { %1923 = vst [vmem:[#allocation1 + $0x7] ss:$9 sm:$0xff] %v8257_v55 }
 0x241   : > { %12097 = vst [vmem:[#allocation280_spill] sm:$0xff] %v8268_v42 }
 0x242   : > { %12098 = vst [vmem:[#allocation281_spill] sm:$0xff] %v8272_v61 }
 0x247   : > { %v8274_v3 = vld [vmem:[#allocation1] sm:$0xff] }
 0x248   : > { %12099 = vst [vmem:[#allocation282_spill] sm:$0xff] %v8274_v3  ;;  %v12108_v3 = vld [vmem:[#allocation14_spill] sm:$0xff] }
 0x249   : > { %1927 = vst [vmem:[#allocation1] ss:$9 sm:$0xff] %v8268_v42 }
 0x24a   : > { %1929 = vst [vmem:[#allocation1 + $0x1] ss:$9 sm:$0xff] %v8272_v61  ;;  %v12110_v61 = vld [vmem:[#allocation15_spill] sm:$0xff] }
 0x251   : > { %v8278_v55 = vld [vmem:[#allocation1] sm:$0xff] }
 0x252   : > { %12100 = vst [vmem:[#allocation283_spill] sm:$0xff] %v8278_v55  ;;  %v12111_v55 = vld [vmem:[#allocation17_spill] sm:$0xff] }
 0x253   : > { %1956 = vst [vmem:[#allocation1] ss:$9 sm:$0xff] %v12101_v10  ;;  %v12112_v10 = vld [vmem:[#allocation18_spill] sm:$0xff] }
 0x254   : > { %1958 = vst [vmem:[#allocation1 + $0x1] ss:$9 sm:$0xff] %v12102_v36  ;;  %v12113_v36 = vld [vmem:[#allocation19_spill] sm:$0xff] }
 0x255   : > { %1960 = vst [vmem:[#allocation1 + $0x2] ss:$9 sm:$0xff] %v12103_v23  ;;  %v12114_v23 = vld [vmem:[#allocation21_spill] sm:$0xff] }
 0x256   : > { %1962 = vst [vmem:[#allocation1 + $0x3] ss:$9 sm:$0xff] %v12104_v54  ;;  %v12115_v54 = vld [vmem:[#allocation22_spill] sm:$0xff] }
 0x257   : > { %1964 = vst [vmem:[#allocation1 + $0x4] ss:$9 sm:$0xff] %v12105_v46  ;;  %v12116_v46 = vld [vmem:[#allocation23_spill] sm:$0xff] }
 0x258   : > { %1966 = vst [vmem:[#allocation1 + $0x5] ss:$9 sm:$0xff] %v12106_v39  ;;  %v12117_v39 = vld [vmem:[#allocation24_spill] sm:$0xff] }
 0x259   : > { %1968 = vst [vmem:[#allocation1 + $0x6] ss:$9 sm:$0xff] %v12107_v38 }
 0x25a   : > { %1970 = vst [vmem:[#allocation1 + $0x7] ss:$9 sm:$0xff] %v12108_v3  ;;  %v12119_v3 = vld [vmem:[#allocation26_spill] sm:$0xff] }
 0x261   : > { %v8288_v41 = vld [vmem:[#allocation1] sm:$0xff] }
 0x262   : > { %12109 = vst [vmem:[#allocation5_spill] sm:$0xff] %v8288_v41  ;;  %v12120_v41 = vld [vmem:[#allocation27_spill] sm:$0xff] }
 0x263   : > { %1973 = vst [vmem:[#allocation1] ss:$9 sm:$0xff] %v12110_v61  ;;  %v12121_v61 = vld [vmem:[#allocation29_spill] sm:$0xff] }
 0x264   : > { %1974 = vst [vmem:[#allocation1 + $0x1] ss:$9 sm:$0xff] %v12111_v55  ;;  %v12122_v55 = vld [vmem:[#allocation30_spill] sm:$0xff] }
 0x265   : > { %1975 = vst [vmem:[#allocation1 + $0x2] ss:$9 sm:$0xff] %v12112_v10  ;;  %v12123_v10 = vld [vmem:[#allocation31_spill] sm:$0xff] }
 0x266   : > { %1976 = vst [vmem:[#allocation1 + $0x3] ss:$9 sm:$0xff] %v12113_v36  ;;  %v12124_v36 = vld [vmem:[#allocation33_spill] sm:$0xff] }
 0x267   : > { %1977 = vst [vmem:[#allocation1 + $0x4] ss:$9 sm:$0xff] %v12114_v23  ;;  %v12125_v23 = vld [vmem:[#allocation34_spill] sm:$0xff] }
 0x268   : > { %1978 = vst [vmem:[#allocation1 + $0x5] ss:$9 sm:$0xff] %v12115_v54  ;;  %v12126_v54 = vld [vmem:[#allocation35_spill] sm:$0xff] }
 0x269   : > { %1979 = vst [vmem:[#allocation1 + $0x6] ss:$9 sm:$0xff] %v12116_v46 }
 0x26a   : > { %1980 = vst [vmem:[#allocation1 + $0x7] ss:$9 sm:$0xff] %v12117_v39  ;;  %v12128_v39 = vld [vmem:[#allocation36_spill] sm:$0xff] }
 0x271   : > { %v8298_v38 = vld [vmem:[#allocation1] sm:$0xff] }
 0x272   : > { %12118 = vst [vmem:[#allocation6_spill] sm:$0xff] %v8298_v38  ;;  %v12129_v38 = vld [vmem:[#allocation38_spill] sm:$0xff] }
 0x273   : > { %1983 = vst [vmem:[#allocation1] ss:$9 sm:$0xff] %v12119_v3  ;;  %v12130_v3 = vld [vmem:[#allocation39_spill] sm:$0xff] }
 0x274   : > { %1984 = vst [vmem:[#allocation1 + $0x1] ss:$9 sm:$0xff] %v12120_v41  ;;  %v12131_v41 = vld [vmem:[#allocation41_spill] sm:$0xff] }
 0x275   : > { %1985 = vst [vmem:[#allocation1 + $0x2] ss:$9 sm:$0xff] %v12121_v61  ;;  %v12132_v61 = vld [vmem:[#allocation42_spill] sm:$0xff] }
 0x276   : > { %1986 = vst [vmem:[#allocation1 + $0x3] ss:$9 sm:$0xff] %v12122_v55  ;;  %v12133_v55 = vld [vmem:[#allocation43_spill] sm:$0xff] }
 0x277   : > { %1987 = vst [vmem:[#allocation1 + $0x4] ss:$9 sm:$0xff] %v12123_v10  ;;  %v12134_v10 = vld [vmem:[#allocation45_spill] sm:$0xff] }
 0x278   : > { %1988 = vst [vmem:[#allocation1 + $0x5] ss:$9 sm:$0xff] %v12124_v36  ;;  %v12135_v36 = vld [vmem:[#allocation46_spill] sm:$0xff] }
 0x279   : > { %1989 = vst [vmem:[#allocation1 + $0x6] ss:$9 sm:$0xff] %v12125_v23 }
 0x27a   : > { %1990 = vst [vmem:[#allocation1 + $0x7] ss:$9 sm:$0xff] %v12126_v54  ;;  %v12137_v54 = vld [vmem:[#allocation48_spill] sm:$0xff] }
 0x281   : > { %v8308_v46 = vld [vmem:[#allocation1] sm:$0xff] }
 0x282   : > { %12127 = vst [vmem:[#allocation8_spill] sm:$0xff] %v8308_v46  ;;  %v12138_v46 = vld [vmem:[#allocation49_spill] sm:$0xff] }
 0x283   : > { %1993 = vst [vmem:[#allocation1] ss:$9 sm:$0xff] %v12128_v39  ;;  %v12139_v39 = vld [vmem:[#allocation50_spill] sm:$0xff] }
 0x284   : > { %1994 = vst [vmem:[#allocation1 + $0x1] ss:$9 sm:$0xff] %v12129_v38  ;;  %v12140_v38 = vld [vmem:[#allocation51_spill] sm:$0xff] }
 0x285   : > { %1995 = vst [vmem:[#allocation1 + $0x2] ss:$9 sm:$0xff] %v12130_v3  ;;  %v12141_v3 = vld [vmem:[#allocation53_spill] sm:$0xff] }
 0x286   : > { %1996 = vst [vmem:[#allocation1 + $0x3] ss:$9 sm:$0xff] %v12131_v41  ;;  %v12142_v41 = vld [vmem:[#allocation54_spill] sm:$0xff] }
 0x287   : > { %1997 = vst [vmem:[#allocation1 + $0x4] ss:$9 sm:$0xff] %v12132_v61  ;;  %v12143_v61 = vld [vmem:[#allocation55_spill] sm:$0xff] }
 0x288   : > { %1998 = vst [vmem:[#allocation1 + $0x5] ss:$9 sm:$0xff] %v12133_v55  ;;  %v12144_v55 = vld [vmem:[#allocation57_spill] sm:$0xff] }
 0x289   : > { %1999 = vst [vmem:[#allocation1 + $0x6] ss:$9 sm:$0xff] %v12134_v10 }
 0x28a   : > { %2000 = vst [vmem:[#allocation1 + $0x7] ss:$9 sm:$0xff] %v12135_v36  ;;  %v12146_v36 = vld [vmem:[#allocation58_spill] sm:$0xff] }
 0x291   : > { %v8318_v23 = vld [vmem:[#allocation1] sm:$0xff] }
 0x292   : > { %12136 = vst [vmem:[#allocation9_spill] sm:$0xff] %v8318_v23  ;;  %v12147_v23 = vld [vmem:[#allocation59_spill] sm:$0xff] }
 0x293   : > { %2003 = vst [vmem:[#allocation1] ss:$9 sm:$0xff] %v12137_v54  ;;  %v12148_v54 = vld [vmem:[#allocation60_spill] sm:$0xff] }
 0x294   : > { %2004 = vst [vmem:[#allocation1 + $0x1] ss:$9 sm:$0xff] %v12138_v46  ;;  %v12149_v46 = vld [vmem:[#allocation62_spill] sm:$0xff] }
 0x295   : > { %2005 = vst [vmem:[#allocation1 + $0x2] ss:$9 sm:$0xff] %v12139_v39  ;;  %v12150_v39 = vld [vmem:[#allocation63_spill] sm:$0xff] }
 0x296   : > { %2006 = vst [vmem:[#allocation1 + $0x3] ss:$9 sm:$0xff] %v12140_v38  ;;  %v12151_v38 = vld [vmem:[#allocation65_spill] sm:$0xff] }
 0x297   : > { %2007 = vst [vmem:[#allocation1 + $0x4] ss:$9 sm:$0xff] %v12141_v3  ;;  %v12152_v3 = vld [vmem:[#allocation66_spill] sm:$0xff] }
 0x298   : > { %2008 = vst [vmem:[#allocation1 + $0x5] ss:$9 sm:$0xff] %v12142_v41  ;;  %v12153_v41 = vld [vmem:[#allocation67_spill] sm:$0xff] }
 0x299   : > { %2009 = vst [vmem:[#allocation1 + $0x6] ss:$9 sm:$0xff] %v12143_v61 }
 0x29a   : > { %2010 = vst [vmem:[#allocation1 + $0x7] ss:$9 sm:$0xff] %v12144_v55  ;;  %v12155_v55 = vld [vmem:[#allocation69_spill] sm:$0xff] }
 0x2a1   : > { %v8328_v10 = vld [vmem:[#allocation1] sm:$0xff] }
 0x2a2   : > { %12145 = vst [vmem:[#allocation10_spill] sm:$0xff] %v8328_v10  ;;  %v12156_v10 = vld [vmem:[#allocation70_spill] sm:$0xff] }
 0x2a3   : > { %2013 = vst [vmem:[#allocation1] ss:$9 sm:$0xff] %v12146_v36  ;;  %v12157_v36 = vld [vmem:[#allocation71_spill] sm:$0xff] }
 0x2a4   : > { %2014 = vst [vmem:[#allocation1 + $0x1] ss:$9 sm:$0xff] %v12147_v23  ;;  %v12158_v23 = vld [vmem:[#allocation73_spill] sm:$0xff] }
 0x2a5   : > { %2015 = vst [vmem:[#allocation1 + $0x2] ss:$9 sm:$0xff] %v12148_v54  ;;  %v12159_v54 = vld [vmem:[#allocation74_spill] sm:$0xff] }
 0x2a6   : > { %2016 = vst [vmem:[#allocation1 + $0x3] ss:$9 sm:$0xff] %v12149_v46  ;;  %v12160_v46 = vld [vmem:[#allocation75_spill] sm:$0xff] }
 0x2a7   : > { %2017 = vst [vmem:[#allocation1 + $0x4] ss:$9 sm:$0xff] %v12150_v39  ;;  %v12161_v39 = vld [vmem:[#allocation77_spill] sm:$0xff] }
 0x2a8   : > { %2018 = vst [vmem:[#allocation1 + $0x5] ss:$9 sm:$0xff] %v12151_v38  ;;  %v12162_v38 = vld [vmem:[#allocation78_spill] sm:$0xff] }
 0x2a9   : > { %2019 = vst [vmem:[#allocation1 + $0x6] ss:$9 sm:$0xff] %v12152_v3 }
 0x2aa   : > { %2020 = vst [vmem:[#allocation1 + $0x7] ss:$9 sm:$0xff] %v12153_v41  ;;  %v12164_v41 = vld [vmem:[#allocation79_spill] sm:$0xff] }
 0x2b1   : > { %v8338_v61 = vld [vmem:[#allocation1] sm:$0xff] }
 0x2b2   : > { %12154 = vst [vmem:[#allocation11_spill] sm:$0xff] %v8338_v61  ;;  %v12165_v61 = vld [vmem:[#allocation81_spill] sm:$0xff] }
 0x2b3   : > { %2023 = vst [vmem:[#allocation1] ss:$9 sm:$0xff] %v12155_v55  ;;  %v12166_v55 = vld [vmem:[#allocation82_spill] sm:$0xff] }
 0x2b4   : > { %2024 = vst [vmem:[#allocation1 + $0x1] ss:$9 sm:$0xff] %v12156_v10  ;;  %v12167_v10 = vld [vmem:[#allocation83_spill] sm:$0xff] }
 0x2b5   : > { %2025 = vst [vmem:[#allocation1 + $0x2] ss:$9 sm:$0xff] %v12157_v36  ;;  %v12168_v36 = vld [vmem:[#allocation84_spill] sm:$0xff] }
 0x2b6   : > { %2026 = vst [vmem:[#allocation1 + $0x3] ss:$9 sm:$0xff] %v12158_v23  ;;  %v12169_v23 = vld [vmem:[#allocation86_spill] sm:$0xff] }
 0x2b7   : > { %2027 = vst [vmem:[#allocation1 + $0x4] ss:$9 sm:$0xff] %v12159_v54  ;;  %v12170_v54 = vld [vmem:[#allocation87_spill] sm:$0xff] }
 0x2b8   : > { %2028 = vst [vmem:[#allocation1 + $0x5] ss:$9 sm:$0xff] %v12160_v46  ;;  %v12171_v46 = vld [vmem:[#allocation89_spill] sm:$0xff] }
 0x2b9   : > { %2029 = vst [vmem:[#allocation1 + $0x6] ss:$9 sm:$0xff] %v12161_v39 }
 0x2ba   : > { %2030 = vst [vmem:[#allocation1 + $0x7] ss:$9 sm:$0xff] %v12162_v38  ;;  %v12173_v38 = vld [vmem:[#allocation90_spill] sm:$0xff] }
 0x2c1   : > { %v8348_v3 = vld [vmem:[#allocation1] sm:$0xff] }
 0x2c2   : > { %12163 = vst [vmem:[#allocation12_spill] sm:$0xff] %v8348_v3  ;;  %v12174_v3 = vld [vmem:[#allocation91_spill] sm:$0xff] }
 0x2c3   : > { %2033 = vst [vmem:[#allocation1] ss:$9 sm:$0xff] %v12164_v41  ;;  %v12175_v41 = vld [vmem:[#allocation93_spill] sm:$0xff] }
 0x2c4   : > { %2034 = vst [vmem:[#allocation1 + $0x1] ss:$9 sm:$0xff] %v12165_v61  ;;  %v12176_v61 = vld [vmem:[#allocation94_spill] sm:$0xff] }
 0x2c5   : > { %2035 = vst [vmem:[#allocation1 + $0x2] ss:$9 sm:$0xff] %v12166_v55  ;;  %v12177_v55 = vld [vmem:[#allocation95_spill] sm:$0xff] }
 0x2c6   : > { %2036 = vst [vmem:[#allocation1 + $0x3] ss:$9 sm:$0xff] %v12167_v10  ;;  %v12178_v10 = vld [vmem:[#allocation97_spill] sm:$0xff] }
 0x2c7   : > { %2037 = vst [vmem:[#allocation1 + $0x4] ss:$9 sm:$0xff] %v12168_v36  ;;  %v12179_v36 = vld [vmem:[#allocation98_spill] sm:$0xff] }
 0x2c8   : > { %2038 = vst [vmem:[#allocation1 + $0x5] ss:$9 sm:$0xff] %v12169_v23  ;;  %v12180_v23 = vld [vmem:[#allocation99_spill] sm:$0xff] }
 0x2c9   : > { %2039 = vst [vmem:[#allocation1 + $0x6] ss:$9 sm:$0xff] %v12170_v54 }
 0x2ca   : > { %2040 = vst [vmem:[#allocation1 + $0x7] ss:$9 sm:$0xff] %v12171_v46  ;;  %v12182_v46 = vld [vmem:[#allocation101_spill] sm:$0xff] }
 0x2d1   : > { %v8358_v39 = vld [vmem:[#allocation1] sm:$0xff] }
 0x2d2   : > { %12172 = vst [vmem:[#allocation14_spill] sm:$0xff] %v8358_v39  ;;  %v12183_v39 = vld [vmem:[#allocation102_spill] sm:$0xff] }
 0x2d3   : > { %2043 = vst [vmem:[#allocation1] ss:$9 sm:$0xff] %v12173_v38  ;;  %v12184_v38 = vld [vmem:[#allocation103_spill] sm:$0xff] }
 0x2d4   : > { %2044 = vst [vmem:[#allocation1 + $0x1] ss:$9 sm:$0xff] %v12174_v3  ;;  %v12185_v3 = vld [vmem:[#allocation105_spill] sm:$0xff] }
 0x2d5   : > { %2045 = vst [vmem:[#allocation1 + $0x2] ss:$9 sm:$0xff] %v12175_v41  ;;  %v12186_v41 = vld [vmem:[#allocation106_spill] sm:$0xff] }
 0x2d6   : > { %2046 = vst [vmem:[#allocation1 + $0x3] ss:$9 sm:$0xff] %v12176_v61  ;;  %v12187_v61 = vld [vmem:[#allocation107_spill] sm:$0xff] }
 0x2d7   : > { %2047 = vst [vmem:[#allocation1 + $0x4] ss:$9 sm:$0xff] %v12177_v55  ;;  %v12188_v55 = vld [vmem:[#allocation108_spill] sm:$0xff] }
 0x2d8   : > { %2048 = vst [vmem:[#allocation1 + $0x5] ss:$9 sm:$0xff] %v12178_v10  ;;  %v12189_v10 = vld [vmem:[#allocation110_spill] sm:$0xff] }
 0x2d9   : > { %2049 = vst [vmem:[#allocation1 + $0x6] ss:$9 sm:$0xff] %v12179_v36 }
 0x2da   : > { %2050 = vst [vmem:[#allocation1 + $0x7] ss:$9 sm:$0xff] %v12180_v23  ;;  %v12191_v23 = vld [vmem:[#allocation111_spill] sm:$0xff] }
 0x2e1   : > { %v8368_v54 = vld [vmem:[#allocation1] sm:$0xff] }
 0x2e2   : > { %12181 = vst [vmem:[#allocation15_spill] sm:$0xff] %v8368_v54  ;;  %v12192_v54 = vld [vmem:[#allocation113_spill] sm:$0xff] }
 0x2e3   : > { %2053 = vst [vmem:[#allocation1] ss:$9 sm:$0xff] %v12182_v46  ;;  %v12193_v46 = vld [vmem:[#allocation114_spill] sm:$0xff] }
 0x2e4   : > { %2054 = vst [vmem:[#allocation1 + $0x1] ss:$9 sm:$0xff] %v12183_v39  ;;  %v12194_v39 = vld [vmem:[#allocation115_spill] sm:$0xff] }
 0x2e5   : > { %2055 = vst [vmem:[#allocation1 + $0x2] ss:$9 sm:$0xff] %v12184_v38  ;;  %v12195_v38 = vld [vmem:[#allocation116_spill] sm:$0xff] }
 0x2e6   : > { %2056 = vst [vmem:[#allocation1 + $0x3] ss:$9 sm:$0xff] %v12185_v3  ;;  %v12196_v3 = vld [vmem:[#allocation117_spill] sm:$0xff] }
 0x2e7   : > { %2057 = vst [vmem:[#allocation1 + $0x4] ss:$9 sm:$0xff] %v12186_v41  ;;  %v12197_v41 = vld [vmem:[#allocation118_spill] sm:$0xff] }
 0x2e8   : > { %2058 = vst [vmem:[#allocation1 + $0x5] ss:$9 sm:$0xff] %v12187_v61  ;;  %v12198_v61 = vld [vmem:[#allocation119_spill] sm:$0xff] }
 0x2e9   : > { %2059 = vst [vmem:[#allocation1 + $0x6] ss:$9 sm:$0xff] %v12188_v55 }
 0x2ea   : > { %2060 = vst [vmem:[#allocation1 + $0x7] ss:$9 sm:$0xff] %v12189_v10  ;;  %v12200_v10 = vld [vmem:[#allocation120_spill] sm:$0xff] }
 0x2f1   : > { %v8378_v36 = vld [vmem:[#allocation1] sm:$0xff] }
 0x2f2   : > { %12190 = vst [vmem:[#allocation17_spill] sm:$0xff] %v8378_v36  ;;  %v12201_v36 = vld [vmem:[#allocation121_spill] sm:$0xff] }
 0x2f3   : > { %2063 = vst [vmem:[#allocation1] ss:$9 sm:$0xff] %v12191_v23  ;;  %v12202_v23 = vld [vmem:[#allocation13_spill] sm:$0xff] }
 0x2f4   : > { %2064 = vst [vmem:[#allocation1 + $0x1] ss:$9 sm:$0xff] %v12192_v54 }
 0x2f5   : > { %2065 = vst [vmem:[#allocation1 + $0x2] ss:$9 sm:$0xff] %v12193_v46  ;;  %v12204_v46 = vld [vmem:[#allocation7_spill] sm:$0xff] }
 0x2f6   : > { %2066 = vst [vmem:[#allocation1 + $0x3] ss:$9 sm:$0xff] %v12194_v39 }
 0x2f7   : > { %2067 = vst [vmem:[#allocation1 + $0x4] ss:$9 sm:$0xff] %v12195_v38 }
 0x2f8   : > { %2068 = vst [vmem:[#allocation1 + $0x5] ss:$9 sm:$0xff] %v12196_v3 }
 0x2f9   : > { %2069 = vst [vmem:[#allocation1 + $0x6] ss:$9 sm:$0xff] %v12197_v41 }
 0x2fa   : > { %2070 = vst [vmem:[#allocation1 + $0x7] ss:$9 sm:$0xff] %v12198_v61  ;;  %v12209_v61 = vld [vmem:[#allocation20_spill] sm:$0xff] }
 0x301   : > { %v8388_v55 = vld [vmem:[#allocation1] sm:$0xff] }
 0x302   : > { %12199 = vst [vmem:[#allocation18_spill] sm:$0xff] %v8388_v55 }
 0x303   : > { %2073 = vst [vmem:[#allocation1] ss:$9 sm:$0xff] %v12200_v10 }
 0x304   : > { %2074 = vst [vmem:[#allocation1 + $0x1] ss:$9 sm:$0xff] %v12201_v36 }
 0x305   : > { %2261 = vst [vmem:[#allocation1 + $0x20] sm:$0xff] %v12202_v23 }
 0x30b   : > { %v8393_v54 = vld [vmem:[#allocation1] sm:$0xff] }
 0x30c   : > { %12203 = vst [vmem:[#allocation19_spill] sm:$0xff] %v8393_v54  ;;  %v8396_v39 = vld [vmem:[#allocation1 + $0x20] ss:$4 sm:$0xff]  ;;  %v8398_v38 = vld [vmem:[#allocation1 + $0x21] ss:$4 sm:$0xff] }
 0x30d   : > { %2260 = vst [vmem:[#allocation1] sm:$0xff] %v12204_v46  ;;  %v8400_v3 = vld [vmem:[#allocation1 + $0x22] ss:$4 sm:$0xff]  ;;  %v8402_v41 = vld [vmem:[#allocation1 + $0x23] ss:$4 sm:$0xff] }
 0x30e   : > { %12205 = vst [vmem:[#allocation21_spill] sm:$0xff] %v8396_v39 }
 0x30f   : > { %12206 = vst [vmem:[#allocation22_spill] sm:$0xff] %v8398_v38 }
 0x310   : > { %12207 = vst [vmem:[#allocation23_spill] sm:$0xff] %v8400_v3 }
 0x311   : > { %12208 = vst [vmem:[#allocation24_spill] sm:$0xff] %v8402_v41 }
 0x312   : > { %2279 = vst [vmem:[#allocation1 + $0x20] sm:$0xff] %v12209_v61  ;;  %v12216_v61 = vld [vmem:[#allocation25_spill] sm:$0xff] }
 0x314   : > { %v8405_v55 = vld [vmem:[#allocation1 + $0x1] ss:$4 sm:$0xff]  ;;  %v8407_v10 = vld [vmem:[#allocation1 + $0x2] ss:$4 sm:$0xff]  ;;  %v8409_v36 = vld [vmem:[#allocation1 + $0x3] ss:$4 sm:$0xff] }
 0x315   : > { %12210 = vst [vmem:[#allocation26_spill] sm:$0xff] %v8409_v36  ;;  %v12219_v36 = vld [vmem:[#allocation37_spill] sm:$0xff] }
 0x316   : > { %2276 = vst [vmem:[#allocation1] sm:$0xff] %v6825_v14 }
 0x319   : > { %v8412_v54 = vld [vmem:[#allocation1 + $0x21] ss:$4 sm:$0xff]  ;;  %v8414_v23 = vld [vmem:[#allocation1 + $0x22] ss:$4 sm:$0xff]  ;;  %v8416_v46 = vld [vmem:[#allocation1 + $0x23] ss:$4 sm:$0xff] }
 0x31a   : > { %12211 = vst [vmem:[#allocation27_spill] sm:$0xff] %v8412_v54 }
 0x31b   : > { %12212 = vst [vmem:[#allocation29_spill] sm:$0xff] %v8414_v23 }
 0x31c   : > { %12213 = vst [vmem:[#allocation30_spill] sm:$0xff] %v8416_v46 }
 0x31d   : > { %2284 = vst [vmem:[#allocation1 + $0x20] sm:$0xff] %v6861_v26  ;;  %v8419_v3 = vld [vmem:[#allocation1] ss:$4 sm:$0xff]  ;;  %v8421_v41 = vld [vmem:[#allocation1 + $0x1] ss:$4 sm:$0xff] }
 0x31e   : > { %12214 = vst [vmem:[#allocation31_spill] sm:$0xff] %v8419_v3  ;;  %v12223_v26 = vld [vmem:[#allocation32_spill] sm:$0xff] }
 0x31f   : > { %12215 = vst [vmem:[#allocation33_spill] sm:$0xff] %v8421_v41 }
 0x320   : > { %2283 = vst [vmem:[#allocation1] sm:$0xff] %v12216_v61 }
 0x324   : > { %v8424_v38 = vld [vmem:[#allocation1 + $0x20] ss:$4 sm:$0xff]  ;;  %v8426_v39 = vld [vmem:[#allocation1 + $0x21] ss:$4 sm:$0xff] }
 0x325   : > { %12217 = vst [vmem:[#allocation34_spill] sm:$0xff] %v8424_v38 }
 0x326   : > { %12218 = vst [vmem:[#allocation35_spill] sm:$0xff] %v8426_v39  ;;  %v12228_v39 = vld [vmem:[#allocation44_spill] sm:$0xff] }
 0x327   : > { %2292 = vst [vmem:[#allocation1 + $0x20] sm:$0xff] %v12219_v36  ;;  %v8429_v14 = vld [vmem:[#allocation1] ss:$4 sm:$0xff]  ;;  %v8431_v54 = vld [vmem:[#allocation1 + $0x1] ss:$4 sm:$0xff] }
 0x328   : > { %12220 = vst [vmem:[#allocation36_spill] sm:$0xff] %v8429_v14  ;;  %v8433_v23 = vld [vmem:[#allocation1 + $0x2] ss:$4 sm:$0xff]  ;;  %v8435_v46 = vld [vmem:[#allocation1 + $0x3] ss:$4 sm:$0xff] }
 0x329   : > { %12221 = vst [vmem:[#allocation38_spill] sm:$0xff] %v8431_v54 }
 0x32a   : > { %12222 = vst [vmem:[#allocation39_spill] sm:$0xff] %v8435_v46 }
 0x32b   : > { %2291 = vst [vmem:[#allocation1] sm:$0xff] %v12223_v26 }
 0x32e   : > { %v8438_v3 = vld [vmem:[#allocation1 + $0x20] ss:$4 sm:$0xff]  ;;  %v8440_v41 = vld [vmem:[#allocation1 + $0x21] ss:$4 sm:$0xff]  ;;  %v8442_v61 = vld [vmem:[#allocation1 + $0x22] ss:$4 sm:$0xff] }
 0x32f   : > { %12224 = vst [vmem:[#allocation41_spill] sm:$0xff] %v8438_v3  ;;  %v8444_v38 = vld [vmem:[#allocation1 + $0x23] ss:$4 sm:$0xff] }
 0x330   : > { %12225 = vst [vmem:[#allocation42_spill] sm:$0xff] %v8440_v41 }
 0x331   : > { %12226 = vst [vmem:[#allocation43_spill] sm:$0xff] %v8442_v61 }
 0x332   : > { %12227 = vst [vmem:[#allocation45_spill] sm:$0xff] %v8444_v38  ;;  %v8447_v36 = vld [vmem:[#allocation1 + $0x1] ss:$4 sm:$0xff]  ;;  %v8449_v14 = vld [vmem:[#allocation1 + $0x2] ss:$4 sm:$0xff] }
 0x333   : > { %2303 = vst [vmem:[#allocation1 + $0x20] sm:$0xff] %v12228_v39  ;;  %v8451_v54 = vld [vmem:[#allocation1 + $0x3] ss:$4 sm:$0xff] }
 0x334   : > { %12229 = vst [vmem:[#allocation46_spill] sm:$0xff] %v8449_v14  ;;  %v12236_v39 = vld [vmem:[#allocation47_spill] sm:$0xff] }
 0x335   : > { %12230 = vst [vmem:[#allocation48_spill] sm:$0xff] %v8451_v54  ;;  %v12239_v54 = vld [vmem:[#allocation61_spill] sm:$0xff] }
 0x336   : > { %2300 = vst [vmem:[#allocation1] sm:$0xff] %v6897_v40 }
 0x33a   : > { %v8454_v46 = vld [vmem:[#allocation1 + $0x21] ss:$4 sm:$0xff]  ;;  %v8456_v26 = vld [vmem:[#allocation1 + $0x22] ss:$4 sm:$0xff]  ;;  %v8458_v3 = vld [vmem:[#allocation1 + $0x23] ss:$4 sm:$0xff] }
 0x33b   : > { %12231 = vst [vmem:[#allocation49_spill] sm:$0xff] %v8454_v46 }
 0x33c   : > { %12232 = vst [vmem:[#allocation50_spill] sm:$0xff] %v8456_v26 }
 0x33d   : > { %12233 = vst [vmem:[#allocation51_spill] sm:$0xff] %v8458_v3  ;;  %v8461_v61 = vld [vmem:[#allocation1] ss:$4 sm:$0xff]  ;;  %v8463_v38 = vld [vmem:[#allocation1 + $0x1] ss:$4 sm:$0xff] }
 0x33e   : > { %2308 = vst [vmem:[#allocation1 + $0x20] sm:$0xff] %v6928_v52  ;;  %v12243_v52 = vld [vmem:[#allocation56_spill] sm:$0xff] }
 0x33f   : > { %12234 = vst [vmem:[#allocation53_spill] sm:$0xff] %v8461_v61 }
 0x340   : > { %12235 = vst [vmem:[#allocation54_spill] sm:$0xff] %v8463_v38 }
 0x341   : > { %2307 = vst [vmem:[#allocation1] sm:$0xff] %v12236_v39 }
 0x345   : > { %v8466_v41 = vld [vmem:[#allocation1 + $0x20] ss:$4 sm:$0xff]  ;;  %v8468_v14 = vld [vmem:[#allocation1 + $0x21] ss:$4 sm:$0xff] }
 0x346   : > { %12237 = vst [vmem:[#allocation55_spill] sm:$0xff] %v8466_v41 }
 0x347   : > { %12238 = vst [vmem:[#allocation57_spill] sm:$0xff] %v8468_v14  ;;  %v12248_v14 = vld [vmem:[#allocation68_spill] sm:$0xff] }
 0x348   : > { %2316 = vst [vmem:[#allocation1 + $0x20] sm:$0xff] %v12239_v54  ;;  %v8471_v40 = vld [vmem:[#allocation1] ss:$4 sm:$0xff]  ;;  %v8473_v46 = vld [vmem:[#allocation1 + $0x1] ss:$4 sm:$0xff] }
 0x349   : > { %12240 = vst [vmem:[#allocation58_spill] sm:$0xff] %v8471_v40  ;;  %v8475_v26 = vld [vmem:[#allocation1 + $0x2] ss:$4 sm:$0xff]  ;;  %v8477_v3 = vld [vmem:[#allocation1 + $0x3] ss:$4 sm:$0xff] }
 0x34a   : > { %12241 = vst [vmem:[#allocation59_spill] sm:$0xff] %v8473_v46 }
 0x34b   : > { %12242 = vst [vmem:[#allocation60_spill] sm:$0xff] %v8477_v3 }
 0x34c   : > { %2315 = vst [vmem:[#allocation1] sm:$0xff] %v12243_v52 }
 0x34f   : > { %v8480_v61 = vld [vmem:[#allocation1 + $0x20] ss:$4 sm:$0xff]  ;;  %v8482_v38 = vld [vmem:[#allocation1 + $0x21] ss:$4 sm:$0xff]  ;;  %v8484_v39 = vld [vmem:[#allocation1 + $0x22] ss:$4 sm:$0xff] }
 0x350   : > { %12244 = vst [vmem:[#allocation62_spill] sm:$0xff] %v8480_v61  ;;  %v8486_v41 = vld [vmem:[#allocation1 + $0x23] ss:$4 sm:$0xff] }
 0x351   : > { %12245 = vst [vmem:[#allocation63_spill] sm:$0xff] %v8482_v38 }
 0x352   : > { %12246 = vst [vmem:[#allocation65_spill] sm:$0xff] %v8484_v39 }
 0x353   : > { %12247 = vst [vmem:[#allocation66_spill] sm:$0xff] %v8486_v41  ;;  %v8489_v54 = vld [vmem:[#allocation1 + $0x1] ss:$4 sm:$0xff]  ;;  %v8491_v40 = vld [vmem:[#allocation1 + $0x2] ss:$4 sm:$0xff] }
 0x354   : > { %2327 = vst [vmem:[#allocation1 + $0x20] sm:$0xff] %v12248_v14  ;;  %v8493_v46 = vld [vmem:[#allocation1 + $0x3] ss:$4 sm:$0xff] }
 0x355   : > { %12249 = vst [vmem:[#allocation67_spill] sm:$0xff] %v8491_v40  ;;  %v12256_v14 = vld [vmem:[#allocation72_spill] sm:$0xff] }
 0x356   : > { %12250 = vst [vmem:[#allocation69_spill] sm:$0xff] %v8493_v46  ;;  %v12259_v46 = vld [vmem:[#allocation85_spill] sm:$0xff] }
 0x357   : > { %2324 = vst [vmem:[#allocation1] sm:$0xff] %v6957_v35 }
 0x35b   : > { %v8496_v3 = vld [vmem:[#allocation1 + $0x21] ss:$4 sm:$0xff]  ;;  %v8498_v52 = vld [vmem:[#allocation1 + $0x22] ss:$4 sm:$0xff]  ;;  %v8500_v61 = vld [vmem:[#allocation1 + $0x23] ss:$4 sm:$0xff] }
 0x35c   : > { %12251 = vst [vmem:[#allocation70_spill] sm:$0xff] %v8496_v3 }
 0x35d   : > { %12252 = vst [vmem:[#allocation71_spill] sm:$0xff] %v8498_v52 }
 0x35e   : > { %12253 = vst [vmem:[#allocation73_spill] sm:$0xff] %v8500_v61  ;;  %v8503_v39 = vld [vmem:[#allocation1] ss:$4 sm:$0xff]  ;;  %v8505_v41 = vld [vmem:[#allocation1 + $0x1] ss:$4 sm:$0xff] }
 0x35f   : > { %2332 = vst [vmem:[#allocation1 + $0x20] sm:$0xff] %v6988_v58  ;;  %v12262_v58 = vld [vmem:[#allocation80_spill] sm:$0xff] }
 0x360   : > { %12254 = vst [vmem:[#allocation74_spill] sm:$0xff] %v8503_v39 }
 0x361   : > { %12255 = vst [vmem:[#allocation75_spill] sm:$0xff] %v8505_v41 }
 0x362   : > { %2331 = vst [vmem:[#allocation1] sm:$0xff] %v12256_v14 }
 0x366   : > { %v8508_v38 = vld [vmem:[#allocation1 + $0x20] ss:$4 sm:$0xff]  ;;  %v8510_v40 = vld [vmem:[#allocation1 + $0x21] ss:$4 sm:$0xff] }
 0x367   : > { %12257 = vst [vmem:[#allocation77_spill] sm:$0xff] %v8508_v38 }
 0x368   : > { %12258 = vst [vmem:[#allocation78_spill] sm:$0xff] %v8510_v40  ;;  %v12267_v40 = vld [vmem:[#allocation92_spill] sm:$0xff] }
 0x369   : > { %2340 = vst [vmem:[#allocation1 + $0x20] sm:$0xff] %v12259_v46  ;;  %v8513_v35 = vld [vmem:[#allocation1] ss:$4 sm:$0xff]  ;;  %v8515_v3 = vld [vmem:[#allocation1 + $0x1] ss:$4 sm:$0xff] }
 0x36a   : > { %12260 = vst [vmem:[#allocation79_spill] sm:$0xff] %v8513_v35  ;;  %v8517_v52 = vld [vmem:[#allocation1 + $0x2] ss:$4 sm:$0xff]  ;;  %v8519_v61 = vld [vmem:[#allocation1 + $0x3] ss:$4 sm:$0xff] }
 0x36b   : > { %12261 = vst [vmem:[#allocation81_spill] sm:$0xff] %v8517_v52 }
 0x36c   : > { %2339 = vst [vmem:[#allocation1] sm:$0xff] %v12262_v58 }
 0x370   : > { %v8522_v39 = vld [vmem:[#allocation1 + $0x20] ss:$4 sm:$0xff]  ;;  %v8524_v41 = vld [vmem:[#allocation1 + $0x21] ss:$4 sm:$0xff]  ;;  %v8526_v14 = vld [vmem:[#allocation1 + $0x22] ss:$4 sm:$0xff] }
 0x371   : > { %12263 = vst [vmem:[#allocation82_spill] sm:$0xff] %v8522_v39  ;;  %v8528_v38 = vld [vmem:[#allocation1 + $0x23] ss:$4 sm:$0xff] }
 0x372   : > { %12264 = vst [vmem:[#allocation83_spill] sm:$0xff] %v8524_v41 }
 0x373   : > { %12265 = vst [vmem:[#allocation84_spill] sm:$0xff] %v8526_v14  ;;  %v8531_v46 = vld [vmem:[#allocation1 + $0x1] ss:$4 sm:$0xff]  ;;  %v8533_v35 = vld [vmem:[#allocation1 + $0x2] ss:$4 sm:$0xff] }
 0x374   : > { %12266 = vst [vmem:[#allocation86_spill] sm:$0xff] %v8528_v38  ;;  %v8535_v52 = vld [vmem:[#allocation1 + $0x3] ss:$4 sm:$0xff] }
 0x375   : > { %2351 = vst [vmem:[#allocation1 + $0x20] sm:$0xff] %v12267_v40  ;;  %v12276_v14 = vld [vmem:[#allocation96_spill] sm:$0xff] }
 0x376   : > { %12268 = vst [vmem:[#allocation87_spill] sm:$0xff] %v8531_v46 }
 0x377   : > { %12269 = vst [vmem:[#allocation89_spill] sm:$0xff] %v8533_v35 }
 0x378   : > { %12270 = vst [vmem:[#allocation90_spill] sm:$0xff] %v8535_v52 }
 0x379   : > { %2348 = vst [vmem:[#allocation1] sm:$0xff] %v7018_v53  ;;  %v12279_v53 = vld [vmem:[#allocation109_spill] sm:$0xff] }
 0x37c   : > { %v8538_v58 = vld [vmem:[#allocation1 + $0x21] ss:$4 sm:$0xff]  ;;  %v8540_v39 = vld [vmem:[#allocation1 + $0x22] ss:$4 sm:$0xff]  ;;  %v8542_v41 = vld [vmem:[#allocation1 + $0x23] ss:$4 sm:$0xff] }
 0x37d   : > { %12271 = vst [vmem:[#allocation91_spill] sm:$0xff] %v8538_v58 }
 0x37e   : > { %12272 = vst [vmem:[#allocation93_spill] sm:$0xff] %v8540_v39 }
 0x37f   : > { %12273 = vst [vmem:[#allocation94_spill] sm:$0xff] %v8542_v41 }
 0x380   : > { %2356 = vst [vmem:[#allocation1 + $0x20] sm:$0xff] %v12071_v56  ;;  %v8545_v38 = vld [vmem:[#allocation1] ss:$4 sm:$0xff]  ;;  %v8547_v40 = vld [vmem:[#allocation1 + $0x1] ss:$4 sm:$0xff] }
 0x381   : > { %12274 = vst [vmem:[#allocation95_spill] sm:$0xff] %v8545_v38  ;;  %v8562_v56 = vld [vmem:[%s6776_s17 + $0x18] sm:$0xf] }
 0x382   : > { %12275 = vst [vmem:[#allocation97_spill] sm:$0xff] %v8547_v40  ;;  %v12285_v40 = vld [vmem:[#allocation104_spill] sm:$0xff] }
 0x383   : > { %2355 = vst [vmem:[#allocation1] sm:$0xff] %v12276_v14 }
 0x384   : > { %12283 = vst [vmem:[#allocation105_spill] sm:$0xff] %v8562_v56 }
 0x387   : > { %v8550_v35 = vld [vmem:[#allocation1 + $0x20] ss:$4 sm:$0xff]  ;;  %v8552_v52 = vld [vmem:[#allocation1 + $0x21] ss:$4 sm:$0xff] }
 0x388   : > { %12277 = vst [vmem:[#allocation98_spill] sm:$0xff] %v8550_v35 }
 0x389   : > { %12278 = vst [vmem:[#allocation99_spill] sm:$0xff] %v8552_v52 }
 0x38a   : > { %2364 = vst [vmem:[#allocation1 + $0x20] sm:$0xff] %v12279_v53  ;;  %v8555_v58 = vld [vmem:[#allocation1] ss:$4 sm:$0xff]  ;;  %v8557_v39 = vld [vmem:[#allocation1 + $0x1] ss:$4 sm:$0xff] }
 0x38b   : > { %12280 = vst [vmem:[#allocation101_spill] sm:$0xff] %v8555_v58  ;;  %v8559_v41 = vld [vmem:[#allocation1 + $0x2] ss:$4 sm:$0xff]  ;;  %v8564_v38 = vld [vmem:[#allocation1 + $0x3] ss:$4 sm:$0xff] }
 0x38c   : > { %12281 = vst [vmem:[#allocation102_spill] sm:$0xff] %v8557_v39  ;;  %v8577_v39 = vld [vmem:[%s6776_s17 + $0x20] sm:$0x3] }
 0x38d   : > { %12282 = vst [vmem:[#allocation103_spill] sm:$0xff] %v8559_v41 }
 0x38e   : > { %12284 = vst [vmem:[#allocation106_spill] sm:$0xff] %v8564_v38 }
 0x38f   : > { %2363 = vst [vmem:[#allocation1] sm:$0xff] %v12285_v40 }
 0x390   : > { %12290 = vst [vmem:[#allocation113_spill] sm:$0xff] %v8577_v39 }
 0x391   : > { %v8567_v14 = vld [vmem:[#allocation1 + $0x20] ss:$4 sm:$0xff]  ;;  %v8569_v35 = vld [vmem:[#allocation1 + $0x21] ss:$4 sm:$0xff]  ;;  %v8571_v52 = vld [vmem:[#allocation1 + $0x22] ss:$4 sm:$0xff] }
 0x392   : > { %12286 = vst [vmem:[#allocation107_spill] sm:$0xff] %v8567_v14  ;;  %v8573_v53 = vld [vmem:[#allocation1 + $0x23] ss:$4 sm:$0xff] }
 0x393   : > { %12287 = vst [vmem:[#allocation108_spill] sm:$0xff] %v8569_v35 }
 0x394   : > { %12288 = vst [vmem:[#allocation110_spill] sm:$0xff] %v8571_v52 }
 0x395   : > { %12289 = vst [vmem:[#allocation111_spill] sm:$0xff] %v8573_v53  ;;  %v8594_v53 = vld [vmem:[%s6776_s17 + $0x1c] sm:$0xf] }
 0x396   : > { %2375 = vst [vmem:[#allocation1 + $0x20] sm:$0xff] %v8562_v56  ;;  %v8579_v41 = vld [vmem:[#allocation1 + $0x1] ss:$4 sm:$0xff]  ;;  %v8581_v58 = vld [vmem:[#allocation1 + $0x2] ss:$4 sm:$0xff] }
 0x397   : > { %12291 = vst [vmem:[#allocation114_spill] sm:$0xff] %v8581_v58  ;;  %v8583_v38 = vld [vmem:[#allocation1 + $0x3] ss:$4 sm:$0xff] }
 0x398   : > { %12292 = vst [vmem:[#allocation115_spill] sm:$0xff] %v8583_v38 }
 0x399   : > { %2372 = vst [vmem:[#allocation1] sm:$0xff] %v12091_v20 }
 0x39a   : > { %12296 = vst [vmem:[#allocation119_spill] sm:$0xff] %v8594_v53 }
 0x39d   : > { %v8586_v40 = vld [vmem:[#allocation1 + $0x21] ss:$4 sm:$0xff]  ;;  %v8588_v14 = vld [vmem:[#allocation1 + $0x22] ss:$4 sm:$0xff]  ;;  %v8590_v35 = vld [vmem:[#allocation1 + $0x23] ss:$4 sm:$0xff] }
 0x39e   : > { %12293 = vst [vmem:[#allocation116_spill] sm:$0xff] %v8586_v40 }
 0x39f   : > { %12294 = vst [vmem:[#allocation117_spill] sm:$0xff] %v8588_v14 }
 0x3a0   : > { %12295 = vst [vmem:[#allocation118_spill] sm:$0xff] %v8590_v35  ;;  %v8596_v52 = vld [vmem:[#allocation1] ss:$4 sm:$0xff]  ;;  %v8598_v46 = vld [vmem:[#allocation1 + $0x1] ss:$4 sm:$0xff] }
 0x3a1   : > { %2380 = vst [vmem:[#allocation1 + $0x20] sm:$0xff] %v8577_v39 }
 0x3a2   : > { %2379 = vst [vmem:[#allocation1] sm:$0xff] %v8594_v53 }
 0x3a8   : > { %v8601_v58 = vld [vmem:[#allocation1 + $0x20] ss:$4 sm:$0xff]  ;;  %v8603_v38 = vld [vmem:[#allocation1 + $0x21] ss:$4 sm:$0xff] }
 0x3a9   : > { %12297 = vst [vmem:[#allocation120_spill] sm:$0xff] %v8603_v38  ;;  %v8605_v20 = vld [vmem:[#allocation1] ss:$4 sm:$0xff]  ;;  %v8607_v40 = vld [vmem:[#allocation1 + $0x1] ss:$4 sm:$0xff] }
 0x3aa   : > { %v8609_v14 = vld [vmem:[#allocation1 + $0x2] ss:$4 sm:$0xff]  ;;  %v8611_v35 = vld [vmem:[#allocation1 + $0x3] ss:$4 sm:$0xff] }
 0x3ab   : > { %2387 = vst [vmem:[#allocation1] ss:$9 sm:$0xff] %v7157_v34  ;;  %v12304_v34 = vld [vmem:[#allocation134_spill] sm:$0xff] }
 0x3ac   : > { %2389 = vst [vmem:[#allocation1 + $0x1] ss:$9 sm:$0xff] %v7159_v27  ;;  %v12303_v27 = vld [vmem:[#allocation132_spill] sm:$0xff] }
 0x3ad   : > { %2391 = vst [vmem:[#allocation1 + $0x2] ss:$9 sm:$0xff] %v7161_v25  ;;  %v12302_v25 = vld [vmem:[#allocation131_spill] sm:$0xff] }
 0x3ae   : > { %2393 = vst [vmem:[#allocation1 + $0x3] ss:$9 sm:$0xff] %v7167_v21 }
 0x3af   : > { %2395 = vst [vmem:[#allocation1 + $0x4] ss:$9 sm:$0xff] %v7175_v0  ;;  %v12305_v0 = vld [vmem:[#allocation135_spill] sm:$0xff] }
 0x3b0   : > { %2397 = vst [vmem:[#allocation1 + $0x5] ss:$9 sm:$0xff] %v7177_v45  ;;  %v12306_v45 = vld [vmem:[#allocation136_spill] sm:$0xff] }
 0x3b1   : > { %2399 = vst [vmem:[#allocation1 + $0x6] ss:$9 sm:$0xff] %v7180_v62 }
 0x3b2   : > { %2401 = vst [vmem:[#allocation1 + $0x7] ss:$9 sm:$0xff] %v7192_v22  ;;  %v12301_v22 = vld [vmem:[#allocation129_spill] sm:$0xff] }
 0x3b9   : > { %v8621_v38 = vld [vmem:[#allocation1] sm:$0xff] }
 0x3ba   : > { %12298 = vst [vmem:[#allocation121_spill] sm:$0xff] %v8621_v38  ;;  %v12310_v38 = vld [vmem:[#allocation139_spill] sm:$0xff] }
 0x3bb   : > { %2403 = vst [vmem:[#allocation1] ss:$9 sm:$0xff] %v7202_v19 }
 0x3bc   : > { %2404 = vst [vmem:[#allocation1 + $0x1] ss:$9 sm:$0xff] %v7208_v11 }
 0x3bd   : > { %2405 = vst [vmem:[#allocation1 + $0x2] ss:$9 sm:$0xff] %v7210_v24 }
 0x3be   : > { %2406 = vst [vmem:[#allocation1 + $0x3] ss:$9 sm:$0xff] %v7214_v16 }
 0x3bf   : > { %2407 = vst [vmem:[#allocation1 + $0x4] ss:$9 sm:$0xff] %v7219_v48 }
 0x3c0   : > { %2408 = vst [vmem:[#allocation1 + $0x5] ss:$9 sm:$0xff] %v7225_v33 }
 0x3c1   : > { %2409 = vst [vmem:[#allocation1 + $0x6] ss:$9 sm:$0xff] %v7227_v5 }
 0x3c2   : > { %2410 = vst [vmem:[#allocation1 + $0x7] ss:$9 sm:$0xff] %v7240_v18 }
 0x3c9   : > { %v8631_v21 = vld [vmem:[#allocation1] sm:$0xff] }
 0x3ca   : > { %12299 = vst [vmem:[#allocation284_spill] sm:$0xff] %v8631_v21  ;;  %v12308_v21 = vld [vmem:[#allocation137_spill] sm:$0xff] }
 0x3cb   : > { %2412 = vst [vmem:[#allocation1] ss:$9 sm:$0xff] %v7242_v13 }
 0x3cc   : > { %2413 = vst [vmem:[#allocation1 + $0x1] ss:$9 sm:$0xff] %v7252_v9 }
 0x3cd   : > { %2414 = vst [vmem:[#allocation1 + $0x2] ss:$9 sm:$0xff] %v7261_v1 }
 0x3ce   : > { %2415 = vst [vmem:[#allocation1 + $0x3] ss:$9 sm:$0xff] %v7263_v8 }
 0x3cf   : > { %2416 = vst [vmem:[#allocation1 + $0x4] ss:$9 sm:$0xff] %v11968_v37 }
 0x3d0   : > { %2417 = vst [vmem:[#allocation1 + $0x5] ss:$9 sm:$0xff] %v11970_v63 }
 0x3d1   : > { %2418 = vst [vmem:[#allocation1 + $0x6] ss:$9 sm:$0xff] %v11972_v28 }
 0x3d2   : > { %2419 = vst [vmem:[#allocation1 + $0x7] ss:$9 sm:$0xff] %v7289_v6 }
 0x3d9   : > { %v8641_v19 = vld [vmem:[#allocation1] sm:$0xff] }
 0x3da   : > { %12300 = vst [vmem:[#allocation285_spill] sm:$0xff] %v8641_v19  ;;  %v12309_v19 = vld [vmem:[#allocation138_spill] sm:$0xff] }
 0x3db   : > { %2421 = vst [vmem:[#allocation1] ss:$9 sm:$0xff] %v11980_v43 }
 0x3dc   : > { %2422 = vst [vmem:[#allocation1 + $0x1] ss:$9 sm:$0xff] %v12301_v22 }
 0x3dd   : > { %2423 = vst [vmem:[#allocation1 + $0x2] ss:$9 sm:$0xff] %v12302_v25 }
 0x3de   : > { %2424 = vst [vmem:[#allocation1 + $0x3] ss:$9 sm:$0xff] %v12303_v27  ;;  %v12311_v27 = vld [vmem:[#allocation143_spill] sm:$0xff] }
 0x3df   : > { %2425 = vst [vmem:[#allocation1 + $0x4] ss:$9 sm:$0xff] %v11985_v4  ;;  %v12312_v4 = vld [vmem:[#allocation144_spill] sm:$0xff] }
 0x3e0   : > { %2426 = vst [vmem:[#allocation1 + $0x5] ss:$9 sm:$0xff] %v12304_v34  ;;  %v12313_v34 = vld [vmem:[#allocation145_spill] sm:$0xff] }
 0x3e1   : > { %2427 = vst [vmem:[#allocation1 + $0x6] ss:$9 sm:$0xff] %v12305_v0 }
 0x3e2   : > { %2428 = vst [vmem:[#allocation1 + $0x7] ss:$9 sm:$0xff] %v12306_v45  ;;  %v12315_v45 = vld [vmem:[#allocation146_spill] sm:$0xff] }
 0x3e9   : > { %v8651_v62 = vld [vmem:[#allocation1] sm:$0xff] }
 0x3ea   : > { %12307 = vst [vmem:[#allocation129_spill] sm:$0xff] %v8651_v62  ;;  %v12316_v62 = vld [vmem:[#allocation147_spill] sm:$0xff] }
 0x3eb   : > { %2430 = vst [vmem:[#allocation1] ss:$9 sm:$0xff] %v12308_v21  ;;  %v12317_v21 = vld [vmem:[#allocation148_spill] sm:$0xff] }
 0x3ec   : > { %2431 = vst [vmem:[#allocation1 + $0x1] ss:$9 sm:$0xff] %v12309_v19  ;;  %v12318_v19 = vld [vmem:[#allocation150_spill] sm:$0xff] }
 0x3ed   : > { %2432 = vst [vmem:[#allocation1 + $0x2] ss:$9 sm:$0xff] %v12310_v38 }
 0x3ee   : > { %2433 = vst [vmem:[#allocation1 + $0x3] ss:$9 sm:$0xff] %v11999_v12  ;;  %v12319_v12 = vld [vmem:[#allocation152_spill] sm:$0xff] }
 0x3ef   : > { %2434 = vst [vmem:[#allocation1 + $0x4] ss:$9 sm:$0xff] %v12002_v50  ;;  %v12320_v50 = vld [vmem:[#allocation153_spill] sm:$0xff] }
 0x3f0   : > { %2435 = vst [vmem:[#allocation1 + $0x5] ss:$9 sm:$0xff] %v12311_v27  ;;  %v12321_v27 = vld [vmem:[#allocation154_spill] sm:$0xff] }
 0x3f1   : > { %2436 = vst [vmem:[#allocation1 + $0x6] ss:$9 sm:$0xff] %v12312_v4 }
 0x3f2   : > { %2437 = vst [vmem:[#allocation1 + $0x7] ss:$9 sm:$0xff] %v12313_v34  ;;  %v12323_v34 = vld [vmem:[#allocation155_spill] sm:$0xff] }
 0x3f9   : > { %v8661_v0 = vld [vmem:[#allocation1] sm:$0xff] }
 0x3fa   : > { %12314 = vst [vmem:[#allocation131_spill] sm:$0xff] %v8661_v0  ;;  %v12324_v0 = vld [vmem:[#allocation156_spill] sm:$0xff] }
 0x3fb   : > { %2439 = vst [vmem:[#allocation1] ss:$9 sm:$0xff] %v12315_v45  ;;  %v12325_v45 = vld [vmem:[#allocation157_spill] sm:$0xff] }
 0x3fc   : > { %2440 = vst [vmem:[#allocation1 + $0x1] ss:$9 sm:$0xff] %v12316_v62  ;;  %v12326_v62 = vld [vmem:[#allocation159_spill] sm:$0xff] }
 0x3fd   : > { %2441 = vst [vmem:[#allocation1 + $0x2] ss:$9 sm:$0xff] %v12317_v21  ;;  %v12327_v21 = vld [vmem:[#allocation160_spill] sm:$0xff] }
 0x3fe   : > { %2442 = vst [vmem:[#allocation1 + $0x3] ss:$9 sm:$0xff] %v12318_v19  ;;  %v12364_v19 = vld [vmem:[#allocation204_spill] sm:$0xff] }
 0x3ff   : > { %2443 = vst [vmem:[#allocation1 + $0x4] ss:$9 sm:$0xff] %v12017_v57 }
 0x400   : > { %2444 = vst [vmem:[#allocation1 + $0x5] ss:$9 sm:$0xff] %v12319_v12  ;;  %v12328_v12 = vld [vmem:[#allocation163_spill] sm:$0xff] }
 0x401   : > { %2445 = vst [vmem:[#allocation1 + $0x6] ss:$9 sm:$0xff] %v12320_v50 }
 0x402   : > { %2446 = vst [vmem:[#allocation1 + $0x7] ss:$9 sm:$0xff] %v12321_v27  ;;  %v12330_v27 = vld [vmem:[#allocation164_spill] sm:$0xff] }
 0x409   : > { %v8671_v4 = vld [vmem:[#allocation1] sm:$0xff] }
 0x40a   : > { %12322 = vst [vmem:[#allocation139_spill] sm:$0xff] %v8671_v4  ;;  %v12331_v4 = vld [vmem:[#allocation165_spill] sm:$0xff] }
 0x40b   : > { %2448 = vst [vmem:[#allocation1] ss:$9 sm:$0xff] %v12323_v34  ;;  %v12332_v34 = vld [vmem:[#allocation167_spill] sm:$0xff] }
 0x40c   : > { %2449 = vst [vmem:[#allocation1 + $0x1] ss:$9 sm:$0xff] %v12324_v0  ;;  %v12333_v0 = vld [vmem:[#allocation168_spill] sm:$0xff] }
 0x40d   : > { %2450 = vst [vmem:[#allocation1 + $0x2] ss:$9 sm:$0xff] %v12325_v45  ;;  %v12334_v45 = vld [vmem:[#allocation169_spill] sm:$0xff] }
 0x40e   : > { %2451 = vst [vmem:[#allocation1 + $0x3] ss:$9 sm:$0xff] %v12326_v62  ;;  %v12361_v62 = vld [vmem:[#allocation202_spill] sm:$0xff] }
 0x40f   : > { %2452 = vst [vmem:[#allocation1 + $0x4] ss:$9 sm:$0xff] %v12327_v21  ;;  %v12359_v21 = vld [vmem:[#allocation200_spill] sm:$0xff] }
 0x410   : > { %2453 = vst [vmem:[#allocation1 + $0x5] ss:$9 sm:$0xff] %v12036_v2  ;;  %v12358_v2 = vld [vmem:[#allocation199_spill] sm:$0xff] }
 0x411   : > { %2454 = vst [vmem:[#allocation1 + $0x6] ss:$9 sm:$0xff] %v12040_v47 }
 0x412   : > { %2455 = vst [vmem:[#allocation1 + $0x7] ss:$9 sm:$0xff] %v12328_v12  ;;  %v12336_v12 = vld [vmem:[#allocation173_spill] sm:$0xff] }
 0x419   : > { %v8681_v50 = vld [vmem:[#allocation1] sm:$0xff] }
 0x41a   : > { %12329 = vst [vmem:[#allocation286_spill] sm:$0xff] %v8681_v50  ;;  %v12337_v50 = vld [vmem:[#allocation174_spill] sm:$0xff] }
 0x41b   : > { %2457 = vst [vmem:[#allocation1] ss:$9 sm:$0xff] %v12330_v27  ;;  %v12338_v27 = vld [vmem:[#allocation175_spill] sm:$0xff] }
 0x41c   : > { %2458 = vst [vmem:[#allocation1 + $0x1] ss:$9 sm:$0xff] %v12331_v4  ;;  %v12339_v4 = vld [vmem:[#allocation177_spill] sm:$0xff] }
 0x41d   : > { %2459 = vst [vmem:[#allocation1 + $0x2] ss:$9 sm:$0xff] %v12332_v34  ;;  %v12340_v34 = vld [vmem:[#allocation178_spill] sm:$0xff] }
 0x41e   : > { %2460 = vst [vmem:[#allocation1 + $0x3] ss:$9 sm:$0xff] %v12333_v0  ;;  %v12355_v0 = vld [vmem:[#allocation195_spill] sm:$0xff] }
 0x41f   : > { %2461 = vst [vmem:[#allocation1 + $0x4] ss:$9 sm:$0xff] %v12334_v45  ;;  %v12341_v45 = vld [vmem:[#allocation180_spill] sm:$0xff] }
 0x420   : > { %2462 = vst [vmem:[#allocation1 + $0x5] ss:$9 sm:$0xff] %v12052_v15  ;;  %v12342_v15 = vld [vmem:[#allocation181_spill] sm:$0xff] }
 0x421   : > { %2463 = vst [vmem:[#allocation1 + $0x6] ss:$9 sm:$0xff] %v12054_v31 }
 0x422   : > { %2464 = vst [vmem:[#allocation1 + $0x7] ss:$9 sm:$0xff] %v7524_v51  ;;  %v12344_v51 = vld [vmem:[#allocation182_spill] sm:$0xff] }
 0x429   : > { %v8691_v47 = vld [vmem:[#allocation1] sm:$0xff] }
 0x42a   : > { %12335 = vst [vmem:[#allocation287_spill] sm:$0xff] %v8691_v47  ;;  %v12345_v47 = vld [vmem:[#allocation183_spill] sm:$0xff] }
 0x42b   : > { %2466 = vst [vmem:[#allocation1] ss:$9 sm:$0xff] %v12336_v12  ;;  %v12346_v12 = vld [vmem:[#allocation184_spill] sm:$0xff] }
 0x42c   : > { %2467 = vst [vmem:[#allocation1 + $0x1] ss:$9 sm:$0xff] %v12337_v50  ;;  %v12347_v50 = vld [vmem:[#allocation186_spill] sm:$0xff] }
 0x42d   : > { %2468 = vst [vmem:[#allocation1 + $0x2] ss:$9 sm:$0xff] %v12338_v27  ;;  %v12348_v27 = vld [vmem:[#allocation187_spill] sm:$0xff] }
 0x42e   : > { %2469 = vst [vmem:[#allocation1 + $0x3] ss:$9 sm:$0xff] %v12339_v4  ;;  %v12349_v4 = vld [vmem:[#allocation188_spill] sm:$0xff] }
 0x42f   : > { %2470 = vst [vmem:[#allocation1 + $0x4] ss:$9 sm:$0xff] %v12340_v34 }
 0x430   : > { %2471 = vst [vmem:[#allocation1 + $0x5] ss:$9 sm:$0xff] %v12066_v7  ;;  %v2157_v7 = vrot.slane %v8562_v56, 3 }
 0x431   : > { %2472 = vst [vmem:[#allocation1 + $0x6] ss:$9 sm:$0xff] %v12341_v45 }
 0x432   : > { %2473 = vst [vmem:[#allocation1 + $0x7] ss:$9 sm:$0xff] %v12342_v15 }
 0x439   : > { %v8701_v31 = vld [vmem:[#allocation1] sm:$0xff] }
 0x43a   : > { %12343 = vst [vmem:[#allocation288_spill] sm:$0xff] %v8701_v31  ;;  %v2158_v31 = vrot.slane %v8594_v53, 3 }
 0x43b   : > { %2475 = vst [vmem:[#allocation1] ss:$9 sm:$0xff] %v12344_v51  ;;  %v2163_v51 = vsel %vm470_vm0, %v8562_v56, %v2157_v7 }
 0x43c   : > { %2476 = vst [vmem:[#allocation1 + $0x1] ss:$9 sm:$0xff] %v12345_v47  ;;  %v2178_v45 = vsel %vm474_vm1, %v8594_v53, %v2158_v31 }
 0x43d   : > { %2477 = vst [vmem:[#allocation1 + $0x2] ss:$9 sm:$0xff] %v12346_v12  ;;  %v2166_v12 = vsel %vm474_vm1, %v8562_v56, %v2157_v7 }
 0x43e   : > { %2478 = vst [vmem:[#allocation1 + $0x3] ss:$9 sm:$0xff] %v12347_v50  ;;  %v2169_v50 = vsel %vm478_vm2, %v8562_v56, %v2157_v7 }
 0x43f   : > { %2479 = vst [vmem:[#allocation1 + $0x4] ss:$9 sm:$0xff] %v12348_v27  ;;  %v8723_v27 = vrot.slane %v2163_v51, 1  ;;  %v8731_v15 = vrot.slane %v2169_v50, 3  ;;  %v8739_v51 = vsel %vm466_vm3, %v8594_v53, %v2158_v31  ;;  %v2181_v50 = vsel %vm478_vm2, %v8594_v53, %v2158_v31 }
 0x440   : > { %2480 = vst [vmem:[#allocation1 + $0x5] ss:$9 sm:$0xff] %v12349_v4  ;;  %v8721_v4 = vsel %vm466_vm3, %v8562_v56, %v2157_v7  ;;  %v8744_v7 = vrot.slane %v2178_v45, 2 }
 0x441   : > { %2481 = vst [vmem:[#allocation1 + $0x6] ss:$9 sm:$0xff] %v12086_v59  ;;  %v8725_v59 = vrot.slane %v2166_v12, 2 }
 0x442   : > { %2482 = vst [vmem:[#allocation1 + $0x7] ss:$9 sm:$0xff] %v12089_v30  ;;  %v2175_v30 = vsel %vm470_vm0, %v8594_v53, %v2158_v31  ;;  %v12356_v31 = vld [vmem:[#allocation196_spill] sm:$0xff] }
 0x443   : > { %12351 = vst [vmem:[#allocation290_spill] sm:$0xff] %v8739_v51  ;;  %v8741_v12 = vrot.slane %v2175_v30, 1  ;;  %v11733_v30 = vrot.slane %v8577_v39, 3 }
 0x445   : > { %12352 = vst [vmem:[#allocation291_spill] sm:$0xff] %v8741_v12  ;;  %v8760_v45 = vsel %vm466_vm3, %v8577_v39, %v11733_v30  ;;  %v12360_v30 = vld [vmem:[#allocation201_spill] sm:$0xff] }
 0x449   : > { %v8729_v47 = vld [vmem:[#allocation1] sm:$0xff] }
 0x44a   : > { %12350 = vst [vmem:[#allocation289_spill] sm:$0xff] %v8729_v47  ;;  %v8754_v47 = vrot.slane %v2181_v50, 3  ;;  %v12357_v50 = vld [vmem:[#allocation198_spill] sm:$0xff] }
 0x44b   : > { %2484 = vst [vmem:[#allocation1] ss:$9 sm:$0xff] %v12096_v29 }
 0x44c   : > { %2485 = vst [vmem:[#allocation1 + $0x1] ss:$9 sm:$0xff] %v8721_v4 }
 0x44d   : > { %2486 = vst [vmem:[#allocation1 + $0x2] ss:$9 sm:$0xff] %v8723_v27 }
 0x44e   : > { %2487 = vst [vmem:[#allocation1 + $0x3] ss:$9 sm:$0xff] %v8725_v59 }
 0x44f   : > { %2488 = vst [vmem:[#allocation1 + $0x4] ss:$9 sm:$0xff] %v8731_v15 }
 0x450   : > { %2489 = vst [vmem:[#allocation1 + $0x5] ss:$9 sm:$0xff] %v8739_v51 }
 0x451   : > { %2490 = vst [vmem:[#allocation1 + $0x6] ss:$9 sm:$0xff] %v8741_v12 }
 0x452   : > { %2491 = vst [vmem:[#allocation1 + $0x7] ss:$9 sm:$0xff] %v8744_v7 }
 0x459   : > { %v8762_v29 = vld [vmem:[#allocation1] sm:$0xff] }
 0x45a   : > { %12353 = vst [vmem:[#allocation292_spill] sm:$0xff] %v8762_v29  ;;  %v12362_v29 = vld [vmem:[#allocation203_spill] sm:$0xff] }
 0x45b   : > { %2493 = vst [vmem:[#allocation1] ss:$9 sm:$0xff] %v8754_v47 }
 0x45c   : > { %2494 = vst [vmem:[#allocation1 + $0x1] ss:$9 sm:$0xff] %v8760_v45 }
 0x463   : > { %v8766_v34 = vld [vmem:[#allocation1] sm:$0xff] }
 0x464   : > { %12354 = vst [vmem:[#allocation293_spill] sm:$0xff] %v8766_v34  ;;  %v12365_v34 = vld [vmem:[#allocation205_spill] sm:$0xff] }
 0x465   : > { %2496 = vst [vmem:[#allocation1] ss:$9 sm:$0xff] %v12355_v0  ;;  %v12366_v0 = vld [vmem:[#allocation207_spill] sm:$0xff] }
 0x466   : > { %2498 = vst [vmem:[#allocation1 + $0x1] ss:$9 sm:$0xff] %v12356_v31  ;;  %v12367_v31 = vld [vmem:[#allocation208_spill] sm:$0xff] }
 0x467   : > { %2500 = vst [vmem:[#allocation1 + $0x2] ss:$9 sm:$0xff] %v12357_v50  ;;  %v12368_v50 = vld [vmem:[#allocation209_spill] sm:$0xff] }
 0x468   : > { %2502 = vst [vmem:[#allocation1 + $0x3] ss:$9 sm:$0xff] %v12358_v2  ;;  %v12369_v2 = vld [vmem:[#allocation210_spill] sm:$0xff] }
 0x469   : > { %2504 = vst [vmem:[#allocation1 + $0x4] ss:$9 sm:$0xff] %v12359_v21  ;;  %v12370_v21 = vld [vmem:[#allocation211_spill] sm:$0xff] }
 0x46a   : > { %2506 = vst [vmem:[#allocation1 + $0x5] ss:$9 sm:$0xff] %v12360_v30  ;;  %v12371_v30 = vld [vmem:[#allocation212_spill] sm:$0xff] }
 0x46b   : > { %2508 = vst [vmem:[#allocation1 + $0x6] ss:$9 sm:$0xff] %v12361_v62 }
 0x46c   : > { %2510 = vst [vmem:[#allocation1 + $0x7] ss:$9 sm:$0xff] %v12362_v29  ;;  %v12373_v29 = vld [vmem:[#allocation125_spill] sm:$0xff] }
 0x473   : > { %v8776_v57 = vld [vmem:[#allocation1] sm:$0xff] }
 0x474   : > { %12363 = vst [vmem:[#allocation195_spill] sm:$0xff] %v8776_v57  ;;  %v12374_v57 = vld [vmem:[#allocation126_spill] sm:$0xff] }
 0x475   : > { %2513 = vst [vmem:[#allocation1] ss:$9 sm:$0xff] %v12364_v19  ;;  %v12375_v19 = vld [vmem:[#allocation213_spill] sm:$0xff] }
 0x476   : > { %2514 = vst [vmem:[#allocation1 + $0x1] ss:$9 sm:$0xff] %v12365_v34  ;;  %v12376_v34 = vld [vmem:[#allocation214_spill] sm:$0xff] }
 0x477   : > { %2515 = vst [vmem:[#allocation1 + $0x2] ss:$9 sm:$0xff] %v12366_v0  ;;  %v12377_v0 = vld [vmem:[#allocation215_spill] sm:$0xff] }
 0x478   : > { %2516 = vst [vmem:[#allocation1 + $0x3] ss:$9 sm:$0xff] %v12367_v31  ;;  %v12378_v31 = vld [vmem:[#allocation216_spill] sm:$0xff] }
 0x479   : > { %2517 = vst [vmem:[#allocation1 + $0x4] ss:$9 sm:$0xff] %v12368_v50  ;;  %v12379_v50 = vld [vmem:[#allocation217_spill] sm:$0xff] }
 0x47a   : > { %2518 = vst [vmem:[#allocation1 + $0x5] ss:$9 sm:$0xff] %v12369_v2  ;;  %v12380_v2 = vld [vmem:[#allocation128_spill] sm:$0xff] }
 0x47b   : > { %2519 = vst [vmem:[#allocation1 + $0x6] ss:$9 sm:$0xff] %v12370_v21 }
 0x47c   : > { %2520 = vst [vmem:[#allocation1 + $0x7] ss:$9 sm:$0xff] %v12371_v30  ;;  %v12382_v30 = vld [vmem:[#allocation218_spill] sm:$0xff] }
 0x483   : > { %v8786_v62 = vld [vmem:[#allocation1] sm:$0xff] }
 0x484   : > { %12372 = vst [vmem:[#allocation196_spill] sm:$0xff] %v8786_v62  ;;  %v12383_v62 = vld [vmem:[#allocation219_spill] sm:$0xff] }
 0x485   : > { %2523 = vst [vmem:[#allocation1] ss:$9 sm:$0xff] %v12373_v29  ;;  %v12384_v29 = vld [vmem:[#allocation221_spill] sm:$0xff] }
 0x486   : > { %2524 = vst [vmem:[#allocation1 + $0x1] ss:$9 sm:$0xff] %v12374_v57  ;;  %v12385_v57 = vld [vmem:[#allocation222_spill] sm:$0xff] }
 0x487   : > { %2525 = vst [vmem:[#allocation1 + $0x2] ss:$9 sm:$0xff] %v12375_v19  ;;  %v12386_v19 = vld [vmem:[#allocation223_spill] sm:$0xff] }
 0x488   : > { %2526 = vst [vmem:[#allocation1 + $0x3] ss:$9 sm:$0xff] %v12376_v34  ;;  %v12387_v34 = vld [vmem:[#allocation224_spill] sm:$0xff] }
 0x489   : > { %2527 = vst [vmem:[#allocation1 + $0x4] ss:$9 sm:$0xff] %v12377_v0  ;;  %v12388_v0 = vld [vmem:[#allocation225_spill] sm:$0xff] }
 0x48a   : > { %2528 = vst [vmem:[#allocation1 + $0x5] ss:$9 sm:$0xff] %v12378_v31  ;;  %v12389_v31 = vld [vmem:[#allocation226_spill] sm:$0xff] }
 0x48b   : > { %2529 = vst [vmem:[#allocation1 + $0x6] ss:$9 sm:$0xff] %v12379_v50 }
 0x48c   : > { %2530 = vst [vmem:[#allocation1 + $0x7] ss:$9 sm:$0xff] %v12380_v2  ;;  %v12391_v2 = vld [vmem:[#allocation227_spill] sm:$0xff] }
 0x493   : > { %v8796_v21 = vld [vmem:[#allocation1] sm:$0xff] }
 0x494   : > { %12381 = vst [vmem:[#allocation198_spill] sm:$0xff] %v8796_v21  ;;  %v12392_v21 = vld [vmem:[#allocation228_spill] sm:$0xff] }
 0x495   : > { %2533 = vst [vmem:[#allocation1] ss:$9 sm:$0xff] %v12382_v30  ;;  %v12393_v30 = vld [vmem:[#allocation230_spill] sm:$0xff] }
 0x496   : > { %2534 = vst [vmem:[#allocation1 + $0x1] ss:$9 sm:$0xff] %v12383_v62  ;;  %v12394_v62 = vld [vmem:[#allocation231_spill] sm:$0xff] }
 0x497   : > { %2535 = vst [vmem:[#allocation1 + $0x2] ss:$9 sm:$0xff] %v12384_v29  ;;  %v12395_v29 = vld [vmem:[#allocation232_spill] sm:$0xff] }
 0x498   : > { %2536 = vst [vmem:[#allocation1 + $0x3] ss:$9 sm:$0xff] %v12385_v57  ;;  %v12396_v57 = vld [vmem:[#allocation233_spill] sm:$0xff] }
 0x499   : > { %2537 = vst [vmem:[#allocation1 + $0x4] ss:$9 sm:$0xff] %v12386_v19  ;;  %v12397_v19 = vld [vmem:[#allocation234_spill] sm:$0xff] }
 0x49a   : > { %2538 = vst [vmem:[#allocation1 + $0x5] ss:$9 sm:$0xff] %v12387_v34  ;;  %v12398_v34 = vld [vmem:[#allocation235_spill] sm:$0xff] }
 0x49b   : > { %2539 = vst [vmem:[#allocation1 + $0x6] ss:$9 sm:$0xff] %v12388_v0 }
 0x49c   : > { %2540 = vst [vmem:[#allocation1 + $0x7] ss:$9 sm:$0xff] %v12389_v31  ;;  %v12400_v31 = vld [vmem:[#allocation236_spill] sm:$0xff] }
 0x4a3   : > { %v8806_v50 = vld [vmem:[#allocation1] sm:$0xff] }
 0x4a4   : > { %12390 = vst [vmem:[#allocation199_spill] sm:$0xff] %v8806_v50  ;;  %v12401_v50 = vld [vmem:[#allocation237_spill] sm:$0xff] }
 0x4a5   : > { %2543 = vst [vmem:[#allocation1] ss:$9 sm:$0xff] %v12391_v2  ;;  %v12402_v2 = vld [vmem:[#allocation239_spill] sm:$0xff] }
 0x4a6   : > { %2544 = vst [vmem:[#allocation1 + $0x1] ss:$9 sm:$0xff] %v12392_v21  ;;  %v12403_v21 = vld [vmem:[#allocation240_spill] sm:$0xff] }
 0x4a7   : > { %2545 = vst [vmem:[#allocation1 + $0x2] ss:$9 sm:$0xff] %v12393_v30  ;;  %v12404_v30 = vld [vmem:[#allocation241_spill] sm:$0xff] }
 0x4a8   : > { %2546 = vst [vmem:[#allocation1 + $0x3] ss:$9 sm:$0xff] %v12394_v62  ;;  %v12405_v62 = vld [vmem:[#allocation242_spill] sm:$0xff] }
 0x4a9   : > { %2547 = vst [vmem:[#allocation1 + $0x4] ss:$9 sm:$0xff] %v12395_v29  ;;  %v12406_v29 = vld [vmem:[#allocation243_spill] sm:$0xff] }
 0x4aa   : > { %2548 = vst [vmem:[#allocation1 + $0x5] ss:$9 sm:$0xff] %v12396_v57  ;;  %v12407_v57 = vld [vmem:[#allocation244_spill] sm:$0xff] }
 0x4ab   : > { %2549 = vst [vmem:[#allocation1 + $0x6] ss:$9 sm:$0xff] %v12397_v19 }
 0x4ac   : > { %2550 = vst [vmem:[#allocation1 + $0x7] ss:$9 sm:$0xff] %v12398_v34  ;;  %v12409_v34 = vld [vmem:[#allocation245_spill] sm:$0xff] }
 0x4b3   : > { %v8816_v0 = vld [vmem:[#allocation1] sm:$0xff] }
 0x4b4   : > { %12399 = vst [vmem:[#allocation200_spill] sm:$0xff] %v8816_v0  ;;  %v12410_v0 = vld [vmem:[#allocation246_spill] sm:$0xff] }
 0x4b5   : > { %2553 = vst [vmem:[#allocation1] ss:$9 sm:$0xff] %v12400_v31  ;;  %v12411_v31 = vld [vmem:[#allocation248_spill] sm:$0xff] }
 0x4b6   : > { %2554 = vst [vmem:[#allocation1 + $0x1] ss:$9 sm:$0xff] %v12401_v50  ;;  %v12412_v50 = vld [vmem:[#allocation249_spill] sm:$0xff] }
 0x4b7   : > { %2555 = vst [vmem:[#allocation1 + $0x2] ss:$9 sm:$0xff] %v12402_v2  ;;  %v12413_v2 = vld [vmem:[#allocation250_spill] sm:$0xff] }
 0x4b8   : > { %2556 = vst [vmem:[#allocation1 + $0x3] ss:$9 sm:$0xff] %v12403_v21  ;;  %v12414_v21 = vld [vmem:[#allocation251_spill] sm:$0xff] }
 0x4b9   : > { %2557 = vst [vmem:[#allocation1 + $0x4] ss:$9 sm:$0xff] %v12404_v30  ;;  %v12415_v30 = vld [vmem:[#allocation252_spill] sm:$0xff] }
 0x4ba   : > { %2558 = vst [vmem:[#allocation1 + $0x5] ss:$9 sm:$0xff] %v12405_v62  ;;  %v12416_v62 = vld [vmem:[#allocation253_spill] sm:$0xff] }
 0x4bb   : > { %2559 = vst [vmem:[#allocation1 + $0x6] ss:$9 sm:$0xff] %v12406_v29 }
 0x4bc   : > { %2560 = vst [vmem:[#allocation1 + $0x7] ss:$9 sm:$0xff] %v12407_v57  ;;  %v12418_v57 = vld [vmem:[#allocation254_spill] sm:$0xff] }
 0x4c3   : > { %v8826_v19 = vld [vmem:[#allocation1] sm:$0xff] }
 0x4c4   : > { %12408 = vst [vmem:[#allocation201_spill] sm:$0xff] %v8826_v19  ;;  %v12419_v19 = vld [vmem:[#allocation255_spill] sm:$0xff] }
 0x4c5   : > { %2563 = vst [vmem:[#allocation1] ss:$9 sm:$0xff] %v12409_v34  ;;  %v12420_v34 = vld [vmem:[#allocation257_spill] sm:$0xff] }
 0x4c6   : > { %2564 = vst [vmem:[#allocation1 + $0x1] ss:$9 sm:$0xff] %v12410_v0  ;;  %v12421_v0 = vld [vmem:[#allocation258_spill] sm:$0xff] }
 0x4c7   : > { %2565 = vst [vmem:[#allocation1 + $0x2] ss:$9 sm:$0xff] %v12411_v31  ;;  %v12422_v31 = vld [vmem:[#allocation259_spill] sm:$0xff] }
 0x4c8   : > { %2566 = vst [vmem:[#allocation1 + $0x3] ss:$9 sm:$0xff] %v12412_v50  ;;  %v12423_v50 = vld [vmem:[#allocation260_spill] sm:$0xff] }
 0x4c9   : > { %2567 = vst [vmem:[#allocation1 + $0x4] ss:$9 sm:$0xff] %v12413_v2  ;;  %v12424_v2 = vld [vmem:[#allocation261_spill] sm:$0xff] }
 0x4ca   : > { %2568 = vst [vmem:[#allocation1 + $0x5] ss:$9 sm:$0xff] %v12414_v21  ;;  %v12425_v21 = vld [vmem:[#allocation262_spill] sm:$0xff] }
 0x4cb   : > { %2569 = vst [vmem:[#allocation1 + $0x6] ss:$9 sm:$0xff] %v12415_v30 }
 0x4cc   : > { %2570 = vst [vmem:[#allocation1 + $0x7] ss:$9 sm:$0xff] %v12416_v62 }
 0x4d3   : > { %v8836_v29 = vld [vmem:[#allocation1] sm:$0xff] }
 0x4d4   : > { %12417 = vst [vmem:[#allocation202_spill] sm:$0xff] %v8836_v29  ;;  %v12426_v29 = vld [vmem:[#allocation263_spill] sm:$0xff] }
 0x4d5   : > { %2573 = vst [vmem:[#allocation1] ss:$9 sm:$0xff] %v12418_v57  ;;  %v12427_v57 = vld [vmem:[#allocation264_spill] sm:$0xff] }
 0x4d6   : > { %2574 = vst [vmem:[#allocation1 + $0x1] ss:$9 sm:$0xff] %v12419_v19  ;;  %v12428_v19 = vld [vmem:[#allocation266_spill] sm:$0xff] }
 0x4d7   : > { %2575 = vst [vmem:[#allocation1 + $0x2] ss:$9 sm:$0xff] %v12420_v34  ;;  %v12429_v34 = vld [vmem:[#allocation267_spill] sm:$0xff] }
 0x4d8   : > { %2576 = vst [vmem:[#allocation1 + $0x3] ss:$9 sm:$0xff] %v12421_v0  ;;  %v12430_v0 = vld [vmem:[#allocation268_spill] sm:$0xff] }
 0x4d9   : > { %2577 = vst [vmem:[#allocation1 + $0x4] ss:$9 sm:$0xff] %v12422_v31  ;;  %v12431_v31 = vld [vmem:[#allocation269_spill] sm:$0xff] }
 0x4da   : > { %2578 = vst [vmem:[#allocation1 + $0x5] ss:$9 sm:$0xff] %v12423_v50  ;;  %v12432_v50 = vld [vmem:[#allocation270_spill] sm:$0xff] }
 0x4db   : > { %2579 = vst [vmem:[#allocation1 + $0x6] ss:$9 sm:$0xff] %v12424_v2 }
 0x4dc   : > { %2580 = vst [vmem:[#allocation1 + $0x7] ss:$9 sm:$0xff] %v12425_v21 }
 0x4e3   : > { %v2581_v30 = vld [vmem:[#allocation1] sm:$0xff] }
 0x4e4   : > { %2640 = vrot.lane.b32.xlu0 %v2581_v30, %s6653_s23  ;;  %2583 = vst [vmem:[#allocation1] ss:$9 sm:$0xff] %v12426_v29  ;;  %v12433_v30 = vld [vmem:[#allocation277_spill] sm:$0xff]  ;;  %v2234_v29 = vshll.u32 %v8744_v7, 16 }
 0x4e5   : > { %2584 = vst [vmem:[#allocation1 + $0x1] ss:$9 sm:$0xff] %v12427_v57  ;;  %v2229_v57 = vshrl.u32 %v8741_v12, 16 }
 0x4e6   : > { %2585 = vst [vmem:[#allocation1 + $0x2] ss:$9 sm:$0xff] %v12428_v19 }
 0x4e7   : > { %2586 = vst [vmem:[#allocation1 + $0x3] ss:$9 sm:$0xff] %v12429_v34  ;;  %v2226_v34 = vshll.u32 %v8741_v12, 16 }
 0x4e8   : > { %2587 = vst [vmem:[#allocation1 + $0x4] ss:$9 sm:$0xff] %v12430_v0  ;;  %v12434_v0 = vld [vmem:[#allocation278_spill] sm:$0xff] }
 0x4e9   : > { %2588 = vst [vmem:[#allocation1 + $0x5] ss:$9 sm:$0xff] %v12431_v31  ;;  %v12435_v31 = vld [vmem:[#allocation279_spill] sm:$0xff] }
 0x4ea   : > { %2589 = vst [vmem:[#allocation1 + $0x6] ss:$9 sm:$0xff] %v12432_v50  ;;  %v12447_v50 = vld [vmem:[#allocation31_spill] sm:$0xff] }
 0x4eb   : > { %2590 = vst [vmem:[#allocation1 + $0x7] ss:$9 sm:$0xff] %v8211_v17  ;;  %v2190_v17 = vshrl.u32 %v8721_v4, 16 }
 0x4f2   : > { %v2591_v21 = vld [vmem:[#allocation1] sm:$0xff] }
 0x4f3   : > { %2593 = vst [vmem:[#allocation1] ss:$9 sm:$0xff] %v8217_v49  ;;  %2642 = vrot.lane.b32.xlu2 %v2591_v21, %s6653_s23  ;;  %v2195_v49 = vshll.u32 %v8723_v27, 16  ;;  %v2198_v21 = vshrl.u32 %v8723_v27, 16 }
 0x4f4   : > { %2594 = vst [vmem:[#allocation1 + $0x1] ss:$9 sm:$0xff] %v8223_v32  ;;  %v2203_v32 = vshll.u32 %v8725_v59, 16 }
 0x4f5   : > { %2595 = vst [vmem:[#allocation1 + $0x2] ss:$9 sm:$0xff] %v8231_v60  ;;  %v2206_v60 = vshrl.u32 %v8725_v59, 16 }
 0x4f6   : > { %2596 = vst [vmem:[#allocation1 + $0x3] ss:$9 sm:$0xff] %v8238_v44  ;;  %v2211_v44 = vshll.u32 %v8731_v15, 16  ;;  %v8880_v19 = vsel %vm7622_vm6, %v2198_v21, %v2203_v32  ;;  %v12438_v21 = vrot.slane %v8577_v39, 3 }
 0x4f7   : > { %2597 = vst [vmem:[#allocation1 + $0x4] ss:$9 sm:$0xff] %v12433_v30  ;;  %v2214_v30 = vshrl.u32 %v8731_v15, 16 }
 0x4f8   : > { %2598 = vst [vmem:[#allocation1 + $0x5] ss:$9 sm:$0xff] %v12434_v0  ;;  %v2218_v0 = vshll.u32 %v8739_v51, 16  ;;  %v8888_v62 = vsel %vm7622_vm6, %v2206_v60, %v2211_v44  ;;  %v2187_v12 = vsel %vm470_vm0, %v8577_v39, %v12438_v21  ;;  %v8909_v44 = vsel %vm7622_vm6, %v2229_v57, %v2234_v29 }
 0x4f9   : > { %2599 = vst [vmem:[#allocation1 + $0x6] ss:$9 sm:$0xff] %v12435_v31  ;;  %v8874_v31 = vsel %vm7622_vm6, %v2190_v17, %v2195_v49  ;;  %v2237_v49 = vshrl.u32 %v8744_v7, 16  ;;  %v2242_v17 = vshll.u32 %v8754_v47, 16  ;;  %v2249_v57 = vshll.u32 %v8760_v45, 16 }
 0x4fa   : > { %2600 = vst [vmem:[#allocation1 + $0x7] ss:$9 sm:$0xff] %v8268_v42  ;;  %v2221_v42 = vshrl.u32 %v8739_v51, 16  ;;  %v12437_v51 = vld [vmem:[#allocation281_spill] sm:$0xff]  ;;  %v8895_v32 = vsel %vm7622_vm6, %v2214_v30, %v2218_v0  ;;  %v2189_v30 = vrot.slane %v2187_v12, 1 }
 0x4fb   : > { %v8914_v0 = vsel %vm7622_vm6, %v2237_v49, %v2242_v17 }
 0x4fc   : > { %v8904_v60 = vsel %vm7622_vm6, %v2221_v42, %v2226_v34  ;;  %12439 = vst [vmem:[#allocation203_spill] sm:$0xff] %v8914_v0  ;;  %v2245_v42 = vshrl.u32 %v8754_v47, 16  ;;  %v2252_v34 = vshrl.u32 %v8760_v45, 16  ;;  %v2257_v29 = vshll.u32 %v2189_v30, 16  ;;  %v12442_v30 = vld [vmem:[#allocation26_spill] sm:$0xff] }
 0x4fe   : > { %v8925_v49 = vsel %vm7622_vm6, %v2245_v42, %v2249_v57  ;;  %v8929_v12 = vsel %vm7622_vm6, %v2252_v34, %v2257_v29  ;;  %v12443_v42 = vld [vmem:[#allocation21_spill] sm:$0xff]  ;;  %v12444_v57 = vld [vmem:[#allocation22_spill] sm:$0xff]  ;;  %v12445_v34 = vld [vmem:[#allocation23_spill] sm:$0xff] }
 0x4ff   : > { %12440 = vst [vmem:[#allocation204_spill] sm:$0xff] %v8925_v49  ;;  %v12446_v29 = vld [vmem:[#allocation24_spill] sm:$0xff] }
 0x500   : > { %12441 = vst [vmem:[#allocation281_spill] sm:$0xff] %v8929_v12 }
 0x501   : > { %v8884_v2 = vld [vmem:[#allocation1] sm:$0xff] }
 0x502   : > { %2603 = vst [vmem:[#allocation1] ss:$9 sm:$0xff] %v12437_v51 }
 0x503   : > { %2605 = vst [vmem:[#allocation1 + $0x1] ss:$9 sm:$0xff] %v8874_v31 }
 0x504   : > { %2607 = vst [vmem:[#allocation1 + $0x2] ss:$9 sm:$0xff] %v8880_v19 }
 0x505   : > { %2609 = vst [vmem:[#allocation1 + $0x3] ss:$9 sm:$0xff] %v8888_v62 }
 0x506   : > { %2611 = vst [vmem:[#allocation1 + $0x4] ss:$9 sm:$0xff] %v8895_v32 }
 0x507   : > { %2613 = vst [vmem:[#allocation1 + $0x5] ss:$9 sm:$0xff] %v8904_v60 }
 0x508   : > { %2615 = vst [vmem:[#allocation1 + $0x6] ss:$9 sm:$0xff] %v8909_v44 }
 0x509   : > { %2617 = vst [vmem:[#allocation1 + $0x7] ss:$9 sm:$0xff] %v8914_v0  ;;  %v12499_v0 = vld [vmem:[#allocation94_spill] sm:$0xff] }
 0x510   : > { %v2618_v17 = vld [vmem:[#allocation1] sm:$0xff] }
 0x511   : > { %2621 = vst [vmem:[#allocation1] ss:$9 sm:$0xff] %v8925_v49  ;;  %2646 = vrot.lane.b32.xlu1 %v2618_v17, %s6653_s23  ;;  %v12449_v49 = vld [vmem:[#allocation27_spill] sm:$0xff] }
 0x512   : > { %2623 = vst [vmem:[#allocation1 + $0x1] ss:$9 sm:$0xff] %v8929_v12  ;;  %v12448_v12 = vld [vmem:[#allocation33_spill] sm:$0xff] }
 0x519   : > { %v8934_v21 = vld [vmem:[#allocation1] sm:$0xff] }
 0x51a   : > { %2650 = vst [vmem:[#allocation1] ss:$9 sm:$0xff] %v8405_v55  ;;  %v12450_v55 = vld [vmem:[#allocation29_spill] sm:$0xff] }
 0x51b   : > { %2652 = vst [vmem:[#allocation1 + $0x1] ss:$9 sm:$0xff] %v8407_v10  ;;  %v12451_v10 = vld [vmem:[#allocation30_spill] sm:$0xff] }
 0x51c   : > { %2654 = vst [vmem:[#allocation1 + $0x2] ss:$9 sm:$0xff] %v12442_v30  ;;  %v12452_v30 = vld [vmem:[#allocation36_spill] sm:$0xff] }
 0x51d   : > { %2656 = vst [vmem:[#allocation1 + $0x3] ss:$9 sm:$0xff] %v12443_v42  ;;  %v12453_v42 = vld [vmem:[#allocation38_spill] sm:$0xff] }
 0x51e   : > { %2658 = vst [vmem:[#allocation1 + $0x4] ss:$9 sm:$0xff] %v12444_v57  ;;  %v12454_v57 = vld [vmem:[#allocation39_spill] sm:$0xff] }
 0x51f   : > { %2660 = vst [vmem:[#allocation1 + $0x5] ss:$9 sm:$0xff] %v12445_v34 }
 0x520   : > { %2662 = vst [vmem:[#allocation1 + $0x6] ss:$9 sm:$0xff] %v12446_v29  ;;  %v12456_v29 = vld [vmem:[#allocation35_spill] sm:$0xff] }
 0x521   : > { %2664 = vst [vmem:[#allocation1 + $0x7] ss:$9 sm:$0xff] %v12447_v50  ;;  %v12455_v50 = vld [vmem:[#allocation34_spill] sm:$0xff] }
 0x528   : > { %v8944_v17 = vld [vmem:[#allocation1] sm:$0xff] }
 0x529   : > { %2667 = vst [vmem:[#allocation1] ss:$9 sm:$0xff] %v12448_v12  ;;  %v12458_v12 = vld [vmem:[#allocation48_spill] sm:$0xff] }
 0x52a   : > { %2668 = vst [vmem:[#allocation1 + $0x1] ss:$9 sm:$0xff] %v12449_v49  ;;  %v12457_v49 = vld [vmem:[#allocation46_spill] sm:$0xff] }
 0x52b   : > { %2669 = vst [vmem:[#allocation1 + $0x2] ss:$9 sm:$0xff] %v12450_v55  ;;  %v12459_v55 = vld [vmem:[#allocation41_spill] sm:$0xff] }
 0x52c   : > { %2670 = vst [vmem:[#allocation1 + $0x3] ss:$9 sm:$0xff] %v12451_v10  ;;  %v12460_v10 = vld [vmem:[#allocation42_spill] sm:$0xff] }
 0x52d   : > { %2671 = vst [vmem:[#allocation1 + $0x4] ss:$9 sm:$0xff] %v12452_v30  ;;  %v12461_v30 = vld [vmem:[#allocation43_spill] sm:$0xff] }
 0x52e   : > { %2672 = vst [vmem:[#allocation1 + $0x5] ss:$9 sm:$0xff] %v12453_v42  ;;  %v12462_v42 = vld [vmem:[#allocation45_spill] sm:$0xff] }
 0x52f   : > { %2673 = vst [vmem:[#allocation1 + $0x6] ss:$9 sm:$0xff] %v8433_v23 }
 0x530   : > { %2674 = vst [vmem:[#allocation1 + $0x7] ss:$9 sm:$0xff] %v12454_v57  ;;  %v12463_v57 = vld [vmem:[#allocation53_spill] sm:$0xff] }
 0x537   : > { %v8954_v34 = vld [vmem:[#allocation1] sm:$0xff] }
 0x538   : > { %2677 = vst [vmem:[#allocation1] ss:$9 sm:$0xff] %v12455_v50  ;;  %v12464_v50 = vld [vmem:[#allocation54_spill] sm:$0xff] }
 0x539   : > { %2678 = vst [vmem:[#allocation1 + $0x1] ss:$9 sm:$0xff] %v12456_v29  ;;  %v12465_v29 = vld [vmem:[#allocation49_spill] sm:$0xff] }
 0x53a   : > { %2679 = vst [vmem:[#allocation1 + $0x2] ss:$9 sm:$0xff] %v8447_v36  ;;  %v12466_v36 = vld [vmem:[#allocation50_spill] sm:$0xff] }
 0x53b   : > { %2680 = vst [vmem:[#allocation1 + $0x3] ss:$9 sm:$0xff] %v12457_v49  ;;  %v12467_v49 = vld [vmem:[#allocation51_spill] sm:$0xff] }
 0x53c   : > { %2681 = vst [vmem:[#allocation1 + $0x4] ss:$9 sm:$0xff] %v12458_v12  ;;  %v12468_v12 = vld [vmem:[#allocation58_spill] sm:$0xff] }
 0x53d   : > { %2682 = vst [vmem:[#allocation1 + $0x5] ss:$9 sm:$0xff] %v12459_v55  ;;  %v12469_v55 = vld [vmem:[#allocation59_spill] sm:$0xff] }
 0x53e   : > { %2683 = vst [vmem:[#allocation1 + $0x6] ss:$9 sm:$0xff] %v12460_v10 }
 0x53f   : > { %2684 = vst [vmem:[#allocation1 + $0x7] ss:$9 sm:$0xff] %v12461_v30  ;;  %v12470_v30 = vld [vmem:[#allocation60_spill] sm:$0xff] }
 0x546   : > { %v8964_v23 = vld [vmem:[#allocation1] sm:$0xff] }
 0x547   : > { %2687 = vst [vmem:[#allocation1] ss:$9 sm:$0xff] %v12462_v42  ;;  %v12471_v42 = vld [vmem:[#allocation55_spill] sm:$0xff] }
 0x548   : > { %2688 = vst [vmem:[#allocation1 + $0x1] ss:$9 sm:$0xff] %v12463_v57  ;;  %v12472_v57 = vld [vmem:[#allocation57_spill] sm:$0xff] }
 0x549   : > { %2689 = vst [vmem:[#allocation1 + $0x2] ss:$9 sm:$0xff] %v12464_v50  ;;  %v12473_v50 = vld [vmem:[#allocation67_spill] sm:$0xff] }
 0x54a   : > { %2690 = vst [vmem:[#allocation1 + $0x3] ss:$9 sm:$0xff] %v12465_v29  ;;  %v12474_v29 = vld [vmem:[#allocation69_spill] sm:$0xff] }
 0x54b   : > { %2691 = vst [vmem:[#allocation1 + $0x4] ss:$9 sm:$0xff] %v12466_v36  ;;  %v12475_v36 = vld [vmem:[#allocation62_spill] sm:$0xff] }
 0x54c   : > { %2692 = vst [vmem:[#allocation1 + $0x5] ss:$9 sm:$0xff] %v12467_v49 }
 0x54d   : > { %2693 = vst [vmem:[#allocation1 + $0x6] ss:$9 sm:$0xff] %v12468_v12  ;;  %v12476_v12 = vld [vmem:[#allocation63_spill] sm:$0xff] }
 0x54e   : > { %2694 = vst [vmem:[#allocation1 + $0x7] ss:$9 sm:$0xff] %v12469_v55  ;;  %v12477_v55 = vld [vmem:[#allocation65_spill] sm:$0xff] }
 0x555   : > { %v8974_v10 = vld [vmem:[#allocation1] sm:$0xff] }
 0x556   : > { %2697 = vst [vmem:[#allocation1] ss:$9 sm:$0xff] %v8475_v26  ;;  %v12478_v26 = vld [vmem:[#allocation66_spill] sm:$0xff] }
 0x557   : > { %2698 = vst [vmem:[#allocation1 + $0x1] ss:$9 sm:$0xff] %v12470_v30  ;;  %v12479_v30 = vld [vmem:[#allocation74_spill] sm:$0xff] }
 0x558   : > { %2699 = vst [vmem:[#allocation1 + $0x2] ss:$9 sm:$0xff] %v12471_v42  ;;  %v12480_v42 = vld [vmem:[#allocation75_spill] sm:$0xff] }
 0x559   : > { %2700 = vst [vmem:[#allocation1 + $0x3] ss:$9 sm:$0xff] %v12472_v57  ;;  %v12481_v57 = vld [vmem:[#allocation70_spill] sm:$0xff] }
 0x55a   : > { %2701 = vst [vmem:[#allocation1 + $0x4] ss:$9 sm:$0xff] %v8489_v54  ;;  %v12482_v54 = vld [vmem:[#allocation71_spill] sm:$0xff] }
 0x55b   : > { %2702 = vst [vmem:[#allocation1 + $0x5] ss:$9 sm:$0xff] %v12473_v50  ;;  %v12483_v50 = vld [vmem:[#allocation73_spill] sm:$0xff] }
 0x55c   : > { %2703 = vst [vmem:[#allocation1 + $0x6] ss:$9 sm:$0xff] %v12474_v29 }
 0x55d   : > { %2704 = vst [vmem:[#allocation1 + $0x7] ss:$9 sm:$0xff] %v12475_v36  ;;  %v12484_v36 = vld [vmem:[#allocation79_spill] sm:$0xff] }
 0x564   : > { %v8984_v49 = vld [vmem:[#allocation1] sm:$0xff] }
 0x565   : > { %2707 = vst [vmem:[#allocation1] ss:$9 sm:$0xff] %v12476_v12  ;;  %v12485_v12 = vld [vmem:[#allocation81_spill] sm:$0xff] }
 0x566   : > { %2708 = vst [vmem:[#allocation1 + $0x1] ss:$9 sm:$0xff] %v12477_v55  ;;  %v12486_v55 = vld [vmem:[#allocation77_spill] sm:$0xff] }
 0x567   : > { %2709 = vst [vmem:[#allocation1 + $0x2] ss:$9 sm:$0xff] %v12478_v26  ;;  %v12487_v26 = vld [vmem:[#allocation78_spill] sm:$0xff] }
 0x568   : > { %2710 = vst [vmem:[#allocation1 + $0x3] ss:$9 sm:$0xff] %v12479_v30  ;;  %v12488_v30 = vld [vmem:[#allocation87_spill] sm:$0xff] }
 0x569   : > { %2711 = vst [vmem:[#allocation1 + $0x4] ss:$9 sm:$0xff] %v12480_v42  ;;  %v12489_v42 = vld [vmem:[#allocation89_spill] sm:$0xff] }
 0x56a   : > { %2712 = vst [vmem:[#allocation1 + $0x5] ss:$9 sm:$0xff] %v12481_v57 }
 0x56b   : > { %2713 = vst [vmem:[#allocation1 + $0x6] ss:$9 sm:$0xff] %v12482_v54  ;;  %v12490_v54 = vld [vmem:[#allocation90_spill] sm:$0xff] }
 0x56c   : > { %2714 = vst [vmem:[#allocation1 + $0x7] ss:$9 sm:$0xff] %v12483_v50  ;;  %v12491_v50 = vld [vmem:[#allocation82_spill] sm:$0xff] }
 0x573   : > { %v8994_v29 = vld [vmem:[#allocation1] sm:$0xff] }
 0x574   : > { %2717 = vst [vmem:[#allocation1] ss:$9 sm:$0xff] %v12484_v36  ;;  %v12492_v36 = vld [vmem:[#allocation83_spill] sm:$0xff] }
 0x575   : > { %2718 = vst [vmem:[#allocation1 + $0x1] ss:$9 sm:$0xff] %v8515_v3  ;;  %v12493_v3 = vld [vmem:[#allocation84_spill] sm:$0xff] }
 0x576   : > { %2719 = vst [vmem:[#allocation1 + $0x2] ss:$9 sm:$0xff] %v12485_v12  ;;  %v12494_v12 = vld [vmem:[#allocation86_spill] sm:$0xff] }
 0x577   : > { %2720 = vst [vmem:[#allocation1 + $0x3] ss:$9 sm:$0xff] %v8519_v61  ;;  %v12495_v61 = vld [vmem:[#allocation95_spill] sm:$0xff] }
 0x578   : > { %2721 = vst [vmem:[#allocation1 + $0x4] ss:$9 sm:$0xff] %v12486_v55  ;;  %v12496_v55 = vld [vmem:[#allocation97_spill] sm:$0xff] }
 0x579   : > { %2722 = vst [vmem:[#allocation1 + $0x5] ss:$9 sm:$0xff] %v12487_v26  ;;  %v12497_v26 = vld [vmem:[#allocation91_spill] sm:$0xff] }
 0x57a   : > { %2723 = vst [vmem:[#allocation1 + $0x6] ss:$9 sm:$0xff] %v12488_v30 }
 0x57b   : > { %2724 = vst [vmem:[#allocation1 + $0x7] ss:$9 sm:$0xff] %v12489_v42  ;;  %v12498_v42 = vld [vmem:[#allocation93_spill] sm:$0xff] }
 0x582   : > { %v9004_v57 = vld [vmem:[#allocation1] sm:$0xff] }
 0x583   : > { %2727 = vst [vmem:[#allocation1] ss:$9 sm:$0xff] %v12490_v54  ;;  %v12500_v54 = vld [vmem:[#allocation101_spill] sm:$0xff] }
 0x584   : > { %2728 = vst [vmem:[#allocation1 + $0x1] ss:$9 sm:$0xff] %v12491_v50  ;;  %v12501_v50 = vld [vmem:[#allocation102_spill] sm:$0xff] }
 0x585   : > { %2729 = vst [vmem:[#allocation1 + $0x2] ss:$9 sm:$0xff] %v12492_v36  ;;  %v12502_v36 = vld [vmem:[#allocation103_spill] sm:$0xff] }
 0x586   : > { %2730 = vst [vmem:[#allocation1 + $0x3] ss:$9 sm:$0xff] %v12493_v3  ;;  %v12503_v3 = vld [vmem:[#allocation106_spill] sm:$0xff] }
 0x587   : > { %2731 = vst [vmem:[#allocation1 + $0x4] ss:$9 sm:$0xff] %v12494_v12  ;;  %v12504_v12 = vld [vmem:[#allocation98_spill] sm:$0xff] }
 0x588   : > { %2732 = vst [vmem:[#allocation1 + $0x5] ss:$9 sm:$0xff] %v12495_v61  ;;  %v12505_v61 = vld [vmem:[#allocation99_spill] sm:$0xff] }
 0x589   : > { %2733 = vst [vmem:[#allocation1 + $0x6] ss:$9 sm:$0xff] %v12496_v55 }
 0x58a   : > { %2734 = vst [vmem:[#allocation1 + $0x7] ss:$9 sm:$0xff] %v12497_v26  ;;  %v12506_v26 = vld [vmem:[#allocation114_spill] sm:$0xff] }
 0x591   : > { %v2735_v30 = vld [vmem:[#allocation1] sm:$0xff] }
 0x592   : > { %2737 = vst [vmem:[#allocation1] ss:$9 sm:$0xff] %v12498_v42  ;;  %v12507_v42 = vld [vmem:[#allocation115_spill] sm:$0xff]  ;;  %2785 = vrot.lane.b32.xlu0 %v2735_v30, %s6654_s9  ;;  %v12517_v30 = vld [vmem:[#allocation20_spill] sm:$0xff] }
 0x593   : > { %2738 = vst [vmem:[#allocation1 + $0x1] ss:$9 sm:$0xff] %v12499_v0  ;;  %v12508_v0 = vld [vmem:[#allocation107_spill] sm:$0xff] }
 0x594   : > { %2739 = vst [vmem:[#allocation1 + $0x2] ss:$9 sm:$0xff] %v12500_v54  ;;  %v12509_v54 = vld [vmem:[#allocation108_spill] sm:$0xff] }
 0x595   : > { %2740 = vst [vmem:[#allocation1 + $0x3] ss:$9 sm:$0xff] %v12501_v50  ;;  %v12510_v50 = vld [vmem:[#allocation110_spill] sm:$0xff] }
 0x596   : > { %2741 = vst [vmem:[#allocation1 + $0x4] ss:$9 sm:$0xff] %v12502_v36  ;;  %v12511_v36 = vld [vmem:[#allocation111_spill] sm:$0xff] }
 0x597   : > { %2742 = vst [vmem:[#allocation1 + $0x5] ss:$9 sm:$0xff] %v12503_v3 }
 0x598   : > { %2743 = vst [vmem:[#allocation1 + $0x6] ss:$9 sm:$0xff] %v12504_v12  ;;  %v12512_v12 = vld [vmem:[#allocation116_spill] sm:$0xff] }
 0x599   : > { %2744 = vst [vmem:[#allocation1 + $0x7] ss:$9 sm:$0xff] %v12505_v61  ;;  %v12514_v61 = vld [vmem:[#allocation118_spill] sm:$0xff] }
 0x59a   : > { %2648 = vrot.lane.b32.xlu0 %v8934_v21, %s6653_s23 }
 0x5a0   : > { %v2745_v55 = vld [vmem:[#allocation1] sm:$0xff] }
 0x5a1   : > { %2747 = vst [vmem:[#allocation1] ss:$9 sm:$0xff] %v8579_v41  ;;  %v12513_v41 = vld [vmem:[#allocation117_spill] sm:$0xff]  ;;  %2787 = vrot.lane.b32.xlu2 %v2745_v55, %s6654_s9  ;;  %v12518_v55 = vld [vmem:[#allocation32_spill] sm:$0xff] }
 0x5a2   : > { %2748 = vst [vmem:[#allocation1 + $0x1] ss:$9 sm:$0xff] %v12506_v26 }
 0x5a3   : > { %2749 = vst [vmem:[#allocation1 + $0x2] ss:$9 sm:$0xff] %v12507_v42 }
 0x5a4   : > { %2750 = vst [vmem:[#allocation1 + $0x3] ss:$9 sm:$0xff] %v12508_v0 }
 0x5a5   : > { %2751 = vst [vmem:[#allocation1 + $0x4] ss:$9 sm:$0xff] %v12509_v54 }
 0x5a6   : > { %2752 = vst [vmem:[#allocation1 + $0x5] ss:$9 sm:$0xff] %v12510_v50 }
 0x5a7   : > { %2753 = vst [vmem:[#allocation1 + $0x6] ss:$9 sm:$0xff] %v12511_v36  ;;  %v12520_v36 = vld [vmem:[#allocation40_spill] sm:$0xff] }
 0x5a8   : > { %2754 = vst [vmem:[#allocation1 + $0x7] ss:$9 sm:$0xff] %v8596_v52  ;;  %v12515_v52 = vld [vmem:[#allocation120_spill] sm:$0xff] }
 0x5a9   : > { %2644 = vrot.lane.b32.xlu2 %v8884_v2, %s6653_s23 }
 0x5af   : > { %v2755_v3 = vld [vmem:[#allocation1] sm:$0xff] }
 0x5b0   : > { %2757 = vst [vmem:[#allocation1] ss:$9 sm:$0xff] %v8598_v46  ;;  %v12516_v46 = vld [vmem:[#allocation25_spill] sm:$0xff]  ;;  %2789 = vrot.lane.b32.xlu0 %v2755_v3, %s6654_s9 }
 0x5b1   : > { %2758 = vst [vmem:[#allocation1 + $0x1] ss:$9 sm:$0xff] %v12512_v12  ;;  %v12521_v12 = vld [vmem:[#allocation28_spill] sm:$0xff] }
 0x5b2   : > { %2759 = vst [vmem:[#allocation1 + $0x2] ss:$9 sm:$0xff] %v12513_v41  ;;  %v12522_v41 = vld [vmem:[#allocation197_spill] sm:$0xff] }
 0x5b3   : > { %2760 = vst [vmem:[#allocation1 + $0x3] ss:$9 sm:$0xff] %v12514_v61 }
 0x5b4   : > { %2761 = vst [vmem:[#allocation1 + $0x4] ss:$9 sm:$0xff] %v8605_v20 }
 0x5b5   : > { %2762 = vst [vmem:[#allocation1 + $0x5] ss:$9 sm:$0xff] %v8607_v40 }
 0x5b6   : > { %2763 = vst [vmem:[#allocation1 + $0x6] ss:$9 sm:$0xff] %v8609_v14 }
 0x5b7   : > { %2764 = vst [vmem:[#allocation1 + $0x7] ss:$9 sm:$0xff] %v8611_v35 }
 0x5b8   : > { %1932 = vrot.lane.b32.xlu0 %v12522_v41, %s6653_s23 }
 0x5be   : > { %v2765_v26 = vld [vmem:[#allocation1] sm:$0xff] }
 0x5bf   : > { %2767 = vst [vmem:[#allocation1] ss:$9 sm:$0xff] %v8601_v58  ;;  %2791 = vrot.lane.b32.xlu1 %v2765_v26, %s6654_s9  ;;  %v12525_v26 = vld [vmem:[#allocation47_spill] sm:$0xff] }
 0x5c0   : > { %2768 = vst [vmem:[#allocation1 + $0x1] ss:$9 sm:$0xff] %v12515_v52  ;;  %2771 = vrot.lane.b32.xlu0 %v8944_v17, %s6654_s9  ;;  %v12536_v17 = vld [vmem:[#allocation206_spill] sm:$0xff] }
 0x5c1   : > { %3164 = vst [vmem:[#allocation1 + $0x20] sm:$0xff] %v12516_v46 }
 0x5c7   : > { %v2769_v14 = vld [vmem:[#allocation1] sm:$0xff] }
 0x5c8   : > { %v9048_v35 = vld [vmem:[#allocation1 + $0x20] ss:$4 sm:$0xff]  ;;  %v9050_v40 = vld [vmem:[#allocation1 + $0x21] ss:$4 sm:$0xff]  ;;  %v9052_v20 = vld [vmem:[#allocation1 + $0x22] ss:$4 sm:$0xff]  ;;  %2793 = vrot.lane.b32.xlu1 %v2769_v14, %s6654_s9  ;;  %1934 = vrot.lane.b32.xlu0 %v12536_v17, %s6653_s23 }
 0x5c9   : > { %v9055_v58 = vld [vmem:[#allocation1 + $0x23] ss:$4 sm:$0xff]  ;;  %3163 = vst [vmem:[#allocation1] sm:$0xff] %v12517_v30 }
 0x5ca   : > { %3182 = vst [vmem:[#allocation1 + $0x20] sm:$0xff] %v12518_v55  ;;  %v12526_v55 = vld [vmem:[#allocation37_spill] sm:$0xff] }
 0x5d0   : > { %v9060_v21 = vld [vmem:[#allocation1 + $0x1] ss:$4 sm:$0xff]  ;;  %v9062_v2 = vld [vmem:[#allocation1 + $0x2] ss:$4 sm:$0xff]  ;;  %v9064_v42 = vld [vmem:[#allocation1 + $0x3] ss:$4 sm:$0xff]  ;;  %2773 = vrot.lane.b32.xlu0 %v8954_v34, %s6654_s9 }
 0x5d1   : > { %v9066_v0 = vld [vmem:[#allocation1 + $0x21] ss:$4 sm:$0xff]  ;;  %v9068_v54 = vld [vmem:[#allocation1 + $0x22] ss:$4 sm:$0xff]  ;;  %v9070_v50 = vld [vmem:[#allocation1 + $0x23] ss:$4 sm:$0xff] }
 0x5d2   : > { %12519 = vst [vmem:[#allocation26_spill] sm:$0xff] %v9070_v50  ;;  %v12535_v50 = vld [vmem:[#allocation44_spill] sm:$0xff] }
 0x5d3   : > { %3187 = vst [vmem:[#allocation1 + $0x20] sm:$0xff] %v12520_v36 }
 0x5d4   : > { %3179 = vst [vmem:[#allocation1] sm:$0xff] %v12521_v12 }
 0x5da   : > { %v9076_v3 = vld [vmem:[#allocation1 + $0x20] ss:$4 sm:$0xff]  ;;  %v9078_v61 = vld [vmem:[#allocation1 + $0x21] ss:$4 sm:$0xff] }
 0x5db   : > { %12523 = vst [vmem:[#allocation21_spill] sm:$0xff] %v9076_v3  ;;  %v9081_v52 = vld [vmem:[#allocation1] ss:$4 sm:$0xff]  ;;  %v9083_v14 = vld [vmem:[#allocation1 + $0x1] ss:$4 sm:$0xff] }
 0x5dc   : > { %12524 = vst [vmem:[#allocation22_spill] sm:$0xff] %v9078_v61  ;;  %v12532_v61 = vld [vmem:[#allocation56_spill] sm:$0xff] }
 0x5dd   : > { %3195 = vst [vmem:[#allocation1 + $0x20] sm:$0xff] %v12525_v26 }
 0x5de   : > { %3186 = vst [vmem:[#allocation1] sm:$0xff] %v12526_v55 }
 0x5e4   : > { %v9088_v36 = vld [vmem:[#allocation1 + $0x20] ss:$4 sm:$0xff]  ;;  %v9090_v12 = vld [vmem:[#allocation1 + $0x21] ss:$4 sm:$0xff]  ;;  %v9092_v41 = vld [vmem:[#allocation1 + $0x22] ss:$4 sm:$0xff] }
 0x5e5   : > { %12527 = vst [vmem:[#allocation23_spill] sm:$0xff] %v9088_v36  ;;  %v9094_v46 = vld [vmem:[#allocation1 + $0x23] ss:$4 sm:$0xff]  ;;  %v9096_v30 = vld [vmem:[#allocation1] ss:$4 sm:$0xff] }
 0x5e6   : > { %12528 = vst [vmem:[#allocation24_spill] sm:$0xff] %v9090_v12  ;;  %v9098_v26 = vld [vmem:[#allocation1 + $0x1] ss:$4 sm:$0xff]  ;;  %v9101_v3 = vld [vmem:[#allocation1 + $0x2] ss:$4 sm:$0xff] }
 0x5e7   : > { %12529 = vst [vmem:[#allocation31_spill] sm:$0xff] %v9092_v41  ;;  %v9103_v55 = vld [vmem:[#allocation1 + $0x3] ss:$4 sm:$0xff] }
 0x5e8   : > { %12530 = vst [vmem:[#allocation33_spill] sm:$0xff] %v9094_v46  ;;  %v12540_v36 = vld [vmem:[#allocation64_spill] sm:$0xff] }
 0x5e9   : > { %12531 = vst [vmem:[#allocation27_spill] sm:$0xff] %v9098_v26 }
 0x5ea   : > { %3206 = vst [vmem:[#allocation1 + $0x20] sm:$0xff] %v12532_v61 }
 0x5eb   : > { %12533 = vst [vmem:[#allocation29_spill] sm:$0xff] %v9101_v3 }
 0x5ec   : > { %12534 = vst [vmem:[#allocation30_spill] sm:$0xff] %v9103_v55  ;;  %v12544_v55 = vld [vmem:[#allocation52_spill] sm:$0xff] }
 0x5ed   : > { %3194 = vst [vmem:[#allocation1] sm:$0xff] %v12535_v50 }
 0x5f1   : > { %v9108_v12 = vld [vmem:[#allocation1 + $0x21] ss:$4 sm:$0xff]  ;;  %v9110_v41 = vld [vmem:[#allocation1 + $0x22] ss:$4 sm:$0xff]  ;;  %v9112_v46 = vld [vmem:[#allocation1 + $0x23] ss:$4 sm:$0xff] }
 0x5f2   : > { %12537 = vst [vmem:[#allocation36_spill] sm:$0xff] %v9108_v12  ;;  %v12550_v12 = vld [vmem:[#allocation61_spill] sm:$0xff] }
 0x5f3   : > { %12538 = vst [vmem:[#allocation38_spill] sm:$0xff] %v9110_v41  ;;  %v12547_v41 = vld [vmem:[#allocation72_spill] sm:$0xff] }
 0x5f4   : > { %12539 = vst [vmem:[#allocation39_spill] sm:$0xff] %v9112_v46  ;;  %v9115_v26 = vld [vmem:[#allocation1 + $0x1] ss:$4 sm:$0xff]  ;;  %v9117_v61 = vld [vmem:[#allocation1 + $0x2] ss:$4 sm:$0xff] }
 0x5f5   : > { %3211 = vst [vmem:[#allocation1 + $0x20] sm:$0xff] %v12540_v36  ;;  %v9119_v3 = vld [vmem:[#allocation1 + $0x3] ss:$4 sm:$0xff] }
 0x5f6   : > { %12541 = vst [vmem:[#allocation34_spill] sm:$0xff] %v9115_v26  ;;  %v12559_v26 = vld [vmem:[#allocation68_spill] sm:$0xff] }
 0x5f7   : > { %12542 = vst [vmem:[#allocation35_spill] sm:$0xff] %v9117_v61  ;;  %v12551_v61 = vld [vmem:[#allocation127_spill] sm:$0xff] }
 0x5f8   : > { %12543 = vst [vmem:[#allocation46_spill] sm:$0xff] %v9119_v3  ;;  %1936 = vrot.lane.b32.xlu0 %v12551_v61, %s6653_s23 }
 0x5f9   : > { %3203 = vst [vmem:[#allocation1] sm:$0xff] %v12544_v55 }
 0x5fc   : > { %v9124_v17 = vld [vmem:[#allocation1 + $0x20] ss:$4 sm:$0xff]  ;;  %v9126_v50 = vld [vmem:[#allocation1 + $0x21] ss:$4 sm:$0xff] }
 0x5fd   : > { %12545 = vst [vmem:[#allocation48_spill] sm:$0xff] %v9124_v17 }
 0x5fe   : > { %12546 = vst [vmem:[#allocation41_spill] sm:$0xff] %v9126_v50  ;;  %v12556_v50 = vld [vmem:[#allocation80_spill] sm:$0xff] }
 0x5ff   : > { %3219 = vst [vmem:[#allocation1 + $0x20] sm:$0xff] %v12547_v41 }
 0x600   : > { %v9129_v46 = vld [vmem:[#allocation1] ss:$4 sm:$0xff]  ;;  %v9131_v36 = vld [vmem:[#allocation1 + $0x1] ss:$4 sm:$0xff]  ;;  %2775 = vrot.lane.b32.xlu0 %v8964_v23, %s6654_s9 }
 0x601   : > { %12548 = vst [vmem:[#allocation42_spill] sm:$0xff] %v9129_v46 }
 0x602   : > { %12549 = vst [vmem:[#allocation43_spill] sm:$0xff] %v9131_v36 }
 0x603   : > { %3210 = vst [vmem:[#allocation1] sm:$0xff] %v12550_v12 }
 0x606   : > { %v9136_v3 = vld [vmem:[#allocation1 + $0x20] ss:$4 sm:$0xff]  ;;  %v9138_v55 = vld [vmem:[#allocation1 + $0x21] ss:$4 sm:$0xff]  ;;  %v9140_v34 = vld [vmem:[#allocation1 + $0x22] ss:$4 sm:$0xff] }
 0x607   : > { %12552 = vst [vmem:[#allocation45_spill] sm:$0xff] %v9136_v3  ;;  %v9142_v17 = vld [vmem:[#allocation1 + $0x23] ss:$4 sm:$0xff] }
 0x608   : > { %12553 = vst [vmem:[#allocation53_spill] sm:$0xff] %v9138_v55 }
 0x609   : > { %12554 = vst [vmem:[#allocation54_spill] sm:$0xff] %v9140_v34 }
 0x60a   : > { %12555 = vst [vmem:[#allocation49_spill] sm:$0xff] %v9142_v17  ;;  %v9145_v41 = vld [vmem:[#allocation1] ss:$4 sm:$0xff]  ;;  %v9147_v46 = vld [vmem:[#allocation1 + $0x1] ss:$4 sm:$0xff] }
 0x60b   : > { %3230 = vst [vmem:[#allocation1 + $0x20] sm:$0xff] %v12556_v50  ;;  %v9149_v36 = vld [vmem:[#allocation1 + $0x2] ss:$4 sm:$0xff]  ;;  %v9151_v12 = vld [vmem:[#allocation1 + $0x3] ss:$4 sm:$0xff] }
 0x60c   : > { %12557 = vst [vmem:[#allocation50_spill] sm:$0xff] %v9149_v36  ;;  %v12563_v50 = vld [vmem:[#allocation88_spill] sm:$0xff] }
 0x60d   : > { %12558 = vst [vmem:[#allocation51_spill] sm:$0xff] %v9151_v12  ;;  %v12566_v12 = vld [vmem:[#allocation76_spill] sm:$0xff] }
 0x60e   : > { %3218 = vst [vmem:[#allocation1] sm:$0xff] %v12559_v26  ;;  %v12567_v26 = vld [vmem:[#allocation220_spill] sm:$0xff] }
 0x60f   : > { %1938 = vrot.lane.b32.xlu0 %v12567_v26, %s6653_s23 }
 0x612   : > { %v9156_v61 = vld [vmem:[#allocation1 + $0x21] ss:$4 sm:$0xff]  ;;  %v9158_v34 = vld [vmem:[#allocation1 + $0x22] ss:$4 sm:$0xff]  ;;  %v9160_v17 = vld [vmem:[#allocation1 + $0x23] ss:$4 sm:$0xff] }
 0x613   : > { %12560 = vst [vmem:[#allocation58_spill] sm:$0xff] %v9156_v61 }
 0x614   : > { %12561 = vst [vmem:[#allocation59_spill] sm:$0xff] %v9158_v34  ;;  %v12570_v34 = vld [vmem:[#allocation96_spill] sm:$0xff] }
 0x615   : > { %12562 = vst [vmem:[#allocation60_spill] sm:$0xff] %v9160_v17  ;;  %v9163_v55 = vld [vmem:[#allocation1 + $0x1] ss:$4 sm:$0xff]  ;;  %v9165_v3 = vld [vmem:[#allocation1 + $0x2] ss:$4 sm:$0xff] }
 0x616   : > { %3235 = vst [vmem:[#allocation1 + $0x20] sm:$0xff] %v12563_v50  ;;  %v9167_v36 = vld [vmem:[#allocation1 + $0x3] ss:$4 sm:$0xff] }
 0x617   : > { %12564 = vst [vmem:[#allocation55_spill] sm:$0xff] %v9163_v55  ;;  %v12573_v55 = vld [vmem:[#allocation85_spill] sm:$0xff]  ;;  %2777 = vrot.lane.b32.xlu0 %v8974_v10, %s6654_s9 }
 0x618   : > { %12565 = vst [vmem:[#allocation57_spill] sm:$0xff] %v9167_v36  ;;  %v12582_v10 = vld [vmem:[#allocation229_spill] sm:$0xff] }
 0x619   : > { %3227 = vst [vmem:[#allocation1] sm:$0xff] %v12566_v12 }
 0x61d   : > { %v9172_v23 = vld [vmem:[#allocation1 + $0x20] ss:$4 sm:$0xff]  ;;  %v9174_v61 = vld [vmem:[#allocation1 + $0x21] ss:$4 sm:$0xff] }
 0x61e   : > { %12568 = vst [vmem:[#allocation67_spill] sm:$0xff] %v9172_v23 }
 0x61f   : > { %12569 = vst [vmem:[#allocation69_spill] sm:$0xff] %v9174_v61  ;;  %v12578_v61 = vld [vmem:[#allocation104_spill] sm:$0xff]  ;;  %1940 = vrot.lane.b32.xlu0 %v12582_v10, %s6653_s23 }
 0x620   : > { %3243 = vst [vmem:[#allocation1 + $0x20] sm:$0xff] %v12570_v34  ;;  %v9177_v17 = vld [vmem:[#allocation1] ss:$4 sm:$0xff]  ;;  %v9179_v50 = vld [vmem:[#allocation1 + $0x1] ss:$4 sm:$0xff] }
 0x621   : > { %12571 = vst [vmem:[#allocation62_spill] sm:$0xff] %v9177_v17  ;;  %v12590_v10 = vld [vmem:[#allocation100_spill] sm:$0xff] }
 0x622   : > { %12572 = vst [vmem:[#allocation63_spill] sm:$0xff] %v9179_v50 }
 0x623   : > { %3234 = vst [vmem:[#allocation1] sm:$0xff] %v12573_v55 }
 0x627   : > { %v9184_v36 = vld [vmem:[#allocation1 + $0x20] ss:$4 sm:$0xff]  ;;  %v9186_v12 = vld [vmem:[#allocation1 + $0x21] ss:$4 sm:$0xff]  ;;  %v9188_v26 = vld [vmem:[#allocation1 + $0x22] ss:$4 sm:$0xff]  ;;  %2779 = vrot.lane.b32.xlu0 %v8984_v49, %s6654_s9 }
 0x628   : > { %12574 = vst [vmem:[#allocation65_spill] sm:$0xff] %v9184_v36  ;;  %v9190_v23 = vld [vmem:[#allocation1 + $0x23] ss:$4 sm:$0xff] }
 0x629   : > { %12575 = vst [vmem:[#allocation66_spill] sm:$0xff] %v9186_v12  ;;  %v12583_v36 = vld [vmem:[#allocation92_spill] sm:$0xff] }
 0x62a   : > { %12576 = vst [vmem:[#allocation74_spill] sm:$0xff] %v9188_v26  ;;  %v9193_v34 = vld [vmem:[#allocation1] ss:$4 sm:$0xff]  ;;  %v9195_v17 = vld [vmem:[#allocation1 + $0x1] ss:$4 sm:$0xff] }
 0x62b   : > { %12577 = vst [vmem:[#allocation75_spill] sm:$0xff] %v9190_v23  ;;  %v9197_v50 = vld [vmem:[#allocation1 + $0x2] ss:$4 sm:$0xff]  ;;  %v9199_v55 = vld [vmem:[#allocation1 + $0x3] ss:$4 sm:$0xff] }
 0x62c   : > { %3254 = vst [vmem:[#allocation1 + $0x20] sm:$0xff] %v12578_v61  ;;  %v12587_v61 = vld [vmem:[#allocation112_spill] sm:$0xff] }
 0x62d   : > { %12579 = vst [vmem:[#allocation70_spill] sm:$0xff] %v9193_v34 }
 0x62e   : > { %12580 = vst [vmem:[#allocation71_spill] sm:$0xff] %v9195_v17 }
 0x62f   : > { %12581 = vst [vmem:[#allocation73_spill] sm:$0xff] %v9197_v50 }
 0x630   : > { %3242 = vst [vmem:[#allocation1] sm:$0xff] %v12583_v36 }
 0x633   : > { %v9204_v12 = vld [vmem:[#allocation1 + $0x21] ss:$4 sm:$0xff]  ;;  %v9206_v26 = vld [vmem:[#allocation1 + $0x22] ss:$4 sm:$0xff]  ;;  %v9208_v23 = vld [vmem:[#allocation1 + $0x23] ss:$4 sm:$0xff] }
 0x634   : > { %12584 = vst [vmem:[#allocation79_spill] sm:$0xff] %v9204_v12 }
 0x635   : > { %12585 = vst [vmem:[#allocation81_spill] sm:$0xff] %v9206_v26  ;;  %v12594_v26 = vld [vmem:[#allocation238_spill] sm:$0xff] }
 0x636   : > { %12586 = vst [vmem:[#allocation77_spill] sm:$0xff] %v9208_v23  ;;  %1942 = vrot.lane.b32.xlu0 %v12594_v26, %s6653_s23 }
 0x637   : > { %3259 = vst [vmem:[#allocation1 + $0x20] sm:$0xff] %v12587_v61  ;;  %v9211_v34 = vld [vmem:[#allocation1 + $0x1] ss:$4 sm:$0xff]  ;;  %v9213_v17 = vld [vmem:[#allocation1 + $0x2] ss:$4 sm:$0xff] }
 0x638   : > { %12588 = vst [vmem:[#allocation78_spill] sm:$0xff] %v9213_v17  ;;  %v9215_v50 = vld [vmem:[#allocation1 + $0x3] ss:$4 sm:$0xff] }
 0x639   : > { %12589 = vst [vmem:[#allocation87_spill] sm:$0xff] %v9215_v50  ;;  %v12595_v50 = vld [vmem:[#allocation109_spill] sm:$0xff]  ;;  %v9233_v17 = vld [vmem:[%s6776_s17 + $0x24] sm:$0xf] }
 0x63a   : > { %3251 = vst [vmem:[#allocation1] sm:$0xff] %v12590_v10 }
 0x63e   : > { %v9220_v36 = vld [vmem:[#allocation1 + $0x20] ss:$4 sm:$0xff]  ;;  %v9222_v12 = vld [vmem:[#allocation1 + $0x21] ss:$4 sm:$0xff]  ;;  %2781 = vrot.lane.b32.xlu0 %v8994_v29, %s6654_s9 }
 0x63f   : > { %12591 = vst [vmem:[#allocation89_spill] sm:$0xff] %v9220_v36 }
 0x640   : > { %12592 = vst [vmem:[#allocation90_spill] sm:$0xff] %v9222_v12 }
 0x641   : > { %3267 = vst [vmem:[#allocation1 + $0x20] sm:$0xff] %v8594_v53  ;;  %v9225_v23 = vld [vmem:[#allocation1] ss:$4 sm:$0xff]  ;;  %v9227_v61 = vld [vmem:[#allocation1 + $0x1] ss:$4 sm:$0xff] }
 0x642   : > { %12593 = vst [vmem:[#allocation82_spill] sm:$0xff] %v9227_v61 }
 0x643   : > { %3258 = vst [vmem:[#allocation1] sm:$0xff] %v12595_v50 }
 0x648   : > { %v9235_v49 = vld [vmem:[#allocation1 + $0x20] ss:$4 sm:$0xff]  ;;  %v9237_v10 = vld [vmem:[#allocation1 + $0x21] ss:$4 sm:$0xff]  ;;  %v9239_v36 = vld [vmem:[#allocation1 + $0x22] ss:$4 sm:$0xff] }
 0x649   : > { %12596 = vst [vmem:[#allocation83_spill] sm:$0xff] %v9235_v49  ;;  %v9241_v12 = vld [vmem:[#allocation1 + $0x23] ss:$4 sm:$0xff] }
 0x64a   : > { %12597 = vst [vmem:[#allocation84_spill] sm:$0xff] %v9237_v10  ;;  %v9244_v53 = vld [vmem:[#allocation1] ss:$4 sm:$0xff]  ;;  %v9246_v61 = vld [vmem:[#allocation1 + $0x1] ss:$4 sm:$0xff] }
 0x64b   : > { %12598 = vst [vmem:[#allocation86_spill] sm:$0xff] %v9239_v36  ;;  %v9250_v26 = vld [vmem:[#allocation1 + $0x2] ss:$4 sm:$0xff]  ;;  %v9252_v50 = vld [vmem:[#allocation1 + $0x3] ss:$4 sm:$0xff] }
 0x64c   : > { %12599 = vst [vmem:[#allocation95_spill] sm:$0xff] %v9241_v12  ;;  %v9256_v10 = vld [vmem:[%s6776_s17 + $0x2c] sm:$0x3] }
 0x64d   : > { %3278 = vst [vmem:[#allocation1 + $0x20] sm:$0xff] %v9233_v17 }
 0x64e   : > { %12600 = vst [vmem:[#allocation97_spill] sm:$0xff] %v9246_v61  ;;  %v12606_v61 = vld [vmem:[#allocation247_spill] sm:$0xff] }
 0x64f   : > { %12601 = vst [vmem:[#allocation91_spill] sm:$0xff] %v9250_v26  ;;  %1944 = vrot.lane.b32.xlu0 %v12606_v61, %s6653_s23 }
 0x650   : > { %12602 = vst [vmem:[#allocation93_spill] sm:$0xff] %v9252_v50 }
 0x651   : > { %3266 = vst [vmem:[#allocation1] sm:$0xff] %v8562_v56  ;;  %v9275_v56 = vld [vmem:[%s6776_s17 + $0x28] sm:$0xf] }
 0x654   : > { %v9258_v36 = vld [vmem:[#allocation1 + $0x21] ss:$4 sm:$0xff]  ;;  %v9260_v12 = vld [vmem:[#allocation1 + $0x22] ss:$4 sm:$0xff]  ;;  %v9262_v49 = vld [vmem:[#allocation1 + $0x23] ss:$4 sm:$0xff] }
 0x655   : > { %12603 = vst [vmem:[#allocation94_spill] sm:$0xff] %v9258_v36 }
 0x656   : > { %12604 = vst [vmem:[#allocation101_spill] sm:$0xff] %v9260_v12 }
 0x657   : > { %12605 = vst [vmem:[#allocation102_spill] sm:$0xff] %v9262_v49  ;;  %2783 = vrot.lane.b32.xlu0 %v9004_v57, %s6654_s9 }
 0x658   : > { %3283 = vst [vmem:[#allocation1 + $0x20] sm:$0xff] %v9256_v10  ;;  %v9267_v29 = vld [vmem:[#allocation1 + $0x1] ss:$4 sm:$0xff]  ;;  %v9269_v26 = vld [vmem:[#allocation1 + $0x2] ss:$4 sm:$0xff] }
 0x659   : > { %12607 = vst [vmem:[#allocation103_spill] sm:$0xff] %v9267_v29  ;;  %v9271_v50 = vld [vmem:[#allocation1 + $0x3] ss:$4 sm:$0xff] }
 0x65a   : > { %12608 = vst [vmem:[#allocation106_spill] sm:$0xff] %v9269_v26  ;;  %v12610_v26 = vld [vmem:[#allocation256_spill] sm:$0xff] }
 0x65b   : > { %12609 = vst [vmem:[#allocation98_spill] sm:$0xff] %v9271_v50 }
 0x65c   : > { %3275 = vst [vmem:[#allocation1] sm:$0xff] %v8577_v39 }
 0x65f   : > { %v9284_v61 = vld [vmem:[#allocation1 + $0x20] ss:$4 sm:$0xff]  ;;  %v9286_v36 = vld [vmem:[#allocation1 + $0x21] ss:$4 sm:$0xff]  ;;  %1946 = vrot.lane.b32.xlu0 %v12610_v26, %s6653_s23 }
 0x663   : > { %v9279_v12 = vld [vmem:[#allocation1] ss:$4 sm:$0xff]  ;;  %v9281_v49 = vld [vmem:[#allocation1 + $0x1] ss:$4 sm:$0xff] }
 0x664   : > { %3282 = vst [vmem:[#allocation1] sm:$0xff] %v9275_v56 }
 0x66b   : > { %v9290_v50 = vld [vmem:[#allocation1] ss:$4 sm:$0xff]  ;;  %v9292_v39 = vld [vmem:[#allocation1 + $0x1] ss:$4 sm:$0xff]  ;;  %v9294_v29 = vld [vmem:[#allocation1 + $0x2] ss:$4 sm:$0xff] }
 0x66c   : > { %v9296_v57 = vld [vmem:[#allocation1 + $0x3] ss:$4 sm:$0xff] }
 0x66d   : > { %3290 = vst [vmem:[#allocation1] ss:$9 sm:$0xff] %v7208_v11 }
 0x66e   : > { %3292 = vst [vmem:[#allocation1 + $0x1] ss:$9 sm:$0xff] %v7210_v24  ;;  %v12617_v24 = vld [vmem:[#allocation138_spill] sm:$0xff] }
 0x66f   : > { %3294 = vst [vmem:[#allocation1 + $0x2] ss:$9 sm:$0xff] %v7214_v16  ;;  %v12614_v16 = vld [vmem:[#allocation135_spill] sm:$0xff] }
 0x670   : > { %3296 = vst [vmem:[#allocation1 + $0x3] ss:$9 sm:$0xff] %v7219_v48  ;;  %v12616_v48 = vld [vmem:[#allocation137_spill] sm:$0xff] }
 0x671   : > { %3298 = vst [vmem:[#allocation1 + $0x4] ss:$9 sm:$0xff] %v7225_v33  ;;  %v12618_v33 = vld [vmem:[#allocation141_spill] sm:$0xff] }
 0x672   : > { %3300 = vst [vmem:[#allocation1 + $0x5] ss:$9 sm:$0xff] %v7227_v5  ;;  %v12619_v5 = vld [vmem:[#allocation142_spill] sm:$0xff] }
 0x673   : > { %3302 = vst [vmem:[#allocation1 + $0x6] ss:$9 sm:$0xff] %v7240_v18  ;;  %v12615_v18 = vld [vmem:[#allocation136_spill] sm:$0xff] }
 0x674   : > { %3304 = vst [vmem:[#allocation1 + $0x7] ss:$9 sm:$0xff] %v7242_v13  ;;  %v12612_v13 = vld [vmem:[#allocation133_spill] sm:$0xff] }
 0x67b   : > { %v9306_v26 = vld [vmem:[#allocation1] sm:$0xff] }
 0x67c   : > { %3306 = vst [vmem:[#allocation1] ss:$9 sm:$0xff] %v7252_v9  ;;  %v12611_v9 = vld [vmem:[#allocation132_spill] sm:$0xff] }
 0x67d   : > { %3307 = vst [vmem:[#allocation1 + $0x1] ss:$9 sm:$0xff] %v7261_v1  ;;  %v12620_v1 = vld [vmem:[#allocation143_spill] sm:$0xff] }
 0x67e   : > { %3308 = vst [vmem:[#allocation1 + $0x2] ss:$9 sm:$0xff] %v7263_v8  ;;  %v12613_v8 = vld [vmem:[#allocation134_spill] sm:$0xff] }
 0x67f   : > { %3309 = vst [vmem:[#allocation1 + $0x3] ss:$9 sm:$0xff] %v11968_v37  ;;  %v12622_v37 = vld [vmem:[#allocation145_spill] sm:$0xff] }
 0x680   : > { %3310 = vst [vmem:[#allocation1 + $0x4] ss:$9 sm:$0xff] %v11970_v63  ;;  %v12621_v63 = vld [vmem:[#allocation144_spill] sm:$0xff] }
 0x681   : > { %3311 = vst [vmem:[#allocation1 + $0x5] ss:$9 sm:$0xff] %v11972_v28  ;;  %v12623_v28 = vld [vmem:[#allocation146_spill] sm:$0xff] }
 0x682   : > { %3312 = vst [vmem:[#allocation1 + $0x6] ss:$9 sm:$0xff] %v7289_v6 }
 0x683   : > { %3313 = vst [vmem:[#allocation1 + $0x7] ss:$9 sm:$0xff] %v11980_v43 }
 0x68a   : > { %v9316_v11 = vld [vmem:[#allocation1] sm:$0xff] }
 0x68b   : > { %3315 = vst [vmem:[#allocation1] ss:$9 sm:$0xff] %v12301_v22  ;;  %v12624_v22 = vld [vmem:[#allocation147_spill] sm:$0xff] }
 0x68c   : > { %3316 = vst [vmem:[#allocation1 + $0x1] ss:$9 sm:$0xff] %v12302_v25  ;;  %v12625_v25 = vld [vmem:[#allocation148_spill] sm:$0xff] }
 0x68d   : > { %3317 = vst [vmem:[#allocation1 + $0x2] ss:$9 sm:$0xff] %v12611_v9  ;;  %v12626_v9 = vld [vmem:[#allocation150_spill] sm:$0xff] }
 0x68e   : > { %3318 = vst [vmem:[#allocation1 + $0x3] ss:$9 sm:$0xff] %v12612_v13  ;;  %v12628_v13 = vld [vmem:[#allocation152_spill] sm:$0xff] }
 0x68f   : > { %3319 = vst [vmem:[#allocation1 + $0x4] ss:$9 sm:$0xff] %v12613_v8  ;;  %v12629_v8 = vld [vmem:[#allocation153_spill] sm:$0xff] }
 0x690   : > { %3320 = vst [vmem:[#allocation1 + $0x5] ss:$9 sm:$0xff] %v12614_v16  ;;  %v12630_v16 = vld [vmem:[#allocation154_spill] sm:$0xff] }
 0x691   : > { %3321 = vst [vmem:[#allocation1 + $0x6] ss:$9 sm:$0xff] %v12615_v18  ;;  %v12631_v18 = vld [vmem:[#allocation155_spill] sm:$0xff] }
 0x692   : > { %3322 = vst [vmem:[#allocation1 + $0x7] ss:$9 sm:$0xff] %v12616_v48 }
 0x699   : > { %v9326_v6 = vld [vmem:[#allocation1] sm:$0xff] }
 0x69a   : > { %3324 = vst [vmem:[#allocation1] ss:$9 sm:$0xff] %v12617_v24  ;;  %v12632_v24 = vld [vmem:[#allocation156_spill] sm:$0xff] }
 0x69b   : > { %3325 = vst [vmem:[#allocation1 + $0x1] ss:$9 sm:$0xff] %v12310_v38  ;;  %v12627_v38 = vld [vmem:[#allocation151_spill] sm:$0xff] }
 0x69c   : > { %3326 = vst [vmem:[#allocation1 + $0x2] ss:$9 sm:$0xff] %v12618_v33  ;;  %v12633_v33 = vld [vmem:[#allocation157_spill] sm:$0xff] }
 0x69d   : > { %3327 = vst [vmem:[#allocation1 + $0x3] ss:$9 sm:$0xff] %v12619_v5  ;;  %v12634_v5 = vld [vmem:[#allocation159_spill] sm:$0xff] }
 0x69e   : > { %3328 = vst [vmem:[#allocation1 + $0x4] ss:$9 sm:$0xff] %v12620_v1  ;;  %v12635_v1 = vld [vmem:[#allocation160_spill] sm:$0xff] }
 0x69f   : > { %3329 = vst [vmem:[#allocation1 + $0x5] ss:$9 sm:$0xff] %v12621_v63  ;;  %v12636_v63 = vld [vmem:[#allocation161_spill] sm:$0xff] }
 0x6a0   : > { %3330 = vst [vmem:[#allocation1 + $0x6] ss:$9 sm:$0xff] %v12622_v37  ;;  %v12637_v37 = vld [vmem:[#allocation162_spill] sm:$0xff] }
 0x6a1   : > { %3331 = vst [vmem:[#allocation1 + $0x7] ss:$9 sm:$0xff] %v12623_v28  ;;  %v12638_v28 = vld [vmem:[#allocation163_spill] sm:$0xff] }
 0x6a8   : > { %v9336_v43 = vld [vmem:[#allocation1] sm:$0xff] }
 0x6a9   : > { %3333 = vst [vmem:[#allocation1] ss:$9 sm:$0xff] %v12624_v22  ;;  %v12639_v22 = vld [vmem:[#allocation164_spill] sm:$0xff] }
 0x6aa   : > { %3334 = vst [vmem:[#allocation1 + $0x1] ss:$9 sm:$0xff] %v12625_v25 }
 0x6ab   : > { %3335 = vst [vmem:[#allocation1 + $0x2] ss:$9 sm:$0xff] %v12626_v9  ;;  %v12640_v9 = vld [vmem:[#allocation165_spill] sm:$0xff] }
 0x6ac   : > { %3336 = vst [vmem:[#allocation1 + $0x3] ss:$9 sm:$0xff] %v12627_v38  ;;  %v12641_v38 = vld [vmem:[#allocation167_spill] sm:$0xff] }
 0x6ad   : > { %3337 = vst [vmem:[#allocation1 + $0x4] ss:$9 sm:$0xff] %v12628_v13  ;;  %v12642_v13 = vld [vmem:[#allocation168_spill] sm:$0xff] }
 0x6ae   : > { %3338 = vst [vmem:[#allocation1 + $0x5] ss:$9 sm:$0xff] %v12629_v8  ;;  %v12643_v8 = vld [vmem:[#allocation169_spill] sm:$0xff] }
 0x6af   : > { %3339 = vst [vmem:[#allocation1 + $0x6] ss:$9 sm:$0xff] %v12630_v16  ;;  %v12644_v16 = vld [vmem:[#allocation170_spill] sm:$0xff] }
 0x6b0   : > { %3340 = vst [vmem:[#allocation1 + $0x7] ss:$9 sm:$0xff] %v12631_v18  ;;  %v12645_v18 = vld [vmem:[#allocation171_spill] sm:$0xff] }
 0x6b7   : > { %v9346_v48 = vld [vmem:[#allocation1] sm:$0xff] }
 0x6b8   : > { %3342 = vst [vmem:[#allocation1] ss:$9 sm:$0xff] %v12632_v24  ;;  %v12646_v24 = vld [vmem:[#allocation172_spill] sm:$0xff] }
 0x6b9   : > { %3343 = vst [vmem:[#allocation1 + $0x1] ss:$9 sm:$0xff] %v12633_v33  ;;  %v12647_v33 = vld [vmem:[#allocation173_spill] sm:$0xff] }
 0x6ba   : > { %3344 = vst [vmem:[#allocation1 + $0x2] ss:$9 sm:$0xff] %v12634_v5 }
 0x6bb   : > { %3345 = vst [vmem:[#allocation1 + $0x3] ss:$9 sm:$0xff] %v12635_v1  ;;  %v12648_v1 = vld [vmem:[#allocation174_spill] sm:$0xff] }
 0x6bc   : > { %3346 = vst [vmem:[#allocation1 + $0x4] ss:$9 sm:$0xff] %v12636_v63  ;;  %v12649_v63 = vld [vmem:[#allocation175_spill] sm:$0xff] }
 0x6bd   : > { %3347 = vst [vmem:[#allocation1 + $0x5] ss:$9 sm:$0xff] %v12637_v37  ;;  %v12650_v37 = vld [vmem:[#allocation177_spill] sm:$0xff] }
 0x6be   : > { %3348 = vst [vmem:[#allocation1 + $0x6] ss:$9 sm:$0xff] %v12638_v28  ;;  %v12651_v28 = vld [vmem:[#allocation178_spill] sm:$0xff] }
 0x6bf   : > { %3349 = vst [vmem:[#allocation1 + $0x7] ss:$9 sm:$0xff] %v12639_v22  ;;  %v12652_v22 = vld [vmem:[#allocation179_spill] sm:$0xff] }
 0x6c6   : > { %v9356_v25 = vld [vmem:[#allocation1] sm:$0xff] }
 0x6c7   : > { %3351 = vst [vmem:[#allocation1] ss:$9 sm:$0xff] %v12640_v9  ;;  %v12653_v9 = vld [vmem:[#allocation180_spill] sm:$0xff] }
 0x6c8   : > { %3352 = vst [vmem:[#allocation1 + $0x1] ss:$9 sm:$0xff] %v12641_v38  ;;  %v12654_v38 = vld [vmem:[#allocation181_spill] sm:$0xff] }
 0x6c9   : > { %3353 = vst [vmem:[#allocation1 + $0x2] ss:$9 sm:$0xff] %v12642_v13  ;;  %v12655_v13 = vld [vmem:[#allocation182_spill] sm:$0xff] }
 0x6ca   : > { %3354 = vst [vmem:[#allocation1 + $0x3] ss:$9 sm:$0xff] %v12643_v8 }
 0x6cb   : > { %3355 = vst [vmem:[#allocation1 + $0x4] ss:$9 sm:$0xff] %v12644_v16  ;;  %v12657_v16 = vld [vmem:[#allocation183_spill] sm:$0xff] }
 0x6cc   : > { %3356 = vst [vmem:[#allocation1 + $0x5] ss:$9 sm:$0xff] %v12645_v18  ;;  %v12658_v18 = vld [vmem:[#allocation184_spill] sm:$0xff] }
 0x6cd   : > { %3357 = vst [vmem:[#allocation1 + $0x6] ss:$9 sm:$0xff] %v12646_v24  ;;  %v12659_v24 = vld [vmem:[#allocation186_spill] sm:$0xff] }
 0x6ce   : > { %3358 = vst [vmem:[#allocation1 + $0x7] ss:$9 sm:$0xff] %v12647_v33  ;;  %v12660_v33 = vld [vmem:[#allocation187_spill] sm:$0xff] }
 0x6d5   : > { %v9366_v5 = vld [vmem:[#allocation1] sm:$0xff] }
 0x6d6   : > { %3360 = vst [vmem:[#allocation1] ss:$9 sm:$0xff] %v12648_v1  ;;  %v12661_v1 = vld [vmem:[#allocation188_spill] sm:$0xff] }
 0x6d7   : > { %3361 = vst [vmem:[#allocation1 + $0x1] ss:$9 sm:$0xff] %v12649_v63  ;;  %v12662_v63 = vld [vmem:[#allocation189_spill] sm:$0xff] }
 0x6d8   : > { %3362 = vst [vmem:[#allocation1 + $0x2] ss:$9 sm:$0xff] %v12650_v37  ;;  %v12663_v37 = vld [vmem:[#allocation190_spill] sm:$0xff] }
 0x6d9   : > { %3363 = vst [vmem:[#allocation1 + $0x3] ss:$9 sm:$0xff] %v12651_v28  ;;  %v12664_v28 = vld [vmem:[#allocation191_spill] sm:$0xff] }
 0x6da   : > { %3364 = vst [vmem:[#allocation1 + $0x4] ss:$9 sm:$0xff] %v12652_v22 }
 0x6db   : > { %3365 = vst [vmem:[#allocation1 + $0x5] ss:$9 sm:$0xff] %v12653_v9  ;;  %v12666_v9 = vld [vmem:[#allocation290_spill] sm:$0xff] }
 0x6dc   : > { %3366 = vst [vmem:[#allocation1 + $0x6] ss:$9 sm:$0xff] %v12654_v38  ;;  %v12667_v38 = vld [vmem:[#allocation291_spill] sm:$0xff] }
 0x6dd   : > { %3367 = vst [vmem:[#allocation1 + $0x7] ss:$9 sm:$0xff] %v12655_v13  ;;  %v3060_v13 = vrot.slane %v9233_v17, 3 }
 0x6e4   : > { %v9376_v8 = vld [vmem:[#allocation1] sm:$0xff] }
 0x6e5   : > { %12656 = vst [vmem:[#allocation99_spill] sm:$0xff] %v9376_v8  ;;  %v12720_v8 = vld [vmem:[#allocation250_spill] sm:$0xff] }
 0x6e6   : > { %3369 = vst [vmem:[#allocation1] ss:$9 sm:$0xff] %v12657_v16  ;;  %v3061_v16 = vrot.slane %v9275_v56, 3 }
 0x6e7   : > { %3370 = vst [vmem:[#allocation1 + $0x1] ss:$9 sm:$0xff] %v12658_v18 }
 0x6e8   : > { %3371 = vst [vmem:[#allocation1 + $0x2] ss:$9 sm:$0xff] %v12659_v24 }
 0x6e9   : > { %3372 = vst [vmem:[#allocation1 + $0x3] ss:$9 sm:$0xff] %v12660_v33 }
 0x6ea   : > { %3373 = vst [vmem:[#allocation1 + $0x4] ss:$9 sm:$0xff] %v12661_v1  ;;  %v3081_v1 = vsel %vm474_vm1, %v9275_v56, %v3061_v16 }
 0x6eb   : > { %3374 = vst [vmem:[#allocation1 + $0x5] ss:$9 sm:$0xff] %v12662_v63 }
 0x6ec   : > { %3375 = vst [vmem:[#allocation1 + $0x6] ss:$9 sm:$0xff] %v12663_v37  ;;  %v9429_v37 = vrot.slane %v3081_v1, 2  ;;  %v12676_v1 = vld [vmem:[#allocation211_spill] sm:$0xff] }
 0x6ed   : > { %3376 = vst [vmem:[#allocation1 + $0x7] ss:$9 sm:$0xff] %v12664_v28  ;;  %v11750_v28 = vrot.slane %v9256_v10, 3 }
 0x6f4   : > { %v9386_v22 = vld [vmem:[#allocation1] sm:$0xff] }
 0x6f5   : > { %12665 = vst [vmem:[#allocation114_spill] sm:$0xff] %v9386_v22  ;;  %v12710_v22 = vld [vmem:[#allocation241_spill] sm:$0xff] }
 0x6f6   : > { %3378 = vst [vmem:[#allocation1] ss:$9 sm:$0xff] %v8721_v4  ;;  %v3066_v4 = vsel %vm470_vm0, %v9233_v17, %v3060_v13 }
 0x6f7   : > { %3379 = vst [vmem:[#allocation1 + $0x1] ss:$9 sm:$0xff] %v8723_v27  ;;  %v9406_v27 = vsel %vm466_vm3, %v9233_v17, %v3060_v13  ;;  %v9408_v18 = vrot.slane %v3066_v4, 1 }
 0x6f8   : > { %3380 = vst [vmem:[#allocation1 + $0x2] ss:$9 sm:$0xff] %v8725_v59  ;;  %v3069_v59 = vsel %vm474_vm1, %v9233_v17, %v3060_v13 }
 0x6f9   : > { %3381 = vst [vmem:[#allocation1 + $0x3] ss:$9 sm:$0xff] %v8731_v15  ;;  %v3072_v15 = vsel %vm478_vm2, %v9233_v17, %v3060_v13  ;;  %v9424_v17 = vsel %vm466_vm3, %v9275_v56, %v3061_v16 }
 0x6fa   : > { %3382 = vst [vmem:[#allocation1 + $0x4] ss:$9 sm:$0xff] %v12666_v9  ;;  %v9416_v33 = vrot.slane %v3072_v15, 3  ;;  %v12674_v15 = vld [vmem:[#allocation209_spill] sm:$0xff] }
 0x6fb   : > { %3383 = vst [vmem:[#allocation1 + $0x5] ss:$9 sm:$0xff] %v12667_v38  ;;  %v9445_v38 = vsel %vm466_vm3, %v9256_v10, %v11750_v28  ;;  %v12678_v28 = vld [vmem:[#allocation125_spill] sm:$0xff] }
 0x6fc   : > { %3384 = vst [vmem:[#allocation1 + $0x6] ss:$9 sm:$0xff] %v8744_v7  ;;  %v9410_v7 = vrot.slane %v3069_v59, 2  ;;  %v12671_v59 = vld [vmem:[#allocation205_spill] sm:$0xff] }
 0x6fd   : > { %3385 = vst [vmem:[#allocation1 + $0x7] ss:$9 sm:$0xff] %v8754_v47  ;;  %v3078_v47 = vsel %vm470_vm0, %v9275_v56, %v3061_v16 }
 0x6fe   : > { %v9426_v63 = vrot.slane %v3078_v47, 1  ;;  %v12675_v47 = vld [vmem:[#allocation210_spill] sm:$0xff] }
 0x704   : > { %v9414_v24 = vld [vmem:[#allocation1] sm:$0xff] }
 0x705   : > { %12668 = vst [vmem:[#allocation115_spill] sm:$0xff] %v9414_v24  ;;  %v12688_v24 = vld [vmem:[#allocation219_spill] sm:$0xff] }
 0x706   : > { %3387 = vst [vmem:[#allocation1] ss:$9 sm:$0xff] %v8760_v45  ;;  %v3084_v45 = vsel %vm478_vm2, %v9275_v56, %v3061_v16  ;;  %v12672_v56 = vld [vmem:[#allocation207_spill] sm:$0xff]  ;;  %v12673_v16 = vld [vmem:[#allocation208_spill] sm:$0xff]  ;;  %vm2881_vm2 = vcmask 1043456  }
 0x707   : > { %3388 = vst [vmem:[#allocation1 + $0x1] ss:$9 sm:$0xff] %v9406_v27  ;;  %v9439_v9 = vrot.slane %v3084_v45, 3  ;;  %v12677_v45 = vld [vmem:[#allocation212_spill] sm:$0xff] }
 0x708   : > { %3389 = vst [vmem:[#allocation1 + $0x2] ss:$9 sm:$0xff] %v9408_v18 }
 0x709   : > { %3390 = vst [vmem:[#allocation1 + $0x3] ss:$9 sm:$0xff] %v9410_v7 }
 0x70a   : > { %3391 = vst [vmem:[#allocation1 + $0x4] ss:$9 sm:$0xff] %v9416_v33 }
 0x70b   : > { %3392 = vst [vmem:[#allocation1 + $0x5] ss:$9 sm:$0xff] %v9424_v17 }
 0x70c   : > { %3393 = vst [vmem:[#allocation1 + $0x6] ss:$9 sm:$0xff] %v9426_v63 }
 0x70d   : > { %3394 = vst [vmem:[#allocation1 + $0x7] ss:$9 sm:$0xff] %v9429_v37 }
 0x714   : > { %v9447_v13 = vld [vmem:[#allocation1] sm:$0xff] }
 0x715   : > { %12669 = vst [vmem:[#allocation107_spill] sm:$0xff] %v9447_v13 }
 0x716   : > { %3396 = vst [vmem:[#allocation1] ss:$9 sm:$0xff] %v9439_v9 }
 0x717   : > { %3397 = vst [vmem:[#allocation1 + $0x1] ss:$9 sm:$0xff] %v9445_v38 }
 0x71e   : > { %v9451_v4 = vld [vmem:[#allocation1] sm:$0xff] }
 0x71f   : > { %12670 = vst [vmem:[#allocation108_spill] sm:$0xff] %v9451_v4  ;;  %v12679_v4 = vld [vmem:[#allocation126_spill] sm:$0xff] }
 0x720   : > { %3399 = vst [vmem:[#allocation1] ss:$9 sm:$0xff] %v12671_v59  ;;  %v12680_v59 = vld [vmem:[#allocation213_spill] sm:$0xff] }
 0x721   : > { %3401 = vst [vmem:[#allocation1 + $0x1] ss:$9 sm:$0xff] %v12672_v56  ;;  %v12681_v56 = vld [vmem:[#allocation214_spill] sm:$0xff] }
 0x722   : > { %3403 = vst [vmem:[#allocation1 + $0x2] ss:$9 sm:$0xff] %v12673_v16  ;;  %v12682_v16 = vld [vmem:[#allocation215_spill] sm:$0xff] }
 0x723   : > { %3405 = vst [vmem:[#allocation1 + $0x3] ss:$9 sm:$0xff] %v12674_v15  ;;  %v12683_v15 = vld [vmem:[#allocation216_spill] sm:$0xff] }
 0x724   : > { %3407 = vst [vmem:[#allocation1 + $0x4] ss:$9 sm:$0xff] %v12675_v47  ;;  %v12684_v47 = vld [vmem:[#allocation217_spill] sm:$0xff] }
 0x725   : > { %3409 = vst [vmem:[#allocation1 + $0x5] ss:$9 sm:$0xff] %v12676_v1  ;;  %v12685_v1 = vld [vmem:[#allocation128_spill] sm:$0xff] }
 0x726   : > { %3411 = vst [vmem:[#allocation1 + $0x6] ss:$9 sm:$0xff] %v12677_v45  ;;  %v12686_v45 = vld [vmem:[#allocation218_spill] sm:$0xff] }
 0x727   : > { %3413 = vst [vmem:[#allocation1 + $0x7] ss:$9 sm:$0xff] %v12678_v28  ;;  %v12687_v28 = vld [vmem:[#allocation5_spill] sm:$0xff] }
 0x72e   : > { %v3414_v13 = vld [vmem:[#allocation1] sm:$0xff] }
 0x72f   : > { %3529 = vrot.lane.b32.xlu1 %v3414_v13, %s6653_s23  ;;  %3416 = vst [vmem:[#allocation1] ss:$9 sm:$0xff] %v12679_v4  ;;  %v12689_v4 = vld [vmem:[#allocation221_spill] sm:$0xff] }
 0x730   : > { %3417 = vst [vmem:[#allocation1 + $0x1] ss:$9 sm:$0xff] %v12680_v59  ;;  %v12690_v59 = vld [vmem:[#allocation222_spill] sm:$0xff] }
 0x731   : > { %3418 = vst [vmem:[#allocation1 + $0x2] ss:$9 sm:$0xff] %v12681_v56  ;;  %v12691_v56 = vld [vmem:[#allocation223_spill] sm:$0xff] }
 0x732   : > { %3419 = vst [vmem:[#allocation1 + $0x3] ss:$9 sm:$0xff] %v12682_v16  ;;  %v12692_v16 = vld [vmem:[#allocation224_spill] sm:$0xff] }
 0x733   : > { %3420 = vst [vmem:[#allocation1 + $0x4] ss:$9 sm:$0xff] %v12683_v15  ;;  %v12693_v15 = vld [vmem:[#allocation225_spill] sm:$0xff] }
 0x734   : > { %3421 = vst [vmem:[#allocation1 + $0x5] ss:$9 sm:$0xff] %v12684_v47  ;;  %v12694_v47 = vld [vmem:[#allocation226_spill] sm:$0xff] }
 0x735   : > { %3422 = vst [vmem:[#allocation1 + $0x6] ss:$9 sm:$0xff] %v12685_v1  ;;  %v12695_v1 = vld [vmem:[#allocation227_spill] sm:$0xff] }
 0x736   : > { %3423 = vst [vmem:[#allocation1 + $0x7] ss:$9 sm:$0xff] %v12686_v45  ;;  %v12696_v45 = vld [vmem:[#allocation6_spill] sm:$0xff] }
 0x737   : > { %2077 = vrot.lane.b32.xlu1 %v12687_v28, %s6654_s9  ;;  %v12697_v28 = vld [vmem:[#allocation228_spill] sm:$0xff] }
 0x73d   : > { %v3424_v13 = vld [vmem:[#allocation1] sm:$0xff] }
 0x73e   : > { %3426 = vst [vmem:[#allocation1] ss:$9 sm:$0xff] %v12688_v24 }
 0x73f   : > { %3531 = vrot.lane.b32.xlu1 %v3424_v13, %s6653_s23  ;;  %3427 = vst [vmem:[#allocation1 + $0x1] ss:$9 sm:$0xff] %v12689_v4  ;;  %v12698_v13 = vld [vmem:[#allocation230_spill] sm:$0xff]  ;;  %v12699_v4 = vld [vmem:[#allocation231_spill] sm:$0xff] }
 0x740   : > { %3428 = vst [vmem:[#allocation1 + $0x2] ss:$9 sm:$0xff] %v12690_v59  ;;  %v12700_v59 = vld [vmem:[#allocation232_spill] sm:$0xff] }
 0x741   : > { %3429 = vst [vmem:[#allocation1 + $0x3] ss:$9 sm:$0xff] %v12691_v56  ;;  %v12701_v56 = vld [vmem:[#allocation233_spill] sm:$0xff] }
 0x742   : > { %3430 = vst [vmem:[#allocation1 + $0x4] ss:$9 sm:$0xff] %v12692_v16  ;;  %v12702_v16 = vld [vmem:[#allocation234_spill] sm:$0xff] }
 0x743   : > { %3431 = vst [vmem:[#allocation1 + $0x5] ss:$9 sm:$0xff] %v12693_v15  ;;  %v2641_v15 = vpop.permute.xlu0 %2640 }
 0x744   : > { %3432 = vst [vmem:[#allocation1 + $0x6] ss:$9 sm:$0xff] %v12694_v47  ;;  %v6323_v47 = vld [vmem:[%s11359_s2 + $0x14] sm:$0xf] }
 0x745   : > { %3433 = vst [vmem:[#allocation1 + $0x7] ss:$9 sm:$0xff] %v12695_v1  ;;  %v12703_v1 = vld [vmem:[#allocation235_spill] sm:$0xff] }
 0x747   : > { %2079 = vrot.lane.b32.xlu1 %v12696_v45, %s6654_s9  ;;  %v2852_v45 = vunpack.c.l.b16 %v6323_v47 }
 0x74b   : > { %v2786_v47 = vpop.permute.xlu0 %2785 }
 0x74c   : > { %v3434_v24 = vld [vmem:[#allocation1] sm:$0xff] }
 0x74d   : > { %3436 = vst [vmem:[#allocation1] ss:$9 sm:$0xff] %v12697_v28  ;;  %v12704_v28 = vld [vmem:[#allocation236_spill] sm:$0xff] }
 0x74e   : > { %3437 = vst [vmem:[#allocation1 + $0x1] ss:$9 sm:$0xff] %v12698_v13  ;;  %v12705_v13 = vld [vmem:[#allocation8_spill] sm:$0xff] }
 0x74f   : > { %3533 = vrot.lane.b32.xlu1 %v3434_v24, %s6653_s23  ;;  %3438 = vst [vmem:[#allocation1 + $0x2] ss:$9 sm:$0xff] %v12699_v4  ;;  %v2854_v24 = vpack.c.b16 %v2852_v45, %v2852_v45  ;;  %v12707_v45 = vld [vmem:[#allocation237_spill] sm:$0xff] }
 0x750   : > { %3439 = vst [vmem:[#allocation1 + $0x3] ss:$9 sm:$0xff] %v12700_v59  ;;  %v6465_v59 = vld [vmem:[%s11359_s2 + $0xc] sm:$0xff] }
 0x751   : > { %3440 = vst [vmem:[#allocation1 + $0x4] ss:$9 sm:$0xff] %v12701_v56  ;;  %v2883_v4 = vsel %vm2881_vm2, %v2854_v24, 0  ;;  %v12706_v56 = vld [vmem:[#allocation287_spill] sm:$0xff] }
 0x752   : > { %3441 = vst [vmem:[#allocation1 + $0x5] ss:$9 sm:$0xff] %v12702_v16  ;;  %6470 = vmatpush.bf16.msra.mxu1 %v2883_v4  ;;  %6471 = vmatpush.bf16.msra.mxu2 %v2883_v4  ;;  %v2810_v16 = vsel %vm2101_vm7, %v12706_v56, %v2641_v15  ;;  %v12708_v24 = vld [vmem:[#allocation239_spill] sm:$0xff]  ;;  %v12711_v15 = vld [vmem:[#allocation242_spill] sm:$0xff]  ;;  %v2643_v56 = vpop.permute.xlu2 %2642 }
 0x753   : > { %3442 = vst [vmem:[#allocation1 + $0x6] ss:$9 sm:$0xff] %v12703_v1  ;;  %2891 = vmatpush.bf16.msra.mxu0 %v2883_v4  ;;  %v12712_v4 = vld [vmem:[#allocation243_spill] sm:$0xff] }
 0x754   : > { %3443 = vst [vmem:[#allocation1 + $0x7] ss:$9 sm:$0xff] %v12704_v28  ;;  %v2834_v28 = vsel %vm2126_vm8, %v2810_v16, %v2786_v47  ;;  %v12714_v16 = vld [vmem:[#allocation245_spill] sm:$0xff] }
 0x755   : > { %v12715_v47 = vld [vmem:[#allocation9_spill] sm:$0xff] }
 0x756   : > { %6472 = vmatpush.bf16.msra.mxu1 %v6465_v59  ;;  %6473 = vmatpush.bf16.msra.mxu2 %v6465_v59 }
 0x757   : > { %2081 = vrot.lane.b32.xlu1 %v12705_v13, %s6654_s9  ;;  %2892 = vmatpush.bf16.msra.mxu0 %v6465_v59  ;;  %v12709_v13 = vld [vmem:[#allocation240_spill] sm:$0xff] }
 0x758   : > { %v12716_v59 = vld [vmem:[#allocation288_spill] sm:$0xff] }
 0x759   : > { %6335 = vmatmul.msk.bf16.vlgmr.msra.gmra.mxu1 %vm2856_vm9, %v2834_v28  ;;  %v12718_v28 = vld [vmem:[#allocation248_spill] sm:$0xff] }
 0x75b   : > { %v3444_v1 = vld [vmem:[#allocation1] sm:$0xff] }
 0x75c   : > { %3446 = vst [vmem:[#allocation1] ss:$9 sm:$0xff] %v12707_v45  ;;  %v12713_v45 = vld [vmem:[#allocation244_spill] sm:$0xff] }
 0x75d   : > { %3447 = vst [vmem:[#allocation1 + $0x1] ss:$9 sm:$0xff] %v12708_v24  ;;  %v2812_v24 = vsel %vm2101_vm7, %v12716_v59, %v2643_v56  ;;  %v12723_v56 = vld [vmem:[#allocation253_spill] sm:$0xff]  ;;  %v12725_v59 = vld [vmem:[#allocation10_spill] sm:$0xff] }
 0x75e   : > { %3448 = vst [vmem:[#allocation1 + $0x2] ss:$9 sm:$0xff] %v12709_v13 }
 0x75f   : > { %3535 = vrot.lane.b32.xlu1 %v3444_v1, %s6653_s23  ;;  %3449 = vst [vmem:[#allocation1 + $0x3] ss:$9 sm:$0xff] %v12710_v22  ;;  %v2788_v1 = vpop.permute.xlu2 %2787  ;;  %v12717_v22 = vld [vmem:[#allocation246_spill] sm:$0xff] }
 0x760   : > { %3450 = vst [vmem:[#allocation1 + $0x4] ss:$9 sm:$0xff] %v12711_v15  ;;  %v2836_v15 = vsel %vm2126_vm8, %v2812_v24, %v2788_v1  ;;  %v12726_v1 = vld [vmem:[#allocation255_spill] sm:$0xff] }
 0x761   : > { %3451 = vst [vmem:[#allocation1 + $0x5] ss:$9 sm:$0xff] %v12712_v4  ;;  %v12719_v4 = vld [vmem:[#allocation249_spill] sm:$0xff] }
 0x762   : > { %3452 = vst [vmem:[#allocation1 + $0x6] ss:$9 sm:$0xff] %v12713_v45  ;;  %v12721_v45 = vld [vmem:[#allocation251_spill] sm:$0xff] }
 0x763   : > { %3453 = vst [vmem:[#allocation1 + $0x7] ss:$9 sm:$0xff] %v12714_v16  ;;  %v12722_v16 = vld [vmem:[#allocation252_spill] sm:$0xff] }
 0x767   : > { %2083 = vrot.lane.b32.xlu1 %v12715_v47, %s6654_s9  ;;  %v12724_v47 = vld [vmem:[#allocation254_spill] sm:$0xff] }
 0x769   : > { %6336 = vmatmul.msk.bf16.gmra.mxu1 %vm2856_vm9, %v2836_v15  ;;  %v12731_v15 = vld [vmem:[#allocation261_spill] sm:$0xff] }
 0x76a   : > { %v3454_v13 = vld [vmem:[#allocation1] sm:$0xff] }
 0x76b   : > { %3456 = vst [vmem:[#allocation1] ss:$9 sm:$0xff] %v12717_v22  ;;  %v12727_v22 = vld [vmem:[#allocation257_spill] sm:$0xff] }
 0x76c   : > { %3457 = vst [vmem:[#allocation1 + $0x1] ss:$9 sm:$0xff] %v12718_v28  ;;  %v12730_v28 = vld [vmem:[#allocation260_spill] sm:$0xff] }
 0x76d   : > { %3458 = vst [vmem:[#allocation1 + $0x2] ss:$9 sm:$0xff] %v12719_v4  ;;  %v12732_v4 = vld [vmem:[#allocation262_spill] sm:$0xff] }
 0x76e   : > { %3459 = vst [vmem:[#allocation1 + $0x3] ss:$9 sm:$0xff] %v12720_v8  ;;  %v12728_v8 = vld [vmem:[#allocation258_spill] sm:$0xff] }
 0x76f   : > { %3537 = vrot.lane.b32.xlu1 %v3454_v13, %s6653_s23  ;;  %3460 = vst [vmem:[#allocation1 + $0x4] ss:$9 sm:$0xff] %v12721_v45  ;;  %v12729_v13 = vld [vmem:[#allocation259_spill] sm:$0xff] }
 0x770   : > { %3461 = vst [vmem:[#allocation1 + $0x5] ss:$9 sm:$0xff] %v12722_v16  ;;  %v12733_v45 = vld [vmem:[#allocation263_spill] sm:$0xff] }
 0x771   : > { %3462 = vst [vmem:[#allocation1 + $0x6] ss:$9 sm:$0xff] %v12723_v56  ;;  %v12734_v16 = vld [vmem:[#allocation11_spill] sm:$0xff] }
 0x772   : > { %3463 = vst [vmem:[#allocation1 + $0x7] ss:$9 sm:$0xff] %v12724_v47  ;;  %v12735_v47 = vld [vmem:[#allocation264_spill] sm:$0xff] }
 0x777   : > { %2085 = vrot.lane.b32.xlu1 %v12725_v59, %s6654_s9  ;;  %v12736_v59 = vld [vmem:[#allocation266_spill] sm:$0xff] }
 0x779   : > { %v3464_v24 = vld [vmem:[#allocation1] sm:$0xff] }
 0x77a   : > { %3466 = vst [vmem:[#allocation1] ss:$9 sm:$0xff] %v12726_v1  ;;  %v12737_v1 = vld [vmem:[#allocation267_spill] sm:$0xff] }
 0x77b   : > { %3467 = vst [vmem:[#allocation1 + $0x1] ss:$9 sm:$0xff] %v12727_v22  ;;  %v12738_v22 = vld [vmem:[#allocation268_spill] sm:$0xff] }
 0x77c   : > { %3468 = vst [vmem:[#allocation1 + $0x2] ss:$9 sm:$0xff] %v12728_v8  ;;  %v12739_v8 = vld [vmem:[#allocation269_spill] sm:$0xff] }
 0x77d   : > { %3469 = vst [vmem:[#allocation1 + $0x3] ss:$9 sm:$0xff] %v12729_v13  ;;  %v12741_v13 = vld [vmem:[#allocation271_spill] sm:$0xff] }
 0x77e   : > { %3470 = vst [vmem:[#allocation1 + $0x4] ss:$9 sm:$0xff] %v12730_v28  ;;  %v12742_v28 = vld [vmem:[#allocation272_spill] sm:$0xff] }
 0x77f   : > { %3539 = vrot.lane.b32.xlu1 %v3464_v24, %s6653_s23  ;;  %3471 = vst [vmem:[#allocation1 + $0x5] ss:$9 sm:$0xff] %v12731_v15  ;;  %v12740_v24 = vld [vmem:[#allocation270_spill] sm:$0xff] }
 0x780   : > { %3472 = vst [vmem:[#allocation1 + $0x6] ss:$9 sm:$0xff] %v12732_v4  ;;  %v12743_v4 = vld [vmem:[#allocation12_spill] sm:$0xff] }
 0x781   : > { %3473 = vst [vmem:[#allocation1 + $0x7] ss:$9 sm:$0xff] %v12733_v45  ;;  %v12744_v45 = vld [vmem:[#allocation273_spill] sm:$0xff] }
 0x787   : > { %2087 = vrot.lane.b32.xlu1 %v12734_v16, %s6654_s9  ;;  %v12745_v16 = vld [vmem:[#allocation275_spill] sm:$0xff] }
 0x788   : > { %v3474_v56 = vld [vmem:[#allocation1] sm:$0xff] }
 0x789   : > { %3476 = vst [vmem:[#allocation1] ss:$9 sm:$0xff] %v12735_v47  ;;  %v12746_v47 = vld [vmem:[#allocation276_spill] sm:$0xff] }
 0x78a   : > { %3477 = vst [vmem:[#allocation1 + $0x1] ss:$9 sm:$0xff] %v12736_v59  ;;  %v12747_v59 = vld [vmem:[#allocation277_spill] sm:$0xff] }
 0x78b   : > { %3478 = vst [vmem:[#allocation1 + $0x2] ss:$9 sm:$0xff] %v12737_v1  ;;  %v12748_v1 = vld [vmem:[#allocation278_spill] sm:$0xff] }
 0x78c   : > { %3479 = vst [vmem:[#allocation1 + $0x3] ss:$9 sm:$0xff] %v12738_v22  ;;  %v12749_v22 = vld [vmem:[#allocation279_spill] sm:$0xff] }
 0x78d   : > { %3480 = vst [vmem:[#allocation1 + $0x4] ss:$9 sm:$0xff] %v12739_v8 }
 0x78e   : > { %3481 = vst [vmem:[#allocation1 + $0x5] ss:$9 sm:$0xff] %v12740_v24  ;;  %v12751_v24 = vld [vmem:[#allocation14_spill] sm:$0xff] }
 0x78f   : > { %3541 = vrot.lane.b32.xlu1 %v3474_v56, %s6653_s23  ;;  %3482 = vst [vmem:[#allocation1 + $0x6] ss:$9 sm:$0xff] %v12741_v13  ;;  %v12750_v56 = vld [vmem:[#allocation280_spill] sm:$0xff] }
 0x790   : > { %3483 = vst [vmem:[#allocation1 + $0x7] ss:$9 sm:$0xff] %v12742_v28  ;;  %v12753_v13 = vld [vmem:[#allocation204_spill] sm:$0xff]  ;;  %v12754_v28 = vld [vmem:[#allocation265_spill] sm:$0xff] }
 0x797   : > { %v3484_v15 = vld [vmem:[#allocation1] sm:$0xff]  ;;  %2089 = vrot.lane.b32.xlu1 %v12743_v4, %s6654_s9  ;;  %v3121_v4 = vshll.u32 %v9424_v17, 16 }
 0x798   : > { %3486 = vst [vmem:[#allocation1] ss:$9 sm:$0xff] %v12744_v45  ;;  %v2153_v45 = vld [vmem:[%s11359_s2 + $0x8] sm:$0xf] }
 0x799   : > { %3487 = vst [vmem:[#allocation1 + $0x1] ss:$9 sm:$0xff] %v12745_v16 }
 0x79a   : > { %3488 = vst [vmem:[#allocation1 + $0x2] ss:$9 sm:$0xff] %v12746_v47  ;;  %v3124_v47 = vshrl.u32 %v9424_v17, 16  ;;  %v3145_v17 = vshll.u32 %v9439_v9, 16 }
 0x79b   : > { %3489 = vst [vmem:[#allocation1 + $0x3] ss:$9 sm:$0xff] %v12747_v59  ;;  %v3132_v59 = vshrl.u32 %v9426_v63, 16 }
 0x79c   : > { %3490 = vst [vmem:[#allocation1 + $0x4] ss:$9 sm:$0xff] %v12748_v1  ;;  %v9592_v1 = vpop.permute.xlu1 %2646 }
 0x79d   : > { %3491 = vst [vmem:[#allocation1 + $0x5] ss:$9 sm:$0xff] %v12749_v22 }
 0x79e   : > { %3492 = vst [vmem:[#allocation1 + $0x6] ss:$9 sm:$0xff] %v12750_v56  ;;  %v3140_v56 = vshrl.u32 %v9429_v37, 16 }
 0x79f   : > { %3493 = vst [vmem:[#allocation1 + $0x7] ss:$9 sm:$0xff] %v12437_v51  ;;  %3543 = vrot.lane.b32.xlu1 %v3484_v15, %s6653_s23  ;;  %v12752_v51 = vld [vmem:[#allocation203_spill] sm:$0xff]  ;;  %v3098_v15 = vshll.u32 %v9408_v18, 16 }
 0x7a6   : > { %v9562_v8 = vld [vmem:[#allocation1] sm:$0xff] }
 0x7a7   : > { %3496 = vst [vmem:[#allocation1] ss:$9 sm:$0xff] %v8874_v31  ;;  %2091 = vrot.lane.b32.xlu1 %v12751_v24, %s6654_s9  ;;  %v3093_v31 = vshrl.u32 %v9406_v27, 16  ;;  %v3129_v27 = vshll.u32 %v9426_v63, 16  ;;  %v12756_v24 = vld [vmem:[#allocation281_spill] sm:$0xff]  ;;  %v12757_v63 = vrot.slane %v9256_v10, 3 }
 0x7a8   : > { %3497 = vst [vmem:[#allocation1 + $0x1] ss:$9 sm:$0xff] %v8880_v19  ;;  %v3101_v19 = vshrl.u32 %v9408_v18, 16 }
 0x7a9   : > { %3498 = vst [vmem:[#allocation1 + $0x2] ss:$9 sm:$0xff] %v8888_v62  ;;  %v3106_v62 = vshll.u32 %v9410_v7, 16  ;;  %v3100_v16 = vsel %vm7622_vm6, %v3093_v31, %v3098_v15  ;;  %v3147_v31 = vsel %vm7622_vm6, %v3140_v56, %v3145_v17  ;;  %v2958_v56 = vunpack.c.l.b16 %v2153_v45  ;;  %v12772_v45 = vld [vmem:[#allocation23_spill] sm:$0xff] }
 0x7aa   : > { %3499 = vst [vmem:[#allocation1 + $0x3] ss:$9 sm:$0xff] %v8895_v32  ;;  %v3109_v32 = vshrl.u32 %v9410_v7, 16  ;;  %v3137_v7 = vshll.u32 %v9429_v37, 16 }
 0x7ab   : > { %3500 = vst [vmem:[#allocation1 + $0x4] ss:$9 sm:$0xff] %v8904_v60  ;;  %v3114_v60 = vshll.u32 %v9416_v33, 16  ;;  %v3108_v18 = vsel %vm7622_vm6, %v3101_v19, %v3106_v62  ;;  %v3148_v19 = vshrl.u32 %v9439_v9, 16  ;;  %v3155_v62 = vshrl.u32 %v9445_v38, 16  ;;  %v12758_v9 = vld [vmem:[#allocation289_spill] sm:$0xff] }
 0x7ac   : > { %3501 = vst [vmem:[#allocation1 + $0x5] ss:$9 sm:$0xff] %v8909_v44  ;;  %v3117_v44 = vshrl.u32 %v9416_v33, 16  ;;  %v3139_v37 = vsel %vm7622_vm6, %v3132_v59, %v3137_v7 }
 0x7ad   : > { %3502 = vst [vmem:[#allocation1 + $0x6] ss:$9 sm:$0xff] %v12752_v51  ;;  %v3116_v33 = vsel %vm7622_vm6, %v3109_v32, %v3114_v60  ;;  %v9616_v60 = vpop.permute.xlu0 %2648 }
 0x7ae   : > { %3503 = vst [vmem:[#allocation1 + $0x7] ss:$9 sm:$0xff] %v12753_v13  ;;  %v3123_v51 = vsel %vm7622_vm6, %v3117_v44, %v3121_v4  ;;  %v3090_v13 = vsel %vm470_vm0, %v9256_v10, %v12757_v63  ;;  %v3152_v10 = vshll.u32 %v9445_v38, 16  ;;  %v2792_v44 = vpop.permute.xlu1 %2791  ;;  %vm4214_vm0 = vmor %vm466_vm3, %vm474_vm1 }
 0x7af   : > { %1948 = vrot.lane.b32.xlu1 %v12754_v28, %s6653_s23  ;;  %v3131_v28 = vsel %vm7622_vm6, %v3124_v47, %v3129_v27  ;;  %v3092_v15 = vrot.slane %v3090_v13, 1  ;;  %v2645_v27 = vpop.permute.xlu2 %2644  ;;  %vm4216_vm11 = vmor %vm4214_vm0, %vm4215_vm10 }
 0x7b0   : > { %v3154_v4 = vsel %vm7622_vm6, %v3148_v19, %v3152_v10  ;;  %vm9973_vm13 = vmor %vm4216_vm11, %vm4217_vm12 }
 0x7b1   : > { %v3160_v32 = vshll.u32 %v3092_v15, 16  ;;  %v12765_v15 = vld [vmem:[#allocation123_spill] sm:$0xff] }
 0x7b5   : > { %v9594_v22 = vld [vmem:[#allocation1] sm:$0xff]  ;;  %v2790_v59 = vpop.permute.xlu0 %2789 }
 0x7b6   : > { %3506 = vst [vmem:[#allocation1] ss:$9 sm:$0xff] %v12756_v24  ;;  %v9626_v38 = vpop.permute.xlu1 %2793  ;;  %v2960_v24 = vpack.c.b16 %v2958_v56, %v2958_v56  ;;  %v12773_v56 = vld [vmem:[#allocation24_spill] sm:$0xff] }
 0x7b7   : > { %3508 = vst [vmem:[#allocation1 + $0x1] ss:$9 sm:$0xff] %v3100_v16  ;;  %v3162_v16 = vsel %vm7622_vm6, %v3155_v62, %v3160_v32 }
 0x7b8   : > { %3510 = vst [vmem:[#allocation1 + $0x2] ss:$9 sm:$0xff] %v3108_v18  ;;  %v2814_v18 = vsel %vm2101_vm7, %v12758_v9, %v2645_v27  ;;  %v12769_v27 = vld [vmem:[#allocation34_spill] sm:$0xff] }
 0x7b9   : > { %3512 = vst [vmem:[#allocation1 + $0x3] ss:$9 sm:$0xff] %v3116_v33  ;;  %v2838_v7 = vsel %vm2126_vm8, %v2814_v18, %v2790_v59  ;;  %v12770_v59 = vld [vmem:[#allocation35_spill] sm:$0xff] }
 0x7ba   : > { %3514 = vst [vmem:[#allocation1 + $0x4] ss:$9 sm:$0xff] %v3123_v51  ;;  %6337 = vmatmul.msk.bf16.gmra.mxu1 %vm2856_vm9, %v2838_v7  ;;  %v2987_v51 = vsel %vm2881_vm2, %v2960_v24, 0  ;;  %v12774_v24 = vld [vmem:[#allocation31_spill] sm:$0xff] }
 0x7bb   : > { %3516 = vst [vmem:[#allocation1 + $0x5] ss:$9 sm:$0xff] %v3131_v28  ;;  %2995 = vmatpush.bf16.msrb.mxu1 %v2987_v51  ;;  %v12761_v28 = vld [vmem:[#allocation27_spill] sm:$0xff]  ;;  %v12775_v51 = vld [vmem:[#allocation196_spill] sm:$0xff] }
 0x7bc   : > { %3518 = vst [vmem:[#allocation1 + $0x6] ss:$9 sm:$0xff] %v3139_v37  ;;  %v12762_v37 = vld [vmem:[#allocation29_spill] sm:$0xff] }
 0x7bd   : > { %3520 = vst [vmem:[#allocation1 + $0x7] ss:$9 sm:$0xff] %v3147_v31  ;;  %v12763_v31 = vld [vmem:[#allocation30_spill] sm:$0xff] }
 0x7be   : > { %v9637_v17 = vpop.permute.xlu1 %3529 }
 0x7c4   : > { %v9622_v47 = vld [vmem:[#allocation1] sm:$0xff] }
 0x7c5   : > { %3524 = vst [vmem:[#allocation1] ss:$9 sm:$0xff] %v3154_v4  ;;  %v12767_v4 = vld [vmem:[#allocation21_spill] sm:$0xff] }
 0x7c6   : > { %3526 = vst [vmem:[#allocation1 + $0x1] ss:$9 sm:$0xff] %v3162_v16  ;;  %v2078_v63 = vpop.permute.xlu1 %2077  ;;  %v12768_v16 = vld [vmem:[#allocation22_spill] sm:$0xff] }
 0x7cd   : > { %v9633_v33 = vld [vmem:[#allocation1] sm:$0xff] }
 0x7ce   : > { %3553 = vst [vmem:[#allocation1] ss:$9 sm:$0xff] %v9060_v21  ;;  %v6464_v21 = vld [vmem:[%s11359_s2] sm:$0xff] }
 0x7cf   : > { %3555 = vst [vmem:[#allocation1 + $0x1] ss:$9 sm:$0xff] %v9062_v2  ;;  %v1933_v2 = vpop.permute.xlu0 %1932  ;;  %2996 = vmatpush.bf16.msrb.mxu1 %v6464_v21 }
 0x7d0   : > { %3557 = vst [vmem:[#allocation1 + $0x2] ss:$9 sm:$0xff] %v9064_v42  ;;  %v12759_v42 = vld [vmem:[#allocation122_spill] sm:$0xff] }
 0x7d1   : > { %3559 = vst [vmem:[#allocation1 + $0x3] ss:$9 sm:$0xff] %v9048_v35  ;;  %v2103_v35 = vsel %vm2101_vm7, %v12759_v42, %v1933_v2  ;;  %v12776_v2 = vld [vmem:[#allocation124_spill] sm:$0xff] }
 0x7d2   : > { %3561 = vst [vmem:[#allocation1 + $0x4] ss:$9 sm:$0xff] %v9050_v40  ;;  %v2128_v13 = vsel %vm2126_vm8, %v2103_v35, %v2078_v63 }
 0x7d3   : > { %3563 = vst [vmem:[#allocation1 + $0x5] ss:$9 sm:$0xff] %v9052_v20  ;;  %6344 = vmatmul.msk.bf16.vlgmr.msrb.gmra.mxu1 %vm2856_vm9, %v2128_v13  ;;  %v12777_v13 = vld [vmem:[#allocation33_spill] sm:$0xff] }
 0x7d4   : > { %3565 = vst [vmem:[#allocation1 + $0x6] ss:$9 sm:$0xff] %v9055_v58  ;;  %v9659_v58 = vpop.permute.xlu1 %3531 }
 0x7d5   : > { %3567 = vst [vmem:[#allocation1 + $0x7] ss:$9 sm:$0xff] %v9081_v52  ;;  %v12760_v52 = vld [vmem:[#allocation26_spill] sm:$0xff] }
 0x7d7   : > { %v9656_v20 = vpop.permute.xlu0 %2771 }
 0x7dc   : > { %v3568_v40 = vld [vmem:[#allocation1] sm:$0xff] }
 0x7dd   : > { %3674 = vrot.lane.b32.xlu2 %v3568_v40, %s6654_s9  ;;  %3570 = vst [vmem:[#allocation1] ss:$9 sm:$0xff] %v9083_v14  ;;  %v12764_v14 = vld [vmem:[#allocation195_spill] sm:$0xff]  ;;  %v12778_v40 = vld [vmem:[#allocation42_spill] sm:$0xff] }
 0x7de   : > { %3571 = vst [vmem:[#allocation1 + $0x1] ss:$9 sm:$0xff] %v9066_v0 }
 0x7df   : > { %3572 = vst [vmem:[#allocation1 + $0x2] ss:$9 sm:$0xff] %v9068_v54  ;;  %v1935_v0 = vpop.permute.xlu0 %1934  ;;  %v2080_v54 = vpop.permute.xlu1 %2079 }
 0x7e0   : > { %3573 = vst [vmem:[#allocation1 + $0x3] ss:$9 sm:$0xff] %v12760_v52  ;;  %v2105_v19 = vsel %vm2101_vm7, %v12765_v15, %v1935_v0  ;;  %v12779_v52 = vld [vmem:[#allocation293_spill] sm:$0xff]  ;;  %v12782_v0 = vld [vmem:[#allocation38_spill] sm:$0xff] }
 0x7e1   : > { %3574 = vst [vmem:[#allocation1 + $0x4] ss:$9 sm:$0xff] %v9096_v30  ;;  %v2130_v10 = vsel %vm2126_vm8, %v2105_v19, %v2080_v54  ;;  %v12766_v30 = vld [vmem:[#allocation292_spill] sm:$0xff]  ;;  %v12783_v19 = vld [vmem:[#allocation39_spill] sm:$0xff] }
 0x7e2   : > { %3575 = vst [vmem:[#allocation1 + $0x5] ss:$9 sm:$0xff] %v12761_v28  ;;  %v2816_v62 = vsel %vm2101_vm7, %v12766_v30, %v9592_v1  ;;  %v12771_v1 = vld [vmem:[#allocation46_spill] sm:$0xff]  ;;  %v2818_v28 = vsel %vm2101_vm7, %v12779_v52, %v9616_v60  ;;  %v6367_v54 = vld [vmem:[%s11359_s2 + $0x20] sm:$0xf]  ;;  %v12795_v52 = vld [vmem:[#allocation53_spill] sm:$0xff] }
 0x7e3   : > { %3576 = vst [vmem:[#allocation1 + $0x6] ss:$9 sm:$0xff] %v12762_v37  ;;  %6345 = vmatmul.msk.bf16.gmra.mxu1 %vm2856_vm9, %v2130_v10  ;;  %v2840_v18 = vsel %vm2126_vm8, %v2816_v62, %v2792_v44  ;;  %v12780_v37 = vld [vmem:[#allocation43_spill] sm:$0xff]  ;;  %v2842_v60 = vsel %vm2126_vm8, %v2818_v28, %v9626_v38  ;;  %v3755_v10 = vunpack.c.l.b16 %v6367_v54  ;;  %v12784_v62 = vld [vmem:[#allocation198_spill] sm:$0xff] }
 0x7e4   : > { %3577 = vst [vmem:[#allocation1 + $0x7] ss:$9 sm:$0xff] %v12763_v31  ;;  %6338 = vmatmul.msk.bf16.vlgmr.msra.gmra.mxu2 %vm2856_vm9, %v2840_v18  ;;  %v12781_v31 = vld [vmem:[#allocation36_spill] sm:$0xff]  ;;  %v12800_v54 = vld [vmem:[#allocation58_spill] sm:$0xff] }
 0x7e5   : > { %2626 = vrot.lane.b32.xlu2 %v12764_v14, %s6653_s23  ;;  %v3757_v30 = vpack.c.b16 %v3755_v10, %v3755_v10  ;;  %v12802_v10 = vld [vmem:[#allocation60_spill] sm:$0xff] }
 0x7e7   : > { %v9679_v9 = vpop.permute.xlu0 %2773  ;;  %v9684_v7 = vpop.permute.xlu1 %3533 }
 0x7eb   : > { %v3578_v32 = vld [vmem:[#allocation1] sm:$0xff] }
 0x7ec   : > { %3580 = vst [vmem:[#allocation1] ss:$9 sm:$0xff] %v12767_v4 }
 0x7ed   : > { %3676 = vrot.lane.b32.xlu2 %v3578_v32, %s6654_s9  ;;  %3581 = vst [vmem:[#allocation1 + $0x1] ss:$9 sm:$0xff] %v12768_v16  ;;  %v3784_v32 = vsel %vm2881_vm2, %v3757_v30, 0  ;;  %v12785_v16 = vld [vmem:[#allocation130_spill] sm:$0xff]  ;;  %v12803_v30 = vld [vmem:[#allocation200_spill] sm:$0xff] }
 0x7ee   : > { %3582 = vst [vmem:[#allocation1 + $0x2] ss:$9 sm:$0xff] %v12769_v27  ;;  %3792 = vmatpush.bf16.msrb.mxu2 %v3784_v32  ;;  %v12804_v32 = vld [vmem:[#allocation70_spill] sm:$0xff] }
 0x7ef   : > { %3583 = vst [vmem:[#allocation1 + $0x3] ss:$9 sm:$0xff] %v12770_v59  ;;  %v1937_v21 = vpop.permute.xlu0 %1936  ;;  %v2082_v42 = vpop.permute.xlu1 %2081  ;;  %v12786_v59 = vld [vmem:[#allocation50_spill] sm:$0xff] }
 0x7f0   : > { %3584 = vst [vmem:[#allocation1 + $0x4] ss:$9 sm:$0xff] %v12771_v1  ;;  %v2107_v44 = vsel %vm2101_vm7, %v12776_v2, %v1937_v21  ;;  %v12788_v1 = vld [vmem:[#allocation48_spill] sm:$0xff]  ;;  %v12791_v2 = vld [vmem:[#allocation57_spill] sm:$0xff] }
 0x7f1   : > { %3585 = vst [vmem:[#allocation1 + $0x5] ss:$9 sm:$0xff] %v12772_v45  ;;  %v2132_v35 = vsel %vm2126_vm8, %v2107_v44, %v2082_v42  ;;  %v12789_v45 = vld [vmem:[#allocation41_spill] sm:$0xff]  ;;  %v12793_v42 = vld [vmem:[#allocation199_spill] sm:$0xff] }
 0x7f2   : > { %3586 = vst [vmem:[#allocation1 + $0x6] ss:$9 sm:$0xff] %v12773_v56  ;;  %v12790_v56 = vld [vmem:[#allocation55_spill] sm:$0xff]  ;;  %v12792_v44 = vld [vmem:[#allocation45_spill] sm:$0xff] }
 0x7f3   : > { %3587 = vst [vmem:[#allocation1 + $0x7] ss:$9 sm:$0xff] %v12774_v24  ;;  %6346 = vmatmul.msk.bf16.gmra.mxu1 %vm2856_vm9, %v2132_v35  ;;  %v6466_v24 = vld [vmem:[%s11359_s2 + $0x18] sm:$0xff] }
 0x7f4   : > { %6339 = vmatmul.msk.bf16.gmra.mxu2 %vm2856_vm9, %v2842_v60  ;;  %v12801_v60 = vld [vmem:[#allocation59_spill] sm:$0xff] }
 0x7f5   : > { %2628 = vrot.lane.b32.xlu2 %v12775_v51, %s6653_s23  ;;  %3793 = vmatpush.bf16.msrb.mxu2 %v6466_v24 }
 0x7f7   : > { %v9704_v14 = vpop.permute.xlu0 %2775  ;;  %v9707_v15 = vpop.permute.xlu1 %3535 }
 0x7fa   : > { %v3588_v63 = vld [vmem:[#allocation1] sm:$0xff] }
 0x7fb   : > { %3590 = vst [vmem:[#allocation1] ss:$9 sm:$0xff] %v12777_v13 }
 0x7fc   : > { %3591 = vst [vmem:[#allocation1 + $0x1] ss:$9 sm:$0xff] %v12778_v40 }
 0x7fd   : > { %3678 = vrot.lane.b32.xlu2 %v3588_v63, %s6654_s9  ;;  %3592 = vst [vmem:[#allocation1 + $0x2] ss:$9 sm:$0xff] %v12780_v37  ;;  %v12796_v37 = vld [vmem:[#allocation54_spill] sm:$0xff] }
 0x7fe   : > { %3593 = vst [vmem:[#allocation1 + $0x3] ss:$9 sm:$0xff] %v12781_v31  ;;  %v12797_v31 = vld [vmem:[#allocation49_spill] sm:$0xff] }
 0x7ff   : > { %3594 = vst [vmem:[#allocation1 + $0x4] ss:$9 sm:$0xff] %v12782_v0  ;;  %v1939_v4 = vpop.permute.xlu0 %1938  ;;  %v2084_v18 = vpop.permute.xlu1 %2083  ;;  %v12798_v0 = vld [vmem:[#allocation62_spill] sm:$0xff] }
 0x800   : > { %3595 = vst [vmem:[#allocation1 + $0x5] ss:$9 sm:$0xff] %v12783_v19  ;;  %v2109_v27 = vsel %vm2101_vm7, %v12785_v16, %v1939_v4  ;;  %v12799_v19 = vld [vmem:[#allocation63_spill] sm:$0xff]  ;;  %v12806_v16 = vld [vmem:[#allocation73_spill] sm:$0xff] }
 0x801   : > { %3596 = vst [vmem:[#allocation1 + $0x6] ss:$9 sm:$0xff] %v9145_v41  ;;  %v2134_v38 = vsel %vm2126_vm8, %v2109_v27, %v2084_v18  ;;  %v12805_v4 = vld [vmem:[#allocation71_spill] sm:$0xff] }
 0x802   : > { %3597 = vst [vmem:[#allocation1 + $0x7] ss:$9 sm:$0xff] %v9147_v46  ;;  %v12787_v46 = vld [vmem:[#allocation51_spill] sm:$0xff] }
 0x803   : > { %6347 = vmatmul.msk.bf16.gmra.mxu1 %vm2856_vm9, %v2134_v38  ;;  %v12807_v27 = vld [vmem:[#allocation67_spill] sm:$0xff]  ;;  %v12808_v38 = vld [vmem:[#allocation69_spill] sm:$0xff] }
 0x805   : > { %2630 = vrot.lane.b32.xlu2 %v12784_v62, %s6653_s23 }
 0x807   : > { %v9735_v51 = vpop.permute.xlu0 %2777  ;;  %v9737_v21 = vpop.permute.xlu1 %3537 }
 0x809   : > { %v3598_v41 = vld [vmem:[#allocation1] sm:$0xff] }
 0x80a   : > { %3600 = vst [vmem:[#allocation1] ss:$9 sm:$0xff] %v12786_v59  ;;  %v12809_v59 = vld [vmem:[#allocation78_spill] sm:$0xff] }
 0x80b   : > { %3601 = vst [vmem:[#allocation1 + $0x1] ss:$9 sm:$0xff] %v12787_v46  ;;  %v3699_v46 = vsel %vm2101_vm7, %v9306_v26, %v9637_v17  ;;  %v12814_v17 = vld [vmem:[#allocation66_spill] sm:$0xff] }
 0x80c   : > { %3602 = vst [vmem:[#allocation1 + $0x2] ss:$9 sm:$0xff] %v12788_v1 }
 0x80d   : > { %3680 = vrot.lane.b32.xlu2 %v3598_v41, %s6654_s9  ;;  %3603 = vst [vmem:[#allocation1 + $0x3] ss:$9 sm:$0xff] %v12789_v45  ;;  %v9776_v45 = vpop.f32.mrf.mxu1 }
 0x80e   : > { %3604 = vst [vmem:[#allocation1 + $0x4] ss:$9 sm:$0xff] %v12790_v56 }
 0x80f   : > { %3605 = vst [vmem:[#allocation1 + $0x5] ss:$9 sm:$0xff] %v9165_v3  ;;  %v1941_v35 = vpop.permute.xlu0 %1940  ;;  %v2086_v63 = vpop.permute.xlu1 %2085  ;;  %v12794_v3 = vld [vmem:[#allocation140_spill] sm:$0xff] }
 0x810   : > { %3606 = vst [vmem:[#allocation1 + $0x6] ss:$9 sm:$0xff] %v12791_v2  ;;  %v2111_v40 = vsel %vm2101_vm7, %v12794_v3, %v1941_v35  ;;  %v12811_v2 = vld [vmem:[#allocation87_spill] sm:$0xff] }
 0x811   : > { %3607 = vst [vmem:[#allocation1 + $0x7] ss:$9 sm:$0xff] %v12792_v44  ;;  %v2136_v28 = vsel %vm2126_vm8, %v2111_v40, %v2086_v63  ;;  %v12812_v44 = vld [vmem:[#allocation149_spill] sm:$0xff]  ;;  %v12816_v3 = vld [vmem:[#allocation75_spill] sm:$0xff]  ;;  %v12817_v40 = vld [vmem:[#allocation82_spill] sm:$0xff] }
 0x812   : > { %v12813_v63 = vld [vmem:[#allocation65_spill] sm:$0xff] }
 0x813   : > { %6348 = vmatmul.msk.bf16.gmra.mxu1 %vm2856_vm9, %v2136_v28 }
 0x815   : > { %2632 = vrot.lane.b32.xlu2 %v12793_v42, %s6653_s23  ;;  %v9793_v28 = vpop.f32.mrf.mxu1 }
 0x817   : > { %v9763_v18 = vpop.permute.xlu0 %2779  ;;  %v9767_v41 = vpop.permute.xlu1 %3539 }
 0x818   : > { %v3608_v13 = vld [vmem:[#allocation1] sm:$0xff] }
 0x819   : > { %3610 = vst [vmem:[#allocation1] ss:$9 sm:$0xff] %v12795_v52  ;;  %v12818_v52 = vld [vmem:[#allocation79_spill] sm:$0xff] }
 0x81a   : > { %3611 = vst [vmem:[#allocation1 + $0x1] ss:$9 sm:$0xff] %v12796_v37 }
 0x81b   : > { %3612 = vst [vmem:[#allocation1 + $0x2] ss:$9 sm:$0xff] %v12797_v31 }
 0x81c   : > { %3613 = vst [vmem:[#allocation1 + $0x3] ss:$9 sm:$0xff] %v12798_v0 }
 0x81d   : > { %3682 = vrot.lane.b32.xlu2 %v3608_v13, %s6654_s9  ;;  %3614 = vst [vmem:[#allocation1 + $0x4] ss:$9 sm:$0xff] %v12799_v19  ;;  %v12815_v13 = vld [vmem:[#allocation74_spill] sm:$0xff]  ;;  %v12819_v19 = vld [vmem:[#allocation121_spill] sm:$0xff] }
 0x81e   : > { %3615 = vst [vmem:[#allocation1 + $0x5] ss:$9 sm:$0xff] %v12800_v54 }
 0x81f   : > { %3616 = vst [vmem:[#allocation1 + $0x6] ss:$9 sm:$0xff] %v12801_v60  ;;  %v1943_v56 = vpop.permute.xlu0 %1942 }
 0x820   : > { %3617 = vst [vmem:[#allocation1 + $0x7] ss:$9 sm:$0xff] %v12802_v10  ;;  %v2113_v42 = vsel %vm2101_vm7, %v12812_v44, %v1943_v56  ;;  %v12820_v10 = vld [vmem:[#allocation202_spill] sm:$0xff]  ;;  %v12827_v56 = vld [vmem:[#allocation89_spill] sm:$0xff] }
 0x825   : > { %2634 = vrot.lane.b32.xlu2 %v12803_v30, %s6653_s23 }
 0x827   : > { %v3618_v62 = vld [vmem:[#allocation1] sm:$0xff]  ;;  %v9795_v37 = vpop.permute.xlu0 %2781 }
 0x828   : > { %3620 = vst [vmem:[#allocation1] ss:$9 sm:$0xff] %v12804_v32  ;;  %v9810_v32 = vpop.f32.mrf.mxu1 }
 0x829   : > { %3621 = vst [vmem:[#allocation1 + $0x1] ss:$9 sm:$0xff] %v12805_v4 }
 0x82a   : > { %3622 = vst [vmem:[#allocation1 + $0x2] ss:$9 sm:$0xff] %v12806_v16  ;;  %v12822_v16 = vld [vmem:[#allocation77_spill] sm:$0xff] }
 0x82b   : > { %3623 = vst [vmem:[#allocation1 + $0x3] ss:$9 sm:$0xff] %v9199_v55  ;;  %v12810_v55 = vld [vmem:[#allocation201_spill] sm:$0xff] }
 0x82c   : > { %3624 = vst [vmem:[#allocation1 + $0x4] ss:$9 sm:$0xff] %v12807_v27 }
 0x82d   : > { %3684 = vrot.lane.b32.xlu2 %v3618_v62, %s6654_s9  ;;  %3625 = vst [vmem:[#allocation1 + $0x5] ss:$9 sm:$0xff] %v12808_v38  ;;  %v12821_v62 = vld [vmem:[#allocation81_spill] sm:$0xff]  ;;  %v12823_v38 = vld [vmem:[#allocation158_spill] sm:$0xff] }
 0x82e   : > { %3626 = vst [vmem:[#allocation1 + $0x6] ss:$9 sm:$0xff] %v9211_v34  ;;  %v2088_v34 = vpop.permute.xlu1 %2087 }
 0x82f   : > { %3627 = vst [vmem:[#allocation1 + $0x7] ss:$9 sm:$0xff] %v12809_v59  ;;  %v2138_v26 = vsel %vm2126_vm8, %v2113_v42, %v2088_v34  ;;  %v1945_v4 = vpop.permute.xlu0 %1944  ;;  %v12830_v34 = vld [vmem:[#allocation284_spill] sm:$0xff] }
 0x830   : > { %6349 = vmatmul.msk.bf16.gmra.mxu1 %vm2856_vm9, %v2138_v26 }
 0x835   : > { %2636 = vrot.lane.b32.xlu2 %v12810_v55, %s6653_s23  ;;  %v12825_v55 = vld [vmem:[#allocation91_spill] sm:$0xff] }
 0x836   : > { %v3628_v1 = vld [vmem:[#allocation1] sm:$0xff]  ;;  %v9797_v0 = vpop.permute.xlu1 %3541 }
 0x837   : > { %v3675_v24 = vpop.permute.xlu2 %3674  ;;  %3630 = vst [vmem:[#allocation1] ss:$9 sm:$0xff] %v12811_v2  ;;  %v9828_v2 = vpop.permute.xlu0 %2783 }
 0x838   : > { %v3723_v35 = vsel %vm2126_vm8, %v3699_v46, %v3675_v24  ;;  %3631 = vst [vmem:[#allocation1 + $0x1] ss:$9 sm:$0xff] %v12813_v63  ;;  %v12824_v46 = vld [vmem:[#allocation97_spill] sm:$0xff]  ;;  %v12828_v24 = vld [vmem:[#allocation90_spill] sm:$0xff] }
 0x839   : > { %6372 = vmatmul.msk.bf16.vlgmr.msrb.gmra.mxu2 %vm2856_vm9, %v3723_v35  ;;  %3632 = vst [vmem:[#allocation1 + $0x2] ss:$9 sm:$0xff] %v12814_v17  ;;  %v3703_v17 = vsel %vm2101_vm7, %v9326_v6, %v9684_v7  ;;  %v12836_v6 = vld [vmem:[#allocation83_spill] sm:$0xff] }
 0x83a   : > { %3633 = vst [vmem:[#allocation1 + $0x3] ss:$9 sm:$0xff] %v12815_v13  ;;  %v12831_v13 = vld [vmem:[#allocation103_spill] sm:$0xff] }
 0x83b   : > { %3634 = vst [vmem:[#allocation1 + $0x4] ss:$9 sm:$0xff] %v12816_v3  ;;  %v12832_v3 = vld [vmem:[#allocation106_spill] sm:$0xff] }
 0x83c   : > { %3635 = vst [vmem:[#allocation1 + $0x5] ss:$9 sm:$0xff] %v9225_v23  ;;  %v3701_v23 = vsel %vm2101_vm7, %v9316_v11, %v9659_v58 }
 0x83d   : > { %3686 = vrot.lane.b32.xlu2 %v3628_v1, %s6654_s9  ;;  %3636 = vst [vmem:[#allocation1 + $0x6] ss:$9 sm:$0xff] %v12817_v40  ;;  %v12826_v1 = vld [vmem:[#allocation93_spill] sm:$0xff] }
 0x83e   : > { %3637 = vst [vmem:[#allocation1 + $0x7] ss:$9 sm:$0xff] %v12818_v52  ;;  %v2090_v59 = vpop.permute.xlu1 %2089 }
 0x83f   : > { %v2627_v31 = vpop.permute.xlu2 %2626  ;;  %v1947_v52 = vpop.permute.xlu0 %1946 }
 0x840   : > { %v2796_v54 = vsel %vm2101_vm7, %v12819_v19, %v2627_v31  ;;  %v12835_v19 = vld [vmem:[#allocation166_spill] sm:$0xff] }
 0x841   : > { %v2820_v60 = vsel %vm2126_vm8, %v2796_v54, %v9656_v20  ;;  %v2115_v20 = vsel %vm2101_vm7, %v12823_v38, %v1945_v4  ;;  %v2117_v54 = vsel %vm2101_vm7, %v12835_v19, %v1947_v52 }
 0x842   : > { %6328 = vmatmul.msk.bf16.vlgmr.msra.gmra.mxu0 %vm2856_vm9, %v2820_v60  ;;  %v2140_v58 = vsel %vm2126_vm8, %v2115_v20, %v2090_v59 }
 0x843   : > { %6350 = vmatmul.msk.bf16.gmra.mxu1 %vm2856_vm9, %v2140_v58  ;;  %v12845_v58 = vld [vmem:[#allocation274_spill] sm:$0xff] }
 0x845   : > { %2638 = vrot.lane.b32.xlu2 %v12820_v10, %s6653_s23  ;;  %v3638_v30 = vld [vmem:[#allocation1] sm:$0xff] }
 0x846   : > { %3640 = vst [vmem:[#allocation1] ss:$9 sm:$0xff] %v12821_v62  ;;  %v9830_v42 = vpop.permute.xlu1 %3543  ;;  %v12837_v10 = vld [vmem:[#allocation84_spill] sm:$0xff]  ;;  %v12840_v62 = vld [vmem:[#allocation15_spill] sm:$0xff] }
 0x847   : > { %3641 = vst [vmem:[#allocation1 + $0x1] ss:$9 sm:$0xff] %v12822_v16  ;;  %v3677_v27 = vpop.permute.xlu2 %3676 }
 0x848   : > { %3642 = vst [vmem:[#allocation1 + $0x2] ss:$9 sm:$0xff] %v9244_v53  ;;  %v3725_v11 = vsel %vm2126_vm8, %v3701_v23, %v3677_v27  ;;  %v9826_v53 = vpop.f32.mrf.mxu1  ;;  %v12842_v27 = vld [vmem:[#allocation285_spill] sm:$0xff] }
 0x849   : > { %3643 = vst [vmem:[#allocation1 + $0x3] ss:$9 sm:$0xff] %v12824_v46  ;;  %6373 = vmatmul.msk.bf16.gmra.mxu2 %vm2856_vm9, %v3725_v11  ;;  %v12844_v11 = vld [vmem:[#allocation94_spill] sm:$0xff] }
 0x84a   : > { %3644 = vst [vmem:[#allocation1 + $0x4] ss:$9 sm:$0xff] %v12825_v55  ;;  %v12847_v55 = vld [vmem:[#allocation102_spill] sm:$0xff] }
 0x84b   : > { %3645 = vst [vmem:[#allocation1 + $0x5] ss:$9 sm:$0xff] %v12826_v1 }
 0x84c   : > { %3646 = vst [vmem:[#allocation1 + $0x6] ss:$9 sm:$0xff] %v12827_v56 }
 0x84d   : > { %3647 = vst [vmem:[#allocation1 + $0x7] ss:$9 sm:$0xff] %v12828_v24  ;;  %3688 = vrot.lane.b32.xlu2 %v3638_v30, %s6654_s9  ;;  %v12839_v30 = vld [vmem:[#allocation95_spill] sm:$0xff] }
 0x84e   : > { %12829 = vst [vmem:[#allocation110_spill] sm:$0xff] %v9826_v53  ;;  %v2092_v60 = vpop.permute.xlu1 %2091 }
 0x84f   : > { %v2629_v44 = vpop.permute.xlu2 %2628  ;;  %v2142_v23 = vsel %vm2126_vm8, %v2117_v54, %v2092_v60 }
 0x850   : > { %v2798_v35 = vsel %vm2101_vm7, %v12830_v34, %v2629_v44  ;;  %v9845_v40 = vpop.f32.mrf.mxu1 }
 0x851   : > { %v2822_v63 = vsel %vm2126_vm8, %v2798_v35, %v9679_v9  ;;  %12833 = vst [vmem:[#allocation111_spill] sm:$0xff] %v9845_v40  ;;  %v12834_v9 = vld [vmem:[#allocation98_spill] sm:$0xff] }
 0x852   : > { %6329 = vmatmul.msk.bf16.gmra.mxu0 %vm2856_vm9, %v2822_v63 }
 0x853   : > { %6351 = vmatmul.msk.bf16.gmra.mxu1 %vm2856_vm9, %v2142_v23 }
 0x854   : > { %v3648_v26 = vld [vmem:[#allocation1] sm:$0xff] }
 0x855   : > { %3690 = vrot.lane.b32.xlu0 %v3648_v26, %s6654_s9  ;;  %3650 = vst [vmem:[#allocation1] ss:$9 sm:$0xff] %v12831_v13  ;;  %3545 = vrot.lane.b32.xlu2 %v9562_v8, %s6653_s23  ;;  %v12838_v8 = vld [vmem:[#allocation86_spill] sm:$0xff] }
 0x856   : > { %3651 = vst [vmem:[#allocation1 + $0x1] ss:$9 sm:$0xff] %v12832_v3 }
 0x857   : > { %3652 = vst [vmem:[#allocation1 + $0x2] ss:$9 sm:$0xff] %v12834_v9  ;;  %v3679_v31 = vpop.permute.xlu2 %3678 }
 0x858   : > { %3653 = vst [vmem:[#allocation1 + $0x3] ss:$9 sm:$0xff] %v12836_v6  ;;  %v3727_v7 = vsel %vm2126_vm8, %v3703_v17, %v3679_v31  ;;  %v9863_v4 = vpop.f32.mrf.mxu1  ;;  %v12853_v17 = vld [vmem:[#allocation131_spill] sm:$0xff] }
 0x859   : > { %3654 = vst [vmem:[#allocation1 + $0x4] ss:$9 sm:$0xff] %v12837_v10  ;;  %6374 = vmatmul.msk.bf16.gmra.mxu2 %vm2856_vm9, %v3727_v7 }
 0x85a   : > { %3655 = vst [vmem:[#allocation1 + $0x5] ss:$9 sm:$0xff] %v12838_v8 }
 0x85b   : > { %3656 = vst [vmem:[#allocation1 + $0x6] ss:$9 sm:$0xff] %v12839_v30  ;;  %v12856_v30 = vld [vmem:[#allocation286_spill] sm:$0xff] }
 0x85c   : > { %3657 = vst [vmem:[#allocation1 + $0x7] ss:$9 sm:$0xff] %v9279_v12  ;;  %v3705_v12 = vsel %vm2101_vm7, %v9336_v43, %v9707_v15  ;;  %v12848_v43 = vld [vmem:[#allocation282_spill] sm:$0xff] }
 0x85d   : > { %3547 = vrot.lane.b32.xlu0 %v9594_v22, %s6653_s23  ;;  %2093 = vrot.lane.b32.xlu2 %v12840_v62, %s6654_s9  ;;  %12841 = vst [vmem:[#allocation116_spill] sm:$0xff] %v9863_v4  ;;  %v12843_v22 = vld [vmem:[#allocation17_spill] sm:$0xff] }
 0x85f   : > { %v2631_v16 = vpop.permute.xlu2 %2630 }
 0x860   : > { %v2800_v38 = vsel %vm2101_vm7, %v12842_v27, %v2631_v16  ;;  %v9881_v46 = vpop.f32.mrf.mxu1 }
 0x861   : > { %v2824_v20 = vsel %vm2126_vm8, %v2800_v38, %v9704_v14  ;;  %v12846_v14 = vld [vmem:[#allocation101_spill] sm:$0xff] }
 0x862   : > { %6330 = vmatmul.msk.bf16.gmra.mxu0 %vm2856_vm9, %v2824_v20 }
 0x863   : > { %v3658_v59 = vld [vmem:[#allocation1] sm:$0xff] }
 0x864   : > { %3692 = vrot.lane.b32.xlu1 %v3658_v59, %s6654_s9  ;;  %3660 = vst [vmem:[#allocation1] ss:$9 sm:$0xff] %v9281_v49 }
 0x865   : > { %2095 = vrot.lane.b32.xlu0 %v12843_v22, %s6654_s9  ;;  %3661 = vst [vmem:[#allocation1 + $0x1] ss:$9 sm:$0xff] %v12844_v11  ;;  %1950 = vrot.lane.b32.xlu2 %v12845_v58, %s6653_s23  ;;  %v12858_v22 = vld [vmem:[#allocation7_spill] sm:$0xff] }
 0x866   : > { %3662 = vst [vmem:[#allocation1 + $0x2] ss:$9 sm:$0xff] %v12846_v14  ;;  %v4084_v11 = vunpack.c.l.bf16 %v12858_v22  ;;  %v12860_v14 = vld [vmem:[#allocation13_spill] sm:$0xff] }
 0x867   : > { %3663 = vst [vmem:[#allocation1 + $0x3] ss:$9 sm:$0xff] %v12847_v55  ;;  %v3681_v1 = vpop.permute.xlu2 %3680  ;;  %v9901_v44 = vpop.f32.mrf.mxu2  ;;  %v4085_v55 = vunpack.c.l.bf16 %v12860_v14  ;;  %v12866_v22 = vld [vmem:[#allocation25_spill] sm:$0xff] }
 0x868   : > { %3664 = vst [vmem:[#allocation1 + $0x4] ss:$9 sm:$0xff] %v9290_v50  ;;  %v3729_v49 = vsel %vm2126_vm8, %v3705_v12, %v3681_v1  ;;  %v9894_v15 = vpop.f32.mrf.mxu1  ;;  %v12849_v50 = vld [vmem:[#allocation129_spill] sm:$0xff]  ;;  %v1949_v12 = vpop.permute.xlu1 %1948  ;;  %v4144_v1 = vrot.slane %v4084_v11, 2 }
 0x869   : > { %3665 = vst [vmem:[#allocation1 + $0x5] ss:$9 sm:$0xff] %v9292_v39  ;;  %6375 = vmatmul.msk.bf16.gmra.mxu2 %vm2856_vm9, %v3729_v49 }
 0x86a   : > { %3666 = vst [vmem:[#allocation1 + $0x6] ss:$9 sm:$0xff] %v9294_v29 }
 0x86b   : > { %3667 = vst [vmem:[#allocation1 + $0x7] ss:$9 sm:$0xff] %v9296_v57  ;;  %v12851_v57 = vld [vmem:[#allocation18_spill] sm:$0xff] }
 0x86c   : > { %3549 = vrot.lane.b32.xlu1 %v9622_v47, %s6653_s23  ;;  %12850 = vst [vmem:[#allocation117_spill] sm:$0xff] %v9901_v44  ;;  %v3707_v47 = vsel %vm2101_vm7, %v9346_v48, %v9737_v21  ;;  %v3709_v21 = vsel %vm2101_vm7, %v9356_v25, %v9767_v41  ;;  %v3711_v25 = vsel %vm2101_vm7, %v9366_v5, %v9797_v0  ;;  %v12857_v5 = vld [vmem:[#allocation99_spill] sm:$0xff] }
 0x86d   : > { %1952 = vrot.lane.b32.xlu0 %v12848_v43, %s6653_s23  ;;  %v3713_v0 = vsel %vm2101_vm7, %v12857_v5, %v9830_v42  ;;  %v4145_v42 = vrot.slane %v4084_v11, 4 }
 0x86f   : > { %v2633_v56 = vpop.permute.xlu2 %2632  ;;  %v9915_v63 = vpop.f32.mrf.mxu2 }
 0x870   : > { %v2802_v24 = vsel %vm2101_vm7, %v12849_v50, %v2633_v56  ;;  %v9911_v34 = vpop.f32.mrf.mxu1  ;;  %12852 = vst [vmem:[#allocation118_spill] sm:$0xff] %v9915_v63  ;;  %v4146_v56 = vrot.slane %v4084_v11, 6 }
 0x871   : > { %v2826_v39 = vsel %vm2126_vm8, %v2802_v24, %v9735_v51  ;;  %v4147_v24 = vrot.slane %v4085_v55, 2 }
 0x872   : > { %6331 = vmatmul.msk.bf16.gmra.mxu0 %vm2856_vm9, %v2826_v39  ;;  %v3668_v29 = vld [vmem:[#allocation1] sm:$0xff]  ;;  %v4148_v39 = vrot.slane %v4085_v55, 4 }
 0x873   : > { %3694 = vrot.lane.b32.xlu2 %v3668_v29, %s6654_s9  ;;  %3670 = vst [vmem:[#allocation1] ss:$9 sm:$0xff] %v9284_v61  ;;  %v4221_v29 = vrot.slane %v4144_v1, 7 }
 0x874   : > { %2097 = vrot.lane.b32.xlu1 %v12851_v57, %s6654_s9  ;;  %3671 = vst [vmem:[#allocation1 + $0x1] ss:$9 sm:$0xff] %v9286_v36  ;;  %v4224_v57 = vrot.slane %v4145_v42, 7 }
 0x877   : > { %v3683_v51 = vpop.permute.xlu2 %3682  ;;  %v9924_v48 = vpop.f32.mrf.mxu2 }
 0x878   : > { %v3731_v35 = vsel %vm2126_vm8, %v3707_v47, %v3683_v51  ;;  %v9917_v26 = vpop.f32.mrf.mxu1  ;;  %12854 = vst [vmem:[#allocation120_spill] sm:$0xff] %v9924_v48  ;;  %v6384_v47 = vrot.slane %v4084_v11, 9  ;;  %v4227_v51 = vrot.slane %v4146_v56, 7  ;;  %v10000_v11 = vunpack.c.l.bf16 %v12866_v22 }
 0x879   : > { %6376 = vmatmul.msk.bf16.gmra.mxu2 %vm2856_vm9, %v3731_v35 }
 0x87a   : > { %v4154_v42 = vrot.slane %v10000_v11, 2 }
 0x87f   : > { %v2635_v61 = vpop.permute.xlu2 %2634  ;;  %v2951_v31 = vpop.f32.mrf.mxu2 }
 0x880   : > { %v2804_v13 = vsel %vm2101_vm7, %v12853_v17, %v2635_v61  ;;  %v9929_v3 = vpop.f32.mrf.mxu1  ;;  %v4149_v17 = vrot.slane %v4085_v55, 6 }
 0x881   : > { %v2828_v36 = vsel %vm2126_vm8, %v2804_v13, %v9763_v18  ;;  %v12855_v18 = vld [vmem:[#allocation139_spill] sm:$0xff]  ;;  %v9977_v13 = vrot.slane %v4147_v24, 7 }
 0x882   : > { %6332 = vmatmul.msk.bf16.gmra.mxu0 %vm2856_vm9, %v2828_v36  ;;  %v4236_v36 = vrot.slane %v4148_v39, 7  ;;  %v4239_v5 = vrot.slane %v4149_v17, 7 }
 0x884   : > { %v4241_v39 = vrot.slane %v4239_v5, 2 }
 0x887   : > { %v3685_v52 = vpop.permute.xlu2 %3684 }
 0x888   : > { %v3733_v9 = vsel %vm2126_vm8, %v3709_v21, %v3685_v52  ;;  %v9933_v19 = vpop.f32.mrf.mxu1  ;;  %v4223_v21 = vrot.slane %v4221_v29, 2  ;;  %v4226_v52 = vrot.slane %v4224_v57, 2 }
 0x889   : > { %6377 = vmatmul.msk.bf16.gmra.mxu2 %vm2856_vm9, %v3733_v9  ;;  %v4230_v9 = vrot.slane %v4085_v55, 7 }
 0x88f   : > { %v2637_v54 = vpop.permute.xlu2 %2636 }
 0x890   : > { %v2806_v60 = vsel %vm2101_vm7, %v12855_v18, %v2637_v54  ;;  %v9943_v41 = vpop.f32.mrf.mxu1  ;;  %v12863_v54 = vld [vmem:[#allocation20_spill] sm:$0xff] }
 0x891   : > { %v2830_v6 = vsel %vm2126_vm8, %v2806_v60, %v9795_v37  ;;  %v9982_v18 = vunpack.c.l.bf16 %v12863_v54 }
 0x892   : > { %6333 = vmatmul.msk.bf16.gmra.mxu0 %vm2856_vm9, %v2830_v6  ;;  %v4222_v6 = vsel %vm9973_vm13, %v6384_v47, %v4221_v29 }
 0x893   : > { %v4152_v14 = vrot.slane %v9982_v18, 4 }
 0x897   : > { %v3687_v7 = vpop.permute.xlu2 %3686 }
 0x898   : > { %v3735_v23 = vsel %vm2126_vm8, %v3711_v25, %v3687_v7  ;;  %v9947_v10 = vpop.f32.mrf.mxu1  ;;  %v4229_v25 = vrot.slane %v4227_v51, 2  ;;  %v12864_v7 = vld [vmem:[#allocation16_spill] sm:$0xff] }
 0x899   : > { %6378 = vmatmul.msk.bf16.gmra.mxu2 %vm2856_vm9, %v3735_v23  ;;  %v4086_v23 = vunpack.c.l.bf16 %v12864_v7  ;;  %v4258_v7 = vrot.slane %v10000_v11, 7 }
 0x89a   : > { %v4231_v55 = vsel %vm9973_vm13, %v4229_v25, %v4230_v9 }
 0x89b   : > { %v4242_v1 = vrot.slane %v4086_v23, 7  ;;  %v6385_v17 = vrot.slane %v4086_v23, 9 }
 0x89f   : > { %v2639_v8 = vpop.permute.xlu2 %2638 }
 0x8a0   : > { %v2808_v62 = vsel %vm2101_vm7, %v12856_v30, %v2639_v8  ;;  %v9957_v16 = vpop.f32.mrf.mxu1  ;;  %v9991_v30 = vld [vmem:[%s11360_s3] ss:$0 sm:$0xff] }
 0x8a1   : > { %v2832_v37 = vsel %vm2126_vm8, %v2808_v62, %v9828_v2  ;;  %v12859_v2 = vld [vmem:[#allocation176_spill] sm:$0xff]  ;;  %v9993_v62 = vrot.slane %v4230_v9, 2 }
 0x8a2   : > { %6334 = vmatmul.msk.bf16.gmra.mxu0 %vm2856_vm9, %v2832_v37  ;;  %v2119_v58 = vsel %vm2101_vm7, %v12859_v2, %v1949_v12  ;;  %v4235_v37 = vrot.slane %v9977_v13, 2  ;;  %v4151_v12 = vrot.slane %v9982_v18, 2  ;;  %v4225_v2 = vsel %vm9973_vm13, %v4223_v21, %v4224_v57 }
 0x8a3   : > { %v4244_v57 = vrot.slane %v4242_v1, 2  ;;  %v6386_v21 = vrot.slane %v9982_v18, 9 }
 0x8a4   : > { %v10018_v24 = vsel %vm9973_vm13, %v4235_v37, %v4236_v36  ;;  %v4249_v47 = vrot.slane %v4151_v12, 7  ;;  %v10031_v37 = vld [vmem:[#allocation1] sm:$0xff] }
 0x8a7   : > { %v3689_v27 = vpop.permute.xlu2 %3688 }
 0x8a8   : > { %v3737_v38 = vsel %vm2126_vm8, %v3713_v0, %v3689_v27  ;;  %v9961_v20 = vpop.f32.mrf.mxu1  ;;  %v12865_v0 = vld [vmem:[#allocation114_spill] sm:$0xff] }
 0x8a9   : > { %6379 = vmatmul.msk.bf16.gmra.mxu2 %vm2856_vm9, %v3737_v38  ;;  %v4238_v38 = vrot.slane %v4236_v36, 2  ;;  %v4155_v36 = vrot.slane %v10000_v11, 4 }
 0x8ab   : > { %v10022_v29 = vsel %vm9973_vm13, %v4238_v38, %v4239_v5  ;;  %v10040_v63 = vrot.slane %v4155_v36, 7  ;;  %v10058_v36 = vstv %s6405_s22 }
 0x8ac   : > { %vm4698_vm3 = vcmp.ge.s32.totalorder %v10058_v36, 0  ;;  %vm4708_vm15 = vcmp.lt.s32.totalorder %v10058_v36, 16 }
 0x8ad   : > { %vm10262_vm4 = vmand %vm4698_vm3, %vm4708_vm15  ;;  %vm5412_vm3 = vcmask 1042432   ;;  %vm5413_vm15 = vcmask 1046532  }
 0x8af   : > { %v3546_v59 = vpop.permute.xlu2 %3545 }
 0x8b0   : > { %v9969_v49 = vpop.f32.mrf.mxu1  ;;  %v3715_v27 = vsel %vm2101_vm7, %v12865_v0, %v3546_v59  ;;  %v4153_v59 = vrot.slane %v9982_v18, 6 }
 0x8b2   : > { %v4255_v25 = vrot.slane %v4153_v59, 7 }
 0x8b7   : > { %v2094_v43 = vpop.permute.xlu2 %2093 }
 0x8b8   : > { %v2144_v50 = vsel %vm2126_vm8, %v2119_v58, %v2094_v43  ;;  %v9979_v31 = vpop.f32.mrf.mxu1  ;;  %v4228_v58 = vsel %vm9973_vm13, %v4226_v52, %v4227_v51  ;;  %v4691_v51 = vlaneseq  ;;  %v4252_v52 = vrot.slane %v4152_v14, 7 }
 0x8b9   : > { %6352 = vmatmul.msk.bf16.gmra.mxu1 %vm2856_vm9, %v2144_v50  ;;  %v4156_v14 = vrot.slane %v10000_v11, 6 }
 0x8ba   : > { %v4254_v50 = vrot.slane %v4252_v52, 2 }
 0x8bc   : > { %v3795_v35 = vpop.f32.mrf.mxu2 }
 0x8bf   : > { %v2894_v60 = vpop.f32.mrf.mxu0  ;;  %v1951_v12 = vpop.permute.xlu2 %1950 }
 0x8c0   : > { %v2999_v8 = vadd.f32 %v9881_v46, %v2894_v60  ;;  %v10025_v9 = vpop.f32.mrf.mxu1 }
 0x8c2   : > { %v3854_v46 = vadd.f32 %v3795_v35, %v2999_v8  ;;  %v10029_v8 = vrot.slane %v4154_v42, 7 }
 0x8c4   : > { %v3881_v43 = vadd.f32 %v9991_v30, %v3854_v46  ;;  %v3797_v56 = vpop.f32.mrf.mxu2  ;;  %v4251_v46 = vrot.slane %v4249_v47, 2 }
 0x8c6   : > { %v3904_v35 = vmax.f32 %v3881_v43, 0.0 }
 0x8c7   : > { %v3691_v54 = vpop.permute.xlu0 %3690  ;;  %v2896_v60 = vpop.f32.mrf.mxu0 }
 0x8c8   : > { %v3739_v5 = vsel %vm2126_vm8, %v3715_v27, %v3691_v54  ;;  %v3950_v23 = vrot.slane %v3904_v35, 2  ;;  %v3951_v0 = vrot.slane %v3904_v35, 4  ;;  %v3952_v18 = vrot.slane %v3904_v35, 6 }
 0x8c9   : > { %6380 = vmatmul.msk.bf16.gmra.mxu2 %vm2856_vm9, %v3739_v5  ;;  %v4589_v38 = vadd.f32 %v4222_v6, %v3904_v35  ;;  %v3001_v22 = vadd.f32 %v9894_v15, %v2896_v60  ;;  %v4257_v27 = vrot.slane %v4255_v25, 2  ;;  %v10038_v54 = vrot.slane %v4258_v7, 2  ;;  %v12867_v6 = vld [vmem:[#allocation185_spill] sm:$0xff] }
 0x8ca   : > { %v4590_v59 = vadd.f32 %v4225_v2, %v3950_v23  ;;  %v4591_v42 = vadd.f32 %v4228_v58, %v3951_v0  ;;  %v4592_v43 = vadd.f32 %v4231_v55, %v3952_v18  ;;  %v10044_v35 = vsel %vm2101_vm7, %v12867_v6, %v1951_v12  ;;  %v12869_v18 = vld [vmem:[#allocation28_spill] sm:$0xff] }
 0x8cb   : > { %4976 = vst [vmem:[#allocation1] ss:$4 sm:$0xff] %v4589_v38  ;;  %v3855_v48 = vadd.f32 %v3797_v56, %v3001_v22  ;;  %v4243_v15 = vsel %vm9973_vm13, %v4241_v39, %v4242_v1  ;;  %v4263_v2 = vrot.slane %v10029_v8, 2  ;;  %v4692_v58 = vshrl.u32 %v4691_v51, 7  ;;  %v10070_v51 = vpop.f32.mrf.mxu1 }
 0x8cc   : > { %4978 = vst [vmem:[#allocation1 + $0x1] ss:$4 sm:$0xff] %v4590_v59  ;;  %v3800_v11 = vpop.f32.mrf.mxu2  ;;  %v10052_v56 = vsel %vm9973_vm13, %v4244_v57, %v6385_v17  ;;  %v10056_v60 = vsel %vm9973_vm13, %v6386_v21, %v4249_v47  ;;  %v10062_v1 = vsel %vm9973_vm13, %v4251_v46, %v4252_v52  ;;  %v10066_v39 = vsel %vm9973_vm13, %v4254_v50, %v4255_v25  ;;  %v12868_v57 = vld [vmem:[#allocation32_spill] sm:$0xff] }
 0x8cd   : > { %4980 = vst [vmem:[#allocation1 + $0x2] ss:$4 sm:$0xff] %v4591_v42  ;;  %v3882_v55 = vadd.f32 %v9991_v30, %v3855_v48  ;;  %v10068_v48 = vrot.slane %v4156_v14, 7  ;;  %v10073_v17 = vunpack.c.l.bf16 %v12868_v57  ;;  %v10077_v23 = vsel %vm9973_vm13, %v4257_v27, %v4258_v7 }
 0x8ce   : > { %4982 = vst [vmem:[#allocation1 + $0x3] ss:$4 sm:$0xff] %v4592_v43  ;;  %v4266_v52 = vrot.slane %v10040_v63, 2  ;;  %v10088_v0 = vsel %vm9973_vm13, %v4263_v2, %v10040_v63  ;;  %v4089_v38 = vunpack.c.l.bf16 %v12869_v18  ;;  %v12870_v14 = vsel %vm9973_vm13, %v9993_v62, %v9977_v13 }
 0x8cf   : > { %v3548_v47 = vpop.permute.xlu0 %3547  ;;  %v3905_v21 = vmax.f32 %v3882_v55, 0.0  ;;  %v2899_v5 = vpop.f32.mrf.mxu0  ;;  %v4159_v43 = vrot.slane %v10073_v17, 4  ;;  %v4694_v63 = vadd.s32 16, %v4692_v58  ;;  %v12871_v55 = vld [vmem:[#allocation37_spill] sm:$0xff]  ;;  %v12874_v53 = vrot.slane %v10068_v48, 2 }
 0x8d0   : > { %v3004_v25 = vadd.f32 %v9911_v34, %v2899_v5  ;;  %v4158_v34 = vrot.slane %v10073_v17, 2  ;;  %v10102_v57 = vunpack.c.l.bf16 %v12871_v55  ;;  %v12872_v5 = vld [vmem:[#allocation115_spill] sm:$0xff] }
 0x8d1   : > { %v3953_v7 = vrot.slane %v3905_v21, 2  ;;  %v3954_v22 = vrot.slane %v3905_v21, 4  ;;  %v3955_v46 = vrot.slane %v3905_v21, 6  ;;  %v4593_v59 = vadd.f32 %v12870_v14, %v3905_v21 }
 0x8d2   : > { %v3856_v42 = vadd.f32 %v3800_v11, %v3004_v25  ;;  %v3717_v18 = vsel %vm2101_vm7, %v12872_v5, %v3548_v47  ;;  %v4160_v11 = vrot.slane %v10073_v17, 6  ;;  %v10108_v21 = vadd.s32 4294967295, %v4692_v58 }
 0x8d3   : > { %v4594_v27 = vadd.f32 %v10018_v24, %v3953_v7  ;;  %v4595_v6 = vadd.f32 %v10022_v29, %v3954_v22  ;;  %v4596_v2 = vadd.f32 %v4243_v15, %v3955_v46  ;;  %4984 = vst [vmem:[#allocation1 + $0x20] ss:$4 sm:$0xff] %v4593_v59  ;;  %v4270_v25 = vrot.slane %v4089_v38, 7 }
 0x8d4   : > { %v3883_v13 = vadd.f32 %v9991_v30, %v3856_v42  ;;  %v3802_v62 = vpop.f32.mrf.mxu2  ;;  %v6387_v24 = vrot.slane %v4089_v38, 9  ;;  %v6388_v29 = vrot.slane %v10073_v17, 9  ;;  %v4161_v15 = vrot.slane %v10102_v57, 2 }
 0x8d5   : > { %4986 = vst [vmem:[#allocation1 + $0x21] ss:$4 sm:$0xff] %v4594_v27  ;;  %v4277_v46 = vrot.slane %v4158_v34, 7  ;;  %v4286_v47 = vrot.slane %v10102_v57, 7  ;;  %v10113_v14 = vadd.s32 4294967295, %v4694_v63  ;;  %v4280_v27 = vrot.slane %v4159_v43, 7 }
 0x8d6   : > { %4988 = vst [vmem:[#allocation1 + $0x22] ss:$4 sm:$0xff] %v4595_v6  ;;  %v3693_v7 = vpop.permute.xlu1 %3692  ;;  %v3906_v22 = vmax.f32 %v3883_v13, 0.0  ;;  %v4162_v38 = vrot.slane %v10102_v57, 4  ;;  %v4283_v55 = vrot.slane %v4160_v11, 7  ;;  %v3033_v13 = vpop.f32.mrf.mxu1  ;;  %v10119_v34 = vrot.slane %v4161_v15, 7 }
 0x8d7   : > { %4990 = vst [vmem:[#allocation1 + $0x23] ss:$4 sm:$0xff] %v4596_v2  ;;  %v2096_v59 = vpop.permute.xlu0 %2095  ;;  %v3741_v58 = vsel %vm2126_vm8, %v3717_v18, %v3693_v7  ;;  %v2901_v42 = vpop.f32.mrf.mxu0  ;;  %v4272_v18 = vrot.slane %v4270_v25, 2  ;;  %v4268_v11 = vsel %vm9973_vm13, %v4266_v52, %v10068_v48  ;;  %v4282_v7 = vrot.slane %v4280_v27, 2 }
 0x8d8   : > { %v2146_v17 = vsel %vm2126_vm8, %v10044_v35, %v2096_v59  ;;  %v3956_v6 = vrot.slane %v3906_v22, 2  ;;  %v3958_v5 = vrot.slane %v3906_v22, 6  ;;  %v3957_v63 = vrot.slane %v3906_v22, 4  ;;  %v10130_v15 = vld.sshfl [vmem:[#allocation1] sm:$0xff pattern:$0x73625140] }
 0x8d9   : > { %6353 = vmatmul.msk.bf16.gmra.mxu1 %vm2856_vm9, %v2146_v17  ;;  %6381 = vmatmul.msk.bf16.gmra.mxu2 %vm2856_vm9, %v3741_v58  ;;  %v4597_v2 = vadd.f32 %v10052_v56, %v3906_v22  ;;  %v3006_v43 = vadd.f32 %v9917_v26, %v2901_v42  ;;  %v4279_v35 = vrot.slane %v4277_v46, 2  ;;  %v10128_v59 = vrot.slane %v4286_v47, 2  ;;  %v12873_v42 = vld [vmem:[#allocation40_spill] sm:$0xff] }
 0x8da   : > { %v4598_v17 = vadd.f32 %v10056_v60, %v3956_v6  ;;  %v4600_v58 = vadd.f32 %v10066_v39, %v3958_v5  ;;  %v4285_v12 = vrot.slane %v4283_v55, 2  ;;  %v4291_v26 = vrot.slane %v10119_v34, 2 }
 0x8db   : > { %v3857_v50 = vadd.f32 %v3802_v62, %v3006_v43  ;;  %4993 = vst [vmem:[#allocation1] ss:$4 sm:$0xff] %v4597_v2  ;;  %v4292_v22 = vrot.slane %v4162_v38, 7  ;;  %v4092_v44 = vunpack.c.l.bf16 %v12873_v42  ;;  %v4163_v52 = vrot.slane %v10102_v57, 6 }
 0x8dc   : > { %v3805_v56 = vpop.f32.mrf.mxu2  ;;  %v4599_v4 = vadd.f32 %v10062_v1, %v3957_v63  ;;  %v4271_v60 = vsel %vm9973_vm13, %v12874_v53, %v4270_v25  ;;  %v10145_v39 = vsel %vm9973_vm13, %v4272_v18, %v6387_v24  ;;  %v10151_v6 = vsel %vm9973_vm13, %v6388_v29, %v4277_v46  ;;  %v12876_v18 = vld [vmem:[#allocation107_spill] sm:$0xff] }
 0x8dd   : > { %v3884_v40 = vadd.f32 %v9991_v30, %v3857_v50  ;;  %v10155_v1 = vsel %vm9973_vm13, %v4279_v35, %v4280_v27  ;;  %v10158_v48 = vadd.f32 %v3033_v13, %v9776_v45  ;;  %v12875_v50 = vld [vmem:[#allocation44_spill] sm:$0xff]  ;;  %v10165_v24 = vsel %vm9973_vm13, %v4282_v7, %v4283_v55 }
 0x8de   : > { %v10147_v62 = vld.sshfl [vmem:[#allocation1 + $0x20] sm:$0xff pattern:$0x73625140]  ;;  %v3550_v38 = vpop.permute.xlu1 %3549  ;;  %v10161_v53 = vunpack.c.l.bf16 %v12875_v50  ;;  %v4290_v29 = vsel %vm9973_vm13, %v10128_v59, %v10119_v34  ;;  %v4295_v46 = vrot.slane %v4163_v52, 7  ;;  %v10174_v27 = vsel %vm9973_vm13, %v4285_v12, %v4286_v47  ;;  %v12884_v34 = vld [vmem:[#allocation61_spill] sm:$0xff] }
 0x8df   : > { %4995 = vst [vmem:[#allocation1 + $0x20] ss:$4 sm:$0xff] %v4598_v17  ;;  %v3907_v57 = vmax.f32 %v3884_v40, 0.0  ;;  %v2904_v25 = vpop.f32.mrf.mxu0  ;;  %v10178_v40 = vsel %vm9973_vm13, %v4291_v26, %v4292_v22  ;;  %v4298_v5 = vrot.slane %v4092_v44, 7  ;;  %v1953_v55 = vpop.permute.xlu0 %1952  ;;  %v3719_v35 = vsel %vm2101_vm7, %v12876_v18, %v3550_v38  ;;  %v12878_v52 = vld [vmem:[#allocation192_spill] sm:$0xff] }
 0x8e0   : > { %4997 = vst [vmem:[#allocation1 + $0x22] ss:$4 sm:$0xff] %v4600_v58  ;;  %v3009_v45 = vadd.f32 %v9929_v3, %v2904_v25  ;;  %v3695_v3 = vpop.permute.xlu2 %3694  ;;  %v3035_v17 = vpop.f32.mrf.mxu1  ;;  %v4165_v12 = vrot.slane %v10161_v53, 2  ;;  %v4294_v47 = vrot.slane %v4292_v22, 2  ;;  %v2123_v38 = vsel %vm2101_vm7, %v12878_v52, %v1953_v55 }
 0x8e1   : > { %4996 = vst [vmem:[#allocation1 + $0x21] ss:$4 sm:$0xff] %v4599_v4  ;;  %v3959_v13 = vrot.slane %v3907_v57, 2  ;;  %v3960_v63 = vrot.slane %v3907_v57, 4  ;;  %v3961_v2 = vrot.slane %v3907_v57, 6  ;;  %v4601_v43 = vadd.f32 %v10077_v23, %v3907_v57 }
 0x8e2   : > { %v3858_v7 = vadd.f32 %v3805_v56, %v3009_v45  ;;  %v12877_v4 = vsel %vm9973_vm13, %v10038_v54, %v10029_v8  ;;  %v4297_v23 = vrot.slane %v4295_v46, 2  ;;  %v4300_v57 = vrot.slane %v4298_v5, 2  ;;  %v10193_v22 = vld.sshfl [vmem:[#allocation1] sm:$0xff pattern:$0x73625140] }
 0x8e3   : > { %v4602_v58 = vadd.f32 %v12877_v4, %v3959_v13  ;;  %v4603_v26 = vadd.f32 %v10088_v0, %v3960_v63  ;;  %v4604_v42 = vadd.f32 %v4268_v11, %v3961_v2  ;;  %4998 = vst [vmem:[#allocation1 + $0x23] ss:$4 sm:$0xff] %v4601_v43  ;;  %v6389_v25 = vrot.slane %v4092_v44, 9  ;;  %v12879_v2 = vld [vmem:[#allocation47_spill] sm:$0xff] }
 0x8e4   : > { %v3885_v56 = vadd.f32 %v9991_v30, %v3858_v7  ;;  %v3807_v50 = vpop.f32.mrf.mxu2  ;;  %v3743_v45 = vsel %vm2126_vm8, %v3719_v35, %v3695_v3  ;;  %v10197_v8 = vadd.f32 %v3035_v17, %v9793_v28  ;;  %v4166_v54 = vrot.slane %v10161_v53, 4 }
 0x8e5   : > { %v4167_v0 = vrot.slane %v10161_v53, 6  ;;  %5000 = vst [vmem:[#allocation1] ss:$4 sm:$0xff] %v4602_v58  ;;  %v6390_v55 = vrot.slane %v10161_v53, 9  ;;  %v4305_v63 = vrot.slane %v4165_v12, 7  ;;  %v4094_v43 = vunpack.c.l.bf16 %v12879_v2 }
 0x8e6   : > { %v2098_v11 = vpop.permute.xlu1 %2097  ;;  %v3908_v13 = vmax.f32 %v3885_v56, 0.0  ;;  %5001 = vst [vmem:[#allocation1 + $0x1] ss:$4 sm:$0xff] %v4603_v26  ;;  %v10206_v28 = vsel %vm9973_vm13, %v4294_v47, %v4295_v46  ;;  %v10210_v35 = vsel %vm9973_vm13, %v4297_v23, %v4298_v5  ;;  %v4308_v3 = vrot.slane %v4166_v54, 7 }
 0x8e7   : > { %v2148_v44 = vsel %vm2126_vm8, %v2123_v38, %v2098_v11  ;;  %v2906_v18 = vpop.f32.mrf.mxu0  ;;  %5002 = vst [vmem:[#allocation1 + $0x2] ss:$4 sm:$0xff] %v4604_v42  ;;  %v10214_v53 = vsel %vm9973_vm13, %v4300_v57, %v6389_v25  ;;  %v4311_v12 = vrot.slane %v4167_v0, 7  ;;  %v4307_v58 = vrot.slane %v4305_v63, 2  ;;  %v12880_v57 = vld [vmem:[#allocation52_spill] sm:$0xff] }
 0x8e8   : > { %v3962_v7 = vrot.slane %v3908_v13, 2  ;;  %v4605_v17 = vadd.f32 %v4271_v60, %v3908_v13  ;;  %v3963_v4 = vrot.slane %v3908_v13, 4  ;;  %v3964_v46 = vrot.slane %v3908_v13, 6 }
 0x8e9   : > { %6354 = vmatmul.msk.bf16.gmra.mxu1 %vm2856_vm9, %v2148_v44  ;;  %6382 = vmatmul.msk.bf16.gmra.mxu2 %vm2856_vm9, %v3743_v45  ;;  %v3011_v47 = vadd.f32 %v9933_v19, %v2906_v18  ;;  %v10222_v26 = vsel %vm9973_vm13, %v6390_v55, %v4305_v63  ;;  %v4168_v60 = vrot.slane %v4094_v43, 2  ;;  %v4314_v42 = vrot.slane %v4094_v43, 7 }
 0x8ea   : > { %v4606_v5 = vadd.f32 %v10145_v39, %v3962_v7  ;;  %vm4728_vm1 = vcmp.ge.s32.totalorder %v10108_v21, 0  ;;  %5003 = vst [vmem:[#allocation1 + $0x3] ss:$4 sm:$0xff] %v4605_v17  ;;  %v10225_v23 = vld.sshfl [vmem:[#allocation1 + $0x20] sm:$0xff pattern:$0x73625140]  ;;  %v4095_v25 = vunpack.c.l.bf16 %v12880_v57  ;;  %v4607_v0 = vadd.f32 %v10151_v6, %v3963_v4 }
 0x8eb   : > { %v3859_v52 = vadd.f32 %v3807_v50, %v3011_v47  ;;  %v4310_v38 = vrot.slane %v4308_v3, 2  ;;  %v10228_v56 = vadd.s32 2, %v10058_v36  ;;  %v4313_v39 = vrot.slane %v4311_v12, 2  ;;  %vm4757_vm0 = vmand %vm10262_vm4, %vm4728_vm1 }
 0x8ec   : > { %5004 = vst [vmem:[#allocation1 + $0x20] ss:$4 sm:$0xff] %v4606_v5  ;;  %v3810_v19 = vpop.f32.mrf.mxu2  ;;  %v4169_v45 = vrot.slane %v4094_v43, 4  ;;  %v4170_v54 = vrot.slane %v4094_v43, 6  ;;  %v4608_v11 = vadd.f32 %v10155_v1, %v3964_v46  ;;  %v10237_v50 = vsel %vm9973_vm13, %v4307_v58, %v4308_v3 }
 0x8ed   : > { %v3886_v13 = vadd.f32 %v9991_v30, %v3859_v52  ;;  %v10239_v55 = vrot.slane %v4168_v60, 7  ;;  %v4326_v44 = vrot.slane %v4095_v25, 7  ;;  %vm4789_vm14 = vcmp.lt.s32.totalorder %v10113_v14, 16 }
 0x8ee   : > { %v4320_v63 = vrot.slane %v4169_v45, 7  ;;  %v4323_v2 = vrot.slane %v4170_v54, 7  ;;  %v10244_v6 = vsel %vm9973_vm13, %v4310_v38, %v4311_v12  ;;  %v10246_v1 = vrot.slane %v4314_v42, 2  ;;  %vm10311_vm10 = vmand %vm10262_vm4, %vm4789_vm14 }
 0x8ef   : > { %v3909_v18 = vmax.f32 %v3886_v13, 0.0  ;;  %v2909_v7 = vpop.f32.mrf.mxu0  ;;  %v10252_v3 = vsel %vm9973_vm13, %v4313_v39, %v4314_v42  ;;  %v4319_v17 = vrot.slane %v10239_v55, 2  ;;  %v6391_v4 = vrot.slane %v4095_v25, 9  ;;  %v12883_v25 = vld [vmem:[#allocation56_spill] sm:$0xff] }
 0x8f0   : > { %v3014_v43 = vadd.f32 %v9943_v41, %v2909_v7  ;;  %v4322_v52 = vrot.slane %v4320_v63, 2  ;;  %v4325_v38 = vrot.slane %v4323_v2, 2  ;;  %v4328_v57 = vrot.slane %v4326_v44, 2 }
 0x8f1   : > { %v3965_v46 = vrot.slane %v3909_v18, 2  ;;  %v3966_v47 = vrot.slane %v3909_v18, 4  ;;  %v3967_v58 = vrot.slane %v3909_v18, 6  ;;  %v4609_v5 = vadd.f32 %v10165_v24, %v3909_v18  ;;  %v10256_v12 = vld.sshfl [vmem:[#allocation1] sm:$0xff pattern:$0x73625140] }
 0x8f2   : > { %v3860_v60 = vadd.f32 %v3810_v19, %v3014_v43  ;;  %5007 = vst [vmem:[#allocation1] ss:$4 sm:$0xff] %v4607_v0  ;;  %v4096_v45 = vunpack.c.l.bf16 %v12883_v25  ;;  %v4318_v13 = vsel %vm9973_vm13, %v10246_v1, %v10239_v55  ;;  %vm4700_vm5 = vcmp.ge.s32.totalorder %v10228_v56, 0 }
 0x8f3   : > { %v10266_v42 = vld.sshfl [vmem:[#allocation1 + $0x20] sm:$0xff pattern:$0x73625140]  ;;  %v4610_v39 = vadd.f32 %v10174_v27, %v3965_v46  ;;  %v4611_v24 = vadd.f32 %v4290_v29, %v3966_v47  ;;  %v4612_v19 = vadd.f32 %v10178_v40, %v3967_v58  ;;  %5008 = vst [vmem:[#allocation1 + $0x1] ss:$4 sm:$0xff] %v4608_v11  ;;  %vm4710_vm6 = vcmp.lt.s32.totalorder %v10228_v56, 16 }
 0x8f4   : > { %v3887_v54 = vadd.f32 %v9991_v30, %v3860_v60  ;;  %v3812_v0 = vpop.f32.mrf.mxu2  ;;  %5009 = vst [vmem:[#allocation1 + $0x2] ss:$4 sm:$0xff] %v4609_v5  ;;  %v4097_v59 = vunpack.c.l.bf16 %v12884_v34  ;;  %v4172_v29 = vrot.slane %v4096_v45, 2  ;;  %v4173_v27 = vrot.slane %v4096_v45, 4  ;;  %vm10320_vm11 = vmand %vm4700_vm5, %vm4710_vm6 }
 0x8f5   : > { %5011 = vst [vmem:[#allocation1 + $0x20] ss:$4 sm:$0xff] %v4611_v24  ;;  %v4174_v40 = vrot.slane %v4096_v45, 6  ;;  %v10290_v18 = vsel %vm9973_vm13, %v4319_v17, %v4320_v63  ;;  %v10294_v7 = vsel %vm9973_vm13, %v4322_v52, %v4323_v2  ;;  %v10298_v43 = vsel %vm9973_vm13, %v4325_v38, %v4326_v44  ;;  %vm10344_vm12 = vmand %vm10320_vm11, %vm4728_vm1 }
 0x8f6   : > { %5012 = vst [vmem:[#allocation1 + $0x21] ss:$4 sm:$0xff] %v4612_v19  ;;  %v3910_v11 = vmax.f32 %v3887_v54, 0.0  ;;  %v10302_v47 = vsel %vm9973_vm13, %v4328_v57, %v6391_v4  ;;  %v4333_v58 = vrot.slane %v4172_v29, 7  ;;  %v4336_v5 = vrot.slane %v4173_v27, 7  ;;  %vm4804_vm6 = vmand %vm10320_vm11, %vm4789_vm14 }
 0x8f7   : > { %v2911_v46 = vpop.f32.mrf.mxu0  ;;  %v4339_v60 = vrot.slane %v4174_v40, 7  ;;  %5010 = vst [vmem:[#allocation1 + $0x3] ss:$4 sm:$0xff] %v4610_v39  ;;  %v5133_v2 = vsel %vm4757_vm0, %v10130_v15, 0.0  ;;  %v6392_v44 = vrot.slane %v4096_v45, 9  ;;  %v4342_v38 = vrot.slane %v4097_v59, 7  ;;  %vm10420_vm0 = vmor %vm5412_vm3, %vm5413_vm15 }
 0x8f8   : > { %v3968_v24 = vrot.slane %v3910_v11, 2  ;;  %v3969_v63 = vrot.slane %v3910_v11, 4  ;;  %v4613_v17 = vadd.f32 %v10206_v28, %v3910_v11  ;;  %v3970_v52 = vrot.slane %v3910_v11, 6 }
 0x8f9   : > { %v3016_v19 = vadd.f32 %v9947_v10, %v2911_v46  ;;  %v4335_v39 = vrot.slane %v4333_v58, 2  ;;  %v4338_v28 = vrot.slane %v4336_v5, 2  ;;  %v5134_v15 = vsel %vm10262_vm4, %v10147_v62, 0.0 }
 0x8fa   : > { %v4614_v57 = vadd.f32 %v10210_v35, %v3968_v24  ;;  %5013 = vst [vmem:[#allocation1 + $0x22] ss:$4 sm:$0xff] %v4613_v17  ;;  %v4615_v25 = vadd.f32 %v10214_v53, %v3969_v63  ;;  %v4341_v54 = vrot.slane %v4339_v60, 2  ;;  %v12889_v35 = vld [vmem:[#allocation64_spill] sm:$0xff]  ;;  %v4175_v27 = vrot.slane %v4097_v59, 2 }
 0x8fb   : > { %v3861_v45 = vadd.f32 %v3812_v0, %v3016_v19  ;;  %v4098_v34 = vunpack.c.l.bf16 %v12889_v35  ;;  %v4176_v40 = vrot.slane %v4097_v59, 4  ;;  %v4177_v11 = vrot.slane %v4097_v59, 6 }
 0x8fc   : > { %5014 = vst [vmem:[#allocation1 + $0x23] ss:$4 sm:$0xff] %v4614_v57  ;;  %v3815_v29 = vpop.f32.mrf.mxu2  ;;  %v10332_v56 = vsel %vm10311_vm10, %v10193_v22, 0.0  ;;  %v4616_v46 = vadd.f32 %v10222_v26, %v3970_v52  ;;  %v10338_v53 = vsel %vm9973_vm13, %v6392_v44, %v4333_v58  ;;  %v10349_v22 = vadd.s32 3, %v10058_v36 }
 0x8fd   : > { %v3888_v62 = vadd.f32 %v9991_v30, %v3861_v45  ;;  %v10353_v26 = vsel %vm9973_vm13, %v4335_v39, %v4336_v5  ;;  %v10355_v0 = vrot.slane %v4342_v38, 2  ;;  %v10357_v59 = vrot.slane %v4175_v27, 7 }
 0x8fe   : > { %v4348_v58 = vrot.slane %v4176_v40, 7  ;;  %v5015_v24 = vld.sshfl [vmem:[#allocation1] sm:$0xff pattern:$0x73625140]  ;;  %v10361_v52 = vsel %vm9973_vm13, %v4338_v28, %v4339_v60  ;;  %v10365_v19 = vsel %vm9973_vm13, %v4341_v54, %v4342_v38  ;;  %v10369_v5 = vrot.slane %v4098_v34, 7 }
 0x8ff   : > { %v3911_v63 = vmax.f32 %v3888_v62, 0.0  ;;  %v2914_v17 = vpop.f32.mrf.mxu0  ;;  %5017 = vst [vmem:[#allocation1] ss:$4 sm:$0xff] %v4615_v25  ;;  %v4351_v4 = vrot.slane %v4177_v11, 7  ;;  %v5139_v57 = vsel %vm10344_vm12, %v5015_v24, 0.0  ;;  %v10374_v39 = vpack.c.bf16 %v5133_v2, %v5133_v2 }
 0x900   : > { %v3019_v44 = vadd.f32 %v9957_v16, %v2914_v17  ;;  %v10376_v27 = vpack.c.bf16 %v5134_v15, %v5134_v15  ;;  %v4347_v25 = vrot.slane %v10357_v59, 2  ;;  %v4350_v16 = vrot.slane %v4348_v58, 2 }
 0x901   : > { %v3971_v45 = vrot.slane %v3911_v63, 2  ;;  %v3972_v60 = vrot.slane %v3911_v63, 4  ;;  %v3973_v28 = vrot.slane %v3911_v63, 6  ;;  %v4617_v40 = vadd.f32 %v10237_v50, %v3911_v63 }
 0x902   : > { %v3862_v38 = vadd.f32 %v3815_v29, %v3019_v44  ;;  %v10386_v41 = vpack.c.bf16 %v5139_v57, %v5139_v57  ;;  %vm5193_vm4 = vsmask.f32 3328  ;;  %vm5194_vm5 = vsmask.f32 7440 }
 0x903   : > { %v4618_v11 = vadd.f32 %v10244_v6, %v3971_v45  ;;  %v4619_v2 = vadd.f32 %v10252_v3, %v3972_v60  ;;  %v5016_v62 = vld.sshfl [vmem:[#allocation1 + $0x20] sm:$0xff pattern:$0x73625140]  ;;  %v4620_v15 = vadd.f32 %v4318_v13, %v3973_v28  ;;  %v4353_v17 = vrot.slane %v4351_v4, 2  ;;  %vm10445_vm12 = vmor %vm5193_vm4, %vm5194_vm5 }
 0x904   : > { %v3889_v29 = vadd.f32 %v9991_v30, %v3862_v38  ;;  %v3817_v24 = vpop.f32.mrf.mxu2  ;;  %v5140_v50 = vsel %vm10320_vm11, %v5016_v62, 0.0  ;;  %5019 = vst [vmem:[#allocation1 + $0x20] ss:$4 sm:$0xff] %v4616_v46  ;;  %v6411_v3 = vrot.slane %v10386_v41, 9  ;;  %v5245_v55 = vshrl.u32 %v10386_v41, 16  ;;  %v12892_v46 = vld [vmem:[#allocation68_spill] sm:$0xff] }
 0x905   : > { %v10400_v6 = vpack.c.bf16 %v5140_v50, %v5140_v50  ;;  %5020 = vst [vmem:[#allocation1 + $0x21] ss:$4 sm:$0xff] %v4617_v40  ;;  %v5248_v1 = vshll.u32 %v10386_v41, 16  ;;  %v10407_v63 = vsel %vm9973_vm13, %v4347_v25, %v4348_v58  ;;  %v10411_v44 = vsel %vm9973_vm13, %v4350_v16, %v4351_v4 }
 0x906   : > { %v3912_v13 = vmax.f32 %v3889_v29, 0.0  ;;  %v5018_v10 = vld.sshfl [vmem:[#allocation1] sm:$0xff pattern:$0x73625140]  ;;  %5021 = vst [vmem:[#allocation1 + $0x22] ss:$4 sm:$0xff] %v4618_v11  ;;  %v10414_v57 = vunpack.c.l.bf16 %v12892_v46 }
 0x907   : > { %v2916_v45 = vpop.f32.mrf.mxu0  ;;  %v5141_v60 = vsel %vm4804_vm6, %v5018_v10, 0.0  ;;  %v5431_v28 = vrot.slane %v10400_v6, 5  ;;  %5022 = vst [vmem:[#allocation1 + $0x23] ss:$4 sm:$0xff] %v4619_v2  ;;  %v5247_v38 = vrot.slane %v5245_v55, 4  ;;  %v5250_v40 = vrot.slane %v5248_v1, 5 }
 0x908   : > { %v3974_v62 = vrot.slane %v3912_v13, 2  ;;  %v3975_v29 = vrot.slane %v3912_v13, 4  ;;  %v3976_v58 = vrot.slane %v3912_v13, 6  ;;  %v4621_v25 = vadd.f32 %v10290_v18, %v3912_v13  ;;  %5024 = vst [vmem:[#allocation1] ss:$4 sm:$0xff] %v4620_v15 }
 0x909   : > { %v3021_v16 = vadd.f32 %v9961_v20, %v2916_v45  ;;  %v5171_v11 = vpack.c.bf16 %v5141_v60, %v5141_v60  ;;  %v5432_v2 = vsel %vm10420_vm0, %v6411_v3, %v5431_v28  ;;  %v5433_v50 = vrot.slane %v5431_v28, 4 }
 0x90a   : > { %v4622_v55 = vadd.f32 %v10294_v7, %v3974_v62  ;;  %v4623_v1 = vadd.f32 %v10298_v43, %v3975_v29  ;;  %v4624_v18 = vadd.f32 %v10302_v47, %v3976_v58  ;;  %v10433_v13 = vsel %vm9973_vm13, %v4353_v17, %v10369_v5  ;;  %5025 = vst [vmem:[#allocation1 + $0x1] ss:$4 sm:$0xff] %v4621_v25 }
 0x90b   : > { %v3863_v15 = vadd.f32 %v3817_v24, %v3021_v16  ;;  %v5434_v10 = vrot.slane %v5171_v11, 5  ;;  %v5251_v20 = vor.u32 %v5250_v40, %v5247_v38  ;;  %v5254_v46 = vshll.u32 %v10400_v6, 16 }
 0x90c   : > { %vm4701_vm10 = vcmp.ge.s32.totalorder %v10349_v22, 0  ;;  %vm4711_vm11 = vcmp.lt.s32.totalorder %v10349_v22, 16  ;;  %v3820_v7 = vpop.f32.mrf.mxu2  ;;  %v5539_v3 = vunpack.c.l.b16 %v5432_v2  ;;  %5026 = vst [vmem:[#allocation1 + $0x2] ss:$4 sm:$0xff] %v4622_v55  ;;  %v5258_v43 = vshrl.u32 %v10400_v6, 16 }
 0x90d   : > { %v5264_v47 = vshll.u32 %v5171_v11, 16  ;;  %v4179_v45 = vrot.slane %v10414_v57, 2  ;;  %v3890_v17 = vadd.f32 %v9991_v30, %v3863_v15  ;;  %v5435_v24 = vsel %vm10420_vm0, %v5433_v50, %v5434_v10  ;;  %5027 = vst [vmem:[#allocation1 + $0x3] ss:$4 sm:$0xff] %v4623_v1  ;;  %vm10481_vm3 = vmand %vm4701_vm10, %vm4711_vm11 }
 0x90e   : > { %v5252_v60 = vrot.slane %v5251_v20, 4  ;;  %v5256_v28 = vrot.slane %v5254_v46, 5  ;;  %v5540_v38 = vunpack.c.l.b16 %v5435_v24  ;;  %v5260_v62 = vrot.slane %v5258_v43, 4  ;;  %v10450_v25 = vld.sshfl [vmem:[#allocation1 + $0x20] sm:$0xff pattern:$0x73625140]  ;;  %vm10499_vm15 = vmand %vm10481_vm3, %vm4728_vm1 }
 0x90f   : > { %v5266_v29 = vrot.slane %v5264_v47, 5  ;;  %v4180_v58 = vrot.slane %v10414_v57, 4  ;;  %v3913_v16 = vmax.f32 %v3890_v17, 0.0  ;;  %v2919_v11 = vpop.f32.mrf.mxu0  ;;  %v4356_v50 = vrot.slane %v10369_v5, 2  ;;  %5028 = vst [vmem:[#allocation1 + $0x20] ss:$4 sm:$0xff] %v4624_v18  ;;  %vm4807_vm4 = vmand %vm10481_vm3, %vm4789_vm14 }
 0x910   : > { %v5257_v2 = vsel %vm10445_vm12, %v5252_v60, %v5256_v28  ;;  %v6393_v55 = vrot.slane %v4098_v34, 9  ;;  %v3024_v1 = vadd.f32 %v9969_v49, %v2919_v11  ;;  %v5553_v15 = vpack.c.b16 %v5540_v38, %v5539_v3  ;;  %v12897_v11 = vld [vmem:[#allocation72_spill] sm:$0xff] }
 0x911   : > { %v5261_v10 = vor.u32 %v5260_v62, %v5256_v28  ;;  %v4181_v20 = vrot.slane %v10414_v57, 6  ;;  %v3977_v46 = vrot.slane %v3913_v16, 2  ;;  %v3978_v43 = vrot.slane %v3913_v16, 4 }
 0x912   : > { %v3979_v47 = vrot.slane %v3913_v16, 6  ;;  %v5499_v17 = vunpack.c.l.b16 %v5257_v2  ;;  %v4625_v24 = vadd.f32 %v10338_v53, %v3913_v16  ;;  %v3864_v54 = vadd.f32 %v3820_v7, %v3024_v1  ;;  %5563 = vrot.lane.b32.xlu0 %v5553_v15, %s6654_s9 }
 0x913   : > { %v5262_v5 = vrot.slane %v5261_v10, 4  ;;  %v6394_v35 = vrot.slane %v10414_v57, 9  ;;  %v4626_v34 = vadd.f32 %v10353_v26, %v3977_v46  ;;  %v4627_v49 = vadd.f32 %v10361_v52, %v3978_v43  ;;  %v12900_v10 = vld [vmem:[#allocation76_spill] sm:$0xff] }
 0x914   : > { %v10466_v18 = vsel %vm9973_vm13, %v4356_v50, %v6393_v55  ;;  %v4361_v3 = vrot.slane %v4179_v45, 7  ;;  %v3891_v60 = vadd.f32 %v9991_v30, %v3864_v54  ;;  %v3822_v28 = vpop.f32.mrf.mxu2  ;;  %v4364_v7 = vrot.slane %v4180_v58, 7  ;;  %v5029_v62 = vld.sshfl [vmem:[#allocation1] sm:$0xff pattern:$0x73625140] }
 0x915   : > { %v5267_v53 = vsel %vm10445_vm12, %v5262_v5, %v5266_v29  ;;  %v4367_v38 = vrot.slane %v4181_v20, 7  ;;  %v4628_v57 = vadd.f32 %v10365_v19, %v3979_v47  ;;  %v4100_v52 = vunpack.c.l.bf16 %v12897_v11  ;;  %5031 = vst [vmem:[#allocation1] ss:$4 sm:$0xff] %v4625_v24 }
 0x916   : > { %v5500_v16 = vunpack.c.l.b16 %v5267_v53  ;;  %v4363_v26 = vrot.slane %v4361_v3, 2  ;;  %v3914_v2 = vmax.f32 %v3891_v60, 0.0  ;;  %v10475_v45 = vsel %vm9973_vm13, %v6394_v35, %v4361_v3  ;;  %v5030_v15 = vld.sshfl [vmem:[#allocation1 + $0x20] sm:$0xff pattern:$0x73625140] }
 0x917   : > { %v4366_v54 = vrot.slane %v4364_v7, 2  ;;  %v4369_v50 = vrot.slane %v4367_v38, 2  ;;  %v2921_v58 = vpop.f32.mrf.mxu0  ;;  %v4182_v55 = vrot.slane %v4100_v52, 2  ;;  %v4183_v1 = vrot.slane %v4100_v52, 4  ;;  %5032 = vst [vmem:[#allocation1 + $0x1] ss:$4 sm:$0xff] %v4626_v34 }
 0x918   : > { %v5513_v19 = vpack.c.b16 %v5500_v16, %v5499_v17  ;;  %v4101_v20 = vunpack.c.l.bf16 %v12900_v10  ;;  %v3980_v46 = vrot.slane %v3914_v2, 2  ;;  %v3981_v43 = vrot.slane %v3914_v2, 4  ;;  %5033 = vst [vmem:[#allocation1 + $0x2] ss:$4 sm:$0xff] %v4627_v49 }
 0x919   : > { %v3982_v47 = vrot.slane %v3914_v2, 6  ;;  %v12901_v22 = vsel %vm9973_vm13, %v10355_v0, %v10357_v59  ;;  %v3026_v17 = vadd.f32 %v9979_v31, %v2921_v58  ;;  %v4365_v5 = vsel %vm9973_vm13, %v4363_v26, %v4364_v7  ;;  %5034 = vst [vmem:[#allocation1 + $0x3] ss:$4 sm:$0xff] %v4628_v57 }
 0x91a   : > { %v4629_v24 = vadd.f32 %v12901_v22, %v3914_v2  ;;  %5523 = vrot.lane.b32.xlu2 %v5513_v19, %s6653_s23  ;;  %v4184_v35 = vrot.slane %v4100_v52, 6  ;;  %v4370_v34 = vrot.slane %v4100_v52, 7  ;;  %v4630_v0 = vadd.f32 %v10407_v63, %v3980_v46  ;;  %3551 = vrot.lane.b32.xlu0 %v9633_v33, %s6653_s23  ;;  %v12904_v19 = vld [vmem:[#allocation80_spill] sm:$0xff] }
 0x91b   : > { %v4631_v59 = vadd.f32 %v10411_v44, %v3981_v43  ;;  %v4632_v31 = vadd.f32 %v10433_v13, %v3982_v47  ;;  %v10508_v49 = vrot.slane %v4182_v55, 7  ;;  %v3865_v60 = vadd.f32 %v3822_v28, %v3026_v17 }
 0x91c   : > { %5035 = vst [vmem:[#allocation1 + $0x20] ss:$4 sm:$0xff] %v4629_v24  ;;  %v4368_v53 = vsel %vm9973_vm13, %v4366_v54, %v4367_v38  ;;  %v10516_v63 = vrot.slane %v4370_v34, 2  ;;  %v4376_v44 = vrot.slane %v4183_v1, 7  ;;  %v3825_v7 = vpop.f32.mrf.mxu2  ;;  %v10520_v13 = vsel %vm9973_vm13, %v4369_v50, %v4370_v34 }
 0x91d   : > { %v4375_v33 = vrot.slane %v10508_v49, 2  ;;  %v5142_v57 = vsel %vm10499_vm15, %v10450_v25, 0.0  ;;  %v5143_v28 = vsel %vm10481_vm3, %v5029_v62, 0.0  ;;  %5036 = vst [vmem:[#allocation1 + $0x21] ss:$4 sm:$0xff] %v4630_v0  ;;  %v3892_v38 = vadd.f32 %v9991_v30, %v3865_v60 }
 0x91e   : > { %v4378_v16 = vrot.slane %v4376_v44, 2  ;;  %v10529_v26 = vrot.slane %v4184_v35, 7  ;;  %v5144_v11 = vsel %vm4807_vm4, %v5030_v15, 0.0  ;;  %5037 = vst [vmem:[#allocation1 + $0x22] ss:$4 sm:$0xff] %v4631_v59  ;;  %v4374_v52 = vsel %vm9973_vm13, %v10516_v63, %v10508_v49  ;;  %v12905_v35 = vld [vmem:[#allocation19_spill] sm:$0xff] }
 0x91f   : > { %v10535_v2 = vpack.c.bf16 %v5142_v57, %v5142_v57  ;;  %v10537_v54 = vpack.c.bf16 %v5143_v28, %v5143_v28  ;;  %v10539_v25 = vpack.c.bf16 %v5144_v11, %v5144_v11  ;;  %5038 = vst [vmem:[#allocation1 + $0x23] ss:$4 sm:$0xff] %v4632_v31  ;;  %v3915_v62 = vmax.f32 %v3892_v38, 0.0  ;;  %v2924_v50 = vpop.f32.mrf.mxu0 }
 0x920   : > { %v4377_v30 = vsel %vm9973_vm13, %v4375_v33, %v4376_v44  ;;  %v4380_v29 = vsel %vm9973_vm13, %v4378_v16, %v10529_v26  ;;  %v10547_v58 = vunpack.c.l.bf16 %v12904_v19  ;;  %v3029_v55 = vadd.f32 %v10025_v9, %v2924_v50  ;;  %v10559_v0 = vld.sshfl [vmem:[#allocation1] sm:$0xff pattern:$0x73625140] }
 0x921   : > { %v6412_v1 = vrot.slane %v10535_v2, 9  ;;  %v5438_v15 = vrot.slane %v10537_v54, 5  ;;  %v5441_v46 = vrot.slane %v10539_v25, 5  ;;  %v3983_v43 = vrot.slane %v3915_v62, 2 }
 0x922   : > { %v3984_v47 = vrot.slane %v3915_v62, 4  ;;  %v3985_v22 = vrot.slane %v3915_v62, 6  ;;  %v4633_v24 = vadd.f32 %v10466_v18, %v3915_v62  ;;  %v3866_v17 = vadd.f32 %v3825_v7, %v3029_v55  ;;  %2099 = vrot.lane.b32.xlu0 %v12905_v35, %s6654_s9  ;;  %v10566_v18 = vld [vmem:[%s11360_s3] ss:$0 sm:$0xff] }
 0x923   : > { %v5439_v34 = vsel %vm10420_vm0, %v6412_v1, %v5438_v15  ;;  %v5440_v3 = vrot.slane %v5438_v15, 4  ;;  %v5269_v9 = vshrl.u32 %v10535_v2, 16  ;;  %v4634_v59 = vadd.f32 %v10475_v45, %v3983_v43 }
 0x924   : > { %v4635_v31 = vadd.f32 %v4365_v5, %v3984_v47  ;;  %v4636_v49 = vadd.f32 %v4368_v53, %v3985_v22  ;;  %v4381_v60 = vrot.slane %v10529_v26, 2  ;;  %5041 = vst [vmem:[#allocation1] ss:$4 sm:$0xff] %v4633_v24  ;;  %v3893_v63 = vadd.f32 %v10566_v18, %v3866_v17  ;;  %v3827_v33 = vpop.f32.mrf.mxu2 }
 0x925   : > { %v5442_v44 = vsel %vm10420_vm0, %v5440_v3, %v5441_v46  ;;  %v5541_v7 = vunpack.c.l.b16 %v5439_v34  ;;  %v5272_v57 = vshll.u32 %v10535_v2, 16  ;;  %v5271_v5 = vrot.slane %v5269_v9, 4 }
 0x926   : > { %v5542_v45 = vunpack.c.l.b16 %v5442_v44  ;;  %v5278_v53 = vshll.u32 %v10537_v54, 16  ;;  %v5282_v28 = vshrl.u32 %v10537_v54, 16  ;;  %v10574_v38 = vld.sshfl [vmem:[#allocation1 + $0x20] sm:$0xff pattern:$0x73625140]  ;;  %v3916_v16 = vmax.f32 %v3893_v63, 0.0 }
 0x927   : > { %v5274_v26 = vrot.slane %v5272_v57, 5  ;;  %v5288_v11 = vshll.u32 %v10539_v25, 16  ;;  %v4186_v62 = vrot.slane %v10547_v58, 2  ;;  %5043 = vst [vmem:[#allocation1 + $0x20] ss:$4 sm:$0xff] %v4634_v59  ;;  %v2926_v1 = vpop.f32.mrf.mxu0  ;;  %v4187_v15 = vrot.slane %v10547_v58, 4 }
 0x928   : > { %v5554_v50 = vpack.c.b16 %v5542_v45, %v5541_v7  ;;  %v5280_v19 = vrot.slane %v5278_v53, 5  ;;  %v5284_v55 = vrot.slane %v5282_v28, 4  ;;  %5044 = vst [vmem:[#allocation1 + $0x21] ss:$4 sm:$0xff] %v4635_v31  ;;  %v3986_v46 = vrot.slane %v3916_v16, 2 }
 0x929   : > { %v3987_v43 = vrot.slane %v3916_v16, 4  ;;  %v3988_v47 = vrot.slane %v3916_v16, 6  ;;  %v4637_v22 = vadd.f32 %v10520_v13, %v3916_v16  ;;  %5045 = vst [vmem:[#allocation1 + $0x22] ss:$4 sm:$0xff] %v4636_v49  ;;  %v5275_v24 = vor.u32 %v5274_v26, %v5271_v5 }
 0x92a   : > { %5565 = vrot.lane.b32.xlu2 %v5554_v50, %s6654_s9  ;;  %v5285_v25 = vor.u32 %v5284_v55, %v5280_v19  ;;  %v3031_v17 = vadd.f32 %v10070_v51, %v2926_v1  ;;  %v4382_v35 = vrot.slane %v4101_v20, 7  ;;  %v4638_v34 = vadd.f32 %v4374_v52, %v3986_v46 }
 0x92b   : > { %v4639_v3 = vadd.f32 %v4377_v30, %v3987_v43  ;;  %v4640_v9 = vadd.f32 %v4380_v29, %v3988_v47  ;;  %v6395_v59 = vrot.slane %v4101_v20, 9  ;;  %5046 = vst [vmem:[#allocation1 + $0x23] ss:$4 sm:$0xff] %v4637_v22  ;;  %v5276_v31 = vrot.slane %v5275_v24, 4  ;;  %v12907_v47 = vld [vmem:[#allocation283_spill] sm:$0xff] }
 0x92c   : > { %v5286_v63 = vrot.slane %v5285_v25, 4  ;;  %v5290_v13 = vrot.slane %v5288_v11, 5  ;;  %v3867_v49 = vadd.f32 %v3827_v33, %v3031_v17  ;;  %v10586_v44 = vld.sshfl [vmem:[#allocation1] sm:$0xff pattern:$0x73625140]  ;;  %v4384_v7 = vrot.slane %v4382_v35, 2  ;;  %v3830_v5 = vpop.f32.mrf.mxu2 }
 0x92d   : > { %v6396_v57 = vrot.slane %v10547_v58, 9  ;;  %v4389_v51 = vrot.slane %v4186_v62, 7  ;;  %v4392_v45 = vrot.slane %v4187_v15, 7  ;;  %5048 = vst [vmem:[#allocation1] ss:$4 sm:$0xff] %v4638_v34  ;;  %v5281_v52 = vsel %vm10445_vm12, %v5276_v31, %v5280_v19  ;;  %v12906_v62 = vld [vmem:[#allocation85_spill] sm:$0xff] }
 0x92e   : > { %v5291_v10 = vsel %vm10445_vm12, %v5286_v63, %v5290_v13  ;;  %v3894_v20 = vadd.f32 %v10566_v18, %v3867_v49  ;;  %v3868_v30 = vadd.f32 %v3830_v5, %v10158_v48  ;;  %5049 = vst [vmem:[#allocation1 + $0x1] ss:$4 sm:$0xff] %v4639_v3  ;;  %v5501_v29 = vunpack.c.l.b16 %v5281_v52 }
 0x92f   : > { %v5502_v33 = vunpack.c.l.b16 %v5291_v10  ;;  %v4383_v53 = vsel %vm9973_vm13, %v4381_v60, %v4382_v35  ;;  %v4386_v28 = vsel %vm9973_vm13, %v4384_v7, %v6395_v59  ;;  %5050 = vst [vmem:[#allocation1 + $0x2] ss:$4 sm:$0xff] %v4640_v9  ;;  %v4391_v26 = vrot.slane %v4389_v51, 2 }
 0x930   : > { %v3917_v16 = vmax.f32 %v3894_v20, 0.0  ;;  %v3895_v11 = vadd.f32 %v10566_v18, %v3868_v30  ;;  %v4103_v50 = vunpack.c.l.bf16 %v12906_v62  ;;  %v4390_v48 = vsel %vm9973_vm13, %v6396_v57, %v4389_v51  ;;  %v12909_v20 = vld [vmem:[#allocation92_spill] sm:$0xff] }
 0x931   : > { %v5514_v19 = vpack.c.b16 %v5502_v33, %v5501_v29  ;;  %v4188_v55 = vrot.slane %v10547_v58, 6  ;;  %v4394_v1 = vrot.slane %v4392_v45, 2  ;;  %v4393_v43 = vsel %vm9973_vm13, %v4391_v26, %v4392_v45  ;;  %v12908_v58 = vld [vmem:[#allocation88_spill] sm:$0xff] }
 0x932   : > { %v3989_v15 = vrot.slane %v3917_v16, 2  ;;  %v3990_v46 = vrot.slane %v3917_v16, 4  ;;  %v3991_v60 = vrot.slane %v3917_v16, 6  ;;  %1954 = vrot.lane.b32.xlu2 %v12907_v47, %s6653_s23  ;;  %v4641_v22 = vadd.f32 %v4383_v53, %v3917_v16 }
 0x933   : > { %5525 = vrot.lane.b32.xlu1 %v5514_v19, %s6653_s23  ;;  %v3918_v24 = vmax.f32 %v3895_v11, 0.0  ;;  %v4189_v25 = vrot.slane %v4103_v50, 2  ;;  %v4190_v17 = vrot.slane %v4103_v50, 4  ;;  %v4395_v3 = vrot.slane %v4188_v55, 7 }
 0x934   : > { %v4642_v35 = vadd.f32 %v4386_v28, %v3989_v15  ;;  %v4643_v34 = vadd.f32 %v4390_v48, %v3990_v46  ;;  %v4104_v9 = vunpack.c.l.bf16 %v12908_v58  ;;  %v4644_v59 = vadd.f32 %v4393_v43, %v3991_v60  ;;  %v3832_v49 = vpop.f32.mrf.mxu2  ;;  %5051 = vst [vmem:[#allocation1 + $0x3] ss:$4 sm:$0xff] %v4641_v22  ;;  %v10621_v15 = vld.sshfl [vmem:[#allocation1 + $0x20] sm:$0xff pattern:$0x73625140] }
 0x935   : > { %v3992_v31 = vrot.slane %v3918_v24, 2  ;;  %v3993_v63 = vrot.slane %v3918_v24, 4  ;;  %v4398_v13 = vrot.slane %v4103_v50, 7  ;;  %v4396_v7 = vsel %vm9973_vm13, %v4394_v1, %v4395_v3 }
 0x936   : > { %v4397_v57 = vrot.slane %v4395_v3, 2  ;;  %v4401_v51 = vrot.slane %v4189_v25, 7  ;;  %v4404_v45 = vrot.slane %v4190_v17, 7  ;;  %v3994_v5 = vrot.slane %v3918_v24, 6  ;;  %v3038_v29 = vpop.f32.mrf.mxu1  ;;  %5052 = vst [vmem:[#allocation1 + $0x20] ss:$4 sm:$0xff] %v4642_v35 }
 0x937   : > { %v4400_v52 = vrot.slane %v4398_v13, 2  ;;  %v3869_v10 = vadd.f32 %v3832_v49, %v10197_v8  ;;  %v4105_v30 = vunpack.c.l.bf16 %v12909_v20  ;;  %v4191_v28 = vrot.slane %v4103_v50, 6 }
 0x938   : > { %v4399_v33 = vsel %vm9973_vm13, %v4397_v57, %v4398_v13  ;;  %v4403_v53 = vrot.slane %v4401_v51, 2  ;;  %v4406_v16 = vrot.slane %v4404_v45, 2  ;;  %v4645_v11 = vadd.f32 %v4396_v7, %v3918_v24 }
 0x939   : > { %v4402_v26 = vsel %vm9973_vm13, %v4400_v52, %v4401_v51  ;;  %v3896_v62 = vadd.f32 %v10566_v18, %v3869_v10  ;;  %v4193_v19 = vrot.slane %v4105_v30, 2  ;;  %v4646_v8 = vadd.f32 %v4399_v33, %v3992_v31 }
 0x93a   : > { %v4405_v48 = vsel %vm9973_vm13, %v4403_v53, %v4404_v45  ;;  %v4407_v55 = vrot.slane %v4191_v28, 7  ;;  %v4410_v1 = vrot.slane %v4104_v9, 7  ;;  %v4647_v46 = vadd.f32 %v4402_v26, %v3993_v63  ;;  %v12911_v28 = vld [vmem:[#allocation110_spill] sm:$0xff] }
 0x93b   : > { %3696 = vrot.lane.b32.xlu1 %v10031_v37, %s6654_s9  ;;  %v3919_v50 = vmax.f32 %v3896_v62, 0.0  ;;  %v6397_v60 = vrot.slane %v4104_v9, 9  ;;  %v6398_v43 = vrot.slane %v4105_v30, 9  ;;  %v4417_v25 = vrot.slane %v4193_v19, 7  ;;  %v12912_v19 = vld [vmem:[#allocation100_spill] sm:$0xff] }
 0x93c   : > { %v4408_v47 = vsel %vm9973_vm13, %v4406_v16, %v4407_v55  ;;  %v4409_v22 = vrot.slane %v4407_v55, 2  ;;  %v4412_v24 = vrot.slane %v4410_v1, 2  ;;  %v4648_v17 = vadd.f32 %v4405_v48, %v3994_v5  ;;  %v10634_v13 = vld.sshfl [vmem:[#allocation1] sm:$0xff pattern:$0x73625140] }
 0x93d   : > { %v3995_v3 = vrot.slane %v3919_v50, 2  ;;  %v3996_v58 = vrot.slane %v3919_v50, 4  ;;  %v3997_v31 = vrot.slane %v3919_v50, 6  ;;  %v4418_v9 = vsel %vm9973_vm13, %v6398_v43, %v4417_v25  ;;  %5055 = vst [vmem:[#allocation1] ss:$4 sm:$0xff] %v4643_v34  ;;  %v12910_v5 = vld [vmem:[#allocation96_spill] sm:$0xff] }
 0x93e   : > { %v4411_v63 = vsel %vm9973_vm13, %v4409_v22, %v4410_v1  ;;  %v4414_v37 = vsel %vm9973_vm13, %v4412_v24, %v6397_v60  ;;  %v4685_v35 = vadd.s32 4, %v10058_v36  ;;  %v4649_v49 = vadd.f32 %v4408_v47, %v3919_v50  ;;  %v3040_v45 = vpop.f32.mrf.mxu1  ;;  %5056 = vst [vmem:[#allocation1 + $0x1] ss:$4 sm:$0xff] %v4644_v59  ;;  %v10660_v48 = vld.sshfl [vmem:[#allocation1 + $0x20] sm:$0xff pattern:$0x73625140] }
 0x93f   : > { %v4650_v7 = vadd.f32 %v4411_v63, %v3995_v3  ;;  %v10636_v57 = vadd.f32 %v4414_v37, %v3996_v58  ;;  %v10638_v51 = vadd.f32 %v4418_v9, %v3997_v31  ;;  %v10641_v52 = vunpack.c.l.bf16 %v12910_v5  ;;  %5057 = vst [vmem:[#allocation1 + $0x2] ss:$4 sm:$0xff] %v4645_v11 }
 0x940   : > { %vm4702_vm5 = vcmp.ge.s32.totalorder %v4685_v35, 0  ;;  %vm4712_vm6 = vcmp.lt.s32.totalorder %v4685_v35, 16  ;;  %v4194_v10 = vrot.slane %v4105_v30, 4  ;;  %v10644_v20 = vadd.f32 %v3038_v29, %v9810_v32  ;;  %5058 = vst [vmem:[#allocation1 + $0x3] ss:$4 sm:$0xff] %v4646_v8 }
 0x941   : > { %vm4722_vm10 = vmand %vm4702_vm5, %vm4712_vm6  ;;  %v4195_v33 = vrot.slane %v4105_v30, 6  ;;  %v4419_v53 = vrot.slane %v4417_v25, 2  ;;  %v10647_v16 = vadd.f32 %v3040_v45, %v12911_v28  ;;  %v4196_v26 = vrot.slane %v10641_v52, 2  ;;  %5059 = vst [vmem:[#allocation1 + $0x20] ss:$4 sm:$0xff] %v4647_v46 }
 0x942   : > { %vm4769_vm11 = vmand %vm4722_vm10, %vm4728_vm1  ;;  %v5146_v34 = vsel %vm4722_vm10, %v10574_v38, 0.0  ;;  %v4420_v62 = vrot.slane %v4194_v10, 7  ;;  %v4107_v59 = vunpack.c.l.bf16 %v12912_v19  ;;  %v4426_v11 = vrot.slane %v10641_v52, 7  ;;  %5060 = vst [vmem:[#allocation1 + $0x21] ss:$4 sm:$0xff] %v4648_v17 }
 0x943   : > { %vm4810_vm3 = vmand %vm4722_vm10, %vm4789_vm14  ;;  %v5145_v32 = vsel %vm4769_vm11, %v10559_v0, 0.0  ;;  %v10657_v30 = vpack.c.bf16 %v5146_v34, %v5146_v34  ;;  %v4423_v29 = vrot.slane %v4195_v33, 7  ;;  %v4197_v50 = vrot.slane %v10641_v52, 4  ;;  %5061 = vst [vmem:[#allocation1 + $0x22] ss:$4 sm:$0xff] %v4649_v49 }
 0x944   : > { %v5147_v38 = vsel %vm4810_vm3, %v10586_v44, 0.0  ;;  %v10663_v55 = vpack.c.bf16 %v5145_v32, %v5145_v32  ;;  %v4422_v1 = vrot.slane %v4420_v62, 2  ;;  %v10674_v24 = vsel %vm9973_vm13, %v4419_v53, %v4420_v62  ;;  %5062 = vst [vmem:[#allocation1 + $0x23] ss:$4 sm:$0xff] %v4650_v7 }
 0x945   : > { %v5177_v8 = vpack.c.bf16 %v5147_v38, %v5147_v38  ;;  %v5445_v60 = vrot.slane %v10657_v30, 5  ;;  %v5302_v0 = vshll.u32 %v10657_v30, 16  ;;  %v5306_v43 = vshrl.u32 %v10657_v30, 16 }
 0x946   : > { %v6413_v47 = vrot.slane %v10663_v55, 9  ;;  %v5293_v22 = vshrl.u32 %v10663_v55, 16  ;;  %v5296_v44 = vshll.u32 %v10663_v55, 16  ;;  %v4424_v45 = vsel %vm9973_vm13, %v4422_v1, %v4423_v29 }
 0x947   : > { %v5447_v46 = vrot.slane %v5445_v60, 4  ;;  %v5448_v25 = vrot.slane %v5177_v8, 5  ;;  %v5304_v3 = vrot.slane %v5302_v0, 5  ;;  %v5308_v58 = vrot.slane %v5306_v43, 4 }
 0x948   : > { %v5446_v31 = vsel %vm10420_vm0, %v6413_v47, %v5445_v60  ;;  %v5295_v17 = vrot.slane %v5293_v22, 4  ;;  %v5298_v63 = vrot.slane %v5296_v44, 5  ;;  %v5312_v37 = vshll.u32 %v5177_v8, 16  ;;  %v10693_v44 = vld.sshfl [vmem:[#allocation1] sm:$0xff pattern:$0x73625140] }
 0x949   : > { %v5449_v9 = vsel %vm10420_vm0, %v5447_v46, %v5448_v25  ;;  %v5309_v35 = vor.u32 %v5308_v58, %v5304_v3  ;;  %v4425_v5 = vrot.slane %v4423_v29, 2  ;;  %v5543_v49 = vunpack.c.l.b16 %v5446_v31  ;;  %5065 = vst [vmem:[#allocation1] ss:$4 sm:$0xff] %v10636_v57 }
 0x94a   : > { %v5544_v10 = vunpack.c.l.b16 %v5449_v9  ;;  %v5299_v33 = vor.u32 %v5298_v63, %v5295_v17  ;;  %v5314_v53 = vrot.slane %v5312_v37, 5  ;;  %v4428_v7 = vrot.slane %v4426_v11, 2 }
 0x94b   : > { %v5310_v28 = vrot.slane %v5309_v35, 4  ;;  %v4429_v34 = vrot.slane %v4196_v26, 7  ;;  %v4198_v62 = vrot.slane %v10641_v52, 6  ;;  %v4432_v8 = vrot.slane %v4197_v50, 7 }
 0x94c   : > { %v5555_v32 = vpack.c.b16 %v5544_v10, %v5543_v49  ;;  %v5300_v38 = vrot.slane %v5299_v33, 4  ;;  %v4438_v60 = vrot.slane %v4107_v59, 7  ;;  %v3835_v1 = vpop.f32.mrf.mxu2  ;;  %v4427_v29 = vsel %vm9973_vm13, %v4425_v5, %v4426_v11  ;;  %v10697_v11 = vld.sshfl [vmem:[#allocation1 + $0x20] sm:$0xff pattern:$0x73625140] }
 0x94d   : > { %v5315_v0 = vsel %vm10445_vm12, %v5310_v28, %v5314_v53  ;;  %v4431_v43 = vrot.slane %v4429_v34, 2  ;;  %v4435_v47 = vrot.slane %v4198_v62, 7  ;;  %v3870_v50 = vadd.f32 %v3835_v1, %v10644_v20  ;;  %v12913_v5 = vld [vmem:[#allocation104_spill] sm:$0xff]  ;;  %5067 = vst [vmem:[#allocation1 + $0x20] ss:$4 sm:$0xff] %v10638_v51 }
 0x94e   : > { %5567 = vrot.lane.b32.xlu2 %v5555_v32, %s6654_s9  ;;  %v5305_v52 = vsel %vm10445_vm12, %v5300_v38, %v5304_v3  ;;  %v5504_v26 = vunpack.c.l.b16 %v5315_v0  ;;  %v4434_v22 = vrot.slane %v4432_v8, 2  ;;  %v4430_v25 = vsel %vm9973_vm13, %v4428_v7, %v4429_v34 }
 0x94f   : > { %v5503_v46 = vunpack.c.l.b16 %v5305_v52  ;;  %v4437_v58 = vrot.slane %v4435_v47, 2  ;;  %v4440_v31 = vrot.slane %v4438_v60, 2  ;;  %v3897_v17 = vadd.f32 %v10566_v18, %v3870_v50 }
 0x950   : > { %v10702_v63 = vsel %vm9973_vm13, %v4431_v43, %v4432_v8  ;;  %v6399_v20 = vrot.slane %v4107_v59, 9  ;;  %v4686_v3 = vadd.s32 5, %v10058_v36  ;;  %v10710_v9 = vsel %vm9973_vm13, %v4434_v22, %v4435_v47  ;;  %v12914_v59 = vld [vmem:[#allocation109_spill] sm:$0xff] }
 0x951   : > { %v5515_v37 = vpack.c.b16 %v5504_v26, %v5503_v46  ;;  %v10714_v35 = vsel %vm9973_vm13, %v4437_v58, %v4438_v60  ;;  %v10717_v49 = vunpack.c.l.bf16 %v12913_v5  ;;  %v3920_v19 = vmax.f32 %v3897_v17, 0.0  ;;  %v12915_v58 = vld [vmem:[#allocation111_spill] sm:$0xff] }
 0x952   : > { %vm4703_vm15 = vcmp.ge.s32.totalorder %v4686_v3, 0  ;;  %vm4713_vm4 = vcmp.lt.s32.totalorder %v4686_v3, 16  ;;  %v10721_v10 = vunpack.c.l.bf16 %v12914_v59  ;;  %v4442_v57 = vsel %vm9973_vm13, %v4440_v31, %v6399_v20 }
 0x953   : > { %5527 = vrot.lane.b32.xlu1 %v5515_v37, %s6653_s23  ;;  %vm4723_vm5 = vmand %vm4703_vm15, %vm4713_vm4  ;;  %v4200_v33 = vrot.slane %v10717_v49, 2  ;;  %v4201_v53 = vrot.slane %v10717_v49, 4  ;;  %v6400_v28 = vrot.slane %v10717_v49, 9  ;;  %v3998_v7 = vrot.slane %v3920_v19, 2 }
 0x954   : > { %v3999_v51 = vrot.slane %v3920_v19, 4  ;;  %v4000_v34 = vrot.slane %v3920_v19, 6  ;;  %v4653_v62 = vadd.f32 %v10674_v24, %v3920_v19  ;;  %vm4772_vm6 = vmand %vm4723_vm5, %vm4728_vm1  ;;  %v3837_v32 = vpop.f32.mrf.mxu2  ;;  %v5149_v8 = vsel %vm4723_vm5, %v10634_v13, 0.0  ;;  %v10747_v13 = vld.sshfl [vmem:[#allocation1] sm:$0xff pattern:$0x73625140] }
 0x955   : > { %vm4813_vm10 = vmand %vm4723_vm5, %vm4789_vm14  ;;  %v5148_v38 = vsel %vm4772_vm6, %v10621_v15, 0.0  ;;  %v4202_v60 = vrot.slane %v10717_v49, 6  ;;  %v10737_v0 = vrot.slane %v4200_v33, 7  ;;  %v4654_v1 = vadd.f32 %v4424_v45, %v3998_v7 }
 0x956   : > { %v4655_v43 = vadd.f32 %v4427_v29, %v3999_v51  ;;  %v3871_v47 = vadd.f32 %v3837_v32, %v10647_v16  ;;  %v10740_v24 = vrot.slane %v4201_v53, 7  ;;  %5068 = vst [vmem:[#allocation1 + $0x21] ss:$4 sm:$0xff] %v4653_v62  ;;  %v4656_v52 = vadd.f32 %v4430_v25, %v4000_v34  ;;  %v3043_v26 = vpop.f32.mrf.mxu1 }
 0x957   : > { %v5150_v50 = vsel %vm4813_vm10, %v10660_v48, 0.0  ;;  %v10743_v22 = vpack.c.bf16 %v5148_v38, %v5148_v38  ;;  %v10745_v15 = vpack.c.bf16 %v5149_v8, %v5149_v8  ;;  %v3044_v45 = vadd.f32 %v3043_v26, %v12915_v58  ;;  %5069 = vst [vmem:[#allocation1 + $0x22] ss:$4 sm:$0xff] %v4654_v1 }
 0x958   : > { %v3898_v46 = vadd.f32 %v10566_v18, %v3871_v47  ;;  %v5180_v29 = vpack.c.bf16 %v5150_v50, %v5150_v50  ;;  %v10754_v16 = vsel %vm9973_vm13, %v6400_v28, %v10737_v0  ;;  %5070 = vst [vmem:[#allocation1 + $0x23] ss:$4 sm:$0xff] %v4655_v43  ;;  %v4447_v58 = vrot.slane %v10737_v0, 2 }
 0x959   : > { %v5317_v25 = vshrl.u32 %v10743_v22, 16  ;;  %v5320_v48 = vshll.u32 %v10743_v22, 16  ;;  %v5326_v31 = vshll.u32 %v10745_v15, 16  ;;  %v5330_v17 = vshrl.u32 %v10745_v15, 16  ;;  %5072 = vst [vmem:[#allocation1] ss:$4 sm:$0xff] %v4656_v52 }
 0x95a   : > { %v3921_v20 = vmax.f32 %v3898_v46, 0.0  ;;  %v5336_v3 = vshll.u32 %v5180_v29, 16  ;;  %v6414_v37 = vrot.slane %v10743_v22, 9  ;;  %v5452_v5 = vrot.slane %v10745_v15, 5 }
 0x95b   : > { %v5319_v49 = vrot.slane %v5317_v25, 4  ;;  %v5322_v19 = vrot.slane %v5320_v48, 5  ;;  %v5328_v59 = vrot.slane %v5326_v31, 5  ;;  %v5332_v33 = vrot.slane %v5330_v17, 4 }
 0x95c   : > { %v4001_v53 = vrot.slane %v3921_v20, 2  ;;  %v4002_v28 = vrot.slane %v3921_v20, 4  ;;  %v4003_v7 = vrot.slane %v3921_v20, 6  ;;  %v4657_v51 = vadd.f32 %v10702_v63, %v3921_v20  ;;  %v3840_v8 = vpop.f32.mrf.mxu2 }
 0x95d   : > { %v5323_v34 = vor.u32 %v5322_v19, %v5319_v49  ;;  %v5333_v62 = vor.u32 %v5332_v33, %v5328_v59  ;;  %v5338_v32 = vrot.slane %v5336_v3, 5  ;;  %v5453_v38 = vsel %vm10420_vm0, %v6414_v37, %v5452_v5  ;;  %v12916_v19 = vld [vmem:[#allocation112_spill] sm:$0xff] }
 0x95e   : > { %v4658_v1 = vadd.f32 %v10710_v9, %v4001_v53  ;;  %v4659_v43 = vadd.f32 %v10714_v35, %v4002_v28  ;;  %v4660_v47 = vadd.f32 %v4442_v57, %v4003_v7  ;;  %v5454_v52 = vrot.slane %v5452_v5, 4  ;;  %5073 = vst [vmem:[#allocation1 + $0x1] ss:$4 sm:$0xff] %v4657_v51  ;;  %v3045_v63 = vpop.f32.mrf.mxu1 }
 0x95f   : > { %v5324_v26 = vrot.slane %v5323_v34, 4  ;;  %v5334_v50 = vrot.slane %v5333_v62, 4  ;;  %v5455_v46 = vrot.slane %v5180_v29, 5  ;;  %v5545_v25 = vunpack.c.l.b16 %v5453_v38  ;;  %v10776_v0 = vld.sshfl [vmem:[#allocation1 + $0x20] sm:$0xff pattern:$0x73625140] }
 0x960   : > { %v3872_v48 = vadd.f32 %v3840_v8, %v3044_v45  ;;  %v4450_v31 = vrot.slane %v10740_v24, 2  ;;  %v4451_v17 = vrot.slane %v4202_v60, 7  ;;  %5074 = vst [vmem:[#allocation1 + $0x2] ss:$4 sm:$0xff] %v4658_v1  ;;  %v4454_v29 = vrot.slane %v10721_v10, 7  ;;  %v12917_v34 = vld [vmem:[#allocation116_spill] sm:$0xff] }
 0x961   : > { %v5329_v9 = vsel %vm10445_vm12, %v5324_v26, %v5328_v59  ;;  %v5339_v35 = vsel %vm10445_vm12, %v5334_v50, %v5338_v32  ;;  %v5456_v57 = vsel %vm10420_vm0, %v5454_v52, %v5455_v46  ;;  %5075 = vst [vmem:[#allocation1 + $0x3] ss:$4 sm:$0xff] %v4659_v43  ;;  %v4449_v37 = vsel %vm9973_vm13, %v4447_v58, %v10740_v24 }
 0x962   : > { %v5505_v20 = vunpack.c.l.b16 %v5329_v9  ;;  %v5506_v45 = vunpack.c.l.b16 %v5339_v35  ;;  %v5546_v3 = vunpack.c.l.b16 %v5456_v57  ;;  %v3899_v60 = vadd.f32 %v10566_v18, %v3872_v48  ;;  %5076 = vst [vmem:[#allocation1 + $0x20] ss:$4 sm:$0xff] %v4660_v47 }
 0x963   : > { %v4452_v5 = vsel %vm9973_vm13, %v4450_v31, %v4451_v17  ;;  %v4453_v49 = vrot.slane %v4451_v17, 2  ;;  %v4110_v59 = vunpack.c.l.bf16 %v12916_v19  ;;  %v4203_v7 = vrot.slane %v10721_v10, 2 }
 0x964   : > { %v5516_v33 = vpack.c.b16 %v5506_v45, %v5505_v20  ;;  %v5556_v53 = vpack.c.b16 %v5546_v3, %v5545_v25  ;;  %v3922_v28 = vmax.f32 %v3899_v60, 0.0  ;;  %v3046_v62 = vadd.f32 %v3045_v63, %v12917_v34  ;;  %v3842_v32 = vpop.f32.mrf.mxu2  ;;  %v12918_v45 = vld [vmem:[#allocation105_spill] sm:$0xff] }
 0x965   : > { %v4455_v51 = vsel %vm9973_vm13, %v4453_v49, %v4454_v29  ;;  %v4204_v38 = vrot.slane %v10721_v10, 4  ;;  %v4205_v24 = vrot.slane %v10721_v10, 6  ;;  %v4456_v47 = vrot.slane %v4454_v29, 2  ;;  %v12919_v49 = vld [vmem:[#allocation117_spill] sm:$0xff] }
 0x966   : > { %5529 = vrot.lane.b32.xlu0 %v5516_v33, %s6653_s23  ;;  %5569 = vrot.lane.b32.xlu1 %v5556_v53, %s6654_s9  ;;  %v4004_v8 = vrot.slane %v3922_v28, 2  ;;  %v4005_v1 = vrot.slane %v3922_v28, 4  ;;  %v4006_v43 = vrot.slane %v3922_v28, 6  ;;  %v3873_v52 = vadd.f32 %v3842_v32, %v3046_v62  ;;  %v3048_v10 = vpop.f32.mrf.mxu1 }
 0x967   : > { %v4457_v26 = vrot.slane %v4203_v7, 7  ;;  %v4460_v50 = vrot.slane %v4204_v38, 7  ;;  %v4463_v46 = vrot.slane %v4205_v24, 7  ;;  %v4661_v58 = vadd.f32 %v10754_v16, %v3922_v28 }
 0x968   : > { %v4662_v63 = vadd.f32 %v4449_v37, %v4004_v8  ;;  %v4663_v25 = vadd.f32 %v4452_v5, %v4005_v1  ;;  %v10796_v48 = vrot.slane %v4110_v59, 7  ;;  %v10798_v31 = vld.sshfl [vmem:[#allocation1] sm:$0xff pattern:$0x73625140]  ;;  %v4664_v17 = vadd.f32 %v4455_v51, %v4006_v43 }
 0x969   : > { %v3900_v9 = vadd.f32 %v10566_v18, %v3873_v52  ;;  %v4459_v35 = vrot.slane %v4457_v26, 2  ;;  %v4462_v57 = vrot.slane %v4460_v50, 2  ;;  %v4458_v29 = vsel %vm9973_vm13, %v4456_v47, %v4457_v26  ;;  %5079 = vst [vmem:[#allocation1] ss:$4 sm:$0xff] %v4661_v58 }
 0x96a   : > { %v4465_v20 = vrot.slane %v4463_v46, 2  ;;  %v4687_v16 = vadd.s32 6, %v10058_v36  ;;  %v10805_v3 = vunpack.c.l.bf16 %v12918_v45  ;;  %v3049_v33 = vadd.f32 %v3048_v10, %v12919_v49  ;;  %5080 = vst [vmem:[#allocation1 + $0x1] ss:$4 sm:$0xff] %v4662_v63 }
 0x96b   : > { %v3923_v60 = vmax.f32 %v3900_v9, 0.0  ;;  %v4461_v37 = vsel %vm9973_vm13, %v4459_v35, %v4460_v50  ;;  %v4464_v5 = vsel %vm9973_vm13, %v4462_v57, %v4463_v46  ;;  %5081 = vst [vmem:[#allocation1 + $0x2] ss:$4 sm:$0xff] %v4663_v25  ;;  %v4468_v8 = vrot.slane %v10796_v48, 2 }
 0x96c   : > { %v4467_v53 = vsel %vm9973_vm13, %v4465_v20, %v10796_v48  ;;  %vm4704_vm11 = vcmp.ge.s32.totalorder %v4687_v16, 0  ;;  %vm4714_vm3 = vcmp.lt.s32.totalorder %v4687_v16, 16  ;;  %v4207_v28 = vrot.slane %v10805_v3, 2  ;;  %v3845_v32 = vpop.f32.mrf.mxu2  ;;  %5082 = vst [vmem:[#allocation1 + $0x3] ss:$4 sm:$0xff] %v4664_v17 }
 0x96d   : > { %v4007_v7 = vrot.slane %v3923_v60, 2  ;;  %v4008_v51 = vrot.slane %v3923_v60, 4  ;;  %v4009_v34 = vrot.slane %v3923_v60, 6  ;;  %v4665_v62 = vadd.f32 %v4458_v29, %v3923_v60  ;;  %vm4724_vm15 = vmand %vm4704_vm11, %vm4714_vm3  ;;  %v10820_v1 = vld.sshfl [vmem:[#allocation1 + $0x20] sm:$0xff pattern:$0x73625140] }
 0x96e   : > { %vm4775_vm4 = vmand %vm4724_vm15, %vm4728_vm1  ;;  %v5152_v38 = vsel %vm4724_vm15, %v10697_v11, 0.0  ;;  %v3874_v24 = vadd.f32 %v3845_v32, %v3049_v33  ;;  %v10824_v43 = vpack.c.bf16 %v10332_v56, %v10332_v56  ;;  %v6401_v56 = vrot.slane %v4110_v59, 9 }
 0x96f   : > { %v4666_v47 = vadd.f32 %v4461_v37, %v4007_v7  ;;  %v4667_v52 = vadd.f32 %v4464_v5, %v4008_v51  ;;  %v4668_v26 = vadd.f32 %v4467_v53, %v4009_v34  ;;  %vm4816_vm5 = vmand %vm4724_vm15, %vm4789_vm14  ;;  %v5151_v50 = vsel %vm4775_vm4, %v10693_v44, 0.0  ;;  %5083 = vst [vmem:[#allocation1 + $0x20] ss:$4 sm:$0xff] %v4665_v62 }
 0x970   : > { %v5153_v11 = vsel %vm4816_vm5, %v10747_v13, 0.0  ;;  %v10830_v46 = vpack.c.bf16 %v5151_v50, %v5151_v50  ;;  %v10832_v58 = vpack.c.bf16 %v5152_v38, %v5152_v38  ;;  %v3901_v63 = vadd.f32 %v10566_v18, %v3874_v24  ;;  %v3050_v38 = vpop.f32.mrf.mxu1 }
 0x971   : > { %v5183_v25 = vpack.c.bf16 %v5153_v11, %v5153_v11  ;;  %v6402_v48 = vrot.slane %v10805_v3, 9  ;;  %v4473_v10 = vrot.slane %v4207_v28, 7  ;;  %5084 = vst [vmem:[#allocation1 + $0x21] ss:$4 sm:$0xff] %v4666_v47  ;;  %v4208_v5 = vrot.slane %v10805_v3, 4 }
 0x972   : > { %v6415_v17 = vrot.slane %v10830_v46, 9  ;;  %v5459_v44 = vrot.slane %v10832_v58, 5  ;;  %v5341_v13 = vshrl.u32 %v10830_v46, 16  ;;  %v5344_v9 = vshll.u32 %v10830_v46, 16  ;;  %5085 = vst [vmem:[#allocation1 + $0x22] ss:$4 sm:$0xff] %v4667_v52 }
 0x973   : > { %v5462_v35 = vrot.slane %v5183_v25, 5  ;;  %v5350_v57 = vshll.u32 %v10832_v58, 16  ;;  %v5354_v29 = vshrl.u32 %v10832_v58, 16  ;;  %v5360_v19 = vshll.u32 %v5183_v25, 16  ;;  %5086 = vst [vmem:[#allocation1 + $0x23] ss:$4 sm:$0xff] %v4668_v26 }
 0x974   : > { %v5460_v59 = vsel %vm10420_vm0, %v6415_v17, %v5459_v44  ;;  %v5461_v20 = vrot.slane %v5459_v44, 4  ;;  %v5343_v16 = vrot.slane %v5341_v13, 4  ;;  %v5346_v45 = vrot.slane %v5344_v9, 5  ;;  %v3847_v17 = vpop.f32.mrf.mxu2  ;;  %v12920_v9 = vld [vmem:[#allocation118_spill] sm:$0xff] }
 0x975   : > { %v5352_v60 = vrot.slane %v5350_v57, 5  ;;  %v5356_v37 = vrot.slane %v5354_v29, 4  ;;  %v4209_v49 = vrot.slane %v10805_v3, 6  ;;  %v5547_v53 = vunpack.c.l.b16 %v5460_v59 }
 0x976   : > { %v5463_v33 = vsel %vm10420_vm0, %v5461_v20, %v5462_v35  ;;  %v5347_v28 = vor.u32 %v5346_v45, %v5343_v16  ;;  %v3924_v7 = vmax.f32 %v3901_v63, 0.0  ;;  %v5362_v62 = vrot.slane %v5360_v19, 5  ;;  %v12921_v45 = vld [vmem:[#allocation119_spill] sm:$0xff] }
 0x977   : > { %v5548_v51 = vunpack.c.l.b16 %v5463_v33  ;;  %v5357_v34 = vor.u32 %v5356_v37, %v5352_v60  ;;  %v4475_v32 = vrot.slane %v4473_v10, 2  ;;  %v4470_v52 = vsel %vm9973_vm13, %v4468_v8, %v6401_v56 }
 0x978   : > { %v5348_v24 = vrot.slane %v5347_v28, 4  ;;  %v4010_v47 = vrot.slane %v3924_v7, 2  ;;  %v4474_v26 = vsel %vm9973_vm13, %v6402_v48, %v4473_v10  ;;  %v4476_v11 = vrot.slane %v4208_v5, 7 }
 0x979   : > { %v5557_v3 = vpack.c.b16 %v5548_v51, %v5547_v53  ;;  %v5358_v50 = vrot.slane %v5357_v34, 4  ;;  %v4479_v25 = vrot.slane %v4209_v49, 7  ;;  %v4011_v44 = vrot.slane %v3924_v7, 4  ;;  %v10872_v51 = vld.sshfl [vmem:[#allocation1] sm:$0xff pattern:$0x73625140] }
 0x97a   : > { %v5353_v63 = vsel %vm10445_vm12, %v5348_v24, %v5352_v60  ;;  %v4012_v13 = vrot.slane %v3924_v7, 6  ;;  %v3051_v35 = vadd.f32 %v3050_v38, %v12920_v9  ;;  %v4477_v56 = vsel %vm9973_vm13, %v4475_v32, %v4476_v11 }
 0x97b   : > { %5571 = vrot.lane.b32.xlu0 %v5557_v3, %s6654_s9  ;;  %v5363_v8 = vsel %vm10445_vm12, %v5358_v50, %v5362_v62  ;;  %v4478_v48 = vrot.slane %v4476_v11, 2  ;;  %v4669_v10 = vadd.f32 %v4470_v52, %v3924_v7  ;;  %v5507_v57 = vunpack.c.l.b16 %v5353_v63 }
 0x97c   : > { %v5508_v29 = vunpack.c.l.b16 %v5363_v8  ;;  %v4688_v19 = vadd.s32 7, %v10058_v36  ;;  %v3875_v59 = vadd.f32 %v3847_v17, %v3051_v35  ;;  %v4670_v16 = vadd.f32 %v4474_v26, %v4010_v47  ;;  %v10889_v26 = vld.sshfl [vmem:[#allocation1 + $0x20] sm:$0xff pattern:$0x73625140] }
 0x97d   : > { %v4480_v20 = vsel %vm9973_vm13, %v4478_v48, %v4479_v25  ;;  %v10866_v60 = vunpack.c.l.bf16 %v12921_v45  ;;  %v4481_v37 = vrot.slane %v4479_v25, 2  ;;  %v4671_v49 = vadd.f32 %v4477_v56, %v4011_v44  ;;  %5089 = vst [vmem:[#allocation1] ss:$4 sm:$0xff] %v4669_v10 }
 0x97e   : > { %v5517_v5 = vpack.c.b16 %v5508_v29, %v5507_v57  ;;  %vm4705_vm6 = vcmp.ge.s32.totalorder %v4688_v19, 0  ;;  %vm4715_vm10 = vcmp.lt.s32.totalorder %v4688_v19, 16  ;;  %v3902_v33 = vadd.f32 %v10566_v18, %v3875_v59  ;;  %5091 = vst [vmem:[#allocation1 + $0x20] ss:$4 sm:$0xff] %v4670_v16 }
 0x97f   : > { %vm4725_vm11 = vmand %vm4705_vm6, %vm4715_vm10  ;;  %v4210_v53 = vrot.slane %v10866_v60, 2  ;;  %v4482_v28 = vrot.slane %v10866_v60, 7  ;;  %v5197_v7 = vshrl.u32 %v10374_v39, 16  ;;  %v4672_v34 = vadd.f32 %v4480_v20, %v4012_v13  ;;  %5092 = vst [vmem:[#allocation1 + $0x21] ss:$4 sm:$0xff] %v4671_v49 }
 0x980   : > { %5531 = vrot.lane.b32.xlu2 %v5517_v5, %s6653_s23  ;;  %vm4778_vm3 = vmand %vm4725_vm11, %vm4728_vm1  ;;  %v5155_v62 = vsel %vm4725_vm11, %v10798_v31, 0.0  ;;  %v4211_v32 = vrot.slane %v10866_v60, 4  ;;  %v5200_v18 = vshll.u32 %v10374_v39, 16  ;;  %v10885_v47 = vmax.f32 %v3902_v33, 0.0 }
 0x981   : > { %vm4819_vm15 = vmand %vm4725_vm11, %vm4789_vm14  ;;  %v5154_v38 = vsel %vm4778_vm3, %v10776_v0, 0.0  ;;  %v10883_v24 = vpack.c.bf16 %v5155_v62, %v5155_v62  ;;  %v4483_v52 = vsel %vm9973_vm13, %v4481_v37, %v4482_v28  ;;  %v4484_v50 = vrot.slane %v4482_v28, 2  ;;  %5093 = vst [vmem:[#allocation1 + $0x22] ss:$4 sm:$0xff] %v4672_v34 }
 0x982   : > { %v5156_v31 = vsel %vm4819_vm15, %v10820_v1, 0.0  ;;  %v10892_v3 = vpack.c.bf16 %v5154_v38, %v5154_v38  ;;  %v4485_v11 = vrot.slane %v4210_v53, 7  ;;  %v4013_v0 = vrot.slane %v10885_v47, 2 }
 0x983   : > { %v5186_v25 = vpack.c.bf16 %v5156_v31, %v5156_v31  ;;  %v5466_v17 = vrot.slane %v10883_v24, 5  ;;  %v5206_v63 = vshll.u32 %v10376_v27, 16  ;;  %v4014_v13 = vrot.slane %v10885_v47, 4 }
 0x984   : > { %v6416_v44 = vrot.slane %v10892_v3, 9  ;;  %v4486_v1 = vsel %vm9973_vm13, %v4484_v50, %v4485_v11  ;;  %v4487_v9 = vrot.slane %v4485_v11, 2  ;;  %v10901_v56 = vrot.slane %v4211_v32, 7  ;;  %v10913_v37 = vld.sshfl [vmem:[#allocation1] sm:$0xff pattern:$0x73625140] }
 0x985   : > { %v5468_v35 = vrot.slane %v5466_v17, 4  ;;  %v5469_v8 = vrot.slane %v5186_v25, 5  ;;  %v4673_v48 = vadd.f32 %v4483_v52, %v10885_v47  ;;  %v4674_v57 = vadd.f32 %v4486_v1, %v4013_v0 }
 0x986   : > { %v5467_v10 = vsel %vm10420_vm0, %v6416_v44, %v5466_v17  ;;  %v5365_v29 = vshrl.u32 %v10892_v3, 16  ;;  %v5368_v19 = vshll.u32 %v10892_v3, 16  ;;  %v4489_v16 = vsel %vm9973_vm13, %v4487_v9, %v10901_v56 }
 0x987   : > { %v5470_v59 = vsel %vm10420_vm0, %v5468_v35, %v5469_v8  ;;  %v5549_v20 = vunpack.c.l.b16 %v5467_v10  ;;  %v5199_v45 = vrot.slane %v5197_v7, 4  ;;  %5094 = vst [vmem:[#allocation1 + $0x23] ss:$4 sm:$0xff] %v4673_v48  ;;  %v4675_v49 = vadd.f32 %v4489_v16, %v4014_v13  ;;  %v10933_v16 = vld [vmem:[%s11361_s4 + $0x20] sm:$0xf] }
 0x988   : > { %v5550_v5 = vunpack.c.l.b16 %v5470_v59  ;;  %v5367_v33 = vrot.slane %v5365_v29, 4  ;;  %v5370_v53 = vrot.slane %v5368_v19, 5  ;;  %5096 = vst [vmem:[#allocation1] ss:$4 sm:$0xff] %v4674_v57  ;;  %v5374_v28 = vshll.u32 %v10883_v24, 16 }
 0x989   : > { %v5378_v34 = vshrl.u32 %v10883_v24, 16  ;;  %v5202_v62 = vrot.slane %v5200_v18, 5  ;;  %v5208_v52 = vrot.slane %v5206_v63, 5  ;;  %v5210_v31 = vshrl.u32 %v10376_v27, 16  ;;  %5097 = vst [vmem:[#allocation1 + $0x1] ss:$4 sm:$0xff] %v4675_v49 }
 0x98a   : > { %v5558_v32 = vpack.c.b16 %v5550_v5, %v5549_v20  ;;  %v5371_v38 = vor.u32 %v5370_v53, %v5367_v33  ;;  %v5376_v7 = vrot.slane %v5374_v28, 5  ;;  %v5384_v11 = vshll.u32 %v5186_v25, 16  ;;  %v6420_v19 = vld [vmem:[%s11361_s4 + $0x14] sm:$0xf] }
 0x98b   : > { %v5380_v50 = vrot.slane %v5378_v34, 4  ;;  %v5203_v17 = vor.u32 %v5202_v62, %v5199_v45  ;;  %v5212_v44 = vrot.slane %v5210_v31, 4  ;;  %v5216_v13 = vshll.u32 %v10824_v43, 16  ;;  %v10935_v45 = vpop.permute.xlu0 %5563 }
 0x98c   : > { %5573 = vrot.lane.b32.xlu2 %v5558_v32, %s6654_s9  ;;  %v5372_v0 = vrot.slane %v5371_v38, 4  ;;  %v4682_v18 = vadd.s32 1, %v10058_v36  ;;  %v4689_v48 = vadd.s32 8, %v10058_v36  ;;  %v5386_v25 = vrot.slane %v5384_v11, 5 }
 0x98d   : > { %v5381_v1 = vor.u32 %v5380_v50, %v5376_v7  ;;  %v5204_v9 = vrot.slane %v5203_v17, 4  ;;  %v5213_v35 = vor.u32 %v5212_v44, %v5208_v52  ;;  %v5218_v8 = vrot.slane %v5216_v13, 5 }
 0x98e   : > { %v5377_v63 = vsel %vm10445_vm12, %v5372_v0, %v5376_v7  ;;  %v5476_v29 = vunpack.c.l.b16 %v10400_v6  ;;  %vm4699_vm4 = vcmp.ge.s32.totalorder %v4682_v18, 0  ;;  %vm4709_vm5 = vcmp.lt.s32.totalorder %v4682_v18, 16  ;;  %v10950_v7 = vpop.permute.xlu2 %5523 }
 0x98f   : > { %v5382_v10 = vrot.slane %v5381_v1, 4  ;;  %v5209_v57 = vsel %vm10445_vm12, %v5204_v9, %v5208_v52  ;;  %v5509_v59 = vunpack.c.l.b16 %v5377_v63  ;;  %v5214_v20 = vrot.slane %v5213_v35, 4  ;;  %vm4719_vm6 = vmand %vm4699_vm4, %vm4709_vm5 }
 0x990   : > { %v5495_v49 = vunpack.c.l.b16 %v5209_v57  ;;  %vm4706_vm10 = vcmp.ge.s32.totalorder %v4689_v48, 0  ;;  %vm4716_vm11 = vcmp.lt.s32.totalorder %v4689_v48, 16  ;;  %vm4760_vm3 = vmand %vm4719_vm6, %vm4728_vm1  ;;  %v5137_v28 = vsel %vm4719_vm6, %v10256_v12, 0.0 }
 0x991   : > { %v5387_v5 = vsel %vm10445_vm12, %v5382_v10, %v5386_v25  ;;  %v5219_v53 = vsel %vm10445_vm12, %v5214_v20, %v5218_v8  ;;  %v5679_v34 = vunpack.c.l.b16 %v6420_v19  ;;  %vm4801_vm15 = vmand %vm4719_vm6, %vm4789_vm14  ;;  %v5136_v32 = vsel %vm4760_vm3, %v10225_v23, 0.0  ;;  %v6468_v8 = vld [vmem:[%s11361_s4 + $0xc] sm:$0xff] }
 0x992   : > { %v5510_v33 = vunpack.c.l.b16 %v5387_v5  ;;  %v5496_v62 = vunpack.c.l.b16 %v5219_v53  ;;  %v10947_v38 = vpack.c.bf16 %v5137_v28, %v5137_v28  ;;  %v5875_v52 = vunpack.c.l.b16 %v10933_v16  ;;  %vm4726_vm4 = vmand %vm4706_vm10, %vm4716_vm11 }
 0x993   : > { %v5138_v50 = vsel %vm4801_vm15, %v10266_v42, 0.0  ;;  %v10953_v11 = vpack.c.bf16 %v5136_v32, %v5136_v32  ;;  %v5681_v12 = vpack.c.b16 %v5679_v34, %v5679_v34  ;;  %vm4781_vm5 = vmand %vm4726_vm4, %vm4728_vm1  ;;  %v5158_v44 = vsel %vm4726_vm4, %v10889_v26, 0.0 }
 0x994   : > { %v5518_v31 = vpack.c.b16 %v5510_v33, %v5509_v59  ;;  %v5511_v17 = vpack.c.b16 %v5496_v62, %v5495_v49  ;;  %v10957_v0 = vpack.c.bf16 %v5138_v50, %v5138_v50  ;;  %v5424_v23 = vrot.slane %v10947_v38, 5  ;;  %vm4822_vm6 = vmand %vm4726_vm4, %vm4789_vm14  ;;  %v10988_v33 = vpop.permute.xlu0 %3551 }
 0x995   : > { %v6410_v42 = vrot.slane %v10953_v11, 9  ;;  %v5157_v13 = vsel %vm4781_vm5, %v10872_v51, 0.0  ;;  %v10968_v1 = vpack.c.bf16 %v5158_v44, %v5158_v44  ;;  %v5700_v9 = vsel %vm2881_vm2, %v5681_v12, 0 }
 0x996   : > { %5533 = vrot.lane.b32.xlu1 %v5518_v31, %s6653_s23  ;;  %5519 = vrot.lane.b32.xlu2 %v5511_v17, %s6653_s23  ;;  %v5426_v18 = vrot.slane %v5424_v23, 4  ;;  %v5427_v63 = vrot.slane %v10957_v0, 5  ;;  %v5159_v26 = vsel %vm4822_vm6, %v10913_v37, 0.0  ;;  %v10974_v35 = vpack.c.bf16 %v5157_v13, %v5157_v13  ;;  %v10995_v17 = vpop.permute.xlu2 %5565 }
 0x997   : > { %6474 = vmatpush.bf16.msra.mxu3 %v5700_v9  ;;  %v5425_v51 = vsel %vm10420_vm0, %v6410_v42, %v5424_v23  ;;  %v5189_v48 = vpack.c.bf16 %v5159_v26, %v5159_v26  ;;  %v5647_v10 = vrot.slane %v10968_v1, 5  ;;  %v5628_v25 = vshll.u32 %v10968_v1, 16  ;;  %5708 = vmatpush.bf16.msra.mxu2 %v5700_v9 }
 0x998   : > { %v5428_v57 = vsel %vm10420_vm0, %v5426_v18, %v5427_v63  ;;  %v5537_v37 = vunpack.c.l.b16 %v5425_v51  ;;  %v6417_v19 = vrot.slane %v10974_v35, 9  ;;  %v5619_v59 = vshrl.u32 %v10974_v35, 16 }
 0x999   : > { %v5538_v20 = vunpack.c.l.b16 %v5428_v57  ;;  %v5649_v16 = vrot.slane %v5647_v10, 4  ;;  %v5650_v5 = vrot.slane %v5189_v48, 5  ;;  %v5622_v49 = vshll.u32 %v10974_v35, 16 }
 0x99a   : > { %v5648_v53 = vsel %vm10420_vm0, %v6417_v19, %v5647_v10  ;;  %v5621_v28 = vrot.slane %v5619_v59, 4  ;;  %v5630_v34 = vrot.slane %v5628_v25, 5  ;;  %v5632_v62 = vshrl.u32 %v10968_v1, 16  ;;  %v6469_v19 = vld [vmem:[%s11361_s4 + $0x18] sm:$0xff] }
 0x99b   : > { %6475 = vmatpush.bf16.msra.mxu3 %v6468_v8  ;;  %v5552_v32 = vpack.c.b16 %v5538_v20, %v5537_v37  ;;  %v5651_v31 = vsel %vm10420_vm0, %v5649_v16, %v5650_v5  ;;  %v5660_v50 = vunpack.c.l.b16 %v5648_v53  ;;  %v5624_v12 = vrot.slane %v5622_v49, 5  ;;  %5709 = vmatpush.bf16.msra.mxu2 %v6468_v8 }
 0x99c   : > { %v5661_v23 = vunpack.c.l.b16 %v5651_v31  ;;  %v5634_v44 = vrot.slane %v5632_v62, 4  ;;  %v5638_v42 = vshll.u32 %v5189_v48, 16  ;;  %v5877_v13 = vpack.c.b16 %v5875_v52, %v5875_v52 }
 0x99d   : > { %v5625_v9 = vor.u32 %v5624_v12, %v5621_v28  ;;  %v5221_v18 = vshrl.u32 %v10953_v11, 16  ;;  %v5224_v63 = vshll.u32 %v10953_v11, 16  ;;  %v5230_v26 = vshll.u32 %v10947_v38, 16 }
 0x99e   : > { %5561 = vrot.lane.b32.xlu2 %v5552_v32, %s6654_s9  ;;  %v5662_v51 = vpack.c.b16 %v5661_v23, %v5660_v50  ;;  %v5635_v10 = vor.u32 %v5634_v44, %v5630_v34  ;;  %v5640_v25 = vrot.slane %v5638_v42, 5  ;;  %v5882_v57 = vsel %vm2881_vm2, %v5877_v13, 0  ;;  %v1955_v23 = vpop.permute.xlu2 %1954 }
 0x99f   : > { %v5475_v8 = vunpack.c.l.b16 %v10386_v41  ;;  %v5626_v37 = vrot.slane %v5625_v9, 4  ;;  %5890 = vmatpush.bf16.msrb.mxu0 %v5882_v57  ;;  %v5223_v48 = vrot.slane %v5221_v18, 4  ;;  %v5226_v52 = vrot.slane %v5224_v63, 5  ;;  %v12922_v9 = vld [vmem:[#allocation194_spill] sm:$0xff] }
 0x9a0   : > { %5663 = vrot.lane.b32.xlu1 %v5662_v51, %s6654_s9  ;;  %v5636_v59 = vrot.slane %v5635_v10, 4  ;;  %v5232_v20 = vrot.slane %v5230_v26, 5  ;;  %v5234_v16 = vshrl.u32 %v10947_v38, 16  ;;  %v5417_v53 = vrot.slane %v10376_v27, 5 }
 0x9a1   : > { %v5489_v5 = vpack.c.b16 %v5476_v29, %v5475_v8  ;;  %v5631_v41 = vsel %vm10445_vm12, %v5626_v37, %v5630_v34  ;;  %v5227_v49 = vor.u32 %v5226_v52, %v5223_v48  ;;  %v5240_v32 = vshll.u32 %v10957_v0, 16  ;;  %v2100_v34 = vpop.permute.xlu0 %2099 }
 0x9a2   : > { %v5641_v28 = vsel %vm10445_vm12, %v5636_v59, %v5640_v25  ;;  %v5236_v62 = vrot.slane %v5234_v16, 4  ;;  %v5420_v31 = vrot.slane %v10824_v43, 5  ;;  %v5655_v12 = vunpack.c.l.b16 %v5631_v41 }
 0x9a3   : > { %v5583_v50 = vsel %vm2101_vm7, %v5489_v5, %v10950_v7  ;;  %v5656_v6 = vunpack.c.l.b16 %v5641_v28  ;;  %v5228_v29 = vrot.slane %v5227_v49, 4  ;;  %5891 = vmatpush.bf16.msrb.mxu0 %v6469_v19  ;;  %v5419_v42 = vrot.slane %v5417_v53, 4 }
 0x9a4   : > { %v5237_v44 = vor.u32 %v5236_v62, %v5232_v20  ;;  %v11021_v13 = vsel %vm2126_vm8, %v5583_v50, %v10935_v45  ;;  %v2125_v0 = vsel %vm2101_vm7, %v12922_v9, %v1955_v23  ;;  %v6409_v63 = vrot.slane %v10374_v39, 9 }
 0x9a5   : > { %v5526_v18 = vpop.permute.xlu1 %5525  ;;  %v5657_v43 = vpack.c.b16 %v5656_v6, %v5655_v12  ;;  %v5233_v7 = vsel %vm10445_vm12, %v5228_v29, %v5232_v20  ;;  %6426 = vmatmul.msk.bf16.vlgmr.msra.gmra.mxu3 %vm2856_vm9, %v11021_v13  ;;  %v5242_v51 = vrot.slane %v5240_v32, 5  ;;  %v5421_v10 = vsel %vm10420_vm0, %v5419_v42, %v5420_v31 }
 0x9a6   : > { %v5238_v26 = vrot.slane %v5237_v44, 4  ;;  %6453 = vmatmul.msk.bf16.vlgmr.msrb.gmra.mxu0 %vm2856_vm9, %v11021_v13  ;;  %v2150_v45 = vsel %vm2126_vm8, %v2125_v0, %v2100_v34  ;;  %v5418_v25 = vsel %vm10420_vm0, %v6409_v63, %v5417_v53  ;;  %v5497_v8 = vunpack.c.l.b16 %v5233_v7  ;;  %v5617_v0 = vld [vmem:[%s11361_s4 + $0x8] sm:$0xf] }
 0x9a7   : > { %5658 = vrot.lane.b32.xlu0 %v5657_v43, %s6653_s23  ;;  %6355 = vmatmul.msk.bf16.gmra.mxu1 %vm2856_vm9, %v2150_v45  ;;  %v5483_v37 = vunpack.c.l.b16 %v10830_v46  ;;  %v5484_v48 = vunpack.c.l.b16 %v10832_v58  ;;  %v5536_v19 = vunpack.c.l.b16 %v5421_v10  ;;  %v5478_v59 = vunpack.c.l.b16 %v10537_v54  ;;  %v12923_v46 = vld [vmem:[#allocation108_spill] sm:$0xff] }
 0x9a8   : > { %v5243_v57 = vsel %vm10445_vm12, %v5238_v26, %v5242_v51  ;;  %v5471_v20 = vunpack.c.l.b16 %v10374_v39  ;;  %v5472_v5 = vunpack.c.l.b16 %v10376_v27  ;;  %v5473_v41 = vunpack.c.l.b16 %v10953_v11  ;;  %v5568_v29 = vpop.permute.xlu2 %5567  ;;  %v6467_v45 = vld [vmem:[%s11361_s4] sm:$0xff] }
 0x9a9   : > { %v5498_v52 = vunpack.c.l.b16 %v5243_v57  ;;  %v5493_v16 = vpack.c.b16 %v5484_v48, %v5483_v37  ;;  %v5474_v49 = vunpack.c.l.b16 %v10947_v38  ;;  %v5535_v28 = vunpack.c.l.b16 %v5418_v25 }
 0x9aa   : > { %v5477_v62 = vunpack.c.l.b16 %v10535_v2  ;;  %v3721_v58 = vsel %vm2101_vm7, %v12923_v46, %v10988_v33  ;;  %v11052_v31 = vpack.c.b16 %v5472_v5, %v5471_v20  ;;  %v5480_v33 = vunpack.c.l.b16 %v10657_v30 }
 0x9ab   : > { %v5512_v53 = vpack.c.b16 %v5498_v52, %v5497_v8  ;;  %v11054_v54 = vpack.c.b16 %v5474_v49, %v5473_v41  ;;  %v5551_v39 = vpack.c.b16 %v5536_v19, %v5535_v28  ;;  %v5479_v50 = vunpack.c.l.b16 %v10663_v55 }
 0x9ac   : > { %v5490_v27 = vpack.c.b16 %v5478_v59, %v5477_v62  ;;  %v5482_v30 = vunpack.c.l.b16 %v10745_v15  ;;  %v5756_v43 = vunpack.c.l.b16 %v5617_v0  ;;  %v5486_v10 = vunpack.c.l.b16 %v10883_v24 }
 0x9ad   : > { %v3697_v32 = vpop.permute.xlu1 %3696  ;;  %5521 = vrot.lane.b32.xlu1 %v5512_v53, %s6653_s23  ;;  %v5491_v12 = vpack.c.b16 %v5480_v33, %v5479_v50  ;;  %v5485_v25 = vunpack.c.l.b16 %v10892_v3  ;;  %v5653_v24 = vunpack.c.l.b16 %v10968_v1  ;;  %v5652_v3 = vunpack.c.l.b16 %v10974_v35 }
 0x9ae   : > { %v3745_v11 = vsel %vm2126_vm8, %v3721_v58, %v3697_v32  ;;  %v5586_v2 = vsel %vm2101_vm7, %v5490_v27, %v5526_v18  ;;  %v4490_v5 = vrot.slane %v10901_v56, 2  ;;  %v4212_v49 = vrot.slane %v10866_v60, 6 }
 0x9af   : > { %6383 = vmatmul.msk.bf16.gmra.mxu2 %vm2856_vm9, %v3745_v11  ;;  %5559 = vrot.lane.b32.xlu0 %v5551_v39, %s6654_s9  ;;  %v11063_v38 = vsel %vm2126_vm8, %v5586_v2, %v10995_v17  ;;  %v5481_v17 = vunpack.c.l.b16 %v10743_v22  ;;  %v5758_v22 = vpack.c.b16 %v5756_v43, %v5756_v43  ;;  %v5494_v57 = vpack.c.b16 %v5486_v10, %v5485_v25  ;;  %v12924_v2 = vld [vmem:[#allocation113_spill] sm:$0xff]  ;;  %v5095_v10 = vld.sshfl [vmem:[#allocation1 + $0x20] sm:$0xff pattern:$0x73625140] }
 0x9b0   : > { %v5654_v20 = vpack.c.b16 %v5653_v24, %v5652_v3  ;;  %v4015_v53 = vrot.slane %v10885_v47, 6  ;;  %v4491_v1 = vrot.slane %v4212_v49, 7  ;;  %v4113_v33 = vunpack.c.l.bf16 %v12924_v2 }
 0x9b1   : > { %v5492_v44 = vpack.c.b16 %v5482_v30, %v5481_v17  ;;  %v5763_v15 = vsel %vm2881_vm2, %v5758_v22, 0 }
 0x9b2   : > { %5771 = vmatpush.bf16.msrb.mxu3 %v5763_v15  ;;  %v4492_v35 = vsel %vm9973_vm13, %v4490_v5, %v4491_v1 }
 0x9b3   : > { %v4676_v46 = vadd.f32 %v4492_v35, %v4015_v53 }
 0x9b5   : > { %6427 = vmatmul.msk.bf16.gmra.mxu3 %vm2856_vm9, %v11063_v38  ;;  %5098 = vst [vmem:[#allocation1 + $0x2] ss:$4 sm:$0xff] %v4676_v46 }
 0x9b6   : > { %6454 = vmatmul.msk.bf16.gmra.mxu0 %vm2856_vm9, %v11063_v38  ;;  %5772 = vmatpush.bf16.msrb.mxu3 %v6467_v45 }
 0x9c5   : > { %v5528_v6 = vpop.permute.xlu1 %5527 }
 0x9c6   : > { %v5589_v23 = vsel %vm2101_vm7, %v5491_v12, %v5528_v6  ;;  %v12925_v12 = vld [vmem:[#allocation120_spill] sm:$0xff] }
 0x9c7   : > { %v11073_v34 = vsel %vm2126_vm8, %v5589_v23, %v5568_v29  ;;  %v4493_v23 = vrot.slane %v4491_v1, 2 }
 0x9c8   : > { %6428 = vmatmul.msk.bf16.gmra.mxu3 %vm2856_vm9, %v11073_v34  ;;  %6455 = vmatmul.msk.bf16.gmra.mxu0 %vm2856_vm9, %v11073_v34 }
 0x9d8   : > { %v5530_v55 = vpop.permute.xlu0 %5529  ;;  %v5570_v42 = vpop.permute.xlu1 %5569 }
 0x9d9   : > { %v5592_v9 = vsel %vm2101_vm7, %v5492_v44, %v5530_v55  ;;  %v6403_v44 = vrot.slane %v4113_v33, 9  ;;  %v4690_v55 = vadd.s32 9, %v10058_v36 }
 0x9da   : > { %v11086_v18 = vsel %vm2126_vm8, %v5592_v9, %v5570_v42  ;;  %v5532_v7 = vpop.permute.xlu2 %5531 }
 0x9db   : > { %6429 = vmatmul.msk.bf16.gmra.mxu3 %vm2856_vm9, %v11086_v18  ;;  %6456 = vmatmul.msk.bf16.gmra.mxu0 %vm2856_vm9, %v11086_v18  ;;  %v5595_v63 = vsel %vm2101_vm7, %v5493_v16, %v5532_v7  ;;  %vm4707_vm2 = vcmp.ge.s32.totalorder %v4690_v55, 0  ;;  %vm4717_vm10 = vcmp.lt.s32.totalorder %v4690_v55, 16 }
 0x9dc   : > { %vm11147_vm11 = vmand %vm4707_vm2, %vm4717_vm10 }
 0x9e6   : > { %v5574_v37 = vpop.permute.xlu2 %5573 }
 0x9ed   : > { %v5572_v26 = vpop.permute.xlu0 %5571 }
 0x9ee   : > { %v11095_v51 = vsel %vm2126_vm8, %v5595_v63, %v5572_v26 }
 0x9ef   : > { %6430 = vmatmul.msk.bf16.gmra.mxu3 %vm2856_vm9, %v11095_v51  ;;  %6457 = vmatmul.msk.bf16.gmra.mxu0 %vm2856_vm9, %v11095_v51 }
 0x9f0   : > { %v5520_v59 = vpop.permute.xlu2 %5519 }
 0x9f1   : > { %v5577_v39 = vsel %vm2101_vm7, %v11052_v31, %v5520_v59  ;;  %v6556_v31 = vld [vmem:[%s11360_s3] ss:$0 sm:$0xff] }
 0x9f8   : > { %v5562_v58 = vpop.permute.xlu2 %5561 }
 0xa08   : > { %v5534_v8 = vpop.permute.xlu1 %5533 }
 0xa09   : > { %v5598_v48 = vsel %vm2101_vm7, %v5494_v57, %v5534_v8 }
 0xa0a   : > { %v11108_v52 = vsel %vm2126_vm8, %v5598_v48, %v5574_v37 }
 0xa0b   : > { %6431 = vmatmul.msk.bf16.gmra.mxu3 %vm2856_vm9, %v11108_v52  ;;  %6458 = vmatmul.msk.bf16.gmra.mxu0 %vm2856_vm9, %v11108_v52 }
 0xa12   : > { %v5664_v19 = vpop.permute.xlu1 %5663 }
 0xa19   : > { %v5659_v16 = vpop.permute.xlu0 %5658 }
 0xa1a   : > { %v5667_v41 = vsel %vm2101_vm7, %v5654_v20, %v5659_v16 }
 0xa1b   : > { %v5669_v28 = vsel %vm2126_vm8, %v5667_v41, %v5664_v19 }
 0xa1c   : > { %6432 = vmatmul.msk.bf16.gmra.mxu3 %vm2856_vm9, %v5669_v28  ;;  %6459 = vmatmul.msk.bf16.gmra.mxu0 %vm2856_vm9, %v5669_v28 }
 0xa1f   : > { %v5522_v62 = vpop.permute.xlu1 %5521 }
 0xa20   : > { %v5580_v56 = vsel %vm2101_vm7, %v11054_v54, %v5522_v62  ;;  %v4494_v54 = vrot.slane %v4113_v33, 7 }
 0xa21   : > { %v5602_v60 = vsel %vm2126_vm8, %v5580_v56, %v5562_v58  ;;  %v5560_v32 = vpop.permute.xlu0 %5559 }
 0xa22   : > { %6425 = vmatmul.msk.bf16.vlgmr.msra.gmra.mxu2 %vm2856_vm9, %v5602_v60  ;;  %v5600_v27 = vsel %vm2126_vm8, %v5577_v39, %v5560_v32  ;;  %v4496_v30 = vrot.slane %v4494_v54, 2  ;;  %v4495_v9 = vsel %vm9973_vm13, %v4493_v23, %v4494_v54 }
 0xa24   : > { %v3053_v47 = vpop.f32.mrf.mxu1  ;;  %v4498_v43 = vsel %vm9973_vm13, %v4496_v30, %v6403_v44  ;;  %vm4784_vm13 = vmand %vm11147_vm11, %vm4728_vm1 }
 0xa25   : > { %v3054_v6 = vadd.f32 %v3053_v47, %v12925_v12  ;;  %v5160_v61 = vsel %vm4784_vm13, %v5095_v10, 0.0  ;;  %vm4825_vm1 = vmand %vm11147_vm11, %vm4789_vm14  ;;  %vm5985_vm14 = vcmask 60416  }
 0xa26   : > { %v11158_v25 = vpack.c.bf16 %v5160_v61, %v5160_v61 }
 0xa28   : > { %v11134_v50 = vpop.f32.mrf.mxu3  ;;  %v5815_v57 = vshrl.u32 %v11158_v25, 16  ;;  %v5818_v8 = vshll.u32 %v11158_v25, 16  ;;  %v6445_v5 = vrot.slane %v11158_v25, 9 }
 0xa2a   : > { %v5817_v48 = vrot.slane %v5815_v57, 4  ;;  %v5820_v24 = vrot.slane %v5818_v8, 5 }
 0xa2c   : > { %6437 = vmatmul.msk.bf16.vlgmr.msrb.gmra.mxu3 %vm2856_vm9, %v5600_v27  ;;  %v3055_v11 = vpop.f32.mrf.mxu1  ;;  %v5821_v41 = vor.u32 %v5820_v24, %v5817_v48 }
 0xa30   : > { %v11145_v7 = vpop.f32.mrf.mxu3 }
 0xa32   : > { %v3850_v29 = vpop.f32.mrf.mxu2 }
 0xa33   : > { %v3876_v17 = vadd.f32 %v3850_v29, %v3054_v6 }
 0xa35   : > { %v3903_v42 = vadd.f32 %v6556_v31, %v3876_v17 }
 0xa37   : > { %v3926_v0 = vmax.f32 %v3903_v42, 0.0 }
 0xa38   : > { %v11156_v45 = vpop.f32.mrf.mxu3 }
 0xa39   : > { %v4016_v22 = vrot.slane %v3926_v0, 2  ;;  %v4677_v15 = vadd.f32 %v4495_v9, %v3926_v0 }
 0xa3a   : > { %v3852_v63 = vpop.f32.mrf.mxu2 }
 0xa3b   : > { %v4678_v36 = vadd.f32 %v4498_v43, %v4016_v22  ;;  %5099 = vst [vmem:[#allocation1 + $0x3] ss:$4 sm:$0xff] %v4677_v15  ;;  %v11223_v43 = vld [vmem:[%s11362_s5] ss:$0 sm:$0xff] }
 0xa3c   : > { %6438 = vmatmul.msk.bf16.gmra.mxu3 %vm2856_vm9, %v5602_v60  ;;  %v5822_v60 = vrot.slane %v5821_v41, 4 }
 0xa3d   : > { %5100 = vst [vmem:[#allocation1 + $0x20] ss:$4 sm:$0xff] %v4678_v36 }
 0xa40   : > { %v11162_v37 = vpop.f32.mrf.mxu3 }
 0xa42   : > { %v5101_v21 = vld.sshfl [vmem:[#allocation1] sm:$0xff pattern:$0x73625140] }
 0xa43   : > { %v5161_v59 = vsel %vm11147_vm11, %v5101_v21, 0.0 }
 0xa44   : > { %v5102_v19 = vld.sshfl [vmem:[#allocation1 + $0x20] sm:$0xff pattern:$0x73625140]  ;;  %v11172_v20 = vpack.c.bf16 %v5161_v59, %v5161_v59 }
 0xa45   : > { %v5162_v3 = vsel %vm4825_vm1, %v5102_v19, 0.0 }
 0xa46   : > { %v5192_v16 = vpack.c.bf16 %v5162_v3, %v5162_v3  ;;  %v5843_v49 = vrot.slane %v11172_v20, 5  ;;  %v5824_v14 = vshll.u32 %v11172_v20, 16  ;;  %v5828_v53 = vshrl.u32 %v11172_v20, 16 }
 0xa48   : > { %v5834_v28 = vshll.u32 %v5192_v16, 16  ;;  %v5844_v1 = vsel %vm10420_vm0, %v6445_v5, %v5843_v49  ;;  %v5845_v35 = vrot.slane %v5843_v49, 4  ;;  %v5826_v62 = vrot.slane %v5824_v14, 5 }
 0xa49   : > { %v5830_v46 = vrot.slane %v5828_v53, 4  ;;  %v5856_v32 = vunpack.c.l.b16 %v5844_v1  ;;  %v5849_v1 = vunpack.c.l.b16 %v11172_v20 }
 0xa4a   : > { %v5827_v27 = vsel %vm10445_vm12, %v5822_v60, %v5826_v62  ;;  %v5836_v2 = vrot.slane %v5834_v28, 5 }
 0xa4b   : > { %v11180_v58 = vpop.f32.mrf.mxu3  ;;  %v5831_v47 = vor.u32 %v5830_v46, %v5826_v62  ;;  %v5851_v12 = vunpack.c.l.b16 %v5827_v27  ;;  %v5848_v62 = vunpack.c.l.b16 %v11158_v25 }
 0xa4c   : > { %6439 = vmatmul.msk.bf16.gmra.mxu3 %vm2856_vm9, %v11021_v13  ;;  %v5846_v13 = vrot.slane %v5192_v16, 5 }
 0xa4d   : > { %v5832_v11 = vrot.slane %v5831_v47, 4  ;;  %v5850_v60 = vpack.c.b16 %v5849_v1, %v5848_v62 }
 0xa4e   : > { %v5847_v56 = vsel %vm10420_vm0, %v5845_v35, %v5846_v13 }
 0xa4f   : > { %v5857_v39 = vunpack.c.l.b16 %v5847_v56  ;;  %v5837_v54 = vsel %vm10445_vm12, %v5832_v11, %v5836_v2 }
 0xa50   : > { %v5852_v6 = vunpack.c.l.b16 %v5837_v54 }
 0xa51   : > { %v5858_v33 = vpack.c.b16 %v5857_v39, %v5856_v32 }
 0xa52   : > { %v5853_v29 = vpack.c.b16 %v5852_v6, %v5851_v12 }
 0xa53   : > { %5859 = vrot.lane.b32.xlu1 %v5858_v33, %s6654_s9  ;;  %v11191_v4 = vpop.f32.mrf.mxu3  ;;  %s6220_s9 = sshll.u32 %s6769_s20, 5  ;;  %s6461_s20 = sshll.u32 %s6639_s28, 1 }
 0xa54   : > { %5854 = vrot.lane.b32.xlu0 %v5853_v29, %s6653_s23  ;;  %s6219_s23 = sshll.u32 %s6791_s21, 1  ;;  %s336_s21 = sand.u32 1, %s6627_s25  }
 0xa55   : > { %s365_s16 = sadd.s32 %s6220_s9, %s6219_s23  ;;  %s6065_s23 = sadd.s32 %s6635_s27, %s6461_s20 }
 0xa56   : > { %s6221_s17 = sshll.u32 %s365_s16, 2  ;;  %s6066_s22 = scalar_lea.hbm %s11364_s7, %s6065_s23 }
 0xa57   : > { %s11229_s0 = scalar_lea.vmem %s11363_s6, %s6221_s17  ;;  %s337_s18 = scalar_lea.vmem [#allocation2], %s336_s21 }
 0xa58   : > { %s6068_s17 = sshll.u32 %s337_s18, 4  ;;  %s6070_s10 = sshll.u32 %s6066_s22, 4  ;;  %s6069_s17 = int_to_ptr.vmem [resolvable:$true] %s6068_s17  ;;  %s6071_s10 = int_to_ptr.hbm [resolvable:$true] %s6070_s10 }
 0xa59   : > { %s6571_s28 = sshra.s32 %s6071_s10, 4  ;;  %s6577_s23 = scalar_lea.hbm %s11364_s7, 4  ;;  %s6572_s28 = int_to_ptr.hbm [resolvable:$true] %s6571_s28 }
 0xa5a   : > { %s6573_s27 = scalar_lea.hbm %s6572_s28, 1  ;;  %p6578_p5 = scmp.lt.s32.totalorder %s6572_s28, %s11364_s7 }
 0xa5b   : > { %p6574_p1 = scmp.ne.s32.totalorder %s6572_s28, %s6573_s27  ;;  %p6579_p6 = scmp.lt.s32.totalorder %s6577_s23, %s6573_s27 }
 0xa5c   : > { %6440 = vmatmul.msk.bf16.gmra.mxu3 %vm2856_vm9, %v11063_v38 }
 0xa5d   : > { %p6575_p2 = pnand %p6574_p1, %p6746_p3  ;;  %p6580_p7 = por %p6579_p6, %p6578_p5 }
 0xa5e   : > { %v11194_v23 = vpop.f32.mrf.mxu3 }
 0xa5f   : > { %p6576_p4 = pneg %p6575_p2 }
 0xa61   : > { %p6581_p9 = pnand %p6580_p7, %p6576_p4 }
 0xa66   : > { %v11198_v40 = vpop.f32.mrf.mxu3 }
 0xa6c   : > { %6441 = vmatmul.msk.bf16.gmra.mxu3 %vm2856_vm9, %v11073_v34  ;;  %v5893_v34 = vpop.f32.mrf.mxu0 }
 0xa72   : > { %v11200_v17 = vpop.f32.mrf.mxu3 }
 0xa74   : > { %v5895_v31 = vpop.f32.mrf.mxu0 }
 0xa7a   : > { %v11204_v30 = vpop.f32.mrf.mxu3 }
 0xa7c   : > { %6442 = vmatmul.msk.bf16.gmra.mxu3 %vm2856_vm9, %v11086_v18  ;;  %v5898_v9 = vpop.f32.mrf.mxu0 }
 0xa84   : > { %v5900_v10 = vpop.f32.mrf.mxu0 }
 0xa8c   : > { %6443 = vmatmul.msk.bf16.gmra.mxu3 %vm2856_vm9, %v11095_v51  ;;  %v5903_v3 = vpop.f32.mrf.mxu0 }
 0xa8e   : > { %v11208_v38 = vpop.f32.mrf.mxu3 }
 0xa94   : > { %v5905_v35 = vpop.f32.mrf.mxu0 }
 0xa96   : > { %v11210_v44 = vpop.f32.mrf.mxu3 }
 0xa9c   : > { %6444 = vmatmul.msk.bf16.gmra.mxu3 %vm2856_vm9, %v11108_v52  ;;  %v5908_v25 = vpop.f32.mrf.mxu0 }
 0xa9f   : > { %v11214_v55 = vpop.f32.mrf.mxu3 }
 0xaa5   : > { %v5711_v18 = vpop.f32.mrf.mxu2 }
 0xaa7   : > { %v11216_v42 = vpop.f32.mrf.mxu3 }
 0xaad   : > { %v5713_v63 = vpop.f32.mrf.mxu2 }
 0xaaf   : > { %v5774_v0 = vpop.f32.mrf.mxu3 }
 0xab0   : > { %v5775_v51 = vadd.f32 %v5774_v0, %v5711_v18  ;;  %v5910_v18 = vpop.f32.mrf.mxu0 }
 0xab2   : > { %v5933_v52 = vadd.f32 %v5893_v34, %v5775_v51 }
 0xab4   : > { %v5953_v22 = vadd.f32 %v11223_v43, %v5933_v52 }
 0xab6   : > { %v5969_v15 = vpack.c.bf16 %v5953_v22, %v5953_v22  ;;  %v6002_v8 = vsel %vm2101_vm7, %v5953_v22, 0.0 }
 0xab7   : > { %v5776_v36 = vpop.f32.mrf.mxu3 }
 0xab8   : > { %5986 = vst.msk [vmem:[%s11229_s0] sm:$0xf] %vm5985_vm14, %v5969_v15  ;;  %v5777_v26 = vadd.f32 %v5776_v36, %v5713_v63 }
 0xaba   : > { %v5934_v61 = vadd.f32 %v5895_v31, %v5777_v26  ;;  %v5913_v26 = vpop.f32.mrf.mxu0 }
 0xabc   : > { %v5954_v57 = vadd.f32 %v11223_v43, %v5934_v61 }
 0xabe   : > { %v5970_v48 = vpack.c.bf16 %v5954_v57, %v5954_v57  ;;  %v6003_v24 = vsel %vm2101_vm7, %v5954_v57, 0.0 }
 0xabf   : > { %v6004_v21 = vadd.f32 %v6003_v24, %v6002_v8  ;;  %v5779_v19 = vpop.f32.mrf.mxu3 }
 0xac0   : > { %5987 = vst.msk [vmem:[%s11229_s0 + $0x4] sm:$0xf] %vm5985_vm14, %v5970_v48  ;;  %v5780_v59 = vadd.f32 %v5779_v19, %v11134_v50 }
 0xac2   : > { %v5935_v16 = vadd.f32 %v5898_v9, %v5780_v59 }
 0xac4   : > { %v5955_v5 = vadd.f32 %v11223_v43, %v5935_v16 }
 0xac5   : > { %v5860_v27 = vpop.permute.xlu1 %5859 }
 0xac6   : > { %v5971_v41 = vpack.c.bf16 %v5955_v5, %v5955_v5  ;;  %v6005_v49 = vsel %vm2101_vm7, %v5955_v5, 0.0  ;;  %v5855_v39 = vpop.permute.xlu0 %5854 }
 0xac7   : > { %v6006_v13 = vadd.f32 %v6005_v49, %v6004_v21  ;;  %v5781_v14 = vpop.f32.mrf.mxu3  ;;  %v5863_v20 = vsel %vm2101_vm7, %v5850_v60, %v5855_v39 }
 0xac8   : > { %5988 = vst.msk [vmem:[%s11229_s0 + $0x8] sm:$0xf] %vm5985_vm14, %v5971_v41  ;;  %v5782_v53 = vadd.f32 %v5781_v14, %v11145_v7  ;;  %v5865_v11 = vsel %vm2126_vm8, %v5863_v20, %v5860_v27 }
 0xac9   : > { %6460 = vmatmul.msk.bf16.gmra.mxu0 %vm2856_vm9, %v5865_v11 }
 0xaca   : > { %v5936_v28 = vadd.f32 %v5900_v10, %v5782_v53 }
 0xacc   : > { %v5956_v50 = vadd.f32 %v11223_v43, %v5936_v28 }
 0xace   : > { %v5972_v46 = vpack.c.bf16 %v5956_v50, %v5956_v50  ;;  %v6007_v56 = vsel %vm2101_vm7, %v5956_v50, 0.0 }
 0xacf   : > { %v6008_v47 = vadd.f32 %v6007_v56, %v6006_v13  ;;  %v5784_v32 = vpop.f32.mrf.mxu3 }
 0xad0   : > { %5989 = vst.msk [vmem:[%s11229_s0 + $0xc] sm:$0xf] %vm5985_vm14, %v5972_v46  ;;  %v5785_v7 = vadd.f32 %v5784_v32, %v11156_v45 }
 0xad2   : > { %v5937_v2 = vadd.f32 %v5903_v3, %v5785_v7  ;;  %v5915_v3 = vpop.f32.mrf.mxu0 }
 0xad4   : > { %v5957_v33 = vadd.f32 %v11223_v43, %v5937_v2 }
 0xad6   : > { %v5973_v54 = vpack.c.bf16 %v5957_v33, %v5957_v33  ;;  %v6009_v12 = vsel %vm2101_vm7, %v5957_v33, 0.0 }
 0xad7   : > { %v6010_v6 = vadd.f32 %v6009_v12, %v6008_v47  ;;  %v5786_v29 = vpop.f32.mrf.mxu3 }
 0xad8   : > { %5990 = vst.msk [vmem:[%s11229_s0 + $0x10] sm:$0xf] %vm5985_vm14, %v5973_v54  ;;  %v5787_v45 = vadd.f32 %v5786_v29, %v11162_v37 }
 0xada   : > { %v5938_v34 = vadd.f32 %v5905_v35, %v5787_v45  ;;  %v5918_v28 = vpop.f32.mrf.mxu0 }
 0xadc   : > { %v5958_v31 = vadd.f32 %v11223_v43, %v5938_v34 }
 0xade   : > { %v5974_v9 = vpack.c.bf16 %v5958_v31, %v5958_v31  ;;  %v6011_v0 = vsel %vm2101_vm7, %v5958_v31, 0.0 }
 0xadf   : > { %v6012_v51 = vadd.f32 %v6011_v0, %v6010_v6  ;;  %v5789_v52 = vpop.f32.mrf.mxu3 }
 0xae0   : > { %5991 = vst.msk [vmem:[%s11229_s0 + $0x14] sm:$0xf] %vm5985_vm14, %v5974_v9  ;;  %v5790_v22 = vadd.f32 %v5789_v52, %v11180_v58 }
 0xae2   : > { %v5939_v15 = vadd.f32 %v5908_v25, %v5790_v22  ;;  %v5920_v47 = vpop.f32.mrf.mxu0 }
 0xae4   : > { %v5959_v63 = vadd.f32 %v11223_v43, %v5939_v15 }
 0xae6   : > { %v5975_v36 = vpack.c.bf16 %v5959_v63, %v5959_v63  ;;  %v6013_v37 = vsel %vm2101_vm7, %v5959_v63, 0.0 }
 0xae7   : > { %v6014_v10 = vadd.f32 %v6013_v37, %v6012_v51  ;;  %v5791_v61 = vpop.f32.mrf.mxu3 }
 0xae8   : > { %5992 = vst.msk [vmem:[%s11229_s0 + $0x18] sm:$0xf] %vm5985_vm14, %v5975_v36  ;;  %v5792_v57 = vadd.f32 %v5791_v61, %v11191_v4 }
 0xaea   : > { %v5940_v8 = vadd.f32 %v5910_v18, %v5792_v57  ;;  %v5923_v25 = vpop.f32.mrf.mxu0 }
 0xaec   : > { %v5960_v48 = vadd.f32 %v11223_v43, %v5940_v8 }
 0xaee   : > { %v5976_v24 = vpack.c.bf16 %v5960_v48, %v5960_v48  ;;  %v6015_v58 = vsel %vm2101_vm7, %v5960_v48, 0.0 }
 0xaef   : > { %v6016_v21 = vadd.f32 %v6015_v58, %v6014_v10  ;;  %v5794_v19 = vpop.f32.mrf.mxu3 }
 0xaf0   : > { %5993 = vst.msk [vmem:[%s11229_s0 + $0x1c] sm:$0xf] %vm5985_vm14, %v5976_v24  ;;  %v5795_v59 = vadd.f32 %v5794_v19, %v11194_v23 }
 0xaf2   : > { %v5941_v16 = vadd.f32 %v5913_v26, %v5795_v59  ;;  %v5925_v9 = vpop.f32.mrf.mxu0 }
 0xaf4   : > { %v5961_v5 = vadd.f32 %v11223_v43, %v5941_v16 }
 0xaf6   : > { %v5977_v41 = vpack.c.bf16 %v5961_v5, %v5961_v5  ;;  %v6017_v4 = vsel %vm2101_vm7, %v5961_v5, 0.0 }
 0xaf7   : > { %v6018_v49 = vadd.f32 %v6017_v4, %v6016_v21  ;;  %v5796_v13 = vpop.f32.mrf.mxu3 }
 0xaf8   : > { %5994 = vst.msk [vmem:[%s11229_s0 + $0x20] sm:$0xf] %vm5985_vm14, %v5977_v41  ;;  %v5797_v14 = vadd.f32 %v5796_v13, %v11198_v40 }
 0xafa   : > { %v5942_v53 = vadd.f32 %v5915_v3, %v5797_v14 }
 0xafc   : > { %v5962_v1 = vadd.f32 %v11223_v43, %v5942_v53 }
 0xafe   : > { %v5978_v23 = vpack.c.bf16 %v5962_v1, %v5962_v1  ;;  %v6019_v35 = vsel %vm2101_vm7, %v5962_v1, 0.0 }
 0xaff   : > { %v6020_v50 = vadd.f32 %v6019_v35, %v6018_v49  ;;  %v5799_v62 = vpop.f32.mrf.mxu3 }
 0xb00   : > { %5995 = vst.msk [vmem:[%s11229_s0 + $0x24] sm:$0xf] %vm5985_vm14, %v5978_v23  ;;  %v5800_v46 = vadd.f32 %v5799_v62, %v11200_v17 }
 0xb02   : > { %v5943_v56 = vadd.f32 %v5918_v28, %v5800_v46 }
 0xb04   : > { %v5963_v60 = vadd.f32 %v11223_v43, %v5943_v56 }
 0xb06   : > { %v5979_v40 = vpack.c.bf16 %v5963_v60, %v5963_v60  ;;  %v6021_v32 = vsel %vm2101_vm7, %v5963_v60, 0.0 }
 0xb07   : > { %v6022_v39 = vadd.f32 %v6021_v32, %v6020_v50  ;;  %v5801_v7 = vpop.f32.mrf.mxu3 }
 0xb08   : > { %5996 = vst.msk [vmem:[%s11229_s0 + $0x28] sm:$0xf] %vm5985_vm14, %v5979_v40  ;;  %v5802_v27 = vadd.f32 %v5801_v7, %v11204_v30 }
 0xb0a   : > { %v5944_v20 = vadd.f32 %v5920_v47, %v5802_v27 }
 0xb0c   : > { %v5964_v11 = vadd.f32 %v11223_v43, %v5944_v20 }
 0xb0e   : > { %v5980_v2 = vpack.c.bf16 %v5964_v11, %v5964_v11  ;;  %v6023_v17 = vsel %vm2101_vm7, %v5964_v11, 0.0 }
 0xb0f   : > { %v6024_v33 = vadd.f32 %v6023_v17, %v6022_v39  ;;  %v5804_v54 = vpop.f32.mrf.mxu3 }
 0xb10   : > { %5997 = vst.msk [vmem:[%s11229_s0 + $0x2c] sm:$0xf] %vm5985_vm14, %v5980_v2  ;;  %v5805_v12 = vadd.f32 %v5804_v54, %v11208_v38 }
 0xb12   : > { %v5945_v6 = vadd.f32 %v5923_v25, %v5805_v12 }
 0xb14   : > { %v5965_v29 = vadd.f32 %v11223_v43, %v5945_v6 }
 0xb16   : > { %v5981_v45 = vpack.c.bf16 %v5965_v29, %v5965_v29  ;;  %v6025_v30 = vsel %vm2101_vm7, %v5965_v29, 0.0 }
 0xb17   : > { %v6026_v34 = vadd.f32 %v6025_v30, %v6024_v33  ;;  %v5806_v31 = vpop.f32.mrf.mxu3 }
 0xb18   : > { %5998 = vst.msk [vmem:[%s11229_s0 + $0x30] sm:$0xf] %vm5985_vm14, %v5981_v45  ;;  %v5807_v18 = vadd.f32 %v5806_v31, %v11210_v44 }
 0xb1a   : > { %v5946_v0 = vadd.f32 %v5925_v9, %v5807_v18 }
 0xb1c   : > { %v5966_v51 = vadd.f32 %v11223_v43, %v5946_v0 }
 0xb1e   : > { %v5982_v52 = vpack.c.bf16 %v5966_v51, %v5966_v51  ;;  %v6027_v44 = vsel %vm2101_vm7, %v5966_v51, 0.0 }
 0xb1f   : > { %v5809_v38 = vpop.f32.mrf.mxu3  ;;  %v6028_v8 = vadd.f32 %v6027_v44, %v6026_v34 }
 0xb20   : > { %5999 = vst.msk [vmem:[%s11229_s0 + $0x34] sm:$0xf] %vm5985_vm14, %v5982_v52  ;;  %v5810_v22 = vadd.f32 %v5809_v38, %v11214_v55 }
 0xb27   : > { %v5811_v37 = vpop.f32.mrf.mxu3 }
 0xb28   : > { %v5812_v10 = vadd.f32 %v5811_v37, %v11216_v42 }
 0xb46   : > { %v5928_v15 = vpop.f32.mrf.mxu0 }
 0xb47   : > { %v5947_v63 = vadd.f32 %v5928_v15, %v5810_v22 }
 0xb49   : > { %v5967_v36 = vadd.f32 %v11223_v43, %v5947_v63 }
 0xb4b   : > { %v5983_v26 = vpack.c.bf16 %v5967_v36, %v5967_v36  ;;  %v6029_v57 = vsel %vm2101_vm7, %v5967_v36, 0.0 }
 0xb4c   : > { %v6030_v24 = vadd.f32 %v6029_v57, %v6028_v8 }
 0xb4d   : > { %6000 = vst.msk [vmem:[%s11229_s0 + $0x38] sm:$0xf] %vm5985_vm14, %v5983_v26 }
 0xb4e   : > { %v5930_v61 = vpop.f32.mrf.mxu0 }
 0xb4f   : > { %v5948_v55 = vadd.f32 %v5930_v61, %v5812_v10 }
 0xb51   : > { %v5968_v48 = vadd.f32 %v11223_v43, %v5948_v55 }
 0xb53   : > { %v5984_v58 = vpack.c.bf16 %v5968_v48, %v5968_v48  ;;  %v6031_v21 = vsel %vm2101_vm7, %v5968_v48, 0.0  ;;  %vm6039_vm7 = vcmask 57344  }
 0xb54   : > { %v6032_v19 = vadd.f32 %v6031_v21, %v6030_v24 }
 0xb55   : > { %6001 = vst.msk [vmem:[%s11229_s0 + $0x3c] sm:$0xf] %vm5985_vm14, %v5984_v58  ;;  %s6052_s0 = scalar_lea.sflag [#allocation3], %s336_s21 }
 0xb56   : > { %v6033_v59 = vrot.slane %v6032_v19, 4 }
 0xb58   : > { %v6034_v42 = vadd.f32 %v6033_v59, %v6032_v19 }
 0xb5a   : > { %v6035_v3 = vrot.slane %v6034_v42, 2 }
 0xb5c   : > { %v6036_v16 = vadd.f32 %v6035_v3, %v6034_v42 }
 0xb5e   : > { %v6037_v43 = vrot.slane %v6036_v16, 1 }
 0xb60   : > { %v6038_v5 = vadd.f32 %v6037_v43, %v6036_v16 }
 0xb62   : > { %6040 = vst.msk [vmem:[%s337_s18] sm:$0x1] %vm6039_vm7, %v6038_v5 }
 0xb63   : > { %6584 = shalt.err (!%p6581_p9)
}
 0xb64   : > { %6480 = dma.vmem_to_hbm [thread:$0]  (%p6746_p3), %s6069_s17, 16, %s6071_s10, %s6052_s0  }
 0xb65 PF: > { %p6486_p10 = scmp.ge.s32.totalorder %s6651_s8, 2  ;;  %s6095_s21 = sand.u32 1, %s6623_s24  }
 0xb66   : > { %s6096_s22 = scalar_lea.sflag [#allocation3], %s6095_s21 }
 0xb67   : > { %p6483_p11 = pnand %p6486_p10, %p6755_p8 }
 0xb69   : > { %p6484_p12 = pneg %p6483_p11 }
 0xb6b   : > { %6618 = dma.done.wait (%p6484_p12), %s6096_s22, 16  }
 0xb6c   : > { %6620 = vsyncadd (%p6484_p12), %s6096_s22, 4294967280  ;;  %s21_s8 = sadd.s32 1, %s6651_s8   ;;  %s12928_s24 = smov %s6627_s25 }
 0xb6d   : > { %p18_p13 = scmp.ge.s32.totalorder %s21_s8, 6   ;;  %s12929_s25 = smov %s6631_s26 }
 0xb6e   : > { %s12930_s26 = smov %s6764_s19  ;;  %s12931_s27 = smov %s6643_s29 }
 0xb6f   : > { %s12932_s28 = smov %s6647_s30  ;;  %s12933_s29 = smov %s12936_s11 }
 0xb70   : > { %s12934_s30 = smov %s12940_s12  ;;  %20 = sbr.rel (!%p18_p13) target bundleno = 7 (0x7), region = 189 }
 0xb75   :  { %6101 = vsyncpa [#allocation3], 1 }
 0xb76   :  { %6103 = vsyncpa [#allocation3 + $0x1], 1 }

</bundles_post_ra>
